<compile_context>
chip_gen: v7x
topology: tpu7x:2x2x1
jax: 0.10.0
libtpu: 0.0.40
codegen_flags: <defaults>
</compile_context>

<pallas_src>
import jax
import jax.numpy as jnp
from jax.experimental import pallas as pl
from jax.experimental.pallas import tpu as pltpu

NOISE_DIM = 100
FC_IN = NOISE_DIM + 10        # 110
FC_K_PAD = 128                # padded FC contraction dim (zero rows appended to fc_w)
BN_EPS = 1e-5
L3_N_PAD = 128                # layer-3 Cout padded 64 -> 128 for lane-dense stores
HEAD_N_PAD = 8                # head Cout padded 3 -> 8
VMEM_LIMIT = 32 * 1024 * 1024


def _round_up(x, m):
    return ((x + m - 1) // m) * m


# ---------------------------------------------------------------------------
# Kernel 1: fused FC + deconv1(1x1 input, dense matmul) + BN(256) + ReLU.
# ---------------------------------------------------------------------------
def _fc_deconv1_bn_relu_kernel(x_ref, fcw_ref, fcb_ref, w1_ref, g_ref, b_ref, o_ref):
    """For a 1x1 spatial input the ConvTranspose2d is a dense matmul:
    out[b, (kh,kw), cout] = sum_cin h[b,cin] * w1[cin,cout,kh,kw]; columns are ordered
    (tap, cout). The conv bias is omitted: train-mode BN mean subtraction cancels it
    exactly. BN stats are exact two-pass over the B*9 rows of each channel."""
    C = g_ref.shape[1]                                              # 256
    h = jnp.dot(x_ref[...], fcw_ref[...], preferred_element_type=jnp.float32)
    h = jnp.maximum(h + fcb_ref[...], 0.0)                          # (B, 512) f32
    acc = jnp.dot(h.astype(w1_ref.dtype), w1_ref[...],
                  preferred_element_type=jnp.float32)               # (B, 9*C) f32
    T = acc.shape[1] // C                                           # 9 taps
    n_rows = acc.shape[0] * T                                       # B * 9 samples/channel

    col_sum = jnp.sum(acc, axis=0, keepdims=True)                   # (1, 9*C)
    ch_sum = col_sum[:, 0:C]
    for t in range(1, T):                                           # fold the 9 taps
        ch_sum = ch_sum + col_sum[:, t * C:(t + 1) * C]
    mean = ch_sum / n_rows                                          # (1, C)
    mean_cols = jnp.concatenate([mean] * T, axis=1)                 # (1, 9*C)

    cen = acc - mean_cols
    sq_sum = jnp.sum(cen * cen, axis=0, keepdims=True)
    ch_sq = sq_sum[:, 0:C]
    for t in range(1, T):
        ch_sq = ch_sq + sq_sum[:, t * C:(t + 1) * C]
    var = ch_sq / n_rows

    scale = g_ref[...] * jax.lax.rsqrt(var + BN_EPS)                # (1, C)
    shift = b_ref[...] - mean * scale
    scale_cols = jnp.concatenate([scale] * T, axis=1)
    shift_cols = jnp.concatenate([shift] * T, axis=1)
    o_ref[...] = jnp.maximum(acc * scale_cols + shift_cols, 0.0)    # folded BN + ReLU


def fc_deconv1_bn_relu(x, fc_w, fc_b, w1mat, gamma, beta):
    """x:(B,128) f32, fc_w:(128,512) f32, w1mat:(512,2304) bf16 -> (B,3,3,256) f32."""
    B = x.shape[0]
    K, H = fc_w.shape                   # 128, 512
    N9 = w1mat.shape[1]                 # 2304
    C = gamma.shape[1]                  # 256
    out = pl.pallas_call(
        _fc_deconv1_bn_relu_kernel,
        out_shape=jax.ShapeDtypeStruct((B, N9), jnp.float32),
        grid=(1,),
        in_specs=[
            pl.BlockSpec((B, K), lambda i: (0, 0)),
            pl.BlockSpec((K, H), lambda i: (0, 0)),
            pl.BlockSpec((1, H), lambda i: (0, 0)),
            pl.BlockSpec((H, N9), lambda i: (0, 0)),
            pl.BlockSpec((1, C), lambda i: (0, 0)),
            pl.BlockSpec((1, C), lambda i: (0, 0)),
        ],
        out_specs=pl.BlockSpec((B, N9), lambda i: (0, 0)),
        compiler_params=pltpu.CompilerParams(
            dimension_semantics=("arbitrary",),
            vmem_limit_bytes=VMEM_LIMIT),
        cost_estimate=pl.CostEstimate(
            flops=2 * B * K * H + 2 * B * H * N9 + 12 * B * N9,
            transcendentals=C,
            bytes_accessed=4 * (B * K + K * H + H + 2 * C + B * N9) + 2 * H * N9),
    )(x, fc_w, fc_b, w1mat, gamma, beta)
    return out.reshape(B, 3, 3, C)      # columns ordered (kh, kw, cout) -> NHWC directly


# ---------------------------------------------------------------------------
# Kernel 2: deconv core for layers 2-3:  y_raw = patches @ wmat  + per-M-tile BN partials.
# Grid = (M tiles ["parallel"], conv taps ["arbitrary"]); f32 accumulation directly in
# the output block (no scratch). Conv bias omitted (cancelled by BN mean subtraction).
# ---------------------------------------------------------------------------
def _matmul_stats_kernel(x_ref, w_ref, y_ref, stats_ref):
    k = pl.program_id(1)

    @pl.when(k == 0)
    def _():
        y_ref[...] = jnp.zeros_like(y_ref)

    y_ref[...] += jnp.dot(x_ref[...], w_ref[...],
                          preferred_element_type=jnp.float32)

    @pl.when(k == pl.num_programs(1) - 1)
    def _():
        acc = y_ref[...]                                       # (tm, N) f32
        s1 = jnp.sum(acc, axis=0, keepdims=True)               # (1, N) tile sum
        s2 = jnp.sum(acc * acc, axis=0, keepdims=True)         # (1, N) tile sum of squares
        row = jnp.concatenate([s1, s2], axis=1)                # (1, 2N)
        stats_ref[...] = jnp.broadcast_to(row.reshape(1, 1, -1), stats_ref.shape)


def matmul_stats(patches, wmat, *, tm, tk):
    """patches:(M_pad,K) bf16, wmat:(K,N) bf16 -> (y_raw f32 (M_pad,N),
    per-tile stats f32 (m_tiles, 8, 2N) [row 0 = sum|sumsq])."""
    Mp, K = patches.shape
    N = wmat.shape[1]
    assert Mp % tm == 0 and K % tk == 0
    m_tiles, k_tiles = Mp // tm, K // tk
    return pl.pallas_call(
        _matmul_stats_kernel,
        out_shape=(jax.ShapeDtypeStruct((Mp, N), jnp.float32),
                   jax.ShapeDtypeStruct((m_tiles, 8, 2 * N), jnp.float32)),
        grid=(m_tiles, k_tiles),
        in_specs=[
            pl.BlockSpec((tm, tk), lambda i, k: (i, k)),
            pl.BlockSpec((tk, N), lambda i, k: (k, 0)),
        ],
        out_specs=[
            pl.BlockSpec((tm, N), lambda i, k: (i, 0)),
            pl.BlockSpec((1, 8, 2 * N), lambda i, k: (i, 0, 0)),
        ],
        compiler_params=pltpu.CompilerParams(
            dimension_semantics=("parallel", "arbitrary"),
            vmem_limit_bytes=VMEM_LIMIT),
        cost_estimate=pl.CostEstimate(
            flops=2 * Mp * K * N + 3 * Mp * N,
            transcendentals=0,
            bytes_accessed=2 * (Mp * K + K * N) + 4 * (Mp * N + m_tiles * 16 * N)),
    )(patches, wmat)


# ---------------------------------------------------------------------------
# Kernel 3: sigmoid head  y = sigmoid(x @ w + b), rows tiled on a "parallel" axis.
# ---------------------------------------------------------------------------
def _matmul_bias_sigmoid_kernel(x_ref, w_ref, b_ref, o_ref):
    y = jnp.dot(x_ref[...], w_ref[...], preferred_element_type=jnp.float32)
    y = y + b_ref[...]
    # exp and the approximate reciprocal both run on the EUP slot; the clip guards the
    # approx rounding so the output stays exactly inside [0, 1].
    o_ref[...] = jnp.clip(pl.reciprocal(1.0 + jnp.exp(-y), approx=True), 0.0, 1.0)


def matmul_bias_sigmoid(patches, wmat, bias, *, tm):
    M, K = patches.shape
    N = wmat.shape[1]
    assert M % tm == 0
    return pl.pallas_call(
        _matmul_bias_sigmoid_kernel,
        out_shape=jax.ShapeDtypeStruct((M, N), jnp.float32),
        grid=(M // tm,),
        in_specs=[
            pl.BlockSpec((tm, K), lambda i: (i, 0)),
            pl.BlockSpec((K, N), lambda i: (0, 0)),
            pl.BlockSpec((1, N), lambda i: (0, 0)),
        ],
        out_specs=pl.BlockSpec((tm, N), lambda i: (i, 0)),
        compiler_params=pltpu.CompilerParams(
            dimension_semantics=("parallel",),
            vmem_limit_bytes=VMEM_LIMIT),
        cost_estimate=pl.CostEstimate(
            flops=2 * M * K * N + 4 * M * N,
            transcendentals=2 * M * N,
            bytes_accessed=2 * (M * K + K * N) + 4 * (N + M * N)),
    )(patches, wmat, bias)


# ---------------------------------------------------------------------------
# XLA-side glue: im2col for ConvTranspose2d(kernel=3, stride=2, padding=0).
# ---------------------------------------------------------------------------
def _dilate2(x):
    """Zero-insert between spatial elements: (B, H, W, C) -> (B, 2H-1, 2W-1, C)."""
    B, H, W, C = x.shape
    z = jnp.zeros_like(x)
    x = jnp.stack([x, z], axis=2).reshape(B, 2 * H, W, C)[:, :2 * H - 1]
    z = jnp.zeros_like(x)
    x = jnp.stack([x, z], axis=3).reshape(B, 2 * H - 1, 2 * W, C)[:, :, :2 * W - 1]
    return x


def conv_transpose_patches(x_nhwc, output_padding=0, KH=3, KW=3):
    B, H, W, Cin = x_nhwc.shape
    OH = (H - 1) * 2 + KH + output_padding
    OW = (W - 1) * 2 + KW + output_padding
    pad = KH - 1
    xp = jnp.pad(_dilate2(x_nhwc),
                 ((0, 0), (pad, pad + output_padding), (pad, pad + output_padding), (0, 0)))
    cols = [xp[:, kh:kh + OH, kw:kw + OW, :].reshape(B * OH * OW, Cin)
            for kh in range(KH) for kw in range(KW)]
    return jnp.concatenate(cols, axis=1), OH, OW


def deconv_weight_matrix(w_pt):
    """PyTorch ConvTranspose2d weight (Cin, Cout, 3, 3) -> (9*Cin, Cout) im2col matrix."""
    Cin, Cout, KH, KW = w_pt.shape
    wcols = [w_pt[:, :, KH - 1 - kh, KW - 1 - kw]
             for kh in range(KH) for kw in range(KW)]
    return jnp.concatenate(wcols, axis=0)


def _bn_affine_from_stats(stats, gamma, beta, m_true):
    """Fold per-tile [sum, sumsq] partials into BN scale/shift.

    Zero-padded patch rows contribute exactly zero to both partials, so dividing by the
    true row count is exact. var uses E[x^2]-E[x]^2 in f32 clamped at 0: with O(1)
    magnitudes and <=1e6 samples the cancellation error is far below the bf16 operand
    noise (review concern acknowledged)."""
    n = gamma.shape[0]
    s = jnp.sum(stats[:, 0, :], axis=0)                    # (2N,)
    mean = s[:n] / m_true
    var = jnp.maximum(s[n:] / m_true - mean * mean, 0.0)
    scale = gamma * jax.lax.rsqrt(var + BN_EPS)
    shift = beta - mean * scale
    return scale, shift


def deconv_bn_relu(x_nhwc, wmat, gamma, beta):
    """relu(BN(ConvTranspose2d(x, k=3, s=2))); conv bias omitted (cancelled by BN mean).
    The matmul + per-tile BN partials run in Pallas; the tiny stats finalize and the
    elementwise affine+ReLU are XLA glue that fuses into the next layer's patch build."""
    B, H, W, Cin = x_nhwc.shape
    patches, OH, OW = conv_transpose_patches(x_nhwc.astype(jnp.bfloat16))
    M = B * OH * OW
    tm = min(512, _round_up(M, 8))
    m_pad = pl.cdiv(M, tm) * tm
    patches = jnp.pad(patches, ((0, m_pad - M), (0, 0)))
    y_raw, stats = matmul_stats(patches, wmat, tm=tm, tk=Cin)
    scale, shift = _bn_affine_from_stats(stats, gamma, beta, M)
    y = jnp.maximum(y_raw[:M] * scale + shift, 0.0)
    return y.reshape(B, OH, OW, wmat.shape[1])


def deconv_sigmoid_head(x_nhwc, wmat, bias):
    """sigmoid(ConvTranspose2d(x, k=3, s=2, output_padding=1)); Cout padded 3 -> 8."""
    B = x_nhwc.shape[0]
    patches, OH, OW = conv_transpose_patches(x_nhwc.astype(jnp.bfloat16), output_padding=1)
    out = matmul_bias_sigmoid(patches, wmat, bias, tm=1024)   # (B*1024, 8)
    return out[:, :3].reshape(B, OH, OW, 3)


# ---------------------------------------------------------------------------
# Deterministic synthetic parameters mirroring the PyTorch module, pre-converted to the
# kernels' layouts (im2col matrices, padding, bf16) at parameter-conversion time.
# ---------------------------------------------------------------------------
def init_params(key):
    def uniform(k, shape, fan_in):
        bound = 1.0 / float(fan_in) ** 0.5
        return jax.random.uniform(k, shape, jnp.float32, -bound, bound)

    keys = jax.random.split(key, 10)
    p = {}

    fc_w = uniform(keys[0], (FC_IN, 512), FC_IN)
    p["fc_w"] = jnp.pad(fc_w, ((0, FC_K_PAD - FC_IN), (0, 0)))         # (128, 512) f32
    p["fc_b"] = uniform(keys[1], (512,), FC_IN).reshape(1, 512)

    def deconv_w(k, cin, cout):
        return uniform(k, (cin, cout, 3, 3), cin * 9)   # PyTorch layout (Cin, Cout, kH, kW)

    w1 = deconv_w(keys[2], 512, 256)
    w2 = deconv_w(keys[4], 256, 128)
    w3 = deconv_w(keys[6], 128, 64)
    w4 = deconv_w(keys[8], 64, 3)
    b4 = uniform(keys[9], (3,), 64 * 9)
    # Biases of dconv1..3 are not materialized: train-mode BN mean subtraction cancels
    # them exactly (bit-identical output).

    # Layer 1 (1x1 input): dense matrix (512, 9*256), columns ordered (kh, kw, cout).
    p["w1mat"] = jnp.transpose(w1, (0, 2, 3, 1)).reshape(512, 9 * 256).astype(jnp.bfloat16)
    # Layers 2-4: im2col matrices (9*Cin, Cout), rows ordered (kh, kw, cin), kernel flipped.
    p["w2mat"] = deconv_weight_matrix(w2).astype(jnp.bfloat16)                      # (2304, 128)
    w3m = deconv_weight_matrix(w3)                                                  # (1152, 64)
    p["w3mat"] = jnp.pad(w3m, ((0, 0), (0, L3_N_PAD - 64))).astype(jnp.bfloat16)    # lane-dense N
    w4m = deconv_weight_matrix(w4)                                                  # (576, 3)
    p["w4mat"] = jnp.pad(w4m, ((0, 0), (0, HEAD_N_PAD - 3))).astype(jnp.bfloat16)
    p["b4"] = jnp.pad(b4, (0, HEAD_N_PAD - 3)).reshape(1, HEAD_N_PAD)

    # BatchNorm params (PyTorch init weight=1, bias=0). Layer-3 pad channels MUST use
    # gamma=0 / beta=0 so the padded outputs are exact zeros.
    p["bn2_g"] = jnp.ones((1, 256), jnp.float32)
    p["bn2_b"] = jnp.zeros((1, 256), jnp.float32)
    p["bn3_g"] = jnp.ones((128,), jnp.float32)
    p["bn3_b"] = jnp.zeros((128,), jnp.float32)
    p["bn4_g"] = jnp.pad(jnp.ones((64,), jnp.float32), (0, L3_N_PAD - 64))
    p["bn4_b"] = jnp.zeros((L3_N_PAD,), jnp.float32)
    return p


# ---------------------------------------------------------------------------
# Generator forward (mirrors the PyTorch module).
# ---------------------------------------------------------------------------
def generator_forward(params, noise, label):
    B = noise.shape[0]
    x = jnp.concatenate([noise, label], axis=1)                       # (B, 110)
    x = jnp.pad(x, ((0, 0), (0, FC_K_PAD - x.shape[1])))              # aligned K = 128

    # Fused FC + dconv1 (dense matmul, 1x1 input) + BN(256) + ReLU.
    h = fc_deconv1_bn_relu(x, params["fc_w"], params["fc_b"],
                           params["w1mat"], params["bn2_g"], params["bn2_b"])   # (B, 3, 3, 256)
    h = deconv_bn_relu(h, params["w2mat"], params["bn3_g"], params["bn3_b"])    # (B, 7, 7, 128)
    h = deconv_bn_relu(h, params["w3mat"], params["bn4_g"], params["bn4_b"])    # (B,15,15,128)
    # Drop the exact-zero pad channels (fuses into the head's patch construction).
    h = deconv_sigmoid_head(h[..., :64], params["w4mat"], params["b4"])         # (B,32,32,3)

    return jnp.transpose(h, (0, 3, 1, 2))     # NCHW (B, 3, 32, 32); 24 KB, negligible


if __name__ == "__main__":
    key = jax.random.PRNGKey(0)
    pkey, nkey, lkey = jax.random.split(key, 3)
    params = init_params(pkey)

    B = 2
    noise = jax.random.normal(nkey, (B, NOISE_DIM), jnp.float32)
    label_idx = jax.random.randint(lkey, (B,), 0, 10)
    label = jax.nn.one_hot(label_idx, 10, dtype=jnp.float32)          # (B, 10) conditioning

    out = jax.jit(generator_forward)(params, noise, label)
    out = jax.block_until_ready(out)
    assert out.shape == (B, 3, 32, 32), out.shape
    assert bool(jnp.all(jnp.isfinite(out)))
    assert bool(jnp.all((out >= 0.0) & (out <= 1.0)))                 # sigmoid range
    print("KERNEL_OK")
</pallas_src>

<mosaic_0001>
module attributes {stable_mosaic.version = 11 : i64} {
  func.func @_fc_deconv1_bn_relu_kernel(%arg0: i32, %arg1: memref<2x128xf32, #tpu.memory_space<vmem>>, %arg2: memref<128x512xf32, #tpu.memory_space<vmem>>, %arg3: memref<1x512xf32, #tpu.memory_space<vmem>>, %arg4: memref<512x2304xbf16, #tpu.memory_space<vmem>>, %arg5: memref<1x256xf32, #tpu.memory_space<vmem>>, %arg6: memref<1x256xf32, #tpu.memory_space<vmem>>, %arg7: memref<2x2304xf32, #tpu.memory_space<vmem>>) attributes {dimension_semantics = [#tpu.dimension_semantics<arbitrary>], iteration_bounds = array<i64: 1>, scalar_prefetch = 0 : i64, scratch_operands = 0 : i64, tpu.core_type = #tpu.core_type<tc>, window_params = [{pipeline_mode = #tpu.pipeline_mode<synchronous>, transform_indices = @transform_0, window_bounds = array<i64: 2, 128>}, {pipeline_mode = #tpu.pipeline_mode<synchronous>, transform_indices = @transform_1, window_bounds = array<i64: 128, 512>}, {pipeline_mode = #tpu.pipeline_mode<synchronous>, transform_indices = @transform_2, window_bounds = array<i64: 1, 512>}, {pipeline_mode = #tpu.pipeline_mode<synchronous>, transform_indices = @transform_3, window_bounds = array<i64: 512, 2304>}, {pipeline_mode = #tpu.pipeline_mode<synchronous>, transform_indices = @transform_4, window_bounds = array<i64: 1, 256>}, {pipeline_mode = #tpu.pipeline_mode<synchronous>, transform_indices = @transform_5, window_bounds = array<i64: 1, 256>}, {pipeline_mode = #tpu.pipeline_mode<synchronous>, transform_indices = @transform_6, window_bounds = array<i64: 2, 2304>}]} {
    %c0 = arith.constant 0 : index
    %c0_0 = arith.constant 0 : index
    %0 = vector.load %arg1[%c0, %c0_0] : memref<2x128xf32, #tpu.memory_space<vmem>>, vector<2x128xf32>
    %c0_1 = arith.constant 0 : index
    %c0_2 = arith.constant 0 : index
    %1 = vector.load %arg2[%c0_1, %c0_2] : memref<128x512xf32, #tpu.memory_space<vmem>>, vector<128x512xf32>
    %cst = arith.constant dense<0.000000e+00> : vector<2x512xf32>
    %2 = tpu.matmul %0, %1, %cst {dimension_numbers = #tpu.dot_dimension_numbers<[1], [0], [0], [1], [0, 0, 1, 1], [], []>} : vector<2x128xf32>, vector<128x512xf32>, vector<2x512xf32> -> vector<2x512xf32>
    %c0_3 = arith.constant 0 : index
    %c0_4 = arith.constant 0 : index
    %3 = vector.load %arg3[%c0_3, %c0_4] : memref<1x512xf32, #tpu.memory_space<vmem>>, vector<1x512xf32>
    %4 = vector.broadcast %3 : vector<1x512xf32> to vector<2x512xf32>
    %5 = arith.addf %2, %4 : vector<2x512xf32>
    %cst_5 = arith.constant 0.000000e+00 : f32
    %6 = vector.broadcast %cst_5 : f32 to vector<2x512xf32>
    %7 = arith.maximumf %5, %6 : vector<2x512xf32>
    %8 = arith.truncf %7 : vector<2x512xf32> to vector<2x512xbf16>
    %c0_6 = arith.constant 0 : index
    %c0_7 = arith.constant 0 : index
    %9 = vector.load %arg4[%c0_6, %c0_7] : memref<512x2304xbf16, #tpu.memory_space<vmem>>, vector<512x2304xbf16>
    %cst_8 = arith.constant dense<0.000000e+00> : vector<2x2304xf32>
    %10 = tpu.matmul %8, %9, %cst_8 {dimension_numbers = #tpu.dot_dimension_numbers<[1], [0], [0], [1], [0, 0, 1, 1], [], []>} : vector<2x512xbf16>, vector<512x2304xbf16>, vector<2x2304xf32> -> vector<2x2304xf32>
    %cst_9 = arith.constant dense<0.000000e+00> : vector<2304xf32>
    %11 = vector.multi_reduction <add>, %10, %cst_9 [0] : vector<2x2304xf32> to vector<2304xf32>
    %12 = vector.shape_cast %11 : vector<2304xf32> to vector<1x2304xf32>
    %13 = vector.extract_strided_slice %12 {offsets = [0, 0], sizes = [1, 256], strides = [1, 1]} : vector<1x2304xf32> to vector<1x256xf32>
    %14 = vector.extract_strided_slice %12 {offsets = [0, 256], sizes = [1, 256], strides = [1, 1]} : vector<1x2304xf32> to vector<1x256xf32>
    %15 = arith.addf %13, %14 : vector<1x256xf32>
    %16 = vector.extract_strided_slice %12 {offsets = [0, 512], sizes = [1, 256], strides = [1, 1]} : vector<1x2304xf32> to vector<1x256xf32>
    %17 = arith.addf %15, %16 : vector<1x256xf32>
    %18 = vector.extract_strided_slice %12 {offsets = [0, 768], sizes = [1, 256], strides = [1, 1]} : vector<1x2304xf32> to vector<1x256xf32>
    %19 = arith.addf %17, %18 : vector<1x256xf32>
    %20 = vector.extract_strided_slice %12 {offsets = [0, 1024], sizes = [1, 256], strides = [1, 1]} : vector<1x2304xf32> to vector<1x256xf32>
    %21 = arith.addf %19, %20 : vector<1x256xf32>
    %22 = vector.extract_strided_slice %12 {offsets = [0, 1280], sizes = [1, 256], strides = [1, 1]} : vector<1x2304xf32> to vector<1x256xf32>
    %23 = arith.addf %21, %22 : vector<1x256xf32>
    %24 = vector.extract_strided_slice %12 {offsets = [0, 1536], sizes = [1, 256], strides = [1, 1]} : vector<1x2304xf32> to vector<1x256xf32>
    %25 = arith.addf %23, %24 : vector<1x256xf32>
    %26 = vector.extract_strided_slice %12 {offsets = [0, 1792], sizes = [1, 256], strides = [1, 1]} : vector<1x2304xf32> to vector<1x256xf32>
    %27 = arith.addf %25, %26 : vector<1x256xf32>
    %28 = vector.extract_strided_slice %12 {offsets = [0, 2048], sizes = [1, 256], strides = [1, 1]} : vector<1x2304xf32> to vector<1x256xf32>
    %29 = arith.addf %27, %28 : vector<1x256xf32>
    %cst_10 = arith.constant 1.800000e+01 : f32
    %30 = vector.broadcast %cst_10 : f32 to vector<1x256xf32>
    %31 = arith.divf %29, %30 : vector<1x256xf32>
    %32 = tpu.concatenate %31, %31, %31, %31, %31, %31, %31, %31, %31 in 1 : vector<1x256xf32>, vector<1x256xf32>, vector<1x256xf32>, vector<1x256xf32>, vector<1x256xf32>, vector<1x256xf32>, vector<1x256xf32>, vector<1x256xf32>, vector<1x256xf32> -> vector<1x2304xf32>
    %33 = vector.broadcast %32 : vector<1x2304xf32> to vector<2x2304xf32>
    %34 = arith.subf %10, %33 : vector<2x2304xf32>
    %35 = arith.mulf %34, %34 : vector<2x2304xf32>
    %cst_11 = arith.constant dense<0.000000e+00> : vector<2304xf32>
    %36 = vector.multi_reduction <add>, %35, %cst_11 [0] : vector<2x2304xf32> to vector<2304xf32>
    %37 = vector.shape_cast %36 : vector<2304xf32> to vector<1x2304xf32>
    %38 = vector.extract_strided_slice %37 {offsets = [0, 0], sizes = [1, 256], strides = [1, 1]} : vector<1x2304xf32> to vector<1x256xf32>
    %39 = vector.extract_strided_slice %37 {offsets = [0, 256], sizes = [1, 256], strides = [1, 1]} : vector<1x2304xf32> to vector<1x256xf32>
    %40 = arith.addf %38, %39 : vector<1x256xf32>
    %41 = vector.extract_strided_slice %37 {offsets = [0, 512], sizes = [1, 256], strides = [1, 1]} : vector<1x2304xf32> to vector<1x256xf32>
    %42 = arith.addf %40, %41 : vector<1x256xf32>
    %43 = vector.extract_strided_slice %37 {offsets = [0, 768], sizes = [1, 256], strides = [1, 1]} : vector<1x2304xf32> to vector<1x256xf32>
    %44 = arith.addf %42, %43 : vector<1x256xf32>
    %45 = vector.extract_strided_slice %37 {offsets = [0, 1024], sizes = [1, 256], strides = [1, 1]} : vector<1x2304xf32> to vector<1x256xf32>
    %46 = arith.addf %44, %45 : vector<1x256xf32>
    %47 = vector.extract_strided_slice %37 {offsets = [0, 1280], sizes = [1, 256], strides = [1, 1]} : vector<1x2304xf32> to vector<1x256xf32>
    %48 = arith.addf %46, %47 : vector<1x256xf32>
    %49 = vector.extract_strided_slice %37 {offsets = [0, 1536], sizes = [1, 256], strides = [1, 1]} : vector<1x2304xf32> to vector<1x256xf32>
    %50 = arith.addf %48, %49 : vector<1x256xf32>
    %51 = vector.extract_strided_slice %37 {offsets = [0, 1792], sizes = [1, 256], strides = [1, 1]} : vector<1x2304xf32> to vector<1x256xf32>
    %52 = arith.addf %50, %51 : vector<1x256xf32>
    %53 = vector.extract_strided_slice %37 {offsets = [0, 2048], sizes = [1, 256], strides = [1, 1]} : vector<1x2304xf32> to vector<1x256xf32>
    %54 = arith.addf %52, %53 : vector<1x256xf32>
    %cst_12 = arith.constant 1.800000e+01 : f32
    %55 = vector.broadcast %cst_12 : f32 to vector<1x256xf32>
    %56 = arith.divf %54, %55 : vector<1x256xf32>
    %c0_13 = arith.constant 0 : index
    %c0_14 = arith.constant 0 : index
    %57 = vector.load %arg5[%c0_13, %c0_14] : memref<1x256xf32, #tpu.memory_space<vmem>>, vector<1x256xf32>
    %cst_15 = arith.constant 9.99999974E-6 : f32
    %58 = vector.broadcast %cst_15 : f32 to vector<1x256xf32>
    %59 = arith.addf %56, %58 : vector<1x256xf32>
    %60 = math.rsqrt %59 : vector<1x256xf32>
    %61 = arith.mulf %57, %60 : vector<1x256xf32>
    %c0_16 = arith.constant 0 : index
    %c0_17 = arith.constant 0 : index
    %62 = vector.load %arg6[%c0_16, %c0_17] : memref<1x256xf32, #tpu.memory_space<vmem>>, vector<1x256xf32>
    %63 = arith.mulf %31, %61 : vector<1x256xf32>
    %64 = arith.subf %62, %63 : vector<1x256xf32>
    %65 = tpu.concatenate %61, %61, %61, %61, %61, %61, %61, %61, %61 in 1 : vector<1x256xf32>, vector<1x256xf32>, vector<1x256xf32>, vector<1x256xf32>, vector<1x256xf32>, vector<1x256xf32>, vector<1x256xf32>, vector<1x256xf32>, vector<1x256xf32> -> vector<1x2304xf32>
    %66 = tpu.concatenate %64, %64, %64, %64, %64, %64, %64, %64, %64 in 1 : vector<1x256xf32>, vector<1x256xf32>, vector<1x256xf32>, vector<1x256xf32>, vector<1x256xf32>, vector<1x256xf32>, vector<1x256xf32>, vector<1x256xf32>, vector<1x256xf32> -> vector<1x2304xf32>
    %67 = vector.broadcast %65 : vector<1x2304xf32> to vector<2x2304xf32>
    %68 = arith.mulf %10, %67 : vector<2x2304xf32>
    %69 = vector.broadcast %66 : vector<1x2304xf32> to vector<2x2304xf32>
    %70 = arith.addf %68, %69 : vector<2x2304xf32>
    %cst_18 = arith.constant 0.000000e+00 : f32
    %71 = vector.broadcast %cst_18 : f32 to vector<2x2304xf32>
    %72 = arith.maximumf %70, %71 : vector<2x2304xf32>
    %c0_19 = arith.constant 0 : index
    %c0_20 = arith.constant 0 : index
    %73 = vector.load %arg7[%c0_19, %c0_20] : memref<2x2304xf32, #tpu.memory_space<vmem>>, vector<2x2304xf32>
    tpu.vector_store %arg7[%c0_19, %c0_20], %72 {strides = array<i32>} : memref<2x2304xf32, #tpu.memory_space<vmem>>, vector<2x2304xf32>,
    return
  }
  func.func @transform_0(%arg0: i32) -> (i32, i32) {
    %c0_i32 = arith.constant 0 : i32
    %c0_i32_0 = arith.constant 0 : i32
    %c0_i32_1 = arith.constant 0 : i32
    return %c0_i32, %c0_i32_0 : i32, i32
  }
  func.func @transform_1(%arg0: i32) -> (i32, i32) {
    %c0_i32 = arith.constant 0 : i32
    %c0_i32_0 = arith.constant 0 : i32
    %c0_i32_1 = arith.constant 0 : i32
    return %c0_i32, %c0_i32_0 : i32, i32
  }
  func.func @transform_2(%arg0: i32) -> (i32, i32) {
    %c0_i32 = arith.constant 0 : i32
    %c0_i32_0 = arith.constant 0 : i32
    %c0_i32_1 = arith.constant 0 : i32
    return %c0_i32, %c0_i32_0 : i32, i32
  }
  func.func @transform_3(%arg0: i32) -> (i32, i32) {
    %c0_i32 = arith.constant 0 : i32
    %c0_i32_0 = arith.constant 0 : i32
    %c0_i32_1 = arith.constant 0 : i32
    return %c0_i32, %c0_i32_0 : i32, i32
  }
  func.func @transform_4(%arg0: i32) -> (i32, i32) {
    %c0_i32 = arith.constant 0 : i32
    %c0_i32_0 = arith.constant 0 : i32
    %c0_i32_1 = arith.constant 0 : i32
    return %c0_i32, %c0_i32_0 : i32, i32
  }
  func.func @transform_5(%arg0: i32) -> (i32, i32) {
    %c0_i32 = arith.constant 0 : i32
    %c0_i32_0 = arith.constant 0 : i32
    %c0_i32_1 = arith.constant 0 : i32
    return %c0_i32, %c0_i32_0 : i32, i32
  }
  func.func @transform_6(%arg0: i32) -> (i32, i32) {
    %c0_i32 = arith.constant 0 : i32
    %c0_i32_0 = arith.constant 0 : i32
    %c0_i32_1 = arith.constant 0 : i32
    return %c0_i32, %c0_i32_0 : i32, i32
  }
}

module attributes {stable_mosaic.version = 11 : i64} {
  func.func @_matmul_stats_kernel(%arg0: i32, %arg1: i32, %arg2: memref<104x256xbf16, #tpu.memory_space<vmem>>, %arg3: memref<256x128xbf16, #tpu.memory_space<vmem>>, %arg4: memref<104x128xf32, #tpu.memory_space<vmem>>, %arg5: memref<1x8x256xf32, #tpu.memory_space<vmem>>) attributes {dimension_semantics = [#tpu.dimension_semantics<parallel>, #tpu.dimension_semantics<arbitrary>], iteration_bounds = array<i64: 1, 9>, scalar_prefetch = 0 : i64, scratch_operands = 0 : i64, tpu.core_type = #tpu.core_type<tc>, window_params = [{transform_indices = @transform_0, window_bounds = array<i64: 104, 256>}, {transform_indices = @transform_1, window_bounds = array<i64: 256, 128>}, {transform_indices = @transform_2, window_bounds = array<i64: 104, 128>}, {transform_indices = @transform_3, window_bounds = array<i64: 1, 8, 256>}]} {
    %c0_i32 = arith.constant 0 : i32
    %0 = arith.cmpi eq, %arg1, %c0_i32 : i32
    %1 = arith.extui %0 : i1 to i32
    %c0_i32_0 = arith.constant 0 : i32
    %2 = arith.cmpi ne, %1, %c0_i32_0 : i32
    scf.if %2 {
      %cst_9 = arith.constant 0.000000e+00 : f32
      %12 = vector.broadcast %cst_9 : f32 to vector<104x128xf32>
      %c0_10 = arith.constant 0 : index
      %c0_11 = arith.constant 0 : index
      %13 = vector.load %arg4[%c0_10, %c0_11] : memref<104x128xf32, #tpu.memory_space<vmem>>, vector<104x128xf32>
      tpu.vector_store %arg4[%c0_10, %c0_11], %12 {strides = array<i32>} : memref<104x128xf32, #tpu.memory_space<vmem>>, vector<104x128xf32>,
    } else {
    }
    %c0 = arith.constant 0 : index
    %c0_1 = arith.constant 0 : index
    %3 = vector.load %arg4[%c0, %c0_1] : memref<104x128xf32, #tpu.memory_space<vmem>>, vector<104x128xf32>
    %c0_2 = arith.constant 0 : index
    %c0_3 = arith.constant 0 : index
    %4 = vector.load %arg2[%c0_2, %c0_3] : memref<104x256xbf16, #tpu.memory_space<vmem>>, vector<104x256xbf16>
    %c0_4 = arith.constant 0 : index
    %c0_5 = arith.constant 0 : index
    %5 = vector.load %arg3[%c0_4, %c0_5] : memref<256x128xbf16, #tpu.memory_space<vmem>>, vector<256x128xbf16>
    %cst = arith.constant dense<0.000000e+00> : vector<104x128xf32>
    %6 = tpu.matmul %4, %5, %cst {dimension_numbers = #tpu.dot_dimension_numbers<[1], [0], [0], [1], [0, 0, 1, 1], [], []>} : vector<104x256xbf16>, vector<256x128xbf16>, vector<104x128xf32> -> vector<104x128xf32>
    %7 = arith.addf %3, %6 : vector<104x128xf32>
    %c0_6 = arith.constant 0 : index
    %c0_7 = arith.constant 0 : index
    %8 = vector.load %arg4[%c0_6, %c0_7] : memref<104x128xf32, #tpu.memory_space<vmem>>, vector<104x128xf32>
    tpu.vector_store %arg4[%c0_6, %c0_7], %7 {strides = array<i32>} : memref<104x128xf32, #tpu.memory_space<vmem>>, vector<104x128xf32>,
    %c8_i32 = arith.constant 8 : i32
    %9 = arith.cmpi eq, %arg1, %c8_i32 : i32
    %10 = arith.extui %9 : i1 to i32
    %c0_i32_8 = arith.constant 0 : i32
    %11 = arith.cmpi ne, %10, %c0_i32_8 : i32
    scf.if %11 {
      %c0_9 = arith.constant 0 : index
      %c0_10 = arith.constant 0 : index
      %12 = vector.load %arg4[%c0_9, %c0_10] : memref<104x128xf32, #tpu.memory_space<vmem>>, vector<104x128xf32>
      %cst_11 = arith.constant dense<0.000000e+00> : vector<128xf32>
      %13 = vector.multi_reduction <add>, %12, %cst_11 [0] : vector<104x128xf32> to vector<128xf32>
      %14 = vector.shape_cast %13 : vector<128xf32> to vector<1x128xf32>
      %15 = arith.mulf %12, %12 : vector<104x128xf32>
      %cst_12 = arith.constant dense<0.000000e+00> : vector<128xf32>
      %16 = vector.multi_reduction <add>, %15, %cst_12 [0] : vector<104x128xf32> to vector<128xf32>
      %17 = vector.shape_cast %16 : vector<128xf32> to vector<1x128xf32>
      %18 = tpu.concatenate %14, %17 in 1 : vector<1x128xf32>, vector<1x128xf32> -> vector<1x256xf32>
      %19 = vector.shape_cast %18 : vector<1x256xf32> to vector<1x1x256xf32>
      %20 = vector.shape_cast %19 : vector<1x1x256xf32> to vector<1x1x256xf32>
      %21 = vector.broadcast %20 : vector<1x1x256xf32> to vector<1x8x256xf32>
      %c0_13 = arith.constant 0 : index
      %c0_14 = arith.constant 0 : index
      %c0_15 = arith.constant 0 : index
      %22 = vector.load %arg5[%c0_13, %c0_14, %c0_15] : memref<1x8x256xf32, #tpu.memory_space<vmem>>, vector<1x8x256xf32>
      tpu.vector_store %arg5[%c0_13, %c0_14, %c0_15], %21 {strides = array<i32>} : memref<1x8x256xf32, #tpu.memory_space<vmem>>, vector<1x8x256xf32>,
    } else {
    }
    return
  }
  func.func @transform_0(%arg0: i32, %arg1: i32) -> (i32, i32) {
    %c0_i32 = arith.constant 0 : i32
    return %arg0, %arg1 : i32, i32
  }
  func.func @transform_1(%arg0: i32, %arg1: i32) -> (i32, i32) {
    %c0_i32 = arith.constant 0 : i32
    %c0_i32_0 = arith.constant 0 : i32
    return %arg1, %c0_i32 : i32, i32
  }
  func.func @transform_2(%arg0: i32, %arg1: i32) -> (i32, i32) {
    %c0_i32 = arith.constant 0 : i32
    %c0_i32_0 = arith.constant 0 : i32
    return %arg0, %c0_i32 : i32, i32
  }
  func.func @transform_3(%arg0: i32, %arg1: i32) -> (i32, i32, i32) {
    %c0_i32 = arith.constant 0 : i32
    %c0_i32_0 = arith.constant 0 : i32
    %c0_i32_1 = arith.constant 0 : i32
    return %arg0, %c0_i32, %c0_i32_0 : i32, i32, i32
  }
}

module attributes {stable_mosaic.version = 11 : i64} {
  func.func @_matmul_stats_kernel(%arg0: i32, %arg1: i32, %arg2: memref<456x128xbf16, #tpu.memory_space<vmem>>, %arg3: memref<128x128xbf16, #tpu.memory_space<vmem>>, %arg4: memref<456x128xf32, #tpu.memory_space<vmem>>, %arg5: memref<1x8x256xf32, #tpu.memory_space<vmem>>) attributes {dimension_semantics = [#tpu.dimension_semantics<parallel>, #tpu.dimension_semantics<arbitrary>], iteration_bounds = array<i64: 1, 9>, scalar_prefetch = 0 : i64, scratch_operands = 0 : i64, tpu.core_type = #tpu.core_type<tc>, window_params = [{transform_indices = @transform_0, window_bounds = array<i64: 456, 128>}, {transform_indices = @transform_1, window_bounds = array<i64: 128, 128>}, {transform_indices = @transform_2, window_bounds = array<i64: 456, 128>}, {transform_indices = @transform_3, window_bounds = array<i64: 1, 8, 256>}]} {
    %c0_i32 = arith.constant 0 : i32
    %0 = arith.cmpi eq, %arg1, %c0_i32 : i32
    %1 = arith.extui %0 : i1 to i32
    %c0_i32_0 = arith.constant 0 : i32
    %2 = arith.cmpi ne, %1, %c0_i32_0 : i32
    scf.if %2 {
      %cst_9 = arith.constant 0.000000e+00 : f32
      %12 = vector.broadcast %cst_9 : f32 to vector<456x128xf32>
      %c0_10 = arith.constant 0 : index
      %c0_11 = arith.constant 0 : index
      %13 = vector.load %arg4[%c0_10, %c0_11] : memref<456x128xf32, #tpu.memory_space<vmem>>, vector<456x128xf32>
      tpu.vector_store %arg4[%c0_10, %c0_11], %12 {strides = array<i32>} : memref<456x128xf32, #tpu.memory_space<vmem>>, vector<456x128xf32>,
    } else {
    }
    %c0 = arith.constant 0 : index
    %c0_1 = arith.constant 0 : index
    %3 = vector.load %arg4[%c0, %c0_1] : memref<456x128xf32, #tpu.memory_space<vmem>>, vector<456x128xf32>
    %c0_2 = arith.constant 0 : index
    %c0_3 = arith.constant 0 : index
    %4 = vector.load %arg2[%c0_2, %c0_3] : memref<456x128xbf16, #tpu.memory_space<vmem>>, vector<456x128xbf16>
    %c0_4 = arith.constant 0 : index
    %c0_5 = arith.constant 0 : index
    %5 = vector.load %arg3[%c0_4, %c0_5] : memref<128x128xbf16, #tpu.memory_space<vmem>>, vector<128x128xbf16>
    %cst = arith.constant dense<0.000000e+00> : vector<456x128xf32>
    %6 = tpu.matmul %4, %5, %cst {dimension_numbers = #tpu.dot_dimension_numbers<[1], [0], [0], [1], [0, 0, 1, 1], [], []>} : vector<456x128xbf16>, vector<128x128xbf16>, vector<456x128xf32> -> vector<456x128xf32>
    %7 = arith.addf %3, %6 : vector<456x128xf32>
    %c0_6 = arith.constant 0 : index
    %c0_7 = arith.constant 0 : index
    %8 = vector.load %arg4[%c0_6, %c0_7] : memref<456x128xf32, #tpu.memory_space<vmem>>, vector<456x128xf32>
    tpu.vector_store %arg4[%c0_6, %c0_7], %7 {strides = array<i32>} : memref<456x128xf32, #tpu.memory_space<vmem>>, vector<456x128xf32>,
    %c8_i32 = arith.constant 8 : i32
    %9 = arith.cmpi eq, %arg1, %c8_i32 : i32
    %10 = arith.extui %9 : i1 to i32
    %c0_i32_8 = arith.constant 0 : i32
    %11 = arith.cmpi ne, %10, %c0_i32_8 : i32
    scf.if %11 {
      %c0_9 = arith.constant 0 : index
      %c0_10 = arith.constant 0 : index
      %12 = vector.load %arg4[%c0_9, %c0_10] : memref<456x128xf32, #tpu.memory_space<vmem>>, vector<456x128xf32>
      %cst_11 = arith.constant dense<0.000000e+00> : vector<128xf32>
      %13 = vector.multi_reduction <add>, %12, %cst_11 [0] : vector<456x128xf32> to vector<128xf32>
      %14 = vector.shape_cast %13 : vector<128xf32> to vector<1x128xf32>
      %15 = arith.mulf %12, %12 : vector<456x128xf32>
      %cst_12 = arith.constant dense<0.000000e+00> : vector<128xf32>
      %16 = vector.multi_reduction <add>, %15, %cst_12 [0] : vector<456x128xf32> to vector<128xf32>
      %17 = vector.shape_cast %16 : vector<128xf32> to vector<1x128xf32>
      %18 = tpu.concatenate %14, %17 in 1 : vector<1x128xf32>, vector<1x128xf32> -> vector<1x256xf32>
      %19 = vector.shape_cast %18 : vector<1x256xf32> to vector<1x1x256xf32>
      %20 = vector.shape_cast %19 : vector<1x1x256xf32> to vector<1x1x256xf32>
      %21 = vector.broadcast %20 : vector<1x1x256xf32> to vector<1x8x256xf32>
      %c0_13 = arith.constant 0 : index
      %c0_14 = arith.constant 0 : index
      %c0_15 = arith.constant 0 : index
      %22 = vector.load %arg5[%c0_13, %c0_14, %c0_15] : memref<1x8x256xf32, #tpu.memory_space<vmem>>, vector<1x8x256xf32>
      tpu.vector_store %arg5[%c0_13, %c0_14, %c0_15], %21 {strides = array<i32>} : memref<1x8x256xf32, #tpu.memory_space<vmem>>, vector<1x8x256xf32>,
    } else {
    }
    return
  }
  func.func @transform_0(%arg0: i32, %arg1: i32) -> (i32, i32) {
    %c0_i32 = arith.constant 0 : i32
    return %arg0, %arg1 : i32, i32
  }
  func.func @transform_1(%arg0: i32, %arg1: i32) -> (i32, i32) {
    %c0_i32 = arith.constant 0 : i32
    %c0_i32_0 = arith.constant 0 : i32
    return %arg1, %c0_i32 : i32, i32
  }
  func.func @transform_2(%arg0: i32, %arg1: i32) -> (i32, i32) {
    %c0_i32 = arith.constant 0 : i32
    %c0_i32_0 = arith.constant 0 : i32
    return %arg0, %c0_i32 : i32, i32
  }
  func.func @transform_3(%arg0: i32, %arg1: i32) -> (i32, i32, i32) {
    %c0_i32 = arith.constant 0 : i32
    %c0_i32_0 = arith.constant 0 : i32
    %c0_i32_1 = arith.constant 0 : i32
    return %arg0, %c0_i32, %c0_i32_0 : i32, i32, i32
  }
}

module attributes {stable_mosaic.version = 11 : i64} {
  func.func @_matmul_bias_sigmoid_kernel(%arg0: i32, %arg1: memref<1024x576xbf16, #tpu.memory_space<vmem>>, %arg2: memref<576x8xbf16, #tpu.memory_space<vmem>>, %arg3: memref<1x8xf32, #tpu.memory_space<vmem>>, %arg4: memref<1024x8xf32, #tpu.memory_space<vmem>>) attributes {dimension_semantics = [#tpu.dimension_semantics<parallel>], iteration_bounds = array<i64: 2>, scalar_prefetch = 0 : i64, scratch_operands = 0 : i64, tpu.core_type = #tpu.core_type<tc>, window_params = [{transform_indices = @transform_0, window_bounds = array<i64: 1024, 576>}, {pipeline_mode = #tpu.pipeline_mode<synchronous>, transform_indices = @transform_1, window_bounds = array<i64: 576, 8>}, {pipeline_mode = #tpu.pipeline_mode<synchronous>, transform_indices = @transform_2, window_bounds = array<i64: 1, 8>}, {transform_indices = @transform_3, window_bounds = array<i64: 1024, 8>}]} {
    %c0 = arith.constant 0 : index
    %c0_0 = arith.constant 0 : index
    %0 = vector.load %arg1[%c0, %c0_0] : memref<1024x576xbf16, #tpu.memory_space<vmem>>, vector<1024x576xbf16>
    %c0_1 = arith.constant 0 : index
    %c0_2 = arith.constant 0 : index
    %1 = vector.load %arg2[%c0_1, %c0_2] : memref<576x8xbf16, #tpu.memory_space<vmem>>, vector<576x8xbf16>
    %cst = arith.constant dense<0.000000e+00> : vector<1024x8xf32>
    %2 = tpu.matmul %0, %1, %cst {dimension_numbers = #tpu.dot_dimension_numbers<[1], [0], [0], [1], [0, 0, 1, 1], [], []>} : vector<1024x576xbf16>, vector<576x8xbf16>, vector<1024x8xf32> -> vector<1024x8xf32>
    %c0_3 = arith.constant 0 : index
    %c0_4 = arith.constant 0 : index
    %3 = vector.load %arg3[%c0_3, %c0_4] : memref<1x8xf32, #tpu.memory_space<vmem>>, vector<1x8xf32>
    %4 = vector.broadcast %3 : vector<1x8xf32> to vector<1024x8xf32>
    %5 = arith.addf %2, %4 : vector<1024x8xf32>
    %cst_5 = arith.constant 0.000000e+00 : f32
    %6 = vector.broadcast %cst_5 : f32 to vector<1024x8xf32>
    %7 = arith.subf %6, %5 : vector<1024x8xf32>
    %8 = math.exp %7 : vector<1024x8xf32>
    %cst_6 = arith.constant 1.000000e+00 : f32
    %9 = vector.broadcast %cst_6 : f32 to vector<1024x8xf32>
    %10 = arith.addf %9, %8 : vector<1024x8xf32>
    %11 = tpu.reciprocal %10 {approx = true} : vector<1024x8xf32> -> vector<1024x8xf32>
    %cst_7 = arith.constant 0.000000e+00 : f32
    %cst_8 = arith.constant 1.000000e+00 : f32
    %12 = vector.broadcast %cst_7 : f32 to vector<1024x8xf32>
    %13 = arith.maximumf %12, %11 : vector<1024x8xf32>
    %14 = vector.broadcast %cst_8 : f32 to vector<1024x8xf32>
    %15 = arith.minimumf %14, %13 : vector<1024x8xf32>
    %c0_9 = arith.constant 0 : index
    %c0_10 = arith.constant 0 : index
    %16 = vector.load %arg4[%c0_9, %c0_10] : memref<1024x8xf32, #tpu.memory_space<vmem>>, vector<1024x8xf32>
    tpu.vector_store %arg4[%c0_9, %c0_10], %15 {strides = array<i32>} : memref<1024x8xf32, #tpu.memory_space<vmem>>, vector<1024x8xf32>,
    return
  }
  func.func @transform_0(%arg0: i32) -> (i32, i32) {
    %c0_i32 = arith.constant 0 : i32
    %c0_i32_0 = arith.constant 0 : i32
    return %arg0, %c0_i32 : i32, i32
  }
  func.func @transform_1(%arg0: i32) -> (i32, i32) {
    %c0_i32 = arith.constant 0 : i32
    %c0_i32_0 = arith.constant 0 : i32
    %c0_i32_1 = arith.constant 0 : i32
    return %c0_i32, %c0_i32_0 : i32, i32
  }
  func.func @transform_2(%arg0: i32) -> (i32, i32) {
    %c0_i32 = arith.constant 0 : i32
    %c0_i32_0 = arith.constant 0 : i32
    %c0_i32_1 = arith.constant 0 : i32
    return %c0_i32, %c0_i32_0 : i32, i32
  }
  func.func @transform_3(%arg0: i32) -> (i32, i32) {
    %c0_i32 = arith.constant 0 : i32
    %c0_i32_0 = arith.constant 0 : i32
    return %arg0, %c0_i32 : i32, i32
  }
}

</mosaic_0001>

<bundles_post_ra>
// kernel: generator_forward.5
= control target key start
LH: loop header
LB: loop body
LE: loop exit
PB: predicated region body
PF: predicated region fallthrough
CT: control target
= control target key end

     0   :  { %s1111_s12 = smov 0   ;;  %s1113_s13 = smov 0   ;;  %s1373_s0 = inlined_call_operand.vmem [shape: bf16[104,2304], index: 0, kind: input, shape index: {}]   ;;  %s1374_s1 = inlined_call_operand.vmem [shape: bf16[2304,128], index: 1, kind: input, shape index: {}]   ;;  %s1375_s2 = inlined_call_operand.vmem [shape: f32[104,128], index: 2, kind: output, shape index: {0}]   ;;  %s1376_s3 = inlined_call_operand.vmem [shape: f32[1,8,256], index: 3, kind: output, shape index: {1}]  }
   0x1   :  { %s1115_s14 = smov 0   ;;  %s1117_s15 = smov 0  }
   0x2   :  { %s1119_s16 = smov 0  }
   0x3 LB: > { %s23_s17 = sadd.s32 1, %s1084_s15  ;;  %p42_p1 = scmp.ne.s32.totalorder %s1076_s13, %s1072_s12  ;;  %s1088_s16 = sphi %s1119_s16, %s14_s16   ;;  %s1084_s15 = sphi %s1117_s15, %s1380_s15   ;;  %s1080_s14 = sphi %s1115_s14, %s1379_s14   ;;  %s1076_s13 = sphi %s1113_s13, %s1378_s13   ;;  %s1072_s12 = sphi %s1111_s12, %s1377_s12  }
   0x4   : > { %p24_p0 = scmp.ge.s32.totalorder %s23_s17, 9  ;;  %p43_p2 = scmp.eq.s32.totalorder %s1088_s16, 0 }
   0x5   : > { %s35_s19 = sadd.s32 1, %s1076_s13  ;;  %p853_p5 = scmp.ge.s32.totalorder %s1088_s16, 9 }
   0x6   : > { %s1382_s17 = smov (%p24_p0, %s23_s17), 0  ;;  %p44_p3 = por %p43_p2, %p42_p1 }
   0x7   : > { %s31_s18 = ssub.s32 %s1084_s15, %s1382_s17  ;;  %146 = sbr.rel (%p853_p5) target bundleno = 25 (0x19), region = 16 }
   0x8   : > { %p33_p4 = scmp.eq.s32.totalorder %s31_s18, 0 }
   0xa   : > { %s1146_s20 = scalar_select %p33_p4, %s1076_s13, %s35_s19  }
   0xe   : > { %149 = sbr.rel (!%p44_p3) target bundleno = 25 (0x19), region = 20  ;;  %s151_s21 = sand.u32 (%p44_p3), 1, %s1076_s13  }
   0xf   : > { %s896_s22 = sshll.u32 (%p44_p3), %s1084_s15, 3  ;;  %s971_s23 = smul.u32 (%p44_p3), 104, %s151_s21 }
  0x10   : > { %s159_s26 = scalar_lea.vmem (%p44_p3), %s1373_s0, %s896_s22 }
  0x11   : > { %v211_v0 = vld [vmem:[%s159_s26] sm:$0xff] (%p44_p3)  ;;  %v213_v1 = vld [vmem:[%s159_s26 + $0x48] sm:$0xff] (%p44_p3)  ;;  %v215_v2 = vld [vmem:[%s159_s26 + $0x90] sm:$0xff] (%p44_p3)  ;;  %s153_s27 = scalar_lea.vmem (%p44_p3), [#allocation2], %s971_s23 }
  0x12   : > { %v217_v3 = vld [vmem:[%s159_s26 + $0xd8] sm:$0xff] (%p44_p3)  ;;  %v219_v4 = vld [vmem:[%s159_s26 + $0x120] sm:$0xff] (%p44_p3)  ;;  %v221_v5 = vld [vmem:[%s159_s26 + $0x168] sm:$0xff] (%p44_p3)  ;;  %212 = vst [vmem:[%s153_s27] sm:$0xff] (%p44_p3), %v211_v0 }
  0x13   : > { %214 = vst [vmem:[%s153_s27 + $0x8] sm:$0xff] (%p44_p3), %v213_v1  ;;  %216 = vst [vmem:[%s153_s27 + $0x10] sm:$0xff] (%p44_p3), %v215_v2  ;;  %v223_v6 = vld [vmem:[%s159_s26 + $0x1b0] sm:$0xff] (%p44_p3)  ;;  %v225_v7 = vld [vmem:[%s159_s26 + $0x1f8] sm:$0xff] (%p44_p3) }
  0x14   : > { %218 = vst [vmem:[%s153_s27 + $0x18] sm:$0xff] (%p44_p3), %v217_v3  ;;  %220 = vst [vmem:[%s153_s27 + $0x20] sm:$0xff] (%p44_p3), %v219_v4  ;;  %v227_v8 = vld [vmem:[%s159_s26 + $0x240] sm:$0xff] (%p44_p3)  ;;  %v229_v9 = vld [vmem:[%s159_s26 + $0x288] sm:$0xff] (%p44_p3) }
  0x15   : > { %222 = vst [vmem:[%s153_s27 + $0x28] sm:$0xff] %v221_v5  ;;  %224 = vst [vmem:[%s153_s27 + $0x30] sm:$0xff] %v223_v6  ;;  %v231_v10 = vld [vmem:[%s159_s26 + $0x2d0] sm:$0xff]  ;;  %v233_v11 = vld [vmem:[%s159_s26 + $0x318] sm:$0xff] }
  0x16   : > { %226 = vst [vmem:[%s153_s27 + $0x38] sm:$0xff] %v225_v7  ;;  %228 = vst [vmem:[%s153_s27 + $0x40] sm:$0xff] %v227_v8  ;;  %v235_v12 = vld [vmem:[%s159_s26 + $0x360] sm:$0xff] }
  0x17   : > { %230 = vst [vmem:[%s153_s27 + $0x48] sm:$0xff] %v229_v9  ;;  %232 = vst [vmem:[%s153_s27 + $0x50] sm:$0xff] %v231_v10 }
  0x18   : > { %234 = vst [vmem:[%s153_s27 + $0x58] sm:$0xff] %v233_v11  ;;  %236 = vst [vmem:[%s153_s27 + $0x60] sm:$0xff] %v235_v12 }
  0x19 PF: > { %p856_p6 = scmp.ge.s32.totalorder %s1088_s16, 1  ;;  %p250_p7 = scmp.lt.s32.totalorder %s1088_s16, 10 }
  0x1b   : > { %p251_p8 = pnand %p856_p6, %p250_p7 }
  0x1c   : > { %s257_s28 = sand.u32 (!%p251_p8), 1, %s1072_s12   ;;  %s857_s29 = sshll.u32 (!%p251_p8), %s1080_s14, 5 }
  0x1d   : > { %254 = sbr.rel (%p251_p8) target bundleno = 358 (0x166), region = 62  ;;  %p293_p9 = scmp.lt.s32.totalorder (!%p251_p8), %s857_s29, 287 }
  0x1e   : > { %s972_s30 = smul.u32 (!%p251_p8), 104, %s257_s28  ;;  %p859_p10 = scmp.ne.s32.totalorder (!%p251_p8), %s1080_s14, 0 }
  0x20   : > { %s1163_s8 = scalar_lea.vmem (!%p251_p8), [#allocation2], %s972_s30 }
  0x24   : > { %s1384_s29 = smov (!%p293_p9, %s857_s29), 287  ;;  %313 = sbr.rel (%p859_p10) target bundleno = 45 (0x2d), region = 70 }
  0x25   : > { %s858_s4 = sshll.u32 %s1384_s29, 2  ;;  %v1090_v13 = vmov (!%p859_p10), 0.0  }
  0x26   : > { %s1161_s7 = scalar_lea.vmem %s1374_s1, %s858_s4  ;;  %314 = vst [vmem:[%s1375_s2] sm:$0xff] (!%p859_p10), %v1090_v13  ;;  %315 = vst [vmem:[%s1375_s2 + $0x8] sm:$0xff] (!%p859_p10), %v1090_v13 }
  0x27   : > { %316 = vst [vmem:[%s1375_s2 + $0x10] sm:$0xff] (!%p859_p10), %v1090_v13  ;;  %317 = vst [vmem:[%s1375_s2 + $0x18] sm:$0xff] (!%p859_p10), %v1090_v13 }
  0x28   : > { %318 = vst [vmem:[%s1375_s2 + $0x20] sm:$0xff] (!%p859_p10), %v1090_v13  ;;  %319 = vst [vmem:[%s1375_s2 + $0x28] sm:$0xff] (!%p859_p10), %v1090_v13 }
  0x29   : > { %320 = vst [vmem:[%s1375_s2 + $0x30] sm:$0xff] (!%p859_p10), %v1090_v13  ;;  %321 = vst [vmem:[%s1375_s2 + $0x38] sm:$0xff] (!%p859_p10), %v1090_v13 }
  0x2a   : > { %322 = vst [vmem:[%s1375_s2 + $0x40] sm:$0xff] (!%p859_p10), %v1090_v13  ;;  %323 = vst [vmem:[%s1375_s2 + $0x48] sm:$0xff] (!%p859_p10), %v1090_v13 }
  0x2b   : > { %324 = vst [vmem:[%s1375_s2 + $0x50] sm:$0xff] %v1090_v13  ;;  %325 = vst [vmem:[%s1375_s2 + $0x58] sm:$0xff] %v1090_v13 }
  0x2c   : > { %326 = vst [vmem:[%s1375_s2 + $0x60] sm:$0xff] %v1090_v13 }
  0x2d PF: > { %v1014_v14 = vld [vmem:[%s1161_s7 + $0x40] sm:$0xff]   ;;  %v1016_v16 = vld [vmem:[%s1161_s7 + $0x48] sm:$0xff]   ;;  %v1018_v18 = vld [vmem:[%s1161_s7 + $0x50] sm:$0xff]   ;;  %p890_p11 = scmp.ne.s32.totalorder %s1080_s14, 8 }
  0x2e   : > { %v1015_v15 = vld [vmem:[%s1161_s7] sm:$0xff]   ;;  %897 = vmatprep.subr.bf16.mxu0 %v1014_v14  ;;  %955 = vmatprep.subr.bf16.mxu1 %v1014_v14  ;;  %v1017_v17 = vld [vmem:[%s1161_s7 + $0x8] sm:$0xff]   ;;  %v1019_v19 = vld [vmem:[%s1161_s7 + $0x10] sm:$0xff]  }
  0x2f   : > { %898 = vmatpush3.bf16.msra.mxu0 %v1015_v15  ;;  %963 = vmatpush3.bf16.msra.mxu1 %v1015_v15  ;;  %v1020_v20 = vld [vmem:[%s1161_s7 + $0x58] sm:$0xff]   ;;  %v1022_v22 = vld [vmem:[%s1161_s7 + $0x60] sm:$0xff]   ;;  %v1024_v24 = vld [vmem:[%s1161_s7 + $0x68] sm:$0xff]  }
  0x30   : > { %899 = vmatprep.subr.bf16.mxu0 %v1016_v16  ;;  %956 = vmatprep.subr.bf16.mxu1 %v1016_v16  ;;  %v1021_v21 = vld [vmem:[%s1161_s7 + $0x18] sm:$0xff]   ;;  %v1023_v23 = vld [vmem:[%s1161_s7 + $0x20] sm:$0xff]   ;;  %v1025_v27 = vld [vmem:[%s1161_s7 + $0x28] sm:$0xff]  }
  0x31   : > { %v1032_v25 = vld [vmem:[%s1163_s8 + $0x4] ss:$8 sps:$4 sm:$0xff]   ;;  %v1028_v30 = vld [vmem:[%s1161_s7 + $0x78] sm:$0xff]   ;;  %v1030_v32 = vld [vmem:[%s1163_s8] ss:$8 sps:$4 sm:$0xff]  }
  0x32   : > { %v1035_v26 = vld [vmem:[%s1163_s8 + $0x44] ss:$8 sps:$4 sm:$0xff]   ;;  %580 = vmatprep.mubr.bf16.mxu0 %v1032_v25  ;;  %v1029_v31 = vld [vmem:[%s1161_s7 + $0x38] sm:$0xff]   ;;  %v1033_v33 = vld [vmem:[%s1163_s8 + $0x40] ss:$8 sps:$4 sm:$0xff]  }
  0x33   : > { %900 = vmatpush3.bf16.msra.mxu0 %v1017_v17  ;;  %964 = vmatpush3.bf16.msra.mxu1 %v1017_v17  ;;  %v1026_v28 = vld [vmem:[%s1161_s7 + $0x70] sm:$0xff]   ;;  %v352_v36 = vld [vmem:[%s1163_s8 + $0x60] sm:$0xff]  ;;  %v330_v11 = vld [vmem:[%s1375_s2 + $0x18] sm:$0xff] }
  0x34   : > { %901 = vmatprep.subr.bf16.mxu0 %v1018_v18  ;;  %957 = vmatprep.subr.bf16.mxu1 %v1018_v18  ;;  %v1027_v29 = vld [vmem:[%s1161_s7 + $0x30] sm:$0xff]   ;;  %v873_v40 = vcombine.high %v352_v36, %v352_v36  ;;  %v872_v42 = vcombine.low %v352_v36, %v352_v36  ;;  %v327_v47 = vld [vmem:[%s1375_s2] sm:$0xff]  ;;  %v328_v55 = vld [vmem:[%s1375_s2 + $0x8] sm:$0xff] }
  0x35   : > { %612 = vmatprep.mubr.bf16.mxu1 %v1035_v26  ;;  %v1036_v34 = vld [vmem:[%s1163_s8 + $0x14] ss:$8 sps:$4 sm:$0xff]   ;;  %v1038_v37 = vld [vmem:[%s1163_s8 + $0x10] ss:$8 sps:$4 sm:$0xff]   ;;  %v1041_v39 = vld [vmem:[%s1163_s8 + $0x24] ss:$8 sps:$4 sm:$0xff]  }
  0x36   : > { %v1039_v35 = vld [vmem:[%s1163_s8 + $0x54] ss:$8 sps:$4 sm:$0xff]   ;;  %v1043_v38 = vld [vmem:[%s1163_s8 + $0x50] ss:$8 sps:$4 sm:$0xff]   ;;  %v1044_v41 = vld [vmem:[%s1163_s8 + $0x20] ss:$8 sps:$4 sm:$0xff]  }
  0x37   : > { %902 = vmatpush3.bf16.msra.mxu0 %v1019_v19  ;;  %965 = vmatpush3.bf16.msra.mxu1 %v1019_v19  ;;  %v1046_v43 = vld [vmem:[%s1163_s8 + $0x34] ss:$8 sps:$4 sm:$0xff]   ;;  %v1049_v44 = vld [vmem:[%s1163_s8 + $0x30] ss:$8 sps:$4 sm:$0xff]   ;;  %v336_v57 = vld [vmem:[%s1375_s2 + $0x48] sm:$0xff] }
  0x38   : > { %903 = vmatprep.subr.bf16.mxu0 %v1020_v20  ;;  %958 = vmatprep.subr.bf16.mxu1 %v1020_v20  ;;  %v335_v49 = vld [vmem:[%s1375_s2 + $0x40] sm:$0xff]  ;;  %v329_v3 = vld [vmem:[%s1375_s2 + $0x10] sm:$0xff]  ;;  %v338_v13 = vld [vmem:[%s1375_s2 + $0x58] sm:$0xff] }
  0x39   : > { %v337_v5 = vld [vmem:[%s1375_s2 + $0x50] sm:$0xff]  ;;  %v339_v25 = vld [vmem:[%s1375_s2 + $0x60] sm:$0xff] }
  0x3b   : > { %904 = vmatpush3.bf16.msra.mxu0 %v1021_v21  ;;  %966 = vmatpush3.bf16.msra.mxu1 %v1021_v21 }
  0x3c   : > { %905 = vmatprep.subr.bf16.mxu0 %v1022_v22  ;;  %959 = vmatprep.subr.bf16.mxu1 %v1022_v22 }
  0x3f   : > { %906 = vmatpush3.bf16.msra.mxu0 %v1023_v23  ;;  %967 = vmatpush3.bf16.msra.mxu1 %v1023_v23  ;;  %v331_v23 = vld [vmem:[%s1375_s2 + $0x20] sm:$0xff] }
  0x40   : > { %907 = vmatprep.subr.bf16.mxu0 %v1024_v24  ;;  %960 = vmatprep.subr.bf16.mxu1 %v1024_v24 }
  0x43   : > { %908 = vmatpush3.bf16.msra.mxu0 %v1025_v27  ;;  %968 = vmatpush3.bf16.msra.mxu1 %v1025_v27 }
  0x44   : > { %909 = vmatprep.subr.bf16.mxu0 %v1026_v28  ;;  %961 = vmatprep.subr.bf16.mxu1 %v1026_v28 }
  0x47   : > { %910 = vmatpush3.bf16.msra.mxu0 %v1027_v29  ;;  %969 = vmatpush3.bf16.msra.mxu1 %v1027_v29 }
  0x48   : > { %911 = vmatprep.subr.bf16.mxu0 %v1028_v30  ;;  %962 = vmatprep.subr.bf16.mxu1 %v1028_v30 }
  0x4b   : > { %912 = vmatpush3.bf16.msra.mxu0 %v1029_v31  ;;  %970 = vmatpush3.bf16.msra.mxu1 %v1029_v31  ;;  %v332_v31 = vld [vmem:[%s1375_s2 + $0x28] sm:$0xff] }
  0x4e   : > { %581 = vmatmul.mubr.bf16.vlgmr.msra.gmra.mrb[0].mxu0 %v1030_v32  ;;  %613 = vmatmul.mubr.bf16.vlgmr.msra.gmra.mrb[0].mxu1 %v1033_v33 }
  0x4f   : > { %588 = vmatprep.mubr.bf16.mxu0 %v1036_v34  ;;  %620 = vmatprep.mubr.bf16.mxu1 %v1039_v35 }
  0x56   : > { %589 = vmatmul.mubr.bf16.gmra.mrb[4].mxu0 %v1038_v37  ;;  %621 = vmatmul.mubr.bf16.gmra.mrb[4].mxu1 %v1043_v38 }
  0x57   : > { %596 = vmatprep.mubr.bf16.mxu0 %v1041_v39  ;;  %628 = vmatprep.mubr.bf16.mxu1 %v873_v40  ;;  %v333_v39 = vld [vmem:[%s1375_s2 + $0x30] sm:$0xff] }
  0x5e   : > { %597 = vmatmul.mubr.bf16.gmra.mrb[8].mxu0 %v1044_v41  ;;  %629 = vmatmul.mubr.bf16.gmra.mrb[8].mxu1 %v872_v42 }
  0x5f   : > { %604 = vmatprep.mubr.bf16.mxu0 %v1046_v43  ;;  %v334_v43 = vld [vmem:[%s1375_s2 + $0x38] sm:$0xff] }
  0x66   : > { %605 = vmatmul.mubr.bf16.gmra.mrb[12].mxu0 %v1049_v44 }
 0x121   : > { %v913_v45 = vpop.f32.mrb[0].mxu0  ;;  %v937_v46 = vpop.f32.mrb[0].mxu1 }
 0x122   : > { %v914_v48 = vpop.f32.mrb[1].mxu0  ;;  %v938_v50 = vpop.f32.mrb[1].mxu1 }
 0x123   : > { %v915_v51 = vadd.f32 %v914_v48, %v913_v45  ;;  %v916_v52 = vpop.f32.mrb[2].mxu0  ;;  %v939_v53 = vadd.f32 %v938_v50, %v937_v46  ;;  %v940_v54 = vpop.f32.mrb[2].mxu1 }
 0x124   : > { %v917_v56 = vpop.f32.mrb[3].mxu0  ;;  %v941_v58 = vpop.f32.mrb[3].mxu1 }
 0x125   : > { %v636_v59 = vadd.f32 %v915_v51, %v327_v47  ;;  %v918_v60 = vadd.f32 %v917_v56, %v916_v52  ;;  %v644_v61 = vadd.f32 %v939_v53, %v335_v49  ;;  %v942_v62 = vadd.f32 %v941_v58, %v940_v54 }
 0x127   : > { %649 = vst [vmem:[%s1375_s2] sm:$0xff] %v636_v59  ;;  %v637_v63 = vadd.f32 %v918_v60, %v328_v55  ;;  %657 = vst [vmem:[%s1375_s2 + $0x40] sm:$0xff] %v644_v61  ;;  %v645_v0 = vadd.f32 %v942_v62, %v336_v57 }
 0x129   : > { %650 = vst [vmem:[%s1375_s2 + $0x8] sm:$0xff] %v637_v63  ;;  %v919_v1 = vpop.f32.mrb[4].mxu0  ;;  %658 = vst [vmem:[%s1375_s2 + $0x48] sm:$0xff] %v645_v0  ;;  %v943_v2 = vpop.f32.mrb[4].mxu1 }
 0x12a   : > { %v920_v4 = vpop.f32.mrb[5].mxu0  ;;  %v944_v6 = vpop.f32.mrb[5].mxu1 }
 0x12b   : > { %v921_v7 = vadd.f32 %v920_v4, %v919_v1  ;;  %v922_v8 = vpop.f32.mrb[6].mxu0  ;;  %v945_v9 = vadd.f32 %v944_v6, %v943_v2  ;;  %v946_v10 = vpop.f32.mrb[6].mxu1 }
 0x12c   : > { %v923_v12 = vpop.f32.mrb[7].mxu0  ;;  %v947_v14 = vpop.f32.mrb[7].mxu1 }
 0x12d   : > { %v638_v15 = vadd.f32 %v921_v7, %v329_v3  ;;  %v924_v16 = vadd.f32 %v923_v12, %v922_v8  ;;  %v646_v17 = vadd.f32 %v945_v9, %v337_v5  ;;  %v948_v18 = vadd.f32 %v947_v14, %v946_v10 }
 0x12e   : > { %v666_v48 = vld [vmem:[%s1375_s2] sm:$0xff] (!%p890_p11) }
 0x12f   : > { %651 = vst [vmem:[%s1375_s2 + $0x10] sm:$0xff] %v638_v15  ;;  %v639_v19 = vadd.f32 %v924_v16, %v330_v11  ;;  %659 = vst [vmem:[%s1375_s2 + $0x50] sm:$0xff] %v646_v17  ;;  %v647_v20 = vadd.f32 %v948_v18, %v338_v13  ;;  %v697_v52 = vmul.f32 (!%p890_p11), %v666_v48, %v666_v48  ;;  %v674_v9 = vld [vmem:[%s1375_s2 + $0x40] sm:$0xff] (!%p890_p11) }
 0x130   : > { %v667_v49 = vld [vmem:[%s1375_s2 + $0x8] sm:$0xff] (!%p890_p11)  ;;  %v705_v15 = vmul.f32 (!%p890_p11), %v674_v9, %v674_v9 }
 0x131   : > { %652 = vst [vmem:[%s1375_s2 + $0x18] sm:$0xff] %v639_v19  ;;  %v925_v21 = vpop.f32.mrb[8].mxu0  ;;  %660 = vst [vmem:[%s1375_s2 + $0x58] sm:$0xff] %v647_v20  ;;  %v949_v22 = vpop.f32.mrb[8].mxu1  ;;  %v679_v51 = vadd.f32 (!%p890_p11), %v667_v49, %v666_v48  ;;  %v698_v53 = vmul.f32 (!%p890_p11), %v667_v49, %v667_v49  ;;  %v675_v13 = vld [vmem:[%s1375_s2 + $0x48] sm:$0xff] (!%p890_p11) }
 0x132   : > { %v926_v24 = vpop.f32.mrb[9].mxu0  ;;  %v950_v26 = vpop.f32.mrb[9].mxu1  ;;  %v706_v19 = vmul.f32 (!%p890_p11), %v675_v13, %v675_v13 }
 0x133   : > { %v927_v27 = vadd.f32 %v926_v24, %v925_v21  ;;  %v928_v28 = vpop.f32.mrb[10].mxu0  ;;  %v951_v29 = vadd.f32 %v950_v26, %v949_v22  ;;  %v952_v30 = vpop.f32.mrb[10].mxu1  ;;  %v710_v60 = vadd.f32 (!%p890_p11), %v698_v53, %v697_v52 }
 0x134   : > { %v929_v32 = vpop.f32.mrb[11].mxu0  ;;  %v953_v33 = vpop.f32.mrb[11].mxu1 }
 0x135   : > { %v640_v34 = vadd.f32 %v927_v27, %v331_v23  ;;  %v930_v35 = vadd.f32 %v929_v32, %v928_v28  ;;  %v648_v36 = vadd.f32 %v951_v29, %v339_v25  ;;  %v728_v33 = vlaneseq (!%p890_p11) }
 0x136   : > { %v668_v50 = vld [vmem:[%s1375_s2 + $0x10] sm:$0xff] (!%p890_p11) }
 0x137   : > { %653 = vst [vmem:[%s1375_s2 + $0x20] sm:$0xff] %v640_v34  ;;  %v641_v37 = vadd.f32 %v930_v35, %v332_v31  ;;  %661 = vst [vmem:[%s1375_s2 + $0x60] sm:$0xff] %v648_v36  ;;  %v680_v55 = vadd.f32 (!%p890_p11), %v679_v51, %v668_v50  ;;  %v699_v56 = vmul.f32 (!%p890_p11), %v668_v50, %v668_v50  ;;  %v676_v17 = vld [vmem:[%s1375_s2 + $0x50] sm:$0xff] (!%p890_p11) }
 0x138   : > { %v669_v54 = vld [vmem:[%s1375_s2 + $0x18] sm:$0xff] (!%p890_p11)  ;;  %v707_v23 = vmul.f32 (!%p890_p11), %v676_v17, %v676_v17 }
 0x139   : > { %654 = vst [vmem:[%s1375_s2 + $0x28] sm:$0xff] %v641_v37  ;;  %v931_v38 = vpop.f32.mrb[12].mxu0  ;;  %v681_v58 = vadd.f32 (!%p890_p11), %v680_v55, %v669_v54  ;;  %v700_v59 = vmul.f32 (!%p890_p11), %v669_v54, %v669_v54  ;;  %v711_v0 = vadd.f32 (!%p890_p11), %v710_v60, %v699_v56  ;;  %v677_v21 = vld [vmem:[%s1375_s2 + $0x58] sm:$0xff] (!%p890_p11) }
 0x13a   : > { %v932_v40 = vpop.f32.mrb[13].mxu0  ;;  %v708_v27 = vmul.f32 (!%p890_p11), %v677_v21, %v677_v21 }
 0x13b   : > { %v933_v41 = vadd.f32 %v932_v40, %v931_v38  ;;  %v934_v42 = vpop.f32.mrb[14].mxu0  ;;  %665 = sbr.rel (%p890_p11) target bundleno = 358 (0x166), region = 74  ;;  %v712_v4 = vadd.f32 (!%p890_p11), %v711_v0, %v700_v59  ;;  %v729_v38 = vshrl.u32 (!%p890_p11), %v728_v33, 7 }
 0x13c   : > { %v935_v44 = vpop.f32.mrb[15].mxu0 }
 0x13d   : > { %v642_v45 = vadd.f32 %v933_v41, %v333_v39  ;;  %v936_v46 = vadd.f32 %v935_v44, %v934_v42 }
 0x13e   : > { %v670_v57 = vld [vmem:[%s1375_s2 + $0x20] sm:$0xff] (!%p890_p11) }
 0x13f   : > { %655 = vst [vmem:[%s1375_s2 + $0x30] sm:$0xff] %v642_v45  ;;  %v643_v47 = vadd.f32 %v936_v46, %v334_v43  ;;  %v682_v62 = vadd.f32 (!%p890_p11), %v681_v58, %v670_v57  ;;  %v701_v63 = vmul.f32 (!%p890_p11), %v670_v57, %v670_v57  ;;  %v678_v25 = vld [vmem:[%s1375_s2 + $0x60] sm:$0xff] (!%p890_p11)  ;;  %v730_v43 = vsub.s32 (!%p890_p11), 0, %v729_v38 }
 0x140   : > { %v671_v61 = vld [vmem:[%s1375_s2 + $0x28] sm:$0xff] (!%p890_p11)  ;;  %v709_v30 = vmul.f32 (!%p890_p11), %v678_v25, %v678_v25 }
 0x141   : > { %656 = vst [vmem:[%s1375_s2 + $0x38] sm:$0xff] %v643_v47  ;;  %v683_v2 = vadd.f32 (!%p890_p11), %v682_v62, %v671_v61  ;;  %v702_v3 = vmul.f32 (!%p890_p11), %v671_v61, %v671_v61  ;;  %v713_v8 = vadd.f32 (!%p890_p11), %v712_v4, %v701_v63 }
 0x143   : > { %v714_v12 = vadd.f32 %v713_v8, %v702_v3 }
 0x146   : > { %v672_v1 = vld [vmem:[%s1375_s2 + $0x30] sm:$0xff] }
 0x147   : > { %v684_v6 = vadd.f32 %v683_v2, %v672_v1  ;;  %v703_v7 = vmul.f32 %v672_v1, %v672_v1 }
 0x148   : > { %v673_v5 = vld [vmem:[%s1375_s2 + $0x38] sm:$0xff] }
 0x149   : > { %v685_v10 = vadd.f32 %v684_v6, %v673_v5  ;;  %v704_v11 = vmul.f32 %v673_v5, %v673_v5  ;;  %v715_v16 = vadd.f32 %v714_v12, %v703_v7 }
 0x14b   : > { %v686_v14 = vadd.f32 %v685_v10, %v674_v9  ;;  %v716_v20 = vadd.f32 %v715_v16, %v704_v11 }
 0x14d   : > { %v687_v18 = vadd.f32 %v686_v14, %v675_v13  ;;  %v717_v24 = vadd.f32 %v716_v20, %v705_v15 }
 0x14f   : > { %v688_v22 = vadd.f32 %v687_v18, %v676_v17  ;;  %v718_v28 = vadd.f32 %v717_v24, %v706_v19 }
 0x151   : > { %v689_v26 = vadd.f32 %v688_v22, %v677_v21  ;;  %v719_v31 = vadd.f32 %v718_v28, %v707_v23 }
 0x153   : > { %v690_v29 = vadd.f32 %v689_v26, %v678_v25  ;;  %v720_v34 = vadd.f32 %v719_v31, %v708_v27 }
 0x155   : > { %v691_v32 = vrot.slane %v690_v29, 4  ;;  %v721_v36 = vadd.f32 %v720_v34, %v709_v30 }
 0x157   : > { %v692_v35 = vadd.f32 %v691_v32, %v690_v29  ;;  %v722_v39 = vrot.slane %v721_v36, 4 }
 0x159   : > { %v693_v37 = vrot.slane %v692_v35, 2  ;;  %v723_v41 = vadd.f32 %v722_v39, %v721_v36 }
 0x15b   : > { %v694_v40 = vadd.f32 %v693_v37, %v692_v35  ;;  %v724_v44 = vrot.slane %v723_v41, 2 }
 0x15d   : > { %v695_v42 = vrot.slane %v694_v40, 1  ;;  %v725_v46 = vadd.f32 %v724_v44, %v723_v41 }
 0x15f   : > { %v696_v45 = vadd.f32 %v695_v42, %v694_v40  ;;  %v726_v48 = vrot.slane %v725_v46, 1 }
 0x161   : > { %v731_v47 = vrot.slane %v696_v45, %v730_v43  ;;  %v727_v49 = vadd.f32 %v726_v48, %v725_v46 }
 0x163   : > { %736 = vst [vmem:[%s1376_s3] sm:$0xff] %v731_v47  ;;  %v735_v50 = vrot.slane %v727_v49, %v730_v43 }
 0x165   : > { %737 = vst [vmem:[%s1376_s3 + $0x8] sm:$0xff] %v735_v50 }
 0x166 PF: > { %s14_s16 = sadd.s32 1, %s1088_s16   ;;  %s1377_s12 = smov %s1076_s13 }
 0x167   : > { %p11_p12 = scmp.ge.s32.totalorder %s14_s16, 11   ;;  %s1378_s13 = smov %s1146_s20 }
 0x168   : > { %s1379_s14 = smov %s1084_s15  ;;  %s1380_s15 = smov %s1382_s17 }
 0x169   :  { %13 = sbr.rel (!%p11_p12) target bundleno = 3 (0x3), region = 124 }

// kernel: generator_forward.4
= control target key start
LH: loop header
LB: loop body
LE: loop exit
PB: predicated region body
PF: predicated region fallthrough
CT: control target
= control target key end

     0   :  { %11 = vsyncpa [#allocation3], 0  ;;  %s7120_s0 = inlined_call_operand.vmem [shape: f32[2,128], index: 0, kind: input, shape index: {}]   ;;  %s7121_s1 = inlined_call_operand.hbm [shape: f32[128,512], index: 1, kind: input, shape index: {}]   ;;  %s7122_s2 = inlined_call_operand.hbm [shape: f32[1,512], index: 2, kind: input, shape index: {}]   ;;  %s7123_s3 = inlined_call_operand.hbm [shape: bf16[512,2304], index: 3, kind: input, shape index: {}]   ;;  %s7124_s4 = inlined_call_operand.hbm [shape: f32[1,256], index: 4, kind: input, shape index: {}]   ;;  %s7125_s5 = inlined_call_operand.hbm [shape: f32[1,256], index: 5, kind: input, shape index: {}]   ;;  %s7126_s6 = inlined_call_operand.vmem [shape: f32[2,2304], index: 6, kind: output, shape index: {}]  }
   0x1   :  { %12 = vsyncpa [#allocation5], 0 }
   0x2   :  { %13 = vsyncpa [#allocation8], 0  ;;  %s6770_s21 = smov [#allocation4]   ;;  %s6771_s23 = smov [#allocation7]  }
   0x3   :  { %s34_s22 = sshll.u32 %s6770_s21, 4  ;;  %s56_s24 = sshll.u32 %s6771_s23, 4  ;;  %s35_s22 = int_to_ptr.vmem [resolvable:$true] %s34_s22  ;;  %s57_s24 = int_to_ptr.vmem [resolvable:$true] %s56_s24 }
   0x4   :  { %s6654_s27 = scalar_lea.hbm %s7122_s2, 64 }
   0x5   :  { %p6655_p0 = scmp.ne.s32.totalorder %s7122_s2, %s6654_s27  ;;  %p6658_p1 = scmp.lt.u32.totalorder %s6654_s27, %s7122_s2 }
   0x7   :  { %p6660_p2 = pnand %p6658_p1, %p6655_p0 }
   0x9   :  { %6663 = shalt.err (!%p6660_p2)
}
   0xa   :  { %s6664_s8 = scalar_lea.vmem %s35_s22, 64  ;;  %p6669_p4 = scmp.lt.s32.totalorder %s35_s22, %s35_s22 }
   0xb   :  { %p6665_p3 = scmp.ne.s32.totalorder %s35_s22, %s6664_s8  ;;  %p6670_p5 = scmp.lt.s32.totalorder %s6664_s8, %s6664_s8 }
   0xd   :  { %p6671_p6 = por %p6670_p5, %p6669_p4 }
   0xf   :  { %p6672_p7 = pnand %p6671_p6, %p6665_p3 }
  0x11   :  { %6675 = shalt.err (!%p6672_p7)
}
  0x12   :  { %37 = dma.hbm_to_vmem [thread:$0]  %s7122_s2, 64, %s35_s22, [#allocation5]  }
  0x13   :  { %s6676_s13 = scalar_lea.hbm %s7124_s4, 32 }
  0x14   :  { %p6677_p8 = scmp.ne.s32.totalorder %s7124_s4, %s6676_s13  ;;  %p6680_p9 = scmp.lt.u32.totalorder %s6676_s13, %s7124_s4 }
  0x16   :  { %p6682_p10 = pnand %p6680_p9, %p6677_p8 }
  0x18   :  { %6685 = shalt.err (!%p6682_p10)
}
  0x19   :  { %s6686_s18 = scalar_lea.vmem %s57_s24, 32  ;;  %p6691_p12 = scmp.lt.s32.totalorder %s57_s24, %s57_s24 }
  0x1a   :  { %p6687_p11 = scmp.ne.s32.totalorder %s57_s24, %s6686_s18  ;;  %p6692_p13 = scmp.lt.s32.totalorder %s6686_s18, %s6686_s18 }
  0x1c   :  { %p6693_p0 = por %p6692_p13, %p6691_p12 }
  0x1e   :  { %p6694_p1 = pnand %p6693_p0, %p6687_p11 }
  0x20   :  { %6697 = shalt.err (!%p6694_p1)
}
  0x21   :  { %59 = dma.hbm_to_vmem [thread:$0]  %s7124_s4, 32, %s57_s24, [#allocation8]  }
  0x22   :  { %s6772_s20 = smov [#allocation2]   ;;  %s6698_s25 = scalar_lea.hbm %s7121_s1, 8192 }
  0x23   :  { %s21_s21 = sshll.u32 %s6772_s20, 4  ;;  %p6699_p2 = scmp.ne.s32.totalorder %s7121_s1, %s6698_s25  ;;  %s22_s21 = int_to_ptr.vmem [resolvable:$true] %s21_s21 }
  0x24   :  { %p6702_p3 = scmp.lt.u32.totalorder %s6698_s25, %s7121_s1 }
  0x26   :  { %p6704_p4 = pnand %p6702_p3, %p6699_p2 }
  0x28   :  { %6707 = shalt.err (!%p6704_p4)
}
  0x29   :  { %s6708_s30 = scalar_lea.vmem %s22_s21, 8192  ;;  %p6713_p6 = scmp.lt.s32.totalorder %s22_s21, %s22_s21 }
  0x2a   :  { %p6709_p5 = scmp.ne.s32.totalorder %s22_s21, %s6708_s30  ;;  %p6714_p7 = scmp.lt.s32.totalorder %s6708_s30, %s6708_s30 }
  0x2c   :  { %p6715_p8 = por %p6714_p7, %p6713_p6 }
  0x2e   :  { %p6716_p9 = pnand %p6715_p8, %p6709_p5 }
  0x30   :  { %6719 = shalt.err (!%p6716_p9)
}
  0x31   :  { %s6773_s4 = smov 512   ;;  %s6774_s24 = smov 32  }
  0x32   :  { %27 = dma.hbm_to_vmem [thread:$0]  %s7121_s1, 8192, %s22_s21, [#allocation3], %s6773_s4, %s6773_s4, %s6774_s24  }
  0x33   :  { %s6775_s9 = smov [#allocation6]   ;;  %s6720_s13 = scalar_lea.hbm %s7123_s3, 73728 }
  0x34   :  { %s43_s10 = sshll.u32 %s6775_s9, 4  ;;  %p6721_p10 = scmp.ne.s32.totalorder %s7123_s3, %s6720_s13  ;;  %s44_s10 = int_to_ptr.vmem [resolvable:$true] %s43_s10 }
  0x35   :  { %p6724_p11 = scmp.lt.u32.totalorder %s6720_s13, %s7123_s3 }
  0x37   :  { %p6726_p12 = pnand %p6724_p11, %p6721_p10 }
  0x39   :  { %6729 = shalt.err (!%p6726_p12)
}
  0x3a   :  { %s6730_s18 = scalar_lea.vmem %s44_s10, 73728  ;;  %p6735_p0 = scmp.lt.s32.totalorder %s44_s10, %s44_s10 }
  0x3b   :  { %p6731_p13 = scmp.ne.s32.totalorder %s44_s10, %s6730_s18  ;;  %p6736_p1 = scmp.lt.s32.totalorder %s6730_s18, %s6730_s18 }
  0x3d   :  { %p6737_p2 = por %p6736_p1, %p6735_p0 }
  0x3f   :  { %p6738_p3 = pnand %p6737_p2, %p6731_p13 }
  0x41   :  { %6741 = shalt.err (!%p6738_p3)
}
  0x42   :  { %s6776_s1 = smov 1152   ;;  %s6777_s2 = smov 72  }
  0x43   :  { %49 = dma.hbm_to_vmem [thread:$0]  %s7123_s3, 73728, %s44_s10, [#allocation5], %s6776_s1, %s6776_s1, %s6777_s2  }
  0x44   :  { %s6778_s21 = smov [#allocation9]   ;;  %s6742_s26 = scalar_lea.hbm %s7125_s5, 32 }
  0x45   :  { %s66_s22 = sshll.u32 %s6778_s21, 4  ;;  %p6743_p4 = scmp.ne.s32.totalorder %s7125_s5, %s6742_s26  ;;  %s67_s22 = int_to_ptr.vmem [resolvable:$true] %s66_s22 }
  0x46   :  { %p6746_p5 = scmp.lt.u32.totalorder %s6742_s26, %s7125_s5 }
  0x48   :  { %p6748_p6 = pnand %p6746_p5, %p6743_p4 }
  0x4a   :  { %6751 = shalt.err (!%p6748_p6)
}
  0x4b   :  { %s6752_s4 = scalar_lea.vmem %s67_s22, 32  ;;  %p6757_p8 = scmp.lt.s32.totalorder %s67_s22, %s67_s22 }
  0x4c   :  { %p6753_p7 = scmp.ne.s32.totalorder %s67_s22, %s6752_s4  ;;  %p6758_p9 = scmp.lt.s32.totalorder %s6752_s4, %s6752_s4 }
  0x4e   :  { %p6759_p10 = por %p6758_p9, %p6757_p8 }
  0x50   :  { %p6760_p11 = pnand %p6759_p10, %p6753_p7 }
  0x52   :  { %6763 = shalt.err (!%p6760_p11)
}
  0x53   :  { %69 = dma.hbm_to_vmem [thread:$0]  %s7125_s5, 32, %s67_s22, [#allocation8]  }
  0x54   :  { %6764 = dma.done.wait [#allocation3], 8192  }
  0x55   :  { %6765 = vsyncadd [#allocation3], 4294959104 }
  0x56   :  { %6766 = dma.done.wait [#allocation5], 73792  }
  0x57   :  { %6767 = vsyncadd [#allocation5], 4294893504 }
  0x58   :  { %6768 = dma.done.wait [#allocation8], 64  }
  0x59   :  { %6769 = vsyncadd [#allocation8], 4294967232  ;;  %v6779_v0 = vmov 0.0   ;;  %v87_v1 = vld [vmem:[#allocation2 + $0x8] sm:$0xff]  ;;  %v89_v3 = vld [vmem:[#allocation2 + $0x18] sm:$0xff]  ;;  %vm4516_vm0 = vcmask 1041408  }
  0x5a   :  { %236 = vmatprep.mubr.f32.mxu0 %v6779_v0  ;;  %307 = vmatprep.mubr.f32.mxu1 %v6779_v0  ;;  %v91_v2 = vld [vmem:[#allocation2 + $0x28] sm:$0xff]  ;;  %v93_v5 = vld [vmem:[#allocation2 + $0x38] sm:$0xff]  ;;  %v86_v6 = vld [vmem:[#allocation2] sm:$0xff] }
  0x5b   :  { %v5676_v4 = vpack.c.bf16 %v91_v2, %v87_v1  ;;  %v90_v7 = vld [vmem:[#allocation2 + $0x20] sm:$0xff]  ;;  %v5708_v8 = vpack.c.bf16 %v93_v5, %v89_v3  ;;  %v88_v10 = vld [vmem:[#allocation2 + $0x10] sm:$0xff]  ;;  %v95_v12 = vld [vmem:[#allocation2 + $0x48] sm:$0xff] }
  0x5c   :  { %v5678_v9 = vpack.c.bf16 %v90_v7, %v86_v6  ;;  %v92_v11 = vld [vmem:[#allocation2 + $0x30] sm:$0xff]  ;;  %v99_v14 = vld [vmem:[#allocation2 + $0x68] sm:$0xff]  ;;  %v97_v15 = vld [vmem:[#allocation2 + $0x58] sm:$0xff] }
  0x5d   :  { %5677 = vmatprep.subr.bf16.mxu0 %v5676_v4  ;;  %v5710_v13 = vpack.c.bf16 %v92_v11, %v88_v10  ;;  %v101_v16 = vld [vmem:[#allocation2 + $0x78] sm:$0xff]  ;;  %5709 = vmatprep.subr.bf16.mxu1 %v5708_v8  ;;  %v5680_v17 = vpack.c.bf16 %v99_v14, %v95_v12  ;;  %v94_v19 = vld [vmem:[#allocation2 + $0x40] sm:$0xff]  ;;  %v96_v21 = vld [vmem:[#allocation2 + $0x50] sm:$0xff] }
  0x5e   :  { %5679 = vmatpush1.bf16.msra.mxu0 %v5678_v9  ;;  %v5712_v18 = vpack.c.bf16 %v101_v16, %v97_v15  ;;  %v98_v20 = vld [vmem:[#allocation2 + $0x60] sm:$0xff]  ;;  %v100_v23 = vld [vmem:[#allocation2 + $0x70] sm:$0xff]  ;;  %v103_v24 = vld [vmem:[#allocation2 + $0x88] sm:$0xff] }
  0x5f   :  { %5711 = vmatpush1.bf16.msra.mxu1 %v5710_v13  ;;  %v5682_v22 = vpack.c.bf16 %v98_v20, %v94_v19  ;;  %v107_v25 = vld [vmem:[#allocation2 + $0xa8] sm:$0xff]  ;;  %5681 = vmatprep.subr.bf16.mxu0 %v5680_v17  ;;  %v5714_v26 = vpack.c.bf16 %v100_v23, %v96_v21  ;;  %v105_v28 = vld [vmem:[#allocation2 + $0x98] sm:$0xff]  ;;  %v102_v30 = vld [vmem:[#allocation2 + $0x80] sm:$0xff] }
  0x60   :  { %5713 = vmatprep.subr.bf16.mxu1 %v5712_v18  ;;  %v5684_v27 = vpack.c.bf16 %v107_v25, %v103_v24  ;;  %v109_v29 = vld [vmem:[#allocation2 + $0xb8] sm:$0xff]  ;;  %v106_v32 = vld [vmem:[#allocation2 + $0xa0] sm:$0xff]  ;;  %v104_v33 = vld [vmem:[#allocation2 + $0x90] sm:$0xff] }
  0x61   :  { %v5716_v31 = vpack.c.bf16 %v109_v29, %v105_v28  ;;  %v108_v34 = vld [vmem:[#allocation2 + $0xb0] sm:$0xff]  ;;  %v5686_v35 = vpack.c.bf16 %v106_v32, %v102_v30  ;;  %v111_v36 = vld [vmem:[#allocation2 + $0xc8] sm:$0xff]  ;;  %v113_v38 = vld [vmem:[#allocation2 + $0xd8] sm:$0xff] }
  0x62   :  { %5683 = vmatpush1.bf16.msra.mxu0 %v5682_v22  ;;  %v115_v37 = vld [vmem:[#allocation2 + $0xe8] sm:$0xff]  ;;  %v5718_v39 = vpack.c.bf16 %v108_v34, %v104_v33  ;;  %v117_v41 = vld [vmem:[#allocation2 + $0xf8] sm:$0xff]  ;;  %v110_v42 = vld [vmem:[#allocation2 + $0xc0] sm:$0xff] }
  0x63   :  { %5715 = vmatpush1.bf16.msra.mxu1 %v5714_v26  ;;  %5685 = vmatprep.subr.bf16.mxu0 %v5684_v27  ;;  %v5688_v40 = vpack.c.bf16 %v115_v37, %v111_v36  ;;  %v114_v43 = vld [vmem:[#allocation2 + $0xe0] sm:$0xff]  ;;  %v5720_v44 = vpack.c.bf16 %v117_v41, %v113_v38  ;;  %v112_v45 = vld [vmem:[#allocation2 + $0xd0] sm:$0xff]  ;;  %v119_v47 = vld [vmem:[#allocation2 + $0x108] sm:$0xff] }
  0x64   :  { %5717 = vmatprep.subr.bf16.mxu1 %v5716_v31  ;;  %v116_v46 = vld [vmem:[#allocation2 + $0xf0] sm:$0xff]  ;;  %v123_v48 = vld [vmem:[#allocation2 + $0x128] sm:$0xff]  ;;  %v121_v49 = vld [vmem:[#allocation2 + $0x118] sm:$0xff]  ;;  %v5690_v51 = vpack.c.bf16 %v114_v43, %v110_v42 }
  0x65   :  { %v125_v50 = vld [vmem:[#allocation2 + $0x138] sm:$0xff]  ;;  %v5722_v52 = vpack.c.bf16 %v116_v46, %v112_v45  ;;  %v5692_v53 = vpack.c.bf16 %v123_v48, %v119_v47  ;;  %v118_v54 = vld [vmem:[#allocation2 + $0x100] sm:$0xff]  ;;  %v120_v56 = vld [vmem:[#allocation2 + $0x110] sm:$0xff] }
  0x66   :  { %5687 = vmatpush1.bf16.msra.mxu0 %v5686_v35  ;;  %v122_v55 = vld [vmem:[#allocation2 + $0x120] sm:$0xff]  ;;  %v5724_v57 = vpack.c.bf16 %v125_v50, %v121_v49  ;;  %v124_v58 = vld [vmem:[#allocation2 + $0x130] sm:$0xff]  ;;  %v127_v59 = vld [vmem:[#allocation2 + $0x148] sm:$0xff] }
  0x67   :  { %5719 = vmatpush1.bf16.msra.mxu1 %v5718_v39  ;;  %5689 = vmatprep.subr.bf16.mxu0 %v5688_v40  ;;  %v131_v60 = vld [vmem:[#allocation2 + $0x168] sm:$0xff]  ;;  %v129_v61 = vld [vmem:[#allocation2 + $0x158] sm:$0xff]  ;;  %v5694_v63 = vpack.c.bf16 %v122_v55, %v118_v54  ;;  %v5726_v0 = vpack.c.bf16 %v124_v58, %v120_v56  ;;  %v126_v2 = vld [vmem:[#allocation2 + $0x140] sm:$0xff] }
  0x68   :  { %5721 = vmatprep.subr.bf16.mxu1 %v5720_v44  ;;  %v133_v62 = vld [vmem:[#allocation2 + $0x178] sm:$0xff]  ;;  %v5696_v1 = vpack.c.bf16 %v131_v60, %v127_v59  ;;  %v130_v3 = vld [vmem:[#allocation2 + $0x160] sm:$0xff]  ;;  %v128_v4 = vld [vmem:[#allocation2 + $0x150] sm:$0xff] }
  0x69   :  { %v5728_v5 = vpack.c.bf16 %v133_v62, %v129_v61  ;;  %v132_v6 = vld [vmem:[#allocation2 + $0x170] sm:$0xff]  ;;  %v135_v7 = vld [vmem:[#allocation2 + $0x188] sm:$0xff]  ;;  %v137_v9 = vld [vmem:[#allocation2 + $0x198] sm:$0xff]  ;;  %v5698_v11 = vpack.c.bf16 %v130_v3, %v126_v2 }
  0x6a   :  { %5691 = vmatpush1.bf16.msra.mxu0 %v5690_v51  ;;  %v139_v8 = vld [vmem:[#allocation2 + $0x1a8] sm:$0xff]  ;;  %v141_v10 = vld [vmem:[#allocation2 + $0x1b8] sm:$0xff]  ;;  %v134_v12 = vld [vmem:[#allocation2 + $0x180] sm:$0xff]  ;;  %v5730_v15 = vpack.c.bf16 %v132_v6, %v128_v4 }
  0x6b   :  { %5723 = vmatpush1.bf16.msra.mxu1 %v5722_v52  ;;  %5693 = vmatprep.subr.bf16.mxu0 %v5692_v53  ;;  %v138_v13 = vld [vmem:[#allocation2 + $0x1a0] sm:$0xff]  ;;  %v136_v14 = vld [vmem:[#allocation2 + $0x190] sm:$0xff]  ;;  %v5700_v16 = vpack.c.bf16 %v139_v8, %v135_v7  ;;  %v143_v18 = vld [vmem:[#allocation2 + $0x1c8] sm:$0xff]  ;;  %v5732_v19 = vpack.c.bf16 %v141_v10, %v137_v9 }
  0x6c   :  { %5725 = vmatprep.subr.bf16.mxu1 %v5724_v57  ;;  %v140_v17 = vld [vmem:[#allocation2 + $0x1b0] sm:$0xff]  ;;  %v147_v20 = vld [vmem:[#allocation2 + $0x1e8] sm:$0xff]  ;;  %v145_v21 = vld [vmem:[#allocation2 + $0x1d8] sm:$0xff]  ;;  %v5702_v23 = vpack.c.bf16 %v138_v13, %v134_v12 }
  0x6d   :  { %v149_v22 = vld [vmem:[#allocation2 + $0x1f8] sm:$0xff]  ;;  %v5734_v24 = vpack.c.bf16 %v140_v17, %v136_v14  ;;  %v5704_v25 = vpack.c.bf16 %v147_v20, %v143_v18  ;;  %v142_v26 = vld [vmem:[#allocation2 + $0x1c0] sm:$0xff]  ;;  %v144_v29 = vld [vmem:[#allocation2 + $0x1d0] sm:$0xff] }
  0x6e   :  { %5695 = vmatpush1.bf16.msra.mxu0 %v5694_v63  ;;  %v146_v27 = vld [vmem:[#allocation2 + $0x1e0] sm:$0xff]  ;;  %v5736_v28 = vpack.c.bf16 %v149_v22, %v145_v21  ;;  %v148_v30 = vld [vmem:[#allocation2 + $0x1f0] sm:$0xff] }
  0x6f   :  { %5727 = vmatpush1.bf16.msra.mxu1 %v5726_v0  ;;  %5697 = vmatprep.subr.bf16.mxu0 %v5696_v1  ;;  %v5706_v31 = vpack.c.bf16 %v146_v27, %v142_v26  ;;  %v5738_v32 = vpack.c.bf16 %v148_v30, %v144_v29  ;;  %v5791_v33 = vld [vmem:[#allocation6 + $0x904] ss:$72 sps:$4 sm:$0xff]   ;;  %v85_v35 = vld [vmem:[%s7120_s0] sm:$0x3]  ;;  %v5789_v36 = vld [vmem:[#allocation6 + $0x900] ss:$72 sps:$4 sm:$0xff]  }
  0x70   :  { %5729 = vmatprep.subr.bf16.mxu1 %v5728_v5  ;;  %v5788_v34 = vld [vmem:[#allocation6 + $0x4] ss:$72 sps:$4 sm:$0xff]   ;;  %v5786_v37 = vld [vmem:[#allocation6] ss:$72 sps:$4 sm:$0xff]   ;;  %v5797_v38 = vld [vmem:[#allocation6 + $0x994] ss:$72 sps:$4 sm:$0xff]  }
  0x71   :  { %v5794_v39 = vld [vmem:[#allocation6 + $0x94] ss:$72 sps:$4 sm:$0xff]   ;;  %v5795_v40 = vld [vmem:[#allocation6 + $0x990] ss:$72 sps:$4 sm:$0xff]   ;;  %v5803_v42 = vld [vmem:[#allocation6 + $0xa24] ss:$72 sps:$4 sm:$0xff]  }
  0x72   :  { %5699 = vmatpush1.bf16.msra.mxu0 %v5698_v11  ;;  %v5792_v41 = vld [vmem:[#allocation6 + $0x90] ss:$72 sps:$4 sm:$0xff]   ;;  %v5800_v43 = vld [vmem:[#allocation6 + $0x124] ss:$72 sps:$4 sm:$0xff]   ;;  %v5801_v44 = vld [vmem:[#allocation6 + $0xa20] ss:$72 sps:$4 sm:$0xff]  }
  0x73   :  { %5731 = vmatpush1.bf16.msra.mxu1 %v5730_v15  ;;  %5701 = vmatprep.subr.bf16.mxu0 %v5700_v16  ;;  %v5798_v45 = vld [vmem:[#allocation6 + $0x120] ss:$72 sps:$4 sm:$0xff]   ;;  %v5809_v46 = vld [vmem:[#allocation6 + $0xab4] ss:$72 sps:$4 sm:$0xff]   ;;  %v5807_v48 = vld [vmem:[#allocation6 + $0xab0] ss:$72 sps:$4 sm:$0xff]  }
  0x74   :  { %5733 = vmatprep.subr.bf16.mxu1 %v5732_v19  ;;  %v5806_v47 = vld [vmem:[#allocation6 + $0x1b4] ss:$72 sps:$4 sm:$0xff]   ;;  %v5804_v49 = vld [vmem:[#allocation6 + $0x1b0] ss:$72 sps:$4 sm:$0xff]   ;;  %v5815_v50 = vld [vmem:[#allocation6 + $0xb44] ss:$72 sps:$4 sm:$0xff]  }
  0x75   :  { %v5812_v51 = vld [vmem:[#allocation6 + $0x244] ss:$72 sps:$4 sm:$0xff]   ;;  %v5813_v52 = vld [vmem:[#allocation6 + $0xb40] ss:$72 sps:$4 sm:$0xff]   ;;  %v5821_v54 = vld [vmem:[#allocation6 + $0xbd4] ss:$72 sps:$4 sm:$0xff]  }
  0x76   :  { %5703 = vmatpush1.bf16.msra.mxu0 %v5702_v23  ;;  %v5810_v53 = vld [vmem:[#allocation6 + $0x240] ss:$72 sps:$4 sm:$0xff]   ;;  %v5818_v55 = vld [vmem:[#allocation6 + $0x2d4] ss:$72 sps:$4 sm:$0xff]   ;;  %v5819_v56 = vld [vmem:[#allocation6 + $0xbd0] ss:$72 sps:$4 sm:$0xff]  }
  0x77   :  { %5735 = vmatpush1.bf16.msra.mxu1 %v5734_v24  ;;  %5705 = vmatprep.subr.bf16.mxu0 %v5704_v25  ;;  %v5816_v57 = vld [vmem:[#allocation6 + $0x2d0] ss:$72 sps:$4 sm:$0xff]   ;;  %v5827_v58 = vld [vmem:[#allocation6 + $0xc64] ss:$72 sps:$4 sm:$0xff]   ;;  %v5825_v60 = vld [vmem:[#allocation6 + $0xc60] ss:$72 sps:$4 sm:$0xff]  }
  0x78   :  { %5737 = vmatprep.subr.bf16.mxu1 %v5736_v28  ;;  %v5824_v59 = vld [vmem:[#allocation6 + $0x364] ss:$72 sps:$4 sm:$0xff]   ;;  %v5822_v61 = vld [vmem:[#allocation6 + $0x360] ss:$72 sps:$4 sm:$0xff]   ;;  %v5833_v62 = vld [vmem:[#allocation6 + $0xcf4] ss:$72 sps:$4 sm:$0xff]  }
  0x79   :  { %v5830_v63 = vld [vmem:[#allocation6 + $0x3f4] ss:$72 sps:$4 sm:$0xff]   ;;  %v5831_v0 = vld [vmem:[#allocation6 + $0xcf0] ss:$72 sps:$4 sm:$0xff]   ;;  %v5839_v2 = vld [vmem:[#allocation6 + $0xd84] ss:$72 sps:$4 sm:$0xff]  }
  0x7a   :  { %5707 = vmatpush1.bf16.msra.mxu0 %v5706_v31  ;;  %v5828_v1 = vld [vmem:[#allocation6 + $0x3f0] ss:$72 sps:$4 sm:$0xff]   ;;  %v5836_v3 = vld [vmem:[#allocation6 + $0x484] ss:$72 sps:$4 sm:$0xff]   ;;  %v5837_v4 = vld [vmem:[#allocation6 + $0xd80] ss:$72 sps:$4 sm:$0xff]  }
  0x7b   :  { %5739 = vmatpush1.bf16.msra.mxu1 %v5738_v32  ;;  %3819 = vmatprep.subr.bf16.mxu0 %v5791_v33  ;;  %v5834_v5 = vld [vmem:[#allocation6 + $0x480] ss:$72 sps:$4 sm:$0xff]   ;;  %v5845_v6 = vld [vmem:[#allocation6 + $0xe14] ss:$72 sps:$4 sm:$0xff]   ;;  %v5843_v8 = vld [vmem:[#allocation6 + $0xe10] ss:$72 sps:$4 sm:$0xff]  }
  0x7c   :  { %3778 = vmatprep.subr.bf16.mxu1 %v5788_v34  ;;  %v5842_v7 = vld [vmem:[#allocation6 + $0x514] ss:$72 sps:$4 sm:$0xff]   ;;  %v5840_v9 = vld [vmem:[#allocation6 + $0x510] ss:$72 sps:$4 sm:$0xff]   ;;  %v5851_v10 = vld [vmem:[#allocation6 + $0xea4] ss:$72 sps:$4 sm:$0xff]  }
  0x7d   :  { %237 = vmatmul.mubr.f32.vlgmr.msra.gmra.mrb[0].mxu0 %v85_v35  ;;  %v5848_v11 = vld [vmem:[#allocation6 + $0x5a4] ss:$72 sps:$4 sm:$0xff]   ;;  %v5849_v12 = vld [vmem:[#allocation6 + $0xea0] ss:$72 sps:$4 sm:$0xff]   ;;  %v5857_v14 = vld [vmem:[#allocation6 + $0xf34] ss:$72 sps:$4 sm:$0xff]  }
  0x7e   :  { %308 = vmatmul.mubr.f32.vlgmr.msra.gmra.mrb[0].mxu1 %v85_v35  ;;  %3820 = vmatpush1.bf16.msra.mxu0 %v5789_v36  ;;  %v5846_v13 = vld [vmem:[#allocation6 + $0x5a0] ss:$72 sps:$4 sm:$0xff]   ;;  %v5854_v15 = vld [vmem:[#allocation6 + $0x634] ss:$72 sps:$4 sm:$0xff]   ;;  %v5855_v16 = vld [vmem:[#allocation6 + $0xf30] ss:$72 sps:$4 sm:$0xff]   ;;  %v152_v36 = vlaneseq }
  0x7f   :  { %3779 = vmatpush1.bf16.msra.mxu1 %v5786_v37  ;;  %3821 = vmatprep.subr.bf16.mxu0 %v5797_v38  ;;  %v5852_v17 = vld [vmem:[#allocation6 + $0x630] ss:$72 sps:$4 sm:$0xff]   ;;  %v5863_v18 = vld [vmem:[#allocation6 + $0xfc4] ss:$72 sps:$4 sm:$0xff]   ;;  %v5861_v20 = vld [vmem:[#allocation6 + $0xfc0] ss:$72 sps:$4 sm:$0xff]  }
  0x80   :  { %3780 = vmatprep.subr.bf16.mxu1 %v5794_v39  ;;  %v5860_v19 = vld [vmem:[#allocation6 + $0x6c4] ss:$72 sps:$4 sm:$0xff]   ;;  %v5858_v21 = vld [vmem:[#allocation6 + $0x6c0] ss:$72 sps:$4 sm:$0xff]   ;;  %v5869_v22 = vld [vmem:[#allocation6 + $0x1054] ss:$72 sps:$4 sm:$0xff]  }
  0x81   :  { %v5866_v23 = vld [vmem:[#allocation6 + $0x754] ss:$72 sps:$4 sm:$0xff]   ;;  %v5867_v24 = vld [vmem:[#allocation6 + $0x1050] ss:$72 sps:$4 sm:$0xff]   ;;  %v5872_v26 = vld [vmem:[#allocation6 + $0x7e4] ss:$72 sps:$4 sm:$0xff]  }
  0x82   :  { %3822 = vmatpush1.bf16.msra.mxu0 %v5795_v40  ;;  %v5864_v25 = vld [vmem:[#allocation6 + $0x750] ss:$72 sps:$4 sm:$0xff]   ;;  %v5875_v27 = vld [vmem:[#allocation6 + $0x10e4] ss:$72 sps:$4 sm:$0xff]   ;;  %v5870_v28 = vld [vmem:[#allocation6 + $0x7e0] ss:$72 sps:$4 sm:$0xff]  }
  0x83   :  { %3781 = vmatpush1.bf16.msra.mxu1 %v5792_v41  ;;  %3823 = vmatprep.subr.bf16.mxu0 %v5803_v42  ;;  %v5873_v29 = vld [vmem:[#allocation6 + $0x10e0] ss:$72 sps:$4 sm:$0xff]   ;;  %v5878_v30 = vld [vmem:[#allocation6 + $0x874] ss:$72 sps:$4 sm:$0xff]   ;;  %v5876_v32 = vld [vmem:[#allocation6 + $0x870] ss:$72 sps:$4 sm:$0xff]  }
  0x84   :  { %3782 = vmatprep.subr.bf16.mxu1 %v5800_v43  ;;  %v5881_v31 = vld [vmem:[#allocation6 + $0x1174] ss:$72 sps:$4 sm:$0xff]   ;;  %v5879_v33 = vld [vmem:[#allocation6 + $0x1170] ss:$72 sps:$4 sm:$0xff]   ;;  %v6880_v37 = vshrl.u32 %v152_v36, 7 }
  0x85   :  { %v5884_v34 = vld [vmem:[#allocation6 + $0xc] ss:$72 sps:$4 sm:$0xff]   ;;  %v150_v38 = vld [vmem:[#allocation4] sm:$0xf]  ;;  %v5939_v36 = vld [vmem:[#allocation6 + $0x520] ss:$72 sps:$4 sm:$0xff]  }
  0x86   :  { %3824 = vmatpush1.bf16.msra.mxu0 %v5801_v44  ;;  %v5887_v35 = vld [vmem:[#allocation6 + $0x14] ss:$72 sps:$4 sm:$0xff]   ;;  %v6883_v39 = vsub.s32 0, %v6880_v37  ;;  %v162_v40 = vsub.s32 2, %v6880_v37  ;;  %v6887_v41 = vsub.s32 1, %v6880_v37  ;;  %v166_v42 = vsub.s32 3, %v6880_v37 }
  0x87   :  { %3783 = vmatpush1.bf16.msra.mxu1 %v5798_v45  ;;  %3825 = vmatprep.subr.bf16.mxu0 %v5809_v46 }
  0x88   :  { %3784 = vmatprep.subr.bf16.mxu1 %v5806_v47  ;;  %v155_v43 = vrot.slane %v150_v38, %v6883_v39  ;;  %v163_v44 = vrot.slane %v150_v38, %v162_v40  ;;  %v159_v45 = vrot.slane %v150_v38, %v6887_v41  ;;  %v167_v46 = vrot.slane %v150_v38, %v166_v42  ;;  %v5944_v38 = vld [vmem:[#allocation6 + $0x5ac] ss:$72 sps:$4 sm:$0xff]   ;;  %v5942_v42 = vld [vmem:[#allocation6 + $0x5a8] ss:$72 sps:$4 sm:$0xff]  }
  0x89   :  { %v5947_v40 = vld [vmem:[#allocation6 + $0x5b4] ss:$72 sps:$4 sm:$0xff]  }
  0x8a   :  { %3826 = vmatpush1.bf16.msra.mxu0 %v5807_v48 }
  0x8b   :  { %3785 = vmatpush1.bf16.msra.mxu1 %v5804_v49  ;;  %3827 = vmatprep.subr.bf16.mxu0 %v5815_v50 }
  0x8c   :  { %3786 = vmatprep.subr.bf16.mxu1 %v5812_v51 }
  0x8e   :  { %3828 = vmatpush1.bf16.msra.mxu0 %v5813_v52 }
  0x8f   :  { %3787 = vmatpush1.bf16.msra.mxu1 %v5810_v53  ;;  %3829 = vmatprep.subr.bf16.mxu0 %v5821_v54 }
  0x90   :  { %3788 = vmatprep.subr.bf16.mxu1 %v5818_v55 }
  0x92   :  { %3830 = vmatpush1.bf16.msra.mxu0 %v5819_v56 }
  0x93   :  { %3789 = vmatpush1.bf16.msra.mxu1 %v5816_v57  ;;  %3831 = vmatprep.subr.bf16.mxu0 %v5827_v58  ;;  %v5882_v58 = vld [vmem:[#allocation6 + $0x8] ss:$72 sps:$4 sm:$0xff]  }
  0x94   :  { %3790 = vmatprep.subr.bf16.mxu1 %v5824_v59 }
  0x96   :  { %3832 = vmatpush1.bf16.msra.mxu0 %v5825_v60  ;;  %v5885_v60 = vld [vmem:[#allocation6 + $0x10] ss:$72 sps:$4 sm:$0xff]  }
  0x97   :  { %3791 = vmatpush1.bf16.msra.mxu1 %v5822_v61  ;;  %3833 = vmatprep.subr.bf16.mxu0 %v5833_v62 }
  0x98   :  { %3792 = vmatprep.subr.bf16.mxu1 %v5830_v63  ;;  %v5890_v63 = vld [vmem:[#allocation6 + $0x9c] ss:$72 sps:$4 sm:$0xff]  }
  0x9a   :  { %3834 = vmatpush1.bf16.msra.mxu0 %v5831_v0 }
  0x9b   :  { %3793 = vmatpush1.bf16.msra.mxu1 %v5828_v1  ;;  %3835 = vmatprep.subr.bf16.mxu0 %v5839_v2  ;;  %v5888_v2 = vld [vmem:[#allocation6 + $0x98] ss:$72 sps:$4 sm:$0xff]  }
  0x9c   :  { %3794 = vmatprep.subr.bf16.mxu1 %v5836_v3  ;;  %v5893_v3 = vld [vmem:[#allocation6 + $0xa4] ss:$72 sps:$4 sm:$0xff]  }
  0x9e   :  { %3836 = vmatpush1.bf16.msra.mxu0 %v5837_v4  ;;  %v5891_v4 = vld [vmem:[#allocation6 + $0xa0] ss:$72 sps:$4 sm:$0xff]  }
  0x9f   :  { %3795 = vmatpush1.bf16.msra.mxu1 %v5834_v5  ;;  %3837 = vmatprep.subr.bf16.mxu0 %v5845_v6  ;;  %v5896_v5 = vld [vmem:[#allocation6 + $0x12c] ss:$72 sps:$4 sm:$0xff]  }
  0xa0   :  { %3796 = vmatprep.subr.bf16.mxu1 %v5842_v7  ;;  %v5899_v6 = vld [vmem:[#allocation6 + $0x134] ss:$72 sps:$4 sm:$0xff]   ;;  %v5894_v7 = vld [vmem:[#allocation6 + $0x128] ss:$72 sps:$4 sm:$0xff]  }
  0xa2   :  { %3838 = vmatpush1.bf16.msra.mxu0 %v5843_v8  ;;  %v5897_v8 = vld [vmem:[#allocation6 + $0x130] ss:$72 sps:$4 sm:$0xff]  }
  0xa3   :  { %3797 = vmatpush1.bf16.msra.mxu1 %v5840_v9  ;;  %3839 = vmatprep.subr.bf16.mxu0 %v5851_v10  ;;  %v5902_v9 = vld [vmem:[#allocation6 + $0x1bc] ss:$72 sps:$4 sm:$0xff]   ;;  %v5900_v10 = vld [vmem:[#allocation6 + $0x1b8] ss:$72 sps:$4 sm:$0xff]  }
  0xa4   :  { %3798 = vmatprep.subr.bf16.mxu1 %v5848_v11  ;;  %v5905_v11 = vld [vmem:[#allocation6 + $0x1c4] ss:$72 sps:$4 sm:$0xff]  }
  0xa6   :  { %3840 = vmatpush1.bf16.msra.mxu0 %v5849_v12  ;;  %v5903_v12 = vld [vmem:[#allocation6 + $0x1c0] ss:$72 sps:$4 sm:$0xff]  }
  0xa7   :  { %3799 = vmatpush1.bf16.msra.mxu1 %v5846_v13  ;;  %3841 = vmatprep.subr.bf16.mxu0 %v5857_v14  ;;  %v5908_v13 = vld [vmem:[#allocation6 + $0x24c] ss:$72 sps:$4 sm:$0xff]   ;;  %v5906_v14 = vld [vmem:[#allocation6 + $0x248] ss:$72 sps:$4 sm:$0xff]  }
  0xa8   :  { %3800 = vmatprep.subr.bf16.mxu1 %v5854_v15  ;;  %v5911_v15 = vld [vmem:[#allocation6 + $0x254] ss:$72 sps:$4 sm:$0xff]  }
  0xaa   :  { %3842 = vmatpush1.bf16.msra.mxu0 %v5855_v16  ;;  %v5909_v16 = vld [vmem:[#allocation6 + $0x250] ss:$72 sps:$4 sm:$0xff]  }
  0xab   :  { %3801 = vmatpush1.bf16.msra.mxu1 %v5852_v17  ;;  %3843 = vmatprep.subr.bf16.mxu0 %v5863_v18  ;;  %v5914_v17 = vld [vmem:[#allocation6 + $0x2dc] ss:$72 sps:$4 sm:$0xff]   ;;  %v5912_v18 = vld [vmem:[#allocation6 + $0x2d8] ss:$72 sps:$4 sm:$0xff]  }
  0xac   :  { %3802 = vmatprep.subr.bf16.mxu1 %v5860_v19  ;;  %v5917_v19 = vld [vmem:[#allocation6 + $0x2e4] ss:$72 sps:$4 sm:$0xff]  }
  0xae   :  { %3844 = vmatpush1.bf16.msra.mxu0 %v5861_v20  ;;  %v5915_v20 = vld [vmem:[#allocation6 + $0x2e0] ss:$72 sps:$4 sm:$0xff]  }
  0xaf   :  { %3803 = vmatpush1.bf16.msra.mxu1 %v5858_v21  ;;  %3845 = vmatprep.subr.bf16.mxu0 %v5869_v22  ;;  %v5920_v21 = vld [vmem:[#allocation6 + $0x36c] ss:$72 sps:$4 sm:$0xff]   ;;  %v5918_v22 = vld [vmem:[#allocation6 + $0x368] ss:$72 sps:$4 sm:$0xff]  }
  0xb0   :  { %3804 = vmatprep.subr.bf16.mxu1 %v5866_v23  ;;  %v5923_v23 = vld [vmem:[#allocation6 + $0x374] ss:$72 sps:$4 sm:$0xff]  }
  0xb2   :  { %3846 = vmatpush1.bf16.msra.mxu0 %v5867_v24  ;;  %v5921_v24 = vld [vmem:[#allocation6 + $0x370] ss:$72 sps:$4 sm:$0xff]  }
  0xb3   :  { %3805 = vmatpush1.bf16.msra.mxu1 %v5864_v25  ;;  %3847 = vmatprep.subr.bf16.mxu0 %v5875_v27  ;;  %v5926_v25 = vld [vmem:[#allocation6 + $0x3fc] ss:$72 sps:$4 sm:$0xff]  }
  0xb4   :  { %3806 = vmatprep.subr.bf16.mxu1 %v5872_v26  ;;  %v5924_v26 = vld [vmem:[#allocation6 + $0x3f8] ss:$72 sps:$4 sm:$0xff]   ;;  %v5929_v27 = vld [vmem:[#allocation6 + $0x404] ss:$72 sps:$4 sm:$0xff]  }
  0xb6   :  { %3848 = vmatpush1.bf16.msra.mxu0 %v5873_v29  ;;  %v5932_v29 = vld [vmem:[#allocation6 + $0x48c] ss:$72 sps:$4 sm:$0xff]  }
  0xb7   :  { %3807 = vmatpush1.bf16.msra.mxu1 %v5870_v28  ;;  %3849 = vmatprep.subr.bf16.mxu0 %v5881_v31  ;;  %v5927_v28 = vld [vmem:[#allocation6 + $0x400] ss:$72 sps:$4 sm:$0xff]   ;;  %v5935_v31 = vld [vmem:[#allocation6 + $0x494] ss:$72 sps:$4 sm:$0xff]  }
  0xb8   :  { %3808 = vmatprep.subr.bf16.mxu1 %v5878_v30  ;;  %v5930_v30 = vld [vmem:[#allocation6 + $0x488] ss:$72 sps:$4 sm:$0xff]  }
  0xba   :  { %3850 = vmatpush1.bf16.msra.mxu0 %v5879_v33  ;;  %v5938_v33 = vld [vmem:[#allocation6 + $0x51c] ss:$72 sps:$4 sm:$0xff]  }
  0xbb   :  { %3809 = vmatpush1.bf16.msra.mxu1 %v5876_v32  ;;  %3942 = vmatprep.subr.bf16.mxu0 %v5887_v35  ;;  %v5933_v32 = vld [vmem:[#allocation6 + $0x490] ss:$72 sps:$4 sm:$0xff]   ;;  %v5941_v35 = vld [vmem:[#allocation6 + $0x524] ss:$72 sps:$4 sm:$0xff]  }
  0xbc   :  { %3860 = vmatprep.subr.bf16.mxu1 %v5884_v34  ;;  %v5936_v34 = vld [vmem:[#allocation6 + $0x518] ss:$72 sps:$4 sm:$0xff]  }
 0x150   :  { %v238_v47 = vpop.f32.mrb[0].mxu0 }
 0x151   :  { %v239_v48 = vadd.f32 %v238_v47, %v155_v43  ;;  %v309_v49 = vpop.f32.mrb[0].mxu1  ;;  %v240_v50 = vpop.f32.mrb[1].mxu0  ;;  %v5945_v43 = vld [vmem:[#allocation6 + $0x5b0] ss:$72 sps:$4 sm:$0xff]   ;;  %v5951_v47 = vld [vmem:[#allocation6 + $0x640] ss:$72 sps:$4 sm:$0xff]  }
 0x152   :  { %v310_v51 = vadd.f32 %v309_v49, %v163_v44  ;;  %v241_v52 = vadd.f32 %v240_v50, %v159_v45  ;;  %v311_v53 = vpop.f32.mrb[1].mxu1  ;;  %v5950_v44 = vld [vmem:[#allocation6 + $0x63c] ss:$72 sps:$4 sm:$0xff]   ;;  %v5954_v50 = vld [vmem:[#allocation6 + $0x6c8] ss:$72 sps:$4 sm:$0xff]  }
 0x153   :  { %v314_v54 = vmax.f32 %v239_v48, 0.0  ;;  %v312_v55 = vadd.f32 %v311_v53, %v167_v46  ;;  %v5953_v45 = vld [vmem:[#allocation6 + $0x644] ss:$72 sps:$4 sm:$0xff]   ;;  %v5948_v46 = vld [vmem:[#allocation6 + $0x638] ss:$72 sps:$4 sm:$0xff]  }
 0x154   :  { %v316_v56 = vmax.f32 %v310_v51, 0.0  ;;  %v315_v57 = vmax.f32 %v241_v52, 0.0  ;;  %v5956_v48 = vld [vmem:[#allocation6 + $0x6cc] ss:$72 sps:$4 sm:$0xff]   ;;  %v5957_v51 = vld [vmem:[#allocation6 + $0x6d0] ss:$72 sps:$4 sm:$0xff]  }
 0x155   :  { %v317_v59 = vmax.f32 %v312_v55, 0.0  ;;  %v6896_v0 = vpack.c.bf16 %v314_v54, %v314_v54  ;;  %v5959_v49 = vld [vmem:[#allocation6 + $0x6d4] ss:$72 sps:$4 sm:$0xff]   ;;  %v5965_v53 = vld [vmem:[#allocation6 + $0x764] ss:$72 sps:$4 sm:$0xff]  }
 0x156   :  { %v6892_v61 = vpack.c.bf16 %v316_v56, %v316_v56  ;;  %v6894_v62 = vpack.c.bf16 %v315_v57, %v315_v57  ;;  %v5962_v52 = vld [vmem:[#allocation6 + $0x75c] ss:$72 sps:$4 sm:$0xff]   ;;  %v5960_v54 = vld [vmem:[#allocation6 + $0x758] ss:$72 sps:$4 sm:$0xff]   ;;  %v5968_v56 = vld [vmem:[#allocation6 + $0x7ec] ss:$72 sps:$4 sm:$0xff]  }
 0x157   :  { %v6898_v1 = vpack.c.bf16 %v317_v59, %v317_v59  ;;  %v5963_v55 = vld [vmem:[#allocation6 + $0x760] ss:$72 sps:$4 sm:$0xff]   ;;  %v5971_v57 = vld [vmem:[#allocation6 + $0x7f4] ss:$72 sps:$4 sm:$0xff]   ;;  %v5969_v59 = vld [vmem:[#allocation6 + $0x7f0] ss:$72 sps:$4 sm:$0xff]  }
 0x158   :  { %3810 = vmatprep.mubr.bf16.mxu1 %v6894_v62 }
 0x159   :  { %3851 = vmatprep.mubr.bf16.mxu0 %v6898_v1  ;;  %3811 = vmatmul.mubr.bf16.vlgmr.msra.gmra.mrb[4].mxu1 %v6896_v0 }
 0x15a   :  { %3852 = vmatmul.mubr.bf16.vlgmr.msra.gmra.mrb[4].mxu0 %v6892_v61  ;;  %3861 = vmatpush1.bf16.msra.mxu1 %v5882_v58  ;;  %v5966_v58 = vld [vmem:[#allocation6 + $0x7e8] ss:$72 sps:$4 sm:$0xff]  }
 0x15b   :  { %3943 = vmatpush1.bf16.msra.mxu0 %v5885_v60  ;;  %3892 = vmatprep.mubr.bf16.mxu1 %v6894_v62  ;;  %v5974_v60 = vld [vmem:[#allocation6 + $0x87c] ss:$72 sps:$4 sm:$0xff]  }
 0x15c   :  { %3974 = vmatprep.mubr.bf16.mxu0 %v6894_v62  ;;  %3862 = vmatprep.subr.bf16.mxu1 %v5890_v63  ;;  %v5977_v63 = vld [vmem:[#allocation6 + $0x884] ss:$72 sps:$4 sm:$0xff]  }
 0x15d   :  { %3944 = vmatprep.subr.bf16.mxu0 %v5893_v3  ;;  %v5975_v3 = vld [vmem:[#allocation6 + $0x880] ss:$72 sps:$4 sm:$0xff]  }
 0x15e   :  { %3863 = vmatpush1.bf16.msra.mxu1 %v5888_v2  ;;  %v5972_v2 = vld [vmem:[#allocation6 + $0x878] ss:$72 sps:$4 sm:$0xff]  }
 0x15f   :  { %3945 = vmatpush1.bf16.msra.mxu0 %v5891_v4  ;;  %3864 = vmatprep.subr.bf16.mxu1 %v5896_v5  ;;  %v5980_v4 = vld [vmem:[#allocation6 + $0x90c] ss:$72 sps:$4 sm:$0xff]  }
 0x160   :  { %3946 = vmatprep.subr.bf16.mxu0 %v5899_v6  ;;  %v5983_v5 = vld [vmem:[#allocation6 + $0x914] ss:$72 sps:$4 sm:$0xff]   ;;  %v5978_v6 = vld [vmem:[#allocation6 + $0x908] ss:$72 sps:$4 sm:$0xff]  }
 0x162   :  { %3865 = vmatpush1.bf16.msra.mxu1 %v5894_v7  ;;  %v5981_v7 = vld [vmem:[#allocation6 + $0x910] ss:$72 sps:$4 sm:$0xff]  }
 0x163   :  { %3947 = vmatpush1.bf16.msra.mxu0 %v5897_v8  ;;  %3866 = vmatprep.subr.bf16.mxu1 %v5902_v9  ;;  %v5986_v8 = vld [vmem:[#allocation6 + $0x99c] ss:$72 sps:$4 sm:$0xff]  }
 0x164   :  { %3948 = vmatprep.subr.bf16.mxu0 %v5905_v11  ;;  %v5989_v9 = vld [vmem:[#allocation6 + $0x9a4] ss:$72 sps:$4 sm:$0xff]   ;;  %v5987_v11 = vld [vmem:[#allocation6 + $0x9a0] ss:$72 sps:$4 sm:$0xff]  }
 0x166   :  { %3867 = vmatpush1.bf16.msra.mxu1 %v5900_v10  ;;  %v5984_v10 = vld [vmem:[#allocation6 + $0x998] ss:$72 sps:$4 sm:$0xff]  }
 0x167   :  { %3949 = vmatpush1.bf16.msra.mxu0 %v5903_v12  ;;  %3868 = vmatprep.subr.bf16.mxu1 %v5908_v13  ;;  %v5992_v12 = vld [vmem:[#allocation6 + $0xa2c] ss:$72 sps:$4 sm:$0xff]  }
 0x168   :  { %3950 = vmatprep.subr.bf16.mxu0 %v5911_v15  ;;  %v5995_v13 = vld [vmem:[#allocation6 + $0xa34] ss:$72 sps:$4 sm:$0xff]   ;;  %v5993_v15 = vld [vmem:[#allocation6 + $0xa30] ss:$72 sps:$4 sm:$0xff]  }
 0x16a   :  { %3869 = vmatpush1.bf16.msra.mxu1 %v5906_v14  ;;  %v5990_v14 = vld [vmem:[#allocation6 + $0xa28] ss:$72 sps:$4 sm:$0xff]  }
 0x16b   :  { %3951 = vmatpush1.bf16.msra.mxu0 %v5909_v16  ;;  %3870 = vmatprep.subr.bf16.mxu1 %v5914_v17  ;;  %v5998_v16 = vld [vmem:[#allocation6 + $0xabc] ss:$72 sps:$4 sm:$0xff]  }
 0x16c   :  { %3952 = vmatprep.subr.bf16.mxu0 %v5917_v19  ;;  %v6001_v17 = vld [vmem:[#allocation6 + $0xac4] ss:$72 sps:$4 sm:$0xff]   ;;  %v5999_v19 = vld [vmem:[#allocation6 + $0xac0] ss:$72 sps:$4 sm:$0xff]  }
 0x16e   :  { %3871 = vmatpush1.bf16.msra.mxu1 %v5912_v18  ;;  %v5996_v18 = vld [vmem:[#allocation6 + $0xab8] ss:$72 sps:$4 sm:$0xff]  }
 0x16f   :  { %3953 = vmatpush1.bf16.msra.mxu0 %v5915_v20  ;;  %3872 = vmatprep.subr.bf16.mxu1 %v5920_v21  ;;  %v6004_v20 = vld [vmem:[#allocation6 + $0xb4c] ss:$72 sps:$4 sm:$0xff]  }
 0x170   :  { %3954 = vmatprep.subr.bf16.mxu0 %v5923_v23  ;;  %v6007_v21 = vld [vmem:[#allocation6 + $0xb54] ss:$72 sps:$4 sm:$0xff]   ;;  %v6005_v23 = vld [vmem:[#allocation6 + $0xb50] ss:$72 sps:$4 sm:$0xff]  }
 0x172   :  { %3873 = vmatpush1.bf16.msra.mxu1 %v5918_v22  ;;  %v6002_v22 = vld [vmem:[#allocation6 + $0xb48] ss:$72 sps:$4 sm:$0xff]  }
 0x173   :  { %3955 = vmatpush1.bf16.msra.mxu0 %v5921_v24  ;;  %3874 = vmatprep.subr.bf16.mxu1 %v5926_v25  ;;  %v6010_v24 = vld [vmem:[#allocation6 + $0xbdc] ss:$72 sps:$4 sm:$0xff]  }
 0x174   :  { %3956 = vmatprep.subr.bf16.mxu0 %v5929_v27  ;;  %v6013_v25 = vld [vmem:[#allocation6 + $0xbe4] ss:$72 sps:$4 sm:$0xff]   ;;  %v6011_v27 = vld [vmem:[#allocation6 + $0xbe0] ss:$72 sps:$4 sm:$0xff]  }
 0x176   :  { %3875 = vmatpush1.bf16.msra.mxu1 %v5924_v26  ;;  %v6008_v26 = vld [vmem:[#allocation6 + $0xbd8] ss:$72 sps:$4 sm:$0xff]  }
 0x177   :  { %3957 = vmatpush1.bf16.msra.mxu0 %v5927_v28  ;;  %3876 = vmatprep.subr.bf16.mxu1 %v5932_v29  ;;  %v6016_v28 = vld [vmem:[#allocation6 + $0xc6c] ss:$72 sps:$4 sm:$0xff]  }
 0x178   :  { %3958 = vmatprep.subr.bf16.mxu0 %v5935_v31  ;;  %v6019_v29 = vld [vmem:[#allocation6 + $0xc74] ss:$72 sps:$4 sm:$0xff]   ;;  %v6017_v31 = vld [vmem:[#allocation6 + $0xc70] ss:$72 sps:$4 sm:$0xff]  }
 0x17a   :  { %3877 = vmatpush1.bf16.msra.mxu1 %v5930_v30  ;;  %v6014_v30 = vld [vmem:[#allocation6 + $0xc68] ss:$72 sps:$4 sm:$0xff]  }
 0x17b   :  { %3959 = vmatpush1.bf16.msra.mxu0 %v5933_v32  ;;  %3878 = vmatprep.subr.bf16.mxu1 %v5938_v33  ;;  %v6022_v32 = vld [vmem:[#allocation6 + $0xcfc] ss:$72 sps:$4 sm:$0xff]  }
 0x17c   :  { %3960 = vmatprep.subr.bf16.mxu0 %v5941_v35  ;;  %v6025_v33 = vld [vmem:[#allocation6 + $0xd04] ss:$72 sps:$4 sm:$0xff]   ;;  %v6023_v35 = vld [vmem:[#allocation6 + $0xd00] ss:$72 sps:$4 sm:$0xff]  }
 0x17e   :  { %3879 = vmatpush1.bf16.msra.mxu1 %v5936_v34  ;;  %v6020_v34 = vld [vmem:[#allocation6 + $0xcf8] ss:$72 sps:$4 sm:$0xff]  }
 0x17f   :  { %3961 = vmatpush1.bf16.msra.mxu0 %v5939_v36  ;;  %3880 = vmatprep.subr.bf16.mxu1 %v5944_v38  ;;  %v6028_v36 = vld [vmem:[#allocation6 + $0xd8c] ss:$72 sps:$4 sm:$0xff]  }
 0x180   :  { %3962 = vmatprep.subr.bf16.mxu0 %v5947_v40  ;;  %v6031_v38 = vld [vmem:[#allocation6 + $0xd94] ss:$72 sps:$4 sm:$0xff]   ;;  %v6026_v40 = vld [vmem:[#allocation6 + $0xd88] ss:$72 sps:$4 sm:$0xff]  }
 0x182   :  { %3881 = vmatpush1.bf16.msra.mxu1 %v5942_v42  ;;  %v6029_v42 = vld [vmem:[#allocation6 + $0xd90] ss:$72 sps:$4 sm:$0xff]  }
 0x183   :  { %3963 = vmatpush1.bf16.msra.mxu0 %v5945_v43  ;;  %3882 = vmatprep.subr.bf16.mxu1 %v5950_v44  ;;  %v6034_v43 = vld [vmem:[#allocation6 + $0xe1c] ss:$72 sps:$4 sm:$0xff]  }
 0x184   :  { %3964 = vmatprep.subr.bf16.mxu0 %v5953_v45  ;;  %v6037_v44 = vld [vmem:[#allocation6 + $0xe24] ss:$72 sps:$4 sm:$0xff]   ;;  %v6032_v45 = vld [vmem:[#allocation6 + $0xe18] ss:$72 sps:$4 sm:$0xff]  }
 0x186   :  { %3883 = vmatpush1.bf16.msra.mxu1 %v5948_v46  ;;  %v6035_v46 = vld [vmem:[#allocation6 + $0xe20] ss:$72 sps:$4 sm:$0xff]  }
 0x187   :  { %3965 = vmatpush1.bf16.msra.mxu0 %v5951_v47  ;;  %3884 = vmatprep.subr.bf16.mxu1 %v5956_v48  ;;  %v6040_v47 = vld [vmem:[#allocation6 + $0xeac] ss:$72 sps:$4 sm:$0xff]  }
 0x188   :  { %3966 = vmatprep.subr.bf16.mxu0 %v5959_v49  ;;  %v6043_v48 = vld [vmem:[#allocation6 + $0xeb4] ss:$72 sps:$4 sm:$0xff]   ;;  %v6038_v49 = vld [vmem:[#allocation6 + $0xea8] ss:$72 sps:$4 sm:$0xff]  }
 0x18a   :  { %3885 = vmatpush1.bf16.msra.mxu1 %v5954_v50  ;;  %v6041_v50 = vld [vmem:[#allocation6 + $0xeb0] ss:$72 sps:$4 sm:$0xff]  }
 0x18b   :  { %3967 = vmatpush1.bf16.msra.mxu0 %v5957_v51  ;;  %3886 = vmatprep.subr.bf16.mxu1 %v5962_v52  ;;  %v6046_v51 = vld [vmem:[#allocation6 + $0xf3c] ss:$72 sps:$4 sm:$0xff]  }
 0x18c   :  { %3968 = vmatprep.subr.bf16.mxu0 %v5965_v53  ;;  %v6049_v52 = vld [vmem:[#allocation6 + $0xf44] ss:$72 sps:$4 sm:$0xff]   ;;  %v6044_v53 = vld [vmem:[#allocation6 + $0xf38] ss:$72 sps:$4 sm:$0xff]  }
 0x18e   :  { %3887 = vmatpush1.bf16.msra.mxu1 %v5960_v54  ;;  %v6047_v54 = vld [vmem:[#allocation6 + $0xf40] ss:$72 sps:$4 sm:$0xff]  }
 0x18f   :  { %3969 = vmatpush1.bf16.msra.mxu0 %v5963_v55  ;;  %3888 = vmatprep.subr.bf16.mxu1 %v5968_v56  ;;  %v6052_v55 = vld [vmem:[#allocation6 + $0xfcc] ss:$72 sps:$4 sm:$0xff]  }
 0x190   :  { %3970 = vmatprep.subr.bf16.mxu0 %v5971_v57  ;;  %v6055_v56 = vld [vmem:[#allocation6 + $0xfd4] ss:$72 sps:$4 sm:$0xff]   ;;  %v6050_v57 = vld [vmem:[#allocation6 + $0xfc8] ss:$72 sps:$4 sm:$0xff]  }
 0x192   :  { %3889 = vmatpush1.bf16.msra.mxu1 %v5966_v58  ;;  %v6053_v58 = vld [vmem:[#allocation6 + $0xfd0] ss:$72 sps:$4 sm:$0xff]  }
 0x193   :  { %3971 = vmatpush1.bf16.msra.mxu0 %v5969_v59  ;;  %3890 = vmatprep.subr.bf16.mxu1 %v5974_v60  ;;  %v6058_v59 = vld [vmem:[#allocation6 + $0x105c] ss:$72 sps:$4 sm:$0xff]  }
 0x194   :  { %3972 = vmatprep.subr.bf16.mxu0 %v5977_v63  ;;  %v6061_v60 = vld [vmem:[#allocation6 + $0x1064] ss:$72 sps:$4 sm:$0xff]   ;;  %v6056_v63 = vld [vmem:[#allocation6 + $0x1058] ss:$72 sps:$4 sm:$0xff]  }
 0x196   :  { %3891 = vmatpush1.bf16.msra.mxu1 %v5972_v2  ;;  %v6059_v2 = vld [vmem:[#allocation6 + $0x1060] ss:$72 sps:$4 sm:$0xff]  }
 0x197   :  { %3973 = vmatpush1.bf16.msra.mxu0 %v5975_v3  ;;  %3901 = vmatprep.subr.bf16.mxu1 %v5980_v4  ;;  %v6064_v3 = vld [vmem:[#allocation6 + $0x10ec] ss:$72 sps:$4 sm:$0xff]  }
 0x198   :  { %3983 = vmatprep.subr.bf16.mxu0 %v5983_v5  ;;  %v6067_v4 = vld [vmem:[#allocation6 + $0x10f4] ss:$72 sps:$4 sm:$0xff]   ;;  %v6062_v5 = vld [vmem:[#allocation6 + $0x10e8] ss:$72 sps:$4 sm:$0xff]  }
 0x199   :  { %3893 = vmatmul.mubr.bf16.vlgmr.msra.gmra.mrb[8].mxu1 %v6896_v0 }
 0x19a   :  { %3975 = vmatmul.mubr.bf16.vlgmr.msra.gmra.mrb[8].mxu0 %v6896_v0  ;;  %3902 = vmatpush1.bf16.msra.mxu1 %v5978_v6  ;;  %v6065_v6 = vld [vmem:[#allocation6 + $0x10f0] ss:$72 sps:$4 sm:$0xff]  }
 0x19b   :  { %3933 = vmatprep.mubr.bf16.mxu1 %v6898_v1  ;;  %3984 = vmatpush1.bf16.msra.mxu0 %v5981_v7  ;;  %v6070_v7 = vld [vmem:[#allocation6 + $0x117c] ss:$72 sps:$4 sm:$0xff]  }
 0x19c   :  { %4015 = vmatprep.mubr.bf16.mxu0 %v6898_v1  ;;  %3903 = vmatprep.subr.bf16.mxu1 %v5986_v8  ;;  %v6073_v8 = vld [vmem:[#allocation6 + $0x1184] ss:$72 sps:$4 sm:$0xff]  }
 0x19d   :  { %3985 = vmatprep.subr.bf16.mxu0 %v5989_v9  ;;  %v6068_v9 = vld [vmem:[#allocation6 + $0x1178] ss:$72 sps:$4 sm:$0xff]  }
 0x19e   :  { %3904 = vmatpush1.bf16.msra.mxu1 %v5984_v10  ;;  %v6071_v10 = vld [vmem:[#allocation6 + $0x1180] ss:$72 sps:$4 sm:$0xff]  }
 0x19f   :  { %3986 = vmatpush1.bf16.msra.mxu0 %v5987_v11  ;;  %3905 = vmatprep.subr.bf16.mxu1 %v5992_v12  ;;  %v6076_v11 = vld [vmem:[#allocation6 + $0x1c] ss:$72 sps:$4 sm:$0xff]  }
 0x1a0   :  { %3987 = vmatprep.subr.bf16.mxu0 %v5995_v13  ;;  %v6079_v12 = vld [vmem:[#allocation6 + $0x24] ss:$72 sps:$4 sm:$0xff]   ;;  %v6074_v13 = vld [vmem:[#allocation6 + $0x18] ss:$72 sps:$4 sm:$0xff]  }
 0x1a2   :  { %3906 = vmatpush1.bf16.msra.mxu1 %v5990_v14  ;;  %v6077_v14 = vld [vmem:[#allocation6 + $0x20] ss:$72 sps:$4 sm:$0xff]  }
 0x1a3   :  { %3988 = vmatpush1.bf16.msra.mxu0 %v5993_v15  ;;  %3907 = vmatprep.subr.bf16.mxu1 %v5998_v16  ;;  %v6082_v15 = vld [vmem:[#allocation6 + $0xac] ss:$72 sps:$4 sm:$0xff]  }
 0x1a4   :  { %3989 = vmatprep.subr.bf16.mxu0 %v6001_v17  ;;  %v6085_v16 = vld [vmem:[#allocation6 + $0xb4] ss:$72 sps:$4 sm:$0xff]   ;;  %v6080_v17 = vld [vmem:[#allocation6 + $0xa8] ss:$72 sps:$4 sm:$0xff]  }
 0x1a6   :  { %3908 = vmatpush1.bf16.msra.mxu1 %v5996_v18  ;;  %v6083_v18 = vld [vmem:[#allocation6 + $0xb0] ss:$72 sps:$4 sm:$0xff]  }
 0x1a7   :  { %3990 = vmatpush1.bf16.msra.mxu0 %v5999_v19  ;;  %3909 = vmatprep.subr.bf16.mxu1 %v6004_v20  ;;  %v6088_v19 = vld [vmem:[#allocation6 + $0x13c] ss:$72 sps:$4 sm:$0xff]  }
 0x1a8   :  { %3991 = vmatprep.subr.bf16.mxu0 %v6007_v21  ;;  %v6091_v20 = vld [vmem:[#allocation6 + $0x144] ss:$72 sps:$4 sm:$0xff]   ;;  %v6086_v21 = vld [vmem:[#allocation6 + $0x138] ss:$72 sps:$4 sm:$0xff]  }
 0x1aa   :  { %3910 = vmatpush1.bf16.msra.mxu1 %v6002_v22  ;;  %v6089_v22 = vld [vmem:[#allocation6 + $0x140] ss:$72 sps:$4 sm:$0xff]  }
 0x1ab   :  { %3992 = vmatpush1.bf16.msra.mxu0 %v6005_v23  ;;  %3911 = vmatprep.subr.bf16.mxu1 %v6010_v24  ;;  %v6094_v23 = vld [vmem:[#allocation6 + $0x1cc] ss:$72 sps:$4 sm:$0xff]  }
 0x1ac   :  { %3993 = vmatprep.subr.bf16.mxu0 %v6013_v25  ;;  %v6097_v24 = vld [vmem:[#allocation6 + $0x1d4] ss:$72 sps:$4 sm:$0xff]   ;;  %v6092_v25 = vld [vmem:[#allocation6 + $0x1c8] ss:$72 sps:$4 sm:$0xff]  }
 0x1ae   :  { %3912 = vmatpush1.bf16.msra.mxu1 %v6008_v26  ;;  %v6095_v26 = vld [vmem:[#allocation6 + $0x1d0] ss:$72 sps:$4 sm:$0xff]  }
 0x1af   :  { %3994 = vmatpush1.bf16.msra.mxu0 %v6011_v27  ;;  %3913 = vmatprep.subr.bf16.mxu1 %v6016_v28  ;;  %v6100_v27 = vld [vmem:[#allocation6 + $0x25c] ss:$72 sps:$4 sm:$0xff]  }
 0x1b0   :  { %3995 = vmatprep.subr.bf16.mxu0 %v6019_v29  ;;  %v6103_v28 = vld [vmem:[#allocation6 + $0x264] ss:$72 sps:$4 sm:$0xff]   ;;  %v6098_v29 = vld [vmem:[#allocation6 + $0x258] ss:$72 sps:$4 sm:$0xff]  }
 0x1b2   :  { %3914 = vmatpush1.bf16.msra.mxu1 %v6014_v30  ;;  %v6101_v30 = vld [vmem:[#allocation6 + $0x260] ss:$72 sps:$4 sm:$0xff]  }
 0x1b3   :  { %3996 = vmatpush1.bf16.msra.mxu0 %v6017_v31  ;;  %3915 = vmatprep.subr.bf16.mxu1 %v6022_v32  ;;  %v6106_v31 = vld [vmem:[#allocation6 + $0x2ec] ss:$72 sps:$4 sm:$0xff]  }
 0x1b4   :  { %3997 = vmatprep.subr.bf16.mxu0 %v6025_v33  ;;  %v6109_v32 = vld [vmem:[#allocation6 + $0x2f4] ss:$72 sps:$4 sm:$0xff]   ;;  %v6104_v33 = vld [vmem:[#allocation6 + $0x2e8] ss:$72 sps:$4 sm:$0xff]  }
 0x1b6   :  { %3916 = vmatpush1.bf16.msra.mxu1 %v6020_v34  ;;  %v6107_v34 = vld [vmem:[#allocation6 + $0x2f0] ss:$72 sps:$4 sm:$0xff]  }
 0x1b7   :  { %3998 = vmatpush1.bf16.msra.mxu0 %v6023_v35  ;;  %3917 = vmatprep.subr.bf16.mxu1 %v6028_v36  ;;  %v6112_v35 = vld [vmem:[#allocation6 + $0x37c] ss:$72 sps:$4 sm:$0xff]  }
 0x1b8   :  { %3999 = vmatprep.subr.bf16.mxu0 %v6031_v38  ;;  %v6115_v36 = vld [vmem:[#allocation6 + $0x384] ss:$72 sps:$4 sm:$0xff]   ;;  %v6110_v38 = vld [vmem:[#allocation6 + $0x378] ss:$72 sps:$4 sm:$0xff]  }
 0x1ba   :  { %3918 = vmatpush1.bf16.msra.mxu1 %v6026_v40  ;;  %v6113_v40 = vld [vmem:[#allocation6 + $0x380] ss:$72 sps:$4 sm:$0xff]  }
 0x1bb   :  { %4000 = vmatpush1.bf16.msra.mxu0 %v6029_v42  ;;  %3919 = vmatprep.subr.bf16.mxu1 %v6034_v43  ;;  %v6118_v42 = vld [vmem:[#allocation6 + $0x40c] ss:$72 sps:$4 sm:$0xff]  }
 0x1bc   :  { %4001 = vmatprep.subr.bf16.mxu0 %v6037_v44  ;;  %v6121_v43 = vld [vmem:[#allocation6 + $0x414] ss:$72 sps:$4 sm:$0xff]   ;;  %v6116_v44 = vld [vmem:[#allocation6 + $0x408] ss:$72 sps:$4 sm:$0xff]  }
 0x1be   :  { %3920 = vmatpush1.bf16.msra.mxu1 %v6032_v45  ;;  %v6119_v45 = vld [vmem:[#allocation6 + $0x410] ss:$72 sps:$4 sm:$0xff]  }
 0x1bf   :  { %4002 = vmatpush1.bf16.msra.mxu0 %v6035_v46  ;;  %3921 = vmatprep.subr.bf16.mxu1 %v6040_v47  ;;  %v6124_v46 = vld [vmem:[#allocation6 + $0x49c] ss:$72 sps:$4 sm:$0xff]  }
 0x1c0   :  { %4003 = vmatprep.subr.bf16.mxu0 %v6043_v48  ;;  %v6127_v47 = vld [vmem:[#allocation6 + $0x4a4] ss:$72 sps:$4 sm:$0xff]   ;;  %v6122_v48 = vld [vmem:[#allocation6 + $0x498] ss:$72 sps:$4 sm:$0xff]  }
 0x1c2   :  { %3922 = vmatpush1.bf16.msra.mxu1 %v6038_v49  ;;  %v6125_v49 = vld [vmem:[#allocation6 + $0x4a0] ss:$72 sps:$4 sm:$0xff]  }
 0x1c3   :  { %4004 = vmatpush1.bf16.msra.mxu0 %v6041_v50  ;;  %3923 = vmatprep.subr.bf16.mxu1 %v6046_v51  ;;  %v6130_v50 = vld [vmem:[#allocation6 + $0x52c] ss:$72 sps:$4 sm:$0xff]  }
 0x1c4   :  { %4005 = vmatprep.subr.bf16.mxu0 %v6049_v52  ;;  %v6133_v51 = vld [vmem:[#allocation6 + $0x534] ss:$72 sps:$4 sm:$0xff]   ;;  %v6128_v52 = vld [vmem:[#allocation6 + $0x528] ss:$72 sps:$4 sm:$0xff]  }
 0x1c6   :  { %3924 = vmatpush1.bf16.msra.mxu1 %v6044_v53  ;;  %v6131_v53 = vld [vmem:[#allocation6 + $0x530] ss:$72 sps:$4 sm:$0xff]  }
 0x1c7   :  { %4006 = vmatpush1.bf16.msra.mxu0 %v6047_v54  ;;  %3925 = vmatprep.subr.bf16.mxu1 %v6052_v55  ;;  %v6136_v54 = vld [vmem:[#allocation6 + $0x5bc] ss:$72 sps:$4 sm:$0xff]  }
 0x1c8   :  { %4007 = vmatprep.subr.bf16.mxu0 %v6055_v56  ;;  %v6139_v55 = vld [vmem:[#allocation6 + $0x5c4] ss:$72 sps:$4 sm:$0xff]   ;;  %v6134_v56 = vld [vmem:[#allocation6 + $0x5b8] ss:$72 sps:$4 sm:$0xff]  }
 0x1ca   :  { %3926 = vmatpush1.bf16.msra.mxu1 %v6050_v57  ;;  %v6137_v57 = vld [vmem:[#allocation6 + $0x5c0] ss:$72 sps:$4 sm:$0xff]  }
 0x1cb   :  { %4008 = vmatpush1.bf16.msra.mxu0 %v6053_v58  ;;  %3927 = vmatprep.subr.bf16.mxu1 %v6058_v59  ;;  %v6142_v58 = vld [vmem:[#allocation6 + $0x64c] ss:$72 sps:$4 sm:$0xff]  }
 0x1cc   :  { %4009 = vmatprep.subr.bf16.mxu0 %v6061_v60  ;;  %v6145_v59 = vld [vmem:[#allocation6 + $0x654] ss:$72 sps:$4 sm:$0xff]   ;;  %v6140_v60 = vld [vmem:[#allocation6 + $0x648] ss:$72 sps:$4 sm:$0xff]  }
 0x1ce   :  { %3928 = vmatpush1.bf16.msra.mxu1 %v6056_v63  ;;  %v6143_v63 = vld [vmem:[#allocation6 + $0x650] ss:$72 sps:$4 sm:$0xff]  }
 0x1cf   :  { %4010 = vmatpush1.bf16.msra.mxu0 %v6059_v2  ;;  %3929 = vmatprep.subr.bf16.mxu1 %v6064_v3  ;;  %v6148_v2 = vld [vmem:[#allocation6 + $0x6dc] ss:$72 sps:$4 sm:$0xff]  }
 0x1d0   :  { %4011 = vmatprep.subr.bf16.mxu0 %v6067_v4  ;;  %v6151_v3 = vld [vmem:[#allocation6 + $0x6e4] ss:$72 sps:$4 sm:$0xff]   ;;  %v6146_v4 = vld [vmem:[#allocation6 + $0x6d8] ss:$72 sps:$4 sm:$0xff]  }
 0x1d2   :  { %3930 = vmatpush1.bf16.msra.mxu1 %v6062_v5  ;;  %v6149_v5 = vld [vmem:[#allocation6 + $0x6e0] ss:$72 sps:$4 sm:$0xff]  }
 0x1d3   :  { %4012 = vmatpush1.bf16.msra.mxu0 %v6065_v6  ;;  %3931 = vmatprep.subr.bf16.mxu1 %v6070_v7  ;;  %v6154_v6 = vld [vmem:[#allocation6 + $0x76c] ss:$72 sps:$4 sm:$0xff]  }
 0x1d4   :  { %4013 = vmatprep.subr.bf16.mxu0 %v6073_v8  ;;  %v6157_v7 = vld [vmem:[#allocation6 + $0x774] ss:$72 sps:$4 sm:$0xff]   ;;  %v6152_v8 = vld [vmem:[#allocation6 + $0x768] ss:$72 sps:$4 sm:$0xff]  }
 0x1d6   :  { %3932 = vmatpush1.bf16.msra.mxu1 %v6068_v9  ;;  %v6155_v9 = vld [vmem:[#allocation6 + $0x770] ss:$72 sps:$4 sm:$0xff]  }
 0x1d7   :  { %4014 = vmatpush1.bf16.msra.mxu0 %v6071_v10  ;;  %4024 = vmatprep.subr.bf16.mxu1 %v6076_v11  ;;  %v6160_v10 = vld [vmem:[#allocation6 + $0x7fc] ss:$72 sps:$4 sm:$0xff]  }
 0x1d8   :  { %4106 = vmatprep.subr.bf16.mxu0 %v6079_v12  ;;  %v6163_v11 = vld [vmem:[#allocation6 + $0x804] ss:$72 sps:$4 sm:$0xff]   ;;  %v6158_v12 = vld [vmem:[#allocation6 + $0x7f8] ss:$72 sps:$4 sm:$0xff]  }
 0x1d9   :  { %3934 = vmatmul.mubr.bf16.vlgmr.msra.gmra.mrb[8].mxu1 %v6892_v61 }
 0x1da   :  { %4016 = vmatmul.mubr.bf16.vlgmr.msra.gmra.mrb[8].mxu0 %v6892_v61  ;;  %4025 = vmatpush1.bf16.msra.mxu1 %v6074_v13  ;;  %v6161_v13 = vld [vmem:[#allocation6 + $0x800] ss:$72 sps:$4 sm:$0xff]  }
 0x1db   :  { %4056 = vmatprep.mubr.bf16.mxu1 %v6894_v62  ;;  %4107 = vmatpush1.bf16.msra.mxu0 %v6077_v14  ;;  %v6166_v14 = vld [vmem:[#allocation6 + $0x88c] ss:$72 sps:$4 sm:$0xff]  }
 0x1dc   :  { %4138 = vmatprep.mubr.bf16.mxu0 %v6894_v62  ;;  %4026 = vmatprep.subr.bf16.mxu1 %v6082_v15  ;;  %v6169_v15 = vld [vmem:[#allocation6 + $0x894] ss:$72 sps:$4 sm:$0xff]  }
 0x1dd   :  { %4108 = vmatprep.subr.bf16.mxu0 %v6085_v16  ;;  %v6164_v16 = vld [vmem:[#allocation6 + $0x888] ss:$72 sps:$4 sm:$0xff]  }
 0x1de   :  { %4027 = vmatpush1.bf16.msra.mxu1 %v6080_v17  ;;  %v6167_v17 = vld [vmem:[#allocation6 + $0x890] ss:$72 sps:$4 sm:$0xff]  }
 0x1df   :  { %4109 = vmatpush1.bf16.msra.mxu0 %v6083_v18  ;;  %4028 = vmatprep.subr.bf16.mxu1 %v6088_v19  ;;  %v6172_v18 = vld [vmem:[#allocation6 + $0x91c] ss:$72 sps:$4 sm:$0xff]  }
 0x1e0   :  { %4110 = vmatprep.subr.bf16.mxu0 %v6091_v20  ;;  %v6175_v19 = vld [vmem:[#allocation6 + $0x924] ss:$72 sps:$4 sm:$0xff]   ;;  %v6170_v20 = vld [vmem:[#allocation6 + $0x918] ss:$72 sps:$4 sm:$0xff]  }
 0x1e2   :  { %4029 = vmatpush1.bf16.msra.mxu1 %v6086_v21  ;;  %v6173_v21 = vld [vmem:[#allocation6 + $0x920] ss:$72 sps:$4 sm:$0xff]  }
 0x1e3   :  { %4111 = vmatpush1.bf16.msra.mxu0 %v6089_v22  ;;  %4030 = vmatprep.subr.bf16.mxu1 %v6094_v23  ;;  %v6178_v22 = vld [vmem:[#allocation6 + $0x9ac] ss:$72 sps:$4 sm:$0xff]  }
 0x1e4   :  { %4112 = vmatprep.subr.bf16.mxu0 %v6097_v24  ;;  %v6181_v23 = vld [vmem:[#allocation6 + $0x9b4] ss:$72 sps:$4 sm:$0xff]   ;;  %v6176_v24 = vld [vmem:[#allocation6 + $0x9a8] ss:$72 sps:$4 sm:$0xff]  }
 0x1e6   :  { %4031 = vmatpush1.bf16.msra.mxu1 %v6092_v25  ;;  %v6179_v25 = vld [vmem:[#allocation6 + $0x9b0] ss:$72 sps:$4 sm:$0xff]  }
 0x1e7   :  { %4113 = vmatpush1.bf16.msra.mxu0 %v6095_v26  ;;  %4032 = vmatprep.subr.bf16.mxu1 %v6100_v27  ;;  %v6184_v26 = vld [vmem:[#allocation6 + $0xa3c] ss:$72 sps:$4 sm:$0xff]  }
 0x1e8   :  { %4114 = vmatprep.subr.bf16.mxu0 %v6103_v28  ;;  %v6187_v27 = vld [vmem:[#allocation6 + $0xa44] ss:$72 sps:$4 sm:$0xff]   ;;  %v6182_v28 = vld [vmem:[#allocation6 + $0xa38] ss:$72 sps:$4 sm:$0xff]  }
 0x1ea   :  { %4033 = vmatpush1.bf16.msra.mxu1 %v6098_v29  ;;  %v6185_v29 = vld [vmem:[#allocation6 + $0xa40] ss:$72 sps:$4 sm:$0xff]  }
 0x1eb   :  { %4115 = vmatpush1.bf16.msra.mxu0 %v6101_v30  ;;  %4034 = vmatprep.subr.bf16.mxu1 %v6106_v31  ;;  %v6190_v30 = vld [vmem:[#allocation6 + $0xacc] ss:$72 sps:$4 sm:$0xff]  }
 0x1ec   :  { %4116 = vmatprep.subr.bf16.mxu0 %v6109_v32  ;;  %v6193_v31 = vld [vmem:[#allocation6 + $0xad4] ss:$72 sps:$4 sm:$0xff]   ;;  %v6188_v32 = vld [vmem:[#allocation6 + $0xac8] ss:$72 sps:$4 sm:$0xff]  }
 0x1ee   :  { %4035 = vmatpush1.bf16.msra.mxu1 %v6104_v33  ;;  %v6191_v33 = vld [vmem:[#allocation6 + $0xad0] ss:$72 sps:$4 sm:$0xff]  }
 0x1ef   :  { %4117 = vmatpush1.bf16.msra.mxu0 %v6107_v34  ;;  %4036 = vmatprep.subr.bf16.mxu1 %v6112_v35  ;;  %v6196_v34 = vld [vmem:[#allocation6 + $0xb5c] ss:$72 sps:$4 sm:$0xff]  }
 0x1f0   :  { %4118 = vmatprep.subr.bf16.mxu0 %v6115_v36  ;;  %v6199_v35 = vld [vmem:[#allocation6 + $0xb64] ss:$72 sps:$4 sm:$0xff]   ;;  %v6194_v36 = vld [vmem:[#allocation6 + $0xb58] ss:$72 sps:$4 sm:$0xff]  }
 0x1f2   :  { %4037 = vmatpush1.bf16.msra.mxu1 %v6110_v38  ;;  %v6197_v38 = vld [vmem:[#allocation6 + $0xb60] ss:$72 sps:$4 sm:$0xff]  }
 0x1f3   :  { %4119 = vmatpush1.bf16.msra.mxu0 %v6113_v40  ;;  %4038 = vmatprep.subr.bf16.mxu1 %v6118_v42  ;;  %v6202_v40 = vld [vmem:[#allocation6 + $0xbec] ss:$72 sps:$4 sm:$0xff]  }
 0x1f4   :  { %4120 = vmatprep.subr.bf16.mxu0 %v6121_v43  ;;  %v6205_v42 = vld [vmem:[#allocation6 + $0xbf4] ss:$72 sps:$4 sm:$0xff]   ;;  %v6200_v43 = vld [vmem:[#allocation6 + $0xbe8] ss:$72 sps:$4 sm:$0xff]  }
 0x1f6   :  { %4039 = vmatpush1.bf16.msra.mxu1 %v6116_v44  ;;  %v6203_v44 = vld [vmem:[#allocation6 + $0xbf0] ss:$72 sps:$4 sm:$0xff]  }
 0x1f7   :  { %4121 = vmatpush1.bf16.msra.mxu0 %v6119_v45  ;;  %4040 = vmatprep.subr.bf16.mxu1 %v6124_v46  ;;  %v6208_v45 = vld [vmem:[#allocation6 + $0xc7c] ss:$72 sps:$4 sm:$0xff]  }
 0x1f8   :  { %4122 = vmatprep.subr.bf16.mxu0 %v6127_v47  ;;  %v6211_v47 = vld [vmem:[#allocation6 + $0xc84] ss:$72 sps:$4 sm:$0xff]  }
 0x1fa   :  { %4041 = vmatpush1.bf16.msra.mxu1 %v6122_v48 }
 0x1fb   :  { %4123 = vmatpush1.bf16.msra.mxu0 %v6125_v49  ;;  %4042 = vmatprep.subr.bf16.mxu1 %v6130_v50 }
 0x1fc   :  { %4124 = vmatprep.subr.bf16.mxu0 %v6133_v51 }
 0x1fe   :  { %4043 = vmatpush1.bf16.msra.mxu1 %v6128_v52 }
 0x1ff   :  { %4125 = vmatpush1.bf16.msra.mxu0 %v6131_v53  ;;  %4044 = vmatprep.subr.bf16.mxu1 %v6136_v54  ;;  %v6206_v53 = vld [vmem:[#allocation6 + $0xc78] ss:$72 sps:$4 sm:$0xff]  }
 0x200   :  { %4126 = vmatprep.subr.bf16.mxu0 %v6139_v55 }
 0x202   :  { %4045 = vmatpush1.bf16.msra.mxu1 %v6134_v56 }
 0x203   :  { %4127 = vmatpush1.bf16.msra.mxu0 %v6137_v57  ;;  %4046 = vmatprep.subr.bf16.mxu1 %v6142_v58  ;;  %v6209_v57 = vld [vmem:[#allocation6 + $0xc80] ss:$72 sps:$4 sm:$0xff]   ;;  %v6214_v58 = vld [vmem:[#allocation6 + $0xd0c] ss:$72 sps:$4 sm:$0xff]  }
 0x204   :  { %4128 = vmatprep.subr.bf16.mxu0 %v6145_v59 }
 0x206   :  { %4047 = vmatpush1.bf16.msra.mxu1 %v6140_v60  ;;  %v6217_v60 = vld [vmem:[#allocation6 + $0xd14] ss:$72 sps:$4 sm:$0xff]  }
 0x207   :  { %4129 = vmatpush1.bf16.msra.mxu0 %v6143_v63  ;;  %4048 = vmatprep.subr.bf16.mxu1 %v6148_v2  ;;  %v6212_v63 = vld [vmem:[#allocation6 + $0xd08] ss:$72 sps:$4 sm:$0xff]  }
 0x208   :  { %4130 = vmatprep.subr.bf16.mxu0 %v6151_v3  ;;  %v6215_v2 = vld [vmem:[#allocation6 + $0xd10] ss:$72 sps:$4 sm:$0xff]   ;;  %v6220_v3 = vld [vmem:[#allocation6 + $0xd9c] ss:$72 sps:$4 sm:$0xff]  }
 0x20a   :  { %4049 = vmatpush1.bf16.msra.mxu1 %v6146_v4  ;;  %v6223_v4 = vld [vmem:[#allocation6 + $0xda4] ss:$72 sps:$4 sm:$0xff]  }
 0x20b   :  { %4131 = vmatpush1.bf16.msra.mxu0 %v6149_v5  ;;  %4050 = vmatprep.subr.bf16.mxu1 %v6154_v6  ;;  %v6218_v5 = vld [vmem:[#allocation6 + $0xd98] ss:$72 sps:$4 sm:$0xff]  }
 0x20c   :  { %4132 = vmatprep.subr.bf16.mxu0 %v6157_v7  ;;  %v6221_v6 = vld [vmem:[#allocation6 + $0xda0] ss:$72 sps:$4 sm:$0xff]   ;;  %v6226_v7 = vld [vmem:[#allocation6 + $0xe2c] ss:$72 sps:$4 sm:$0xff]  }
 0x20e   :  { %4051 = vmatpush1.bf16.msra.mxu1 %v6152_v8  ;;  %v6229_v8 = vld [vmem:[#allocation6 + $0xe34] ss:$72 sps:$4 sm:$0xff]  }
 0x20f   :  { %4133 = vmatpush1.bf16.msra.mxu0 %v6155_v9  ;;  %4052 = vmatprep.subr.bf16.mxu1 %v6160_v10  ;;  %v6224_v9 = vld [vmem:[#allocation6 + $0xe28] ss:$72 sps:$4 sm:$0xff]  }
 0x210   :  { %4134 = vmatprep.subr.bf16.mxu0 %v6163_v11  ;;  %v6227_v10 = vld [vmem:[#allocation6 + $0xe30] ss:$72 sps:$4 sm:$0xff]   ;;  %v6232_v11 = vld [vmem:[#allocation6 + $0xebc] ss:$72 sps:$4 sm:$0xff]  }
 0x212   :  { %4053 = vmatpush1.bf16.msra.mxu1 %v6158_v12  ;;  %v6235_v12 = vld [vmem:[#allocation6 + $0xec4] ss:$72 sps:$4 sm:$0xff]  }
 0x213   :  { %4135 = vmatpush1.bf16.msra.mxu0 %v6161_v13  ;;  %4054 = vmatprep.subr.bf16.mxu1 %v6166_v14  ;;  %v6230_v13 = vld [vmem:[#allocation6 + $0xeb8] ss:$72 sps:$4 sm:$0xff]  }
 0x214   :  { %4136 = vmatprep.subr.bf16.mxu0 %v6169_v15  ;;  %v6233_v14 = vld [vmem:[#allocation6 + $0xec0] ss:$72 sps:$4 sm:$0xff]   ;;  %v6238_v15 = vld [vmem:[#allocation6 + $0xf4c] ss:$72 sps:$4 sm:$0xff]  }
 0x216   :  { %4055 = vmatpush1.bf16.msra.mxu1 %v6164_v16  ;;  %v6241_v16 = vld [vmem:[#allocation6 + $0xf54] ss:$72 sps:$4 sm:$0xff]  }
 0x217   :  { %4137 = vmatpush1.bf16.msra.mxu0 %v6167_v17  ;;  %4065 = vmatprep.subr.bf16.mxu1 %v6172_v18  ;;  %v6236_v17 = vld [vmem:[#allocation6 + $0xf48] ss:$72 sps:$4 sm:$0xff]  }
 0x218   :  { %4147 = vmatprep.subr.bf16.mxu0 %v6175_v19  ;;  %v6239_v18 = vld [vmem:[#allocation6 + $0xf50] ss:$72 sps:$4 sm:$0xff]   ;;  %v6244_v19 = vld [vmem:[#allocation6 + $0xfdc] ss:$72 sps:$4 sm:$0xff]  }
 0x219   :  { %4057 = vmatmul.mubr.bf16.vlgmr.msra.gmra.mrb[12].mxu1 %v6896_v0 }
 0x21a   :  { %4139 = vmatmul.mubr.bf16.vlgmr.msra.gmra.mrb[12].mxu0 %v6896_v0  ;;  %4066 = vmatpush1.bf16.msra.mxu1 %v6170_v20  ;;  %v6247_v20 = vld [vmem:[#allocation6 + $0xfe4] ss:$72 sps:$4 sm:$0xff]  }
 0x21b   :  { %4097 = vmatprep.mubr.bf16.mxu1 %v6898_v1  ;;  %4148 = vmatpush1.bf16.msra.mxu0 %v6173_v21  ;;  %v6242_v21 = vld [vmem:[#allocation6 + $0xfd8] ss:$72 sps:$4 sm:$0xff]  }
 0x21c   :  { %4179 = vmatprep.mubr.bf16.mxu0 %v6898_v1  ;;  %4067 = vmatprep.subr.bf16.mxu1 %v6178_v22  ;;  %v6245_v22 = vld [vmem:[#allocation6 + $0xfe0] ss:$72 sps:$4 sm:$0xff]  }
 0x21d   :  { %4149 = vmatprep.subr.bf16.mxu0 %v6181_v23  ;;  %v6250_v23 = vld [vmem:[#allocation6 + $0x106c] ss:$72 sps:$4 sm:$0xff]  }
 0x21e   :  { %4068 = vmatpush1.bf16.msra.mxu1 %v6176_v24  ;;  %v6253_v24 = vld [vmem:[#allocation6 + $0x1074] ss:$72 sps:$4 sm:$0xff]  }
 0x21f   :  { %4150 = vmatpush1.bf16.msra.mxu0 %v6179_v25  ;;  %4069 = vmatprep.subr.bf16.mxu1 %v6184_v26  ;;  %v6248_v25 = vld [vmem:[#allocation6 + $0x1068] ss:$72 sps:$4 sm:$0xff]  }
 0x220   :  { %4151 = vmatprep.subr.bf16.mxu0 %v6187_v27  ;;  %v6251_v26 = vld [vmem:[#allocation6 + $0x1070] ss:$72 sps:$4 sm:$0xff]   ;;  %v6256_v27 = vld [vmem:[#allocation6 + $0x10fc] ss:$72 sps:$4 sm:$0xff]  }
 0x222   :  { %4070 = vmatpush1.bf16.msra.mxu1 %v6182_v28  ;;  %v6259_v28 = vld [vmem:[#allocation6 + $0x1104] ss:$72 sps:$4 sm:$0xff]  }
 0x223   :  { %4152 = vmatpush1.bf16.msra.mxu0 %v6185_v29  ;;  %4071 = vmatprep.subr.bf16.mxu1 %v6190_v30  ;;  %v6254_v29 = vld [vmem:[#allocation6 + $0x10f8] ss:$72 sps:$4 sm:$0xff]  }
 0x224   :  { %4153 = vmatprep.subr.bf16.mxu0 %v6193_v31  ;;  %v6257_v30 = vld [vmem:[#allocation6 + $0x1100] ss:$72 sps:$4 sm:$0xff]   ;;  %v6262_v31 = vld [vmem:[#allocation6 + $0x118c] ss:$72 sps:$4 sm:$0xff]  }
 0x226   :  { %4072 = vmatpush1.bf16.msra.mxu1 %v6188_v32  ;;  %v6265_v32 = vld [vmem:[#allocation6 + $0x1194] ss:$72 sps:$4 sm:$0xff]  }
 0x227   :  { %4154 = vmatpush1.bf16.msra.mxu0 %v6191_v33  ;;  %4073 = vmatprep.subr.bf16.mxu1 %v6196_v34  ;;  %v6260_v33 = vld [vmem:[#allocation6 + $0x1188] ss:$72 sps:$4 sm:$0xff]  }
 0x228   :  { %4155 = vmatprep.subr.bf16.mxu0 %v6199_v35  ;;  %v6263_v34 = vld [vmem:[#allocation6 + $0x1190] ss:$72 sps:$4 sm:$0xff]   ;;  %v6268_v35 = vld [vmem:[#allocation6 + $0x2c] ss:$72 sps:$4 sm:$0xff]  }
 0x22a   :  { %4074 = vmatpush1.bf16.msra.mxu1 %v6194_v36  ;;  %v6271_v36 = vld [vmem:[#allocation6 + $0x34] ss:$72 sps:$4 sm:$0xff]  }
 0x22b   :  { %4156 = vmatpush1.bf16.msra.mxu0 %v6197_v38  ;;  %4075 = vmatprep.subr.bf16.mxu1 %v6202_v40  ;;  %v6266_v38 = vld [vmem:[#allocation6 + $0x28] ss:$72 sps:$4 sm:$0xff]  }
 0x22c   :  { %v3812_v46 = vpop.f32.mrb[4].mxu1  ;;  %4157 = vmatprep.subr.bf16.mxu0 %v6205_v42  ;;  %v6269_v40 = vld [vmem:[#allocation6 + $0x30] ss:$72 sps:$4 sm:$0xff]   ;;  %v6274_v42 = vld [vmem:[#allocation6 + $0xbc] ss:$72 sps:$4 sm:$0xff]  }
 0x22d   :  { %v3853_v48 = vpop.f32.mrb[4].mxu0  ;;  %v3814_v49 = vpop.f32.mrb[5].mxu1 }
 0x22e   :  { %v6918_v50 = vadd.f32 %v3853_v48, %v3812_v46  ;;  %v3855_v51 = vpop.f32.mrb[5].mxu0  ;;  %4076 = vmatpush1.bf16.msra.mxu1 %v6200_v43  ;;  %v3816_v52 = vpop.f32.mrb[6].mxu1  ;;  %v6277_v43 = vld [vmem:[#allocation6 + $0xc4] ss:$72 sps:$4 sm:$0xff]   ;;  %v6278_v48 = vld [vmem:[#allocation6 + $0x148] ss:$72 sps:$4 sm:$0xff]  }
 0x22f   :  { %v6920_v54 = vadd.f32 %v3855_v51, %v3814_v49  ;;  %4158 = vmatpush1.bf16.msra.mxu0 %v6203_v44  ;;  %v3857_v55 = vpop.f32.mrb[6].mxu0  ;;  %v3817_v56 = vpop.f32.mrb[7].mxu1  ;;  %4077 = vmatprep.subr.bf16.mxu1 %v6208_v45  ;;  %v6272_v44 = vld [vmem:[#allocation6 + $0xb8] ss:$72 sps:$4 sm:$0xff]   ;;  %v6280_v46 = vld [vmem:[#allocation6 + $0x14c] ss:$72 sps:$4 sm:$0xff]  }
 0x230   :  { %v3858_v59 = vpop.f32.mrb[7].mxu0  ;;  %4159 = vmatprep.subr.bf16.mxu0 %v6211_v47  ;;  %v6275_v45 = vld [vmem:[#allocation6 + $0xc0] ss:$72 sps:$4 sm:$0xff]   ;;  %v6283_v47 = vld [vmem:[#allocation6 + $0x154] ss:$72 sps:$4 sm:$0xff]  }
 0x231   :  { %v6281_v49 = vld [vmem:[#allocation6 + $0x150] ss:$72 sps:$4 sm:$0xff]   ;;  %v6286_v51 = vld [vmem:[#allocation6 + $0x1dc] ss:$72 sps:$4 sm:$0xff]   ;;  %v6287_v55 = vld [vmem:[#allocation6 + $0x1e0] ss:$72 sps:$4 sm:$0xff]  }
 0x232   :  { %4078 = vmatpush1.bf16.msra.mxu1 %v6206_v53  ;;  %v6289_v52 = vld [vmem:[#allocation6 + $0x1e4] ss:$72 sps:$4 sm:$0xff]   ;;  %v6284_v53 = vld [vmem:[#allocation6 + $0x1d8] ss:$72 sps:$4 sm:$0xff]  }
 0x233   :  { %4160 = vmatpush1.bf16.msra.mxu0 %v6209_v57  ;;  %4079 = vmatprep.subr.bf16.mxu1 %v6214_v58  ;;  %v6292_v56 = vld [vmem:[#allocation6 + $0x26c] ss:$72 sps:$4 sm:$0xff]   ;;  %v6290_v58 = vld [vmem:[#allocation6 + $0x268] ss:$72 sps:$4 sm:$0xff]  }
 0x234   :  { %4161 = vmatprep.subr.bf16.mxu0 %v6217_v60  ;;  %v6295_v57 = vld [vmem:[#allocation6 + $0x274] ss:$72 sps:$4 sm:$0xff]   ;;  %v6293_v59 = vld [vmem:[#allocation6 + $0x270] ss:$72 sps:$4 sm:$0xff]  }
 0x235   :  { %v6298_v60 = vld [vmem:[#allocation6 + $0x2fc] ss:$72 sps:$4 sm:$0xff]  }
 0x236   :  { %4080 = vmatpush1.bf16.msra.mxu1 %v6212_v63  ;;  %v6301_v63 = vld [vmem:[#allocation6 + $0x304] ss:$72 sps:$4 sm:$0xff]  }
 0x237   :  { %4162 = vmatpush1.bf16.msra.mxu0 %v6215_v2  ;;  %4081 = vmatprep.subr.bf16.mxu1 %v6220_v3  ;;  %v6296_v2 = vld [vmem:[#allocation6 + $0x2f8] ss:$72 sps:$4 sm:$0xff]  }
 0x238   :  { %4163 = vmatprep.subr.bf16.mxu0 %v6223_v4  ;;  %v6299_v3 = vld [vmem:[#allocation6 + $0x300] ss:$72 sps:$4 sm:$0xff]   ;;  %v6304_v4 = vld [vmem:[#allocation6 + $0x38c] ss:$72 sps:$4 sm:$0xff]  }
 0x23a   :  { %4082 = vmatpush1.bf16.msra.mxu1 %v6218_v5  ;;  %v6307_v5 = vld [vmem:[#allocation6 + $0x394] ss:$72 sps:$4 sm:$0xff]  }
 0x23b   :  { %4164 = vmatpush1.bf16.msra.mxu0 %v6221_v6  ;;  %4083 = vmatprep.subr.bf16.mxu1 %v6226_v7  ;;  %v6302_v6 = vld [vmem:[#allocation6 + $0x388] ss:$72 sps:$4 sm:$0xff]  }
 0x23c   :  { %4165 = vmatprep.subr.bf16.mxu0 %v6229_v8  ;;  %v6305_v7 = vld [vmem:[#allocation6 + $0x390] ss:$72 sps:$4 sm:$0xff]   ;;  %v6310_v8 = vld [vmem:[#allocation6 + $0x41c] ss:$72 sps:$4 sm:$0xff]  }
 0x23e   :  { %4084 = vmatpush1.bf16.msra.mxu1 %v6224_v9  ;;  %v6313_v9 = vld [vmem:[#allocation6 + $0x424] ss:$72 sps:$4 sm:$0xff]  }
 0x23f   :  { %4166 = vmatpush1.bf16.msra.mxu0 %v6227_v10  ;;  %4085 = vmatprep.subr.bf16.mxu1 %v6232_v11  ;;  %v6308_v10 = vld [vmem:[#allocation6 + $0x418] ss:$72 sps:$4 sm:$0xff]  }
 0x240   :  { %4167 = vmatprep.subr.bf16.mxu0 %v6235_v12  ;;  %v6311_v11 = vld [vmem:[#allocation6 + $0x420] ss:$72 sps:$4 sm:$0xff]   ;;  %v6316_v12 = vld [vmem:[#allocation6 + $0x4ac] ss:$72 sps:$4 sm:$0xff]  }
 0x242   :  { %4086 = vmatpush1.bf16.msra.mxu1 %v6230_v13  ;;  %v6319_v13 = vld [vmem:[#allocation6 + $0x4b4] ss:$72 sps:$4 sm:$0xff]  }
 0x243   :  { %4168 = vmatpush1.bf16.msra.mxu0 %v6233_v14  ;;  %4087 = vmatprep.subr.bf16.mxu1 %v6238_v15  ;;  %v6314_v14 = vld [vmem:[#allocation6 + $0x4a8] ss:$72 sps:$4 sm:$0xff]  }
 0x244   :  { %4169 = vmatprep.subr.bf16.mxu0 %v6241_v16  ;;  %v6317_v15 = vld [vmem:[#allocation6 + $0x4b0] ss:$72 sps:$4 sm:$0xff]   ;;  %v6322_v16 = vld [vmem:[#allocation6 + $0x53c] ss:$72 sps:$4 sm:$0xff]  }
 0x246   :  { %4088 = vmatpush1.bf16.msra.mxu1 %v6236_v17  ;;  %v6325_v17 = vld [vmem:[#allocation6 + $0x544] ss:$72 sps:$4 sm:$0xff]  }
 0x247   :  { %4170 = vmatpush1.bf16.msra.mxu0 %v6239_v18  ;;  %4089 = vmatprep.subr.bf16.mxu1 %v6244_v19  ;;  %v6320_v18 = vld [vmem:[#allocation6 + $0x538] ss:$72 sps:$4 sm:$0xff]  }
 0x248   :  { %4171 = vmatprep.subr.bf16.mxu0 %v6247_v20  ;;  %v6323_v19 = vld [vmem:[#allocation6 + $0x540] ss:$72 sps:$4 sm:$0xff]   ;;  %v6328_v20 = vld [vmem:[#allocation6 + $0x5cc] ss:$72 sps:$4 sm:$0xff]  }
 0x24a   :  { %4090 = vmatpush1.bf16.msra.mxu1 %v6242_v21  ;;  %v6331_v21 = vld [vmem:[#allocation6 + $0x5d4] ss:$72 sps:$4 sm:$0xff]  }
 0x24b   :  { %4172 = vmatpush1.bf16.msra.mxu0 %v6245_v22  ;;  %4091 = vmatprep.subr.bf16.mxu1 %v6250_v23  ;;  %v6326_v22 = vld [vmem:[#allocation6 + $0x5c8] ss:$72 sps:$4 sm:$0xff]  }
 0x24c   :  { %4173 = vmatprep.subr.bf16.mxu0 %v6253_v24  ;;  %v6329_v23 = vld [vmem:[#allocation6 + $0x5d0] ss:$72 sps:$4 sm:$0xff]   ;;  %v6334_v24 = vld [vmem:[#allocation6 + $0x65c] ss:$72 sps:$4 sm:$0xff]  }
 0x24e   :  { %4092 = vmatpush1.bf16.msra.mxu1 %v6248_v25  ;;  %v6337_v25 = vld [vmem:[#allocation6 + $0x664] ss:$72 sps:$4 sm:$0xff]  }
 0x24f   :  { %4174 = vmatpush1.bf16.msra.mxu0 %v6251_v26  ;;  %4093 = vmatprep.subr.bf16.mxu1 %v6256_v27  ;;  %v6332_v26 = vld [vmem:[#allocation6 + $0x658] ss:$72 sps:$4 sm:$0xff]  }
 0x250   :  { %4175 = vmatprep.subr.bf16.mxu0 %v6259_v28  ;;  %v6335_v27 = vld [vmem:[#allocation6 + $0x660] ss:$72 sps:$4 sm:$0xff]   ;;  %v6340_v28 = vld [vmem:[#allocation6 + $0x6ec] ss:$72 sps:$4 sm:$0xff]  }
 0x252   :  { %4094 = vmatpush1.bf16.msra.mxu1 %v6254_v29  ;;  %v6343_v29 = vld [vmem:[#allocation6 + $0x6f4] ss:$72 sps:$4 sm:$0xff]  }
 0x253   :  { %4176 = vmatpush1.bf16.msra.mxu0 %v6257_v30  ;;  %4095 = vmatprep.subr.bf16.mxu1 %v6262_v31  ;;  %v6338_v30 = vld [vmem:[#allocation6 + $0x6e8] ss:$72 sps:$4 sm:$0xff]  }
 0x254   :  { %4177 = vmatprep.subr.bf16.mxu0 %v6265_v32  ;;  %v6341_v31 = vld [vmem:[#allocation6 + $0x6f0] ss:$72 sps:$4 sm:$0xff]   ;;  %v6346_v32 = vld [vmem:[#allocation6 + $0x77c] ss:$72 sps:$4 sm:$0xff]  }
 0x256   :  { %4096 = vmatpush1.bf16.msra.mxu1 %v6260_v33  ;;  %v6349_v33 = vld [vmem:[#allocation6 + $0x784] ss:$72 sps:$4 sm:$0xff]  }
 0x257   :  { %4178 = vmatpush1.bf16.msra.mxu0 %v6263_v34  ;;  %4188 = vmatprep.subr.bf16.mxu1 %v6268_v35  ;;  %v6344_v34 = vld [vmem:[#allocation6 + $0x778] ss:$72 sps:$4 sm:$0xff]  }
 0x258   :  { %4270 = vmatprep.subr.bf16.mxu0 %v6271_v36  ;;  %v6347_v35 = vld [vmem:[#allocation6 + $0x780] ss:$72 sps:$4 sm:$0xff]   ;;  %v6352_v36 = vld [vmem:[#allocation6 + $0x80c] ss:$72 sps:$4 sm:$0xff]  }
 0x259   :  { %4098 = vmatmul.mubr.bf16.vlgmr.msra.gmra.mrb[12].mxu1 %v6892_v61 }
 0x25a   :  { %4180 = vmatmul.mubr.bf16.vlgmr.msra.gmra.mrb[12].mxu0 %v6892_v61  ;;  %4189 = vmatpush1.bf16.msra.mxu1 %v6266_v38  ;;  %v6355_v38 = vld [vmem:[#allocation6 + $0x814] ss:$72 sps:$4 sm:$0xff]  }
 0x25b   :  { %4220 = vmatprep.mubr.bf16.mxu1 %v6894_v62  ;;  %4271 = vmatpush1.bf16.msra.mxu0 %v6269_v40  ;;  %v6350_v40 = vld [vmem:[#allocation6 + $0x808] ss:$72 sps:$4 sm:$0xff]  }
 0x25c   :  { %4302 = vmatprep.mubr.bf16.mxu0 %v6894_v62  ;;  %4190 = vmatprep.subr.bf16.mxu1 %v6274_v42  ;;  %v6353_v42 = vld [vmem:[#allocation6 + $0x810] ss:$72 sps:$4 sm:$0xff]  }
 0x25d   :  { %4272 = vmatprep.subr.bf16.mxu0 %v6277_v43  ;;  %v6358_v43 = vld [vmem:[#allocation6 + $0x89c] ss:$72 sps:$4 sm:$0xff]  }
 0x25e   :  { %4191 = vmatpush1.bf16.msra.mxu1 %v6272_v44  ;;  %v6361_v44 = vld [vmem:[#allocation6 + $0x8a4] ss:$72 sps:$4 sm:$0xff]  }
 0x25f   :  { %4273 = vmatpush1.bf16.msra.mxu0 %v6275_v45  ;;  %4192 = vmatprep.subr.bf16.mxu1 %v6280_v46  ;;  %v6356_v45 = vld [vmem:[#allocation6 + $0x898] ss:$72 sps:$4 sm:$0xff]  }
 0x260   :  { %4274 = vmatprep.subr.bf16.mxu0 %v6283_v47  ;;  %v6359_v46 = vld [vmem:[#allocation6 + $0x8a0] ss:$72 sps:$4 sm:$0xff]   ;;  %v6364_v47 = vld [vmem:[#allocation6 + $0x92c] ss:$72 sps:$4 sm:$0xff]  }
 0x262   :  { %4193 = vmatpush1.bf16.msra.mxu1 %v6278_v48  ;;  %v6367_v48 = vld [vmem:[#allocation6 + $0x934] ss:$72 sps:$4 sm:$0xff]  }
 0x263   :  { %4275 = vmatpush1.bf16.msra.mxu0 %v6281_v49  ;;  %4194 = vmatprep.subr.bf16.mxu1 %v6286_v51  ;;  %v6362_v49 = vld [vmem:[#allocation6 + $0x928] ss:$72 sps:$4 sm:$0xff]  }
 0x264   :  { %4276 = vmatprep.subr.bf16.mxu0 %v6289_v52  ;;  %v6365_v51 = vld [vmem:[#allocation6 + $0x930] ss:$72 sps:$4 sm:$0xff]   ;;  %v6370_v52 = vld [vmem:[#allocation6 + $0x9bc] ss:$72 sps:$4 sm:$0xff]  }
 0x266   :  { %4195 = vmatpush1.bf16.msra.mxu1 %v6284_v53  ;;  %v6373_v53 = vld [vmem:[#allocation6 + $0x9c4] ss:$72 sps:$4 sm:$0xff]  }
 0x267   :  { %4277 = vmatpush1.bf16.msra.mxu0 %v6287_v55  ;;  %4196 = vmatprep.subr.bf16.mxu1 %v6292_v56  ;;  %v6368_v55 = vld [vmem:[#allocation6 + $0x9b8] ss:$72 sps:$4 sm:$0xff]  }
 0x268   :  { %4278 = vmatprep.subr.bf16.mxu0 %v6295_v57  ;;  %v6371_v56 = vld [vmem:[#allocation6 + $0x9c0] ss:$72 sps:$4 sm:$0xff]   ;;  %v6376_v57 = vld [vmem:[#allocation6 + $0xa4c] ss:$72 sps:$4 sm:$0xff]  }
 0x26a   :  { %4197 = vmatpush1.bf16.msra.mxu1 %v6290_v58  ;;  %v6379_v58 = vld [vmem:[#allocation6 + $0xa54] ss:$72 sps:$4 sm:$0xff]  }
 0x26b   :  { %4279 = vmatpush1.bf16.msra.mxu0 %v6293_v59  ;;  %4198 = vmatprep.subr.bf16.mxu1 %v6298_v60  ;;  %v6374_v59 = vld [vmem:[#allocation6 + $0xa48] ss:$72 sps:$4 sm:$0xff]  }
 0x26c   :  { %4280 = vmatprep.subr.bf16.mxu0 %v6301_v63  ;;  %v6377_v60 = vld [vmem:[#allocation6 + $0xa50] ss:$72 sps:$4 sm:$0xff]   ;;  %v6382_v63 = vld [vmem:[#allocation6 + $0xadc] ss:$72 sps:$4 sm:$0xff]  }
 0x26e   :  { %4199 = vmatpush1.bf16.msra.mxu1 %v6296_v2  ;;  %v6385_v2 = vld [vmem:[#allocation6 + $0xae4] ss:$72 sps:$4 sm:$0xff]  }
 0x26f   :  { %4281 = vmatpush1.bf16.msra.mxu0 %v6299_v3  ;;  %4200 = vmatprep.subr.bf16.mxu1 %v6304_v4  ;;  %v4517_v3 = vsel %vm4516_vm0, %v6918_v50, 0.0  ;;  %v4524_v4 = vsel %vm4516_vm0, %v6920_v54, 0.0 }
 0x270   :  { %4282 = vmatprep.subr.bf16.mxu0 %v6307_v5  ;;  %v6380_v5 = vld [vmem:[#allocation6 + $0xad8] ss:$72 sps:$4 sm:$0xff]  }
 0x272   :  { %4201 = vmatpush1.bf16.msra.mxu1 %v6302_v6  ;;  %v6383_v6 = vld [vmem:[#allocation6 + $0xae0] ss:$72 sps:$4 sm:$0xff]  }
 0x273   :  { %4283 = vmatpush1.bf16.msra.mxu0 %v6305_v7  ;;  %4202 = vmatprep.subr.bf16.mxu1 %v6310_v8  ;;  %v6388_v7 = vld [vmem:[#allocation6 + $0xb6c] ss:$72 sps:$4 sm:$0xff]   ;;  %v4518_v8 = vrot.slane %v4517_v3, 4 }
 0x274   :  { %4284 = vmatprep.subr.bf16.mxu0 %v6313_v9  ;;  %v6391_v9 = vld [vmem:[#allocation6 + $0xb74] ss:$72 sps:$4 sm:$0xff]  }
 0x276   :  { %4203 = vmatpush1.bf16.msra.mxu1 %v6308_v10  ;;  %v4525_v10 = vrot.slane %v4524_v4, 4 }
 0x277   :  { %4285 = vmatpush1.bf16.msra.mxu0 %v6311_v11  ;;  %4204 = vmatprep.subr.bf16.mxu1 %v6316_v12  ;;  %v6386_v11 = vld [vmem:[#allocation6 + $0xb68] ss:$72 sps:$4 sm:$0xff]  }
 0x278   :  { %4286 = vmatprep.subr.bf16.mxu0 %v6319_v13  ;;  %v6389_v12 = vld [vmem:[#allocation6 + $0xb70] ss:$72 sps:$4 sm:$0xff]   ;;  %v6394_v13 = vld [vmem:[#allocation6 + $0xbfc] ss:$72 sps:$4 sm:$0xff]  }
 0x27a   :  { %4205 = vmatpush1.bf16.msra.mxu1 %v6314_v14  ;;  %v4519_v14 = vadd.f32 %v4518_v8, %v4517_v3  ;;  %v6415_v3 = vld [vmem:[#allocation6 + $0xdb4] ss:$72 sps:$4 sm:$0xff]  }
 0x27b   :  { %4287 = vmatpush1.bf16.msra.mxu0 %v6317_v15  ;;  %4206 = vmatprep.subr.bf16.mxu1 %v6322_v16  ;;  %v6397_v15 = vld [vmem:[#allocation6 + $0xc04] ss:$72 sps:$4 sm:$0xff]   ;;  %v4526_v16 = vadd.f32 %v4525_v10, %v4524_v4 }
 0x27c   :  { %4288 = vmatprep.subr.bf16.mxu0 %v6325_v17  ;;  %v6392_v17 = vld [vmem:[#allocation6 + $0xbf8] ss:$72 sps:$4 sm:$0xff]  }
 0x27e   :  { %4207 = vmatpush1.bf16.msra.mxu1 %v6320_v18  ;;  %v6395_v18 = vld [vmem:[#allocation6 + $0xc00] ss:$72 sps:$4 sm:$0xff]  }
 0x27f   :  { %4289 = vmatpush1.bf16.msra.mxu0 %v6323_v19  ;;  %4208 = vmatprep.subr.bf16.mxu1 %v6328_v20  ;;  %v6400_v19 = vld [vmem:[#allocation6 + $0xc8c] ss:$72 sps:$4 sm:$0xff]   ;;  %v4520_v20 = vrot.slane %v4519_v14, 2 }
 0x280   :  { %4290 = vmatprep.subr.bf16.mxu0 %v6331_v21 }
 0x282   :  { %4209 = vmatpush1.bf16.msra.mxu1 %v6326_v22  ;;  %v6398_v22 = vld [vmem:[#allocation6 + $0xc88] ss:$72 sps:$4 sm:$0xff]  }
 0x283   :  { %4291 = vmatpush1.bf16.msra.mxu0 %v6329_v23  ;;  %4210 = vmatprep.subr.bf16.mxu1 %v6334_v24  ;;  %v6403_v23 = vld [vmem:[#allocation6 + $0xc94] ss:$72 sps:$4 sm:$0xff]   ;;  %v4527_v24 = vrot.slane %v4526_v16, 2 }
 0x284   :  { %4292 = vmatprep.subr.bf16.mxu0 %v6337_v25 }
 0x286   :  { %4211 = vmatpush1.bf16.msra.mxu1 %v6332_v26 }
 0x287   :  { %4293 = vmatpush1.bf16.msra.mxu0 %v6335_v27  ;;  %4212 = vmatprep.subr.bf16.mxu1 %v6340_v28  ;;  %v6401_v28 = vld [vmem:[#allocation6 + $0xc90] ss:$72 sps:$4 sm:$0xff]  }
 0x288   :  { %4294 = vmatprep.subr.bf16.mxu0 %v6343_v29  ;;  %v6406_v29 = vld [vmem:[#allocation6 + $0xd1c] ss:$72 sps:$4 sm:$0xff]  }
 0x28a   :  { %4213 = vmatpush1.bf16.msra.mxu1 %v6338_v30 }
 0x28b   :  { %4295 = vmatpush1.bf16.msra.mxu0 %v6341_v31  ;;  %4214 = vmatprep.subr.bf16.mxu1 %v6346_v32 }
 0x28c   :  { %4296 = vmatprep.subr.bf16.mxu0 %v6349_v33 }
 0x28e   :  { %4215 = vmatpush1.bf16.msra.mxu1 %v6344_v34 }
 0x28f   :  { %4297 = vmatpush1.bf16.msra.mxu0 %v6347_v35  ;;  %4216 = vmatprep.subr.bf16.mxu1 %v6352_v36 }
 0x290   :  { %4298 = vmatprep.subr.bf16.mxu0 %v6355_v38 }
 0x292   :  { %4217 = vmatpush1.bf16.msra.mxu1 %v6350_v40 }
 0x293   :  { %4299 = vmatpush1.bf16.msra.mxu0 %v6353_v42  ;;  %4218 = vmatprep.subr.bf16.mxu1 %v6358_v43  ;;  %v4521_v43 = vadd.f32 %v4520_v20, %v4519_v14 }
 0x294   :  { %4300 = vmatprep.subr.bf16.mxu0 %v6361_v44 }
 0x296   :  { %4219 = vmatpush1.bf16.msra.mxu1 %v6356_v45 }
 0x297   :  { %4301 = vmatpush1.bf16.msra.mxu0 %v6359_v46  ;;  %4229 = vmatprep.subr.bf16.mxu1 %v6364_v47  ;;  %v6409_v47 = vld [vmem:[#allocation6 + $0xd24] ss:$72 sps:$4 sm:$0xff]  }
 0x298   :  { %4311 = vmatprep.subr.bf16.mxu0 %v6367_v48  ;;  %v4528_v48 = vadd.f32 %v4527_v24, %v4526_v16 }
 0x299   :  { %4221 = vmatmul.mubr.bf16.vlgmr.msra.gmra.mrb[16].mxu1 %v6896_v0 }
 0x29a   :  { %4303 = vmatmul.mubr.bf16.vlgmr.msra.gmra.mrb[16].mxu0 %v6896_v0  ;;  %4230 = vmatpush1.bf16.msra.mxu1 %v6362_v49  ;;  %v4529_v4 = vrot.slane %v4528_v48, 1 }
 0x29b   :  { %4261 = vmatprep.mubr.bf16.mxu1 %v6898_v1  ;;  %4312 = vmatpush1.bf16.msra.mxu0 %v6365_v51 }
 0x29c   :  { %4343 = vmatprep.mubr.bf16.mxu0 %v6898_v1  ;;  %4231 = vmatprep.subr.bf16.mxu1 %v6370_v52 }
 0x29d   :  { %4313 = vmatprep.subr.bf16.mxu0 %v6373_v53 }
 0x29e   :  { %4232 = vmatpush1.bf16.msra.mxu1 %v6368_v55  ;;  %v6404_v55 = vld [vmem:[#allocation6 + $0xd18] ss:$72 sps:$4 sm:$0xff]  }
 0x29f   :  { %4314 = vmatpush1.bf16.msra.mxu0 %v6371_v56  ;;  %4233 = vmatprep.subr.bf16.mxu1 %v6376_v57 }
 0x2a0   :  { %4315 = vmatprep.subr.bf16.mxu0 %v6379_v58  ;;  %v6407_v58 = vld [vmem:[#allocation6 + $0xd20] ss:$72 sps:$4 sm:$0xff]  }
 0x2a2   :  { %4234 = vmatpush1.bf16.msra.mxu1 %v6374_v59  ;;  %v6412_v59 = vld [vmem:[#allocation6 + $0xdac] ss:$72 sps:$4 sm:$0xff]  }
 0x2a3   :  { %4316 = vmatpush1.bf16.msra.mxu0 %v6377_v60  ;;  %4235 = vmatprep.subr.bf16.mxu1 %v6382_v63  ;;  %v4522_v60 = vrot.slane %v4521_v43, 1 }
 0x2a4   :  { %4317 = vmatprep.subr.bf16.mxu0 %v6385_v2 }
 0x2a5   :  { %v4523_v14 = vadd.f32 %v4522_v60, %v4521_v43  ;;  %v6436_v43 = vld [vmem:[#allocation6 + $0xfec] ss:$72 sps:$4 sm:$0xff]   ;;  %v6455_v60 = vld [vmem:[#allocation6 + $0x11a0] ss:$72 sps:$4 sm:$0xff]  }
 0x2a6   :  { %4236 = vmatpush1.bf16.msra.mxu1 %v6380_v5 }
 0x2a7   :  { %4318 = vmatpush1.bf16.msra.mxu0 %v6383_v6  ;;  %4237 = vmatprep.subr.bf16.mxu1 %v6388_v7 }
 0x2a8   :  { %4319 = vmatprep.subr.bf16.mxu0 %v6391_v9  ;;  %v6410_v9 = vld [vmem:[#allocation6 + $0xda8] ss:$72 sps:$4 sm:$0xff]  }
 0x2aa   :  { %4238 = vmatpush1.bf16.msra.mxu1 %v6386_v11 }
 0x2ab   :  { %4320 = vmatpush1.bf16.msra.mxu0 %v6389_v12  ;;  %4239 = vmatprep.subr.bf16.mxu1 %v6394_v13  ;;  %v6413_v12 = vld [vmem:[#allocation6 + $0xdb0] ss:$72 sps:$4 sm:$0xff]   ;;  %v6418_v13 = vld [vmem:[#allocation6 + $0xe3c] ss:$72 sps:$4 sm:$0xff]  }
 0x2ac   :  { %v6934_v21 = vpop.f32.mrb[8].mxu1  ;;  %4321 = vmatprep.subr.bf16.mxu0 %v6397_v15 }
 0x2ad   :  { %v4531_v25 = vsel %vm4516_vm0, %v6934_v21, 0.0  ;;  %v6938_v26 = vpop.f32.mrb[8].mxu0  ;;  %v6940_v27 = vpop.f32.mrb[9].mxu1 }
 0x2ae   :  { %v4532_v30 = vrot.slane %v4531_v25, 4  ;;  %v4545_v31 = vsel %vm4516_vm0, %v6938_v26, 0.0  ;;  %v4538_v32 = vsel %vm4516_vm0, %v6940_v27, 0.0  ;;  %v6946_v33 = vpop.f32.mrb[9].mxu0  ;;  %v3939_v34 = vpop.f32.mrb[10].mxu1  ;;  %4240 = vmatpush1.bf16.msra.mxu1 %v6392_v17 }
 0x2af   :  { %v4546_v35 = vrot.slane %v4545_v31, 4  ;;  %v4539_v36 = vrot.slane %v4538_v32, 4  ;;  %v4552_v38 = vsel %vm4516_vm0, %v6946_v33, 0.0  ;;  %v4021_v40 = vpop.f32.mrb[10].mxu0  ;;  %4322 = vmatpush1.bf16.msra.mxu0 %v6395_v18  ;;  %v3940_v42 = vpop.f32.mrb[11].mxu1  ;;  %4241 = vmatprep.subr.bf16.mxu1 %v6400_v19  ;;  %v4530_v18 = vadd.f32 %v4529_v4, %v4528_v48 }
 0x2b0   :  { %v4533_v44 = vadd.f32 %v4532_v30, %v4531_v25  ;;  %v4553_v45 = vrot.slane %v4552_v38, 4  ;;  %v4022_v46 = vpop.f32.mrb[11].mxu0  ;;  %4323 = vmatprep.subr.bf16.mxu0 %v6403_v23  ;;  %v6421_v17 = vld [vmem:[#allocation6 + $0xe44] ss:$72 sps:$4 sm:$0xff]   ;;  %v6416_v23 = vld [vmem:[#allocation6 + $0xe38] ss:$72 sps:$4 sm:$0xff]  }
 0x2b1   :  { %v4547_v49 = vadd.f32 %v4546_v35, %v4545_v31  ;;  %v4540_v51 = vadd.f32 %v4539_v36, %v4538_v32  ;;  %v6427_v31 = vld [vmem:[#allocation6 + $0xed4] ss:$72 sps:$4 sm:$0xff]   ;;  %v6422_v34 = vld [vmem:[#allocation6 + $0xec8] ss:$72 sps:$4 sm:$0xff]   ;;  %v6428_v40 = vld [vmem:[#allocation6 + $0xf58] ss:$72 sps:$4 sm:$0xff]  }
 0x2b2   :  { %v4534_v52 = vrot.slane %v4533_v44, 2  ;;  %v4554_v53 = vadd.f32 %v4553_v45, %v4552_v38  ;;  %4242 = vmatpush1.bf16.msra.mxu1 %v6398_v22  ;;  %v6425_v35 = vld [vmem:[#allocation6 + $0xed0] ss:$72 sps:$4 sm:$0xff]   ;;  %v6430_v36 = vld [vmem:[#allocation6 + $0xf5c] ss:$72 sps:$4 sm:$0xff]  }
 0x2b3   :  { %v4548_v56 = vrot.slane %v4547_v49, 2  ;;  %v4541_v57 = vrot.slane %v4540_v51, 2  ;;  %4324 = vmatpush1.bf16.msra.mxu0 %v6401_v28  ;;  %4243 = vmatprep.subr.bf16.mxu1 %v6406_v29  ;;  %v6419_v28 = vld [vmem:[#allocation6 + $0xe40] ss:$72 sps:$4 sm:$0xff]   ;;  %v6424_v29 = vld [vmem:[#allocation6 + $0xecc] ss:$72 sps:$4 sm:$0xff]  }
 0x2b4   :  { %v4535_v63 = vadd.f32 %v4534_v52, %v4533_v44  ;;  %v4555_v2 = vrot.slane %v4554_v53, 2  ;;  %4325 = vmatprep.subr.bf16.mxu0 %v6409_v47  ;;  %v6433_v38 = vld [vmem:[#allocation6 + $0xf64] ss:$72 sps:$4 sm:$0xff]   ;;  %v6431_v42 = vld [vmem:[#allocation6 + $0xf60] ss:$72 sps:$4 sm:$0xff]  }
 0x2b5   :  { %v4549_v5 = vadd.f32 %v4548_v56, %v4547_v49  ;;  %v4542_v6 = vadd.f32 %v4541_v57, %v4540_v51  ;;  %v6439_v44 = vld [vmem:[#allocation6 + $0xff4] ss:$72 sps:$4 sm:$0xff]   ;;  %v6434_v45 = vld [vmem:[#allocation6 + $0xfe8] ss:$72 sps:$4 sm:$0xff]   ;;  %v6445_v48 = vld [vmem:[#allocation6 + $0x1084] ss:$72 sps:$4 sm:$0xff]  }
 0x2b6   :  { %v4536_v7 = vrot.slane %v4535_v63, 1  ;;  %v4556_v8 = vadd.f32 %v4555_v2, %v4554_v53  ;;  %4244 = vmatpush1.bf16.msra.mxu1 %v6404_v55  ;;  %v6437_v46 = vld [vmem:[#allocation6 + $0xff0] ss:$72 sps:$4 sm:$0xff]   ;;  %v6442_v47 = vld [vmem:[#allocation6 + $0x107c] ss:$72 sps:$4 sm:$0xff]  }
 0x2b7   :  { %v4550_v10 = vrot.slane %v4549_v5, 1  ;;  %v4543_v11 = vrot.slane %v4542_v6, 1  ;;  %4326 = vmatpush1.bf16.msra.mxu0 %v6407_v58  ;;  %4245 = vmatprep.subr.bf16.mxu1 %v6412_v59  ;;  %v6440_v49 = vld [vmem:[#allocation6 + $0x1078] ss:$72 sps:$4 sm:$0xff]   ;;  %v6448_v52 = vld [vmem:[#allocation6 + $0x110c] ss:$72 sps:$4 sm:$0xff]  }
 0x2b8   :  { %v4537_v15 = vadd.f32 %v4536_v7, %v4535_v63  ;;  %v4557_v16 = vrot.slane %v4556_v8, 1  ;;  %4327 = vmatprep.subr.bf16.mxu0 %v6415_v3  ;;  %v6443_v51 = vld [vmem:[#allocation6 + $0x1080] ss:$72 sps:$4 sm:$0xff]   ;;  %v6451_v53 = vld [vmem:[#allocation6 + $0x1114] ss:$72 sps:$4 sm:$0xff]  }
 0x2b9   :  { %v4544_v19 = vadd.f32 %v4543_v11, %v4542_v6  ;;  %v4551_v22 = vadd.f32 %v4550_v10, %v4549_v5  ;;  %v6446_v55 = vld [vmem:[#allocation6 + $0x1108] ss:$72 sps:$4 sm:$0xff]   ;;  %v6454_v57 = vld [vmem:[#allocation6 + $0x119c] ss:$72 sps:$4 sm:$0xff]   ;;  %v6452_v59 = vld [vmem:[#allocation6 + $0x1198] ss:$72 sps:$4 sm:$0xff]  }
 0x2ba   :  { %v4643_v20 = vadd.f32 %v4537_v15, %v4523_v14  ;;  %4246 = vmatpush1.bf16.msra.mxu1 %v6410_v9  ;;  %v4558_v25 = vadd.f32 %v4557_v16, %v4556_v8  ;;  %v6449_v56 = vld [vmem:[#allocation6 + $0x1110] ss:$72 sps:$4 sm:$0xff]   ;;  %v6457_v58 = vld [vmem:[#allocation6 + $0x11a4] ss:$72 sps:$4 sm:$0xff]   ;;  %v6461_v4 = vld [vmem:[#allocation6 + $0x40] ss:$72 sps:$4 sm:$0xff]  }
 0x2bb   :  { %v4644_v24 = vadd.f32 %v4544_v19, %v4530_v18  ;;  %4328 = vmatpush1.bf16.msra.mxu0 %v6413_v12  ;;  %4247 = vmatprep.subr.bf16.mxu1 %v6418_v13  ;;  %v6460_v63 = vld [vmem:[#allocation6 + $0x3c] ss:$72 sps:$4 sm:$0xff]   ;;  %v6458_v3 = vld [vmem:[#allocation6 + $0x38] ss:$72 sps:$4 sm:$0xff]   ;;  %v6466_v5 = vld [vmem:[#allocation6 + $0xcc] ss:$72 sps:$4 sm:$0xff]  }
 0x2bc   :  { %v6950_v30 = vadd.f32 %v4643_v20, %v4551_v22  ;;  %4329 = vmatprep.subr.bf16.mxu0 %v6421_v17  ;;  %v6463_v2 = vld [vmem:[#allocation6 + $0x44] ss:$72 sps:$4 sm:$0xff]   ;;  %v6469_v6 = vld [vmem:[#allocation6 + $0xd4] ss:$72 sps:$4 sm:$0xff]   ;;  %v6464_v7 = vld [vmem:[#allocation6 + $0xc8] ss:$72 sps:$4 sm:$0xff]  }
 0x2bd   :  { %v6952_v32 = vadd.f32 %v4644_v24, %v4558_v25  ;;  %v6467_v8 = vld [vmem:[#allocation6 + $0xd0] ss:$72 sps:$4 sm:$0xff]   ;;  %v6472_v9 = vld [vmem:[#allocation6 + $0x15c] ss:$72 sps:$4 sm:$0xff]   ;;  %v6473_v12 = vld [vmem:[#allocation6 + $0x160] ss:$72 sps:$4 sm:$0xff]  }
 0x2be   :  { %4248 = vmatpush1.bf16.msra.mxu1 %v6416_v23  ;;  %v6475_v10 = vld [vmem:[#allocation6 + $0x164] ss:$72 sps:$4 sm:$0xff]   ;;  %v6470_v11 = vld [vmem:[#allocation6 + $0x158] ss:$72 sps:$4 sm:$0xff]   ;;  %v6481_v14 = vld [vmem:[#allocation6 + $0x1f4] ss:$72 sps:$4 sm:$0xff]  }
 0x2bf   :  { %4330 = vmatpush1.bf16.msra.mxu0 %v6419_v28  ;;  %4249 = vmatprep.subr.bf16.mxu1 %v6424_v29  ;;  %v6478_v13 = vld [vmem:[#allocation6 + $0x1ec] ss:$72 sps:$4 sm:$0xff]   ;;  %v6476_v15 = vld [vmem:[#allocation6 + $0x1e8] ss:$72 sps:$4 sm:$0xff]   ;;  %v6484_v17 = vld [vmem:[#allocation6 + $0x27c] ss:$72 sps:$4 sm:$0xff]  }
 0x2c0   :  { %4331 = vmatprep.subr.bf16.mxu0 %v6427_v31  ;;  %v6479_v16 = vld [vmem:[#allocation6 + $0x1f0] ss:$72 sps:$4 sm:$0xff]   ;;  %v6487_v18 = vld [vmem:[#allocation6 + $0x284] ss:$72 sps:$4 sm:$0xff]   ;;  %v6485_v19 = vld [vmem:[#allocation6 + $0x280] ss:$72 sps:$4 sm:$0xff]  }
 0x2c1   :  { %v6490_v20 = vld [vmem:[#allocation6 + $0x30c] ss:$72 sps:$4 sm:$0xff]   ;;  %v6488_v23 = vld [vmem:[#allocation6 + $0x308] ss:$72 sps:$4 sm:$0xff]   ;;  %v6496_v25 = vld [vmem:[#allocation6 + $0x39c] ss:$72 sps:$4 sm:$0xff]  }
 0x2c2   :  { %4250 = vmatpush1.bf16.msra.mxu1 %v6422_v34  ;;  %v6493_v22 = vld [vmem:[#allocation6 + $0x314] ss:$72 sps:$4 sm:$0xff]   ;;  %v6491_v24 = vld [vmem:[#allocation6 + $0x310] ss:$72 sps:$4 sm:$0xff]   ;;  %v6499_v28 = vld [vmem:[#allocation6 + $0x3a4] ss:$72 sps:$4 sm:$0xff]  }
 0x2c3   :  { %4332 = vmatpush1.bf16.msra.mxu0 %v6425_v35  ;;  %4251 = vmatprep.subr.bf16.mxu1 %v6430_v36  ;;  %v6494_v29 = vld [vmem:[#allocation6 + $0x398] ss:$72 sps:$4 sm:$0xff]   ;;  %v6502_v34 = vld [vmem:[#allocation6 + $0x42c] ss:$72 sps:$4 sm:$0xff]   ;;  %v6500_v36 = vld [vmem:[#allocation6 + $0x428] ss:$72 sps:$4 sm:$0xff]  }
 0x2c4   :  { %4333 = vmatprep.subr.bf16.mxu0 %v6433_v38  ;;  %v6497_v31 = vld [vmem:[#allocation6 + $0x3a0] ss:$72 sps:$4 sm:$0xff]   ;;  %v6505_v35 = vld [vmem:[#allocation6 + $0x434] ss:$72 sps:$4 sm:$0xff]   ;;  %v6503_v38 = vld [vmem:[#allocation6 + $0x430] ss:$72 sps:$4 sm:$0xff]  }
 0x2c6   :  { %4252 = vmatpush1.bf16.msra.mxu1 %v6428_v40  ;;  %v6508_v40 = vld [vmem:[#allocation6 + $0x4bc] ss:$72 sps:$4 sm:$0xff]  }
 0x2c7   :  { %4334 = vmatpush1.bf16.msra.mxu0 %v6431_v42  ;;  %4253 = vmatprep.subr.bf16.mxu1 %v6436_v43  ;;  %v6511_v42 = vld [vmem:[#allocation6 + $0x4c4] ss:$72 sps:$4 sm:$0xff]   ;;  %v6506_v43 = vld [vmem:[#allocation6 + $0x4b8] ss:$72 sps:$4 sm:$0xff]  }
 0x2c8   :  { %4335 = vmatprep.subr.bf16.mxu0 %v6439_v44  ;;  %v6509_v44 = vld [vmem:[#allocation6 + $0x4c0] ss:$72 sps:$4 sm:$0xff]  }
 0x2ca   :  { %4254 = vmatpush1.bf16.msra.mxu1 %v6434_v45  ;;  %v6514_v45 = vld [vmem:[#allocation6 + $0x54c] ss:$72 sps:$4 sm:$0xff]  }
 0x2cb   :  { %4336 = vmatpush1.bf16.msra.mxu0 %v6437_v46  ;;  %4255 = vmatprep.subr.bf16.mxu1 %v6442_v47  ;;  %v6517_v46 = vld [vmem:[#allocation6 + $0x554] ss:$72 sps:$4 sm:$0xff]   ;;  %v6512_v47 = vld [vmem:[#allocation6 + $0x548] ss:$72 sps:$4 sm:$0xff]  }
 0x2cc   :  { %4337 = vmatprep.subr.bf16.mxu0 %v6445_v48  ;;  %v6515_v48 = vld [vmem:[#allocation6 + $0x550] ss:$72 sps:$4 sm:$0xff]  }
 0x2ce   :  { %4256 = vmatpush1.bf16.msra.mxu1 %v6440_v49  ;;  %v6520_v49 = vld [vmem:[#allocation6 + $0x5dc] ss:$72 sps:$4 sm:$0xff]  }
 0x2cf   :  { %4338 = vmatpush1.bf16.msra.mxu0 %v6443_v51  ;;  %4257 = vmatprep.subr.bf16.mxu1 %v6448_v52  ;;  %v6523_v51 = vld [vmem:[#allocation6 + $0x5e4] ss:$72 sps:$4 sm:$0xff]   ;;  %v6518_v52 = vld [vmem:[#allocation6 + $0x5d8] ss:$72 sps:$4 sm:$0xff]  }
 0x2d0   :  { %4339 = vmatprep.subr.bf16.mxu0 %v6451_v53  ;;  %v6521_v53 = vld [vmem:[#allocation6 + $0x5e0] ss:$72 sps:$4 sm:$0xff]  }
 0x2d2   :  { %4258 = vmatpush1.bf16.msra.mxu1 %v6446_v55  ;;  %v6526_v55 = vld [vmem:[#allocation6 + $0x66c] ss:$72 sps:$4 sm:$0xff]  }
 0x2d3   :  { %4340 = vmatpush1.bf16.msra.mxu0 %v6449_v56  ;;  %4259 = vmatprep.subr.bf16.mxu1 %v6454_v57  ;;  %v6529_v56 = vld [vmem:[#allocation6 + $0x674] ss:$72 sps:$4 sm:$0xff]   ;;  %v6524_v57 = vld [vmem:[#allocation6 + $0x668] ss:$72 sps:$4 sm:$0xff]  }
 0x2d4   :  { %4341 = vmatprep.subr.bf16.mxu0 %v6457_v58  ;;  %v6527_v58 = vld [vmem:[#allocation6 + $0x670] ss:$72 sps:$4 sm:$0xff]  }
 0x2d6   :  { %4260 = vmatpush1.bf16.msra.mxu1 %v6452_v59  ;;  %v6532_v59 = vld [vmem:[#allocation6 + $0x6fc] ss:$72 sps:$4 sm:$0xff]  }
 0x2d7   :  { %4342 = vmatpush1.bf16.msra.mxu0 %v6455_v60  ;;  %4352 = vmatprep.subr.bf16.mxu1 %v6460_v63  ;;  %v6535_v60 = vld [vmem:[#allocation6 + $0x704] ss:$72 sps:$4 sm:$0xff]   ;;  %v6530_v63 = vld [vmem:[#allocation6 + $0x6f8] ss:$72 sps:$4 sm:$0xff]  }
 0x2d8   :  { %4434 = vmatprep.subr.bf16.mxu0 %v6463_v2  ;;  %v6533_v2 = vld [vmem:[#allocation6 + $0x700] ss:$72 sps:$4 sm:$0xff]  }
 0x2d9   :  { %4262 = vmatmul.mubr.bf16.vlgmr.msra.gmra.mrb[16].mxu1 %v6892_v61 }
 0x2da   :  { %4344 = vmatmul.mubr.bf16.vlgmr.msra.gmra.mrb[16].mxu0 %v6892_v61  ;;  %4353 = vmatpush1.bf16.msra.mxu1 %v6458_v3  ;;  %v6538_v3 = vld [vmem:[#allocation6 + $0x78c] ss:$72 sps:$4 sm:$0xff]  }
 0x2db   :  { %4384 = vmatprep.mubr.bf16.mxu1 %v6894_v62  ;;  %4435 = vmatpush1.bf16.msra.mxu0 %v6461_v4  ;;  %v6541_v4 = vld [vmem:[#allocation6 + $0x794] ss:$72 sps:$4 sm:$0xff]  }
 0x2dc   :  { %4466 = vmatprep.mubr.bf16.mxu0 %v6894_v62  ;;  %4354 = vmatprep.subr.bf16.mxu1 %v6466_v5  ;;  %v6482_v62 = vld [vmem:[#allocation6 + $0x278] ss:$72 sps:$4 sm:$0xff]   ;;  %v6536_v5 = vld [vmem:[#allocation6 + $0x788] ss:$72 sps:$4 sm:$0xff]  }
 0x2dd   :  { %4436 = vmatprep.subr.bf16.mxu0 %v6469_v6  ;;  %v6539_v6 = vld [vmem:[#allocation6 + $0x790] ss:$72 sps:$4 sm:$0xff]  }
 0x2de   :  { %4355 = vmatpush1.bf16.msra.mxu1 %v6464_v7  ;;  %v6544_v7 = vld [vmem:[#allocation6 + $0x81c] ss:$72 sps:$4 sm:$0xff]  }
 0x2df   :  { %4437 = vmatpush1.bf16.msra.mxu0 %v6467_v8  ;;  %4356 = vmatprep.subr.bf16.mxu1 %v6472_v9  ;;  %v6547_v8 = vld [vmem:[#allocation6 + $0x824] ss:$72 sps:$4 sm:$0xff]   ;;  %v6542_v9 = vld [vmem:[#allocation6 + $0x818] ss:$72 sps:$4 sm:$0xff]  }
 0x2e0   :  { %4438 = vmatprep.subr.bf16.mxu0 %v6475_v10  ;;  %v6545_v10 = vld [vmem:[#allocation6 + $0x820] ss:$72 sps:$4 sm:$0xff]  }
 0x2e2   :  { %4357 = vmatpush1.bf16.msra.mxu1 %v6470_v11  ;;  %v6550_v11 = vld [vmem:[#allocation6 + $0x8ac] ss:$72 sps:$4 sm:$0xff]  }
 0x2e3   :  { %4439 = vmatpush1.bf16.msra.mxu0 %v6473_v12  ;;  %4358 = vmatprep.subr.bf16.mxu1 %v6478_v13  ;;  %v6553_v12 = vld [vmem:[#allocation6 + $0x8b4] ss:$72 sps:$4 sm:$0xff]   ;;  %v6548_v13 = vld [vmem:[#allocation6 + $0x8a8] ss:$72 sps:$4 sm:$0xff]  }
 0x2e4   :  { %4440 = vmatprep.subr.bf16.mxu0 %v6481_v14  ;;  %v6551_v14 = vld [vmem:[#allocation6 + $0x8b0] ss:$72 sps:$4 sm:$0xff]  }
 0x2e6   :  { %4359 = vmatpush1.bf16.msra.mxu1 %v6476_v15  ;;  %v6556_v15 = vld [vmem:[#allocation6 + $0x93c] ss:$72 sps:$4 sm:$0xff]  }
 0x2e7   :  { %4441 = vmatpush1.bf16.msra.mxu0 %v6479_v16  ;;  %4360 = vmatprep.subr.bf16.mxu1 %v6484_v17  ;;  %v6559_v16 = vld [vmem:[#allocation6 + $0x944] ss:$72 sps:$4 sm:$0xff]   ;;  %v6554_v17 = vld [vmem:[#allocation6 + $0x938] ss:$72 sps:$4 sm:$0xff]  }
 0x2e8   :  { %4442 = vmatprep.subr.bf16.mxu0 %v6487_v18  ;;  %v6557_v18 = vld [vmem:[#allocation6 + $0x940] ss:$72 sps:$4 sm:$0xff]  }
 0x2ea   :  { %4361 = vmatpush1.bf16.msra.mxu1 %v6482_v62  ;;  %v6562_v62 = vld [vmem:[#allocation6 + $0x9cc] ss:$72 sps:$4 sm:$0xff]  }
 0x2eb   :  { %4443 = vmatpush1.bf16.msra.mxu0 %v6485_v19  ;;  %4362 = vmatprep.subr.bf16.mxu1 %v6490_v20  ;;  %v6565_v19 = vld [vmem:[#allocation6 + $0x9d4] ss:$72 sps:$4 sm:$0xff]   ;;  %v6560_v20 = vld [vmem:[#allocation6 + $0x9c8] ss:$72 sps:$4 sm:$0xff]  }
 0x2ec   :  { %4444 = vmatprep.subr.bf16.mxu0 %v6493_v22  ;;  %v6563_v22 = vld [vmem:[#allocation6 + $0x9d0] ss:$72 sps:$4 sm:$0xff]  }
 0x2ee   :  { %4363 = vmatpush1.bf16.msra.mxu1 %v6488_v23  ;;  %v6568_v23 = vld [vmem:[#allocation6 + $0xa5c] ss:$72 sps:$4 sm:$0xff]  }
 0x2ef   :  { %4445 = vmatpush1.bf16.msra.mxu0 %v6491_v24  ;;  %4364 = vmatprep.subr.bf16.mxu1 %v6496_v25  ;;  %v6571_v24 = vld [vmem:[#allocation6 + $0xa64] ss:$72 sps:$4 sm:$0xff]   ;;  %v6566_v25 = vld [vmem:[#allocation6 + $0xa58] ss:$72 sps:$4 sm:$0xff]  }
 0x2f0   :  { %4446 = vmatprep.subr.bf16.mxu0 %v6499_v28  ;;  %v6569_v28 = vld [vmem:[#allocation6 + $0xa60] ss:$72 sps:$4 sm:$0xff]  }
 0x2f2   :  { %4365 = vmatpush1.bf16.msra.mxu1 %v6494_v29  ;;  %v6574_v29 = vld [vmem:[#allocation6 + $0xaec] ss:$72 sps:$4 sm:$0xff]  }
 0x2f3   :  { %4447 = vmatpush1.bf16.msra.mxu0 %v6497_v31  ;;  %4366 = vmatprep.subr.bf16.mxu1 %v6502_v34  ;;  %v6572_v31 = vld [vmem:[#allocation6 + $0xae8] ss:$72 sps:$4 sm:$0xff]  }
 0x2f4   :  { %4448 = vmatprep.subr.bf16.mxu0 %v6505_v35  ;;  %v6575_v34 = vld [vmem:[#allocation6 + $0xaf0] ss:$72 sps:$4 sm:$0xff]   ;;  %v6580_v35 = vld [vmem:[#allocation6 + $0xb7c] ss:$72 sps:$4 sm:$0xff]  }
 0x2f6   :  { %4367 = vmatpush1.bf16.msra.mxu1 %v6500_v36  ;;  %v6583_v36 = vld [vmem:[#allocation6 + $0xb84] ss:$72 sps:$4 sm:$0xff]  }
 0x2f7   :  { %4449 = vmatpush1.bf16.msra.mxu0 %v6503_v38  ;;  %4368 = vmatprep.subr.bf16.mxu1 %v6508_v40  ;;  %v6581_v38 = vld [vmem:[#allocation6 + $0xb80] ss:$72 sps:$4 sm:$0xff]   ;;  %v6586_v40 = vld [vmem:[#allocation6 + $0xc0c] ss:$72 sps:$4 sm:$0xff]  }
 0x2f8   :  { %4450 = vmatprep.subr.bf16.mxu0 %v6511_v42  ;;  %v6589_v42 = vld [vmem:[#allocation6 + $0xc14] ss:$72 sps:$4 sm:$0xff]  }
 0x2fa   :  { %4369 = vmatpush1.bf16.msra.mxu1 %v6506_v43  ;;  %v6584_v43 = vld [vmem:[#allocation6 + $0xc08] ss:$72 sps:$4 sm:$0xff]  }
 0x2fb   :  { %4451 = vmatpush1.bf16.msra.mxu0 %v6509_v44  ;;  %4370 = vmatprep.subr.bf16.mxu1 %v6514_v45  ;;  %v6587_v44 = vld [vmem:[#allocation6 + $0xc10] ss:$72 sps:$4 sm:$0xff]   ;;  %v6592_v45 = vld [vmem:[#allocation6 + $0xc9c] ss:$72 sps:$4 sm:$0xff]  }
 0x2fc   :  { %4452 = vmatprep.subr.bf16.mxu0 %v6517_v46 }
 0x2fe   :  { %4371 = vmatpush1.bf16.msra.mxu1 %v6512_v47  ;;  %v6590_v47 = vld [vmem:[#allocation6 + $0xc98] ss:$72 sps:$4 sm:$0xff]  }
 0x2ff   :  { %4453 = vmatpush1.bf16.msra.mxu0 %v6515_v48  ;;  %4372 = vmatprep.subr.bf16.mxu1 %v6520_v49  ;;  %v6595_v48 = vld [vmem:[#allocation6 + $0xca4] ss:$72 sps:$4 sm:$0xff]  }
 0x300   :  { %4454 = vmatprep.subr.bf16.mxu0 %v6523_v51 }
 0x302   :  { %4373 = vmatpush1.bf16.msra.mxu1 %v6518_v52 }
 0x303   :  { %4455 = vmatpush1.bf16.msra.mxu0 %v6521_v53  ;;  %4374 = vmatprep.subr.bf16.mxu1 %v6526_v55  ;;  %v6593_v53 = vld [vmem:[#allocation6 + $0xca0] ss:$72 sps:$4 sm:$0xff]   ;;  %v6598_v55 = vld [vmem:[#allocation6 + $0xd2c] ss:$72 sps:$4 sm:$0xff]  }
 0x304   :  { %4456 = vmatprep.subr.bf16.mxu0 %v6529_v56 }
 0x306   :  { %4375 = vmatpush1.bf16.msra.mxu1 %v6524_v57 }
 0x307   :  { %4457 = vmatpush1.bf16.msra.mxu0 %v6527_v58  ;;  %4376 = vmatprep.subr.bf16.mxu1 %v6532_v59 }
 0x308   :  { %4458 = vmatprep.subr.bf16.mxu0 %v6535_v60 }
 0x30a   :  { %4377 = vmatpush1.bf16.msra.mxu1 %v6530_v63 }
 0x30b   :  { %4459 = vmatpush1.bf16.msra.mxu0 %v6533_v2  ;;  %4378 = vmatprep.subr.bf16.mxu1 %v6538_v3 }
 0x30c   :  { %4460 = vmatprep.subr.bf16.mxu0 %v6541_v4 }
 0x30e   :  { %4379 = vmatpush1.bf16.msra.mxu1 %v6536_v5 }
 0x30f   :  { %4461 = vmatpush1.bf16.msra.mxu0 %v6539_v6  ;;  %4380 = vmatprep.subr.bf16.mxu1 %v6544_v7 }
 0x310   :  { %4462 = vmatprep.subr.bf16.mxu0 %v6547_v8 }
 0x312   :  { %4381 = vmatpush1.bf16.msra.mxu1 %v6542_v9  ;;  %v6601_v9 = vld [vmem:[#allocation6 + $0xd34] ss:$72 sps:$4 sm:$0xff]  }
 0x313   :  { %4463 = vmatpush1.bf16.msra.mxu0 %v6545_v10  ;;  %4382 = vmatprep.subr.bf16.mxu1 %v6550_v11 }
 0x314   :  { %4464 = vmatprep.subr.bf16.mxu0 %v6553_v12 }
 0x316   :  { %4383 = vmatpush1.bf16.msra.mxu1 %v6548_v13 }
 0x317   :  { %4465 = vmatpush1.bf16.msra.mxu0 %v6551_v14  ;;  %4393 = vmatprep.subr.bf16.mxu1 %v6556_v15  ;;  %v6596_v14 = vld [vmem:[#allocation6 + $0xd28] ss:$72 sps:$4 sm:$0xff]  }
 0x318   :  { %4475 = vmatprep.subr.bf16.mxu0 %v6559_v16 }
 0x319   :  { %4385 = vmatmul.mubr.bf16.vlgmr.msra.gmra.mrb[20].mxu1 %v6896_v0 }
 0x31a   :  { %4467 = vmatmul.mubr.bf16.vlgmr.msra.gmra.mrb[20].mxu0 %v6896_v0  ;;  %4394 = vmatpush1.bf16.msra.mxu1 %v6554_v17  ;;  %v6577_v0 = vld [vmem:[#allocation6 + $0xaf4] ss:$72 sps:$4 sm:$0xff]   ;;  %v6599_v17 = vld [vmem:[#allocation6 + $0xd30] ss:$72 sps:$4 sm:$0xff]  }
 0x31b   :  { %4425 = vmatprep.mubr.bf16.mxu1 %v6898_v1  ;;  %4476 = vmatpush1.bf16.msra.mxu0 %v6557_v18  ;;  %v6604_v18 = vld [vmem:[#allocation6 + $0xdbc] ss:$72 sps:$4 sm:$0xff]  }
 0x31c   :  { %4507 = vmatprep.mubr.bf16.mxu0 %v6898_v1  ;;  %4395 = vmatprep.subr.bf16.mxu1 %v6562_v62  ;;  %v6578_v1 = vld [vmem:[#allocation6 + $0xb78] ss:$72 sps:$4 sm:$0xff]  }
 0x31d   :  { %4477 = vmatprep.subr.bf16.mxu0 %v6565_v19 }
 0x31e   :  { %4396 = vmatpush1.bf16.msra.mxu1 %v6560_v20  ;;  %v6607_v20 = vld [vmem:[#allocation6 + $0xdc4] ss:$72 sps:$4 sm:$0xff]  }
 0x31f   :  { %4478 = vmatpush1.bf16.msra.mxu0 %v6563_v22  ;;  %4397 = vmatprep.subr.bf16.mxu1 %v6568_v23 }
 0x320   :  { %4479 = vmatprep.subr.bf16.mxu0 %v6571_v24 }
 0x322   :  { %4398 = vmatpush1.bf16.msra.mxu1 %v6566_v25 }
 0x323   :  { %4480 = vmatpush1.bf16.msra.mxu0 %v6569_v28  ;;  %4399 = vmatprep.subr.bf16.mxu1 %v6574_v29  ;;  %v6602_v28 = vld [vmem:[#allocation6 + $0xdb8] ss:$72 sps:$4 sm:$0xff]  }
 0x324   :  { %4481 = vmatprep.subr.bf16.mxu0 %v6577_v0 }
 0x326   :  { %4400 = vmatpush1.bf16.msra.mxu1 %v6572_v31  ;;  %v6605_v31 = vld [vmem:[#allocation6 + $0xdc0] ss:$72 sps:$4 sm:$0xff]  }
 0x327   :  { %4482 = vmatpush1.bf16.msra.mxu0 %v6575_v34  ;;  %4401 = vmatprep.subr.bf16.mxu1 %v6580_v35  ;;  %v6610_v34 = vld [vmem:[#allocation6 + $0xe4c] ss:$72 sps:$4 sm:$0xff]  }
 0x328   :  { %4483 = vmatprep.subr.bf16.mxu0 %v6583_v36 }
 0x32a   :  { %4402 = vmatpush1.bf16.msra.mxu1 %v6578_v1  ;;  %v6613_v1 = vld [vmem:[#allocation6 + $0xe54] ss:$72 sps:$4 sm:$0xff]  }
 0x32b   :  { %4484 = vmatpush1.bf16.msra.mxu0 %v6581_v38  ;;  %4403 = vmatprep.subr.bf16.mxu1 %v6586_v40 }
 0x32c   :  { %v6962_v46 = vpop.f32.mrb[12].mxu1  ;;  %4485 = vmatprep.subr.bf16.mxu0 %v6589_v42 }
 0x32d   :  { %v4559_v49 = vsel %vm4516_vm0, %v6962_v46, 0.0  ;;  %v6966_v51 = vpop.f32.mrb[12].mxu0  ;;  %v6968_v52 = vpop.f32.mrb[13].mxu1 }
 0x32e   :  { %v4560_v56 = vrot.slane %v4559_v49, 4  ;;  %v4573_v57 = vsel %vm4516_vm0, %v6966_v51, 0.0  ;;  %v4566_v58 = vsel %vm4516_vm0, %v6968_v52, 0.0  ;;  %v6974_v59 = vpop.f32.mrb[13].mxu0  ;;  %v4103_v60 = vpop.f32.mrb[14].mxu1  ;;  %4404 = vmatpush1.bf16.msra.mxu1 %v6584_v43 }
 0x32f   :  { %v4574_v63 = vrot.slane %v4573_v57, 4  ;;  %v4567_v2 = vrot.slane %v4566_v58, 4  ;;  %v4580_v3 = vsel %vm4516_vm0, %v6974_v59, 0.0  ;;  %v4185_v4 = vpop.f32.mrb[14].mxu0  ;;  %4486 = vmatpush1.bf16.msra.mxu0 %v6587_v44  ;;  %v4104_v5 = vpop.f32.mrb[15].mxu1  ;;  %4405 = vmatprep.subr.bf16.mxu1 %v6592_v45 }
 0x330   :  { %v4561_v6 = vadd.f32 %v4560_v56, %v4559_v49  ;;  %v4581_v7 = vrot.slane %v4580_v3, 4  ;;  %v4186_v8 = vpop.f32.mrb[15].mxu0  ;;  %4487 = vmatprep.subr.bf16.mxu0 %v6595_v48  ;;  %v6608_v43 = vld [vmem:[#allocation6 + $0xe48] ss:$72 sps:$4 sm:$0xff]   ;;  %v6616_v48 = vld [vmem:[#allocation6 + $0xedc] ss:$72 sps:$4 sm:$0xff]  }
 0x331   :  { %v4575_v10 = vadd.f32 %v4574_v63, %v4573_v57  ;;  %v4568_v11 = vadd.f32 %v4567_v2, %v4566_v58  ;;  %v6614_v56 = vld [vmem:[#allocation6 + $0xed8] ss:$72 sps:$4 sm:$0xff]   ;;  %v6622_v57 = vld [vmem:[#allocation6 + $0xf6c] ss:$72 sps:$4 sm:$0xff]   ;;  %v6628_v63 = vld [vmem:[#allocation6 + $0xffc] ss:$72 sps:$4 sm:$0xff]  }
 0x332   :  { %v4562_v12 = vrot.slane %v4561_v6, 2  ;;  %v4582_v13 = vadd.f32 %v4581_v7, %v4580_v3  ;;  %4406 = vmatpush1.bf16.msra.mxu1 %v6590_v47  ;;  %v6611_v47 = vld [vmem:[#allocation6 + $0xe50] ss:$72 sps:$4 sm:$0xff]   ;;  %v6625_v58 = vld [vmem:[#allocation6 + $0xf74] ss:$72 sps:$4 sm:$0xff]  }
 0x333   :  { %v4576_v15 = vrot.slane %v4575_v10, 2  ;;  %v4569_v16 = vrot.slane %v4568_v11, 2  ;;  %4488 = vmatpush1.bf16.msra.mxu0 %v6593_v53  ;;  %4407 = vmatprep.subr.bf16.mxu1 %v6598_v55  ;;  %v6619_v53 = vld [vmem:[#allocation6 + $0xee4] ss:$72 sps:$4 sm:$0xff]   ;;  %v6623_v60 = vld [vmem:[#allocation6 + $0xf70] ss:$72 sps:$4 sm:$0xff]  }
 0x334   :  { %v4563_v62 = vadd.f32 %v4562_v12, %v4561_v6  ;;  %v4583_v19 = vrot.slane %v4582_v13, 2  ;;  %4489 = vmatprep.subr.bf16.mxu0 %v6601_v9  ;;  %v6631_v2 = vld [vmem:[#allocation6 + $0x1004] ss:$72 sps:$4 sm:$0xff]   ;;  %v6626_v3 = vld [vmem:[#allocation6 + $0xff8] ss:$72 sps:$4 sm:$0xff]  }
 0x335   :  { %v4577_v22 = vadd.f32 %v4576_v15, %v4575_v10  ;;  %v4570_v23 = vadd.f32 %v4569_v16, %v4568_v11  ;;  %v6629_v4 = vld [vmem:[#allocation6 + $0x1000] ss:$72 sps:$4 sm:$0xff]   ;;  %v6634_v5 = vld [vmem:[#allocation6 + $0x108c] ss:$72 sps:$4 sm:$0xff]   ;;  %v6635_v8 = vld [vmem:[#allocation6 + $0x1090] ss:$72 sps:$4 sm:$0xff]  }
 0x336   :  { %v4564_v24 = vrot.slane %v4563_v62, 1  ;;  %v4584_v25 = vadd.f32 %v4583_v19, %v4582_v13  ;;  %4408 = vmatpush1.bf16.msra.mxu1 %v6596_v14  ;;  %v6637_v6 = vld [vmem:[#allocation6 + $0x1094] ss:$72 sps:$4 sm:$0xff]   ;;  %v6632_v7 = vld [vmem:[#allocation6 + $0x1088] ss:$72 sps:$4 sm:$0xff]  }
 0x337   :  { %v4578_v29 = vrot.slane %v4577_v22, 1  ;;  %v4571_v0 = vrot.slane %v4570_v23, 1  ;;  %4490 = vmatpush1.bf16.msra.mxu0 %v6599_v17  ;;  %4409 = vmatprep.subr.bf16.mxu1 %v6604_v18  ;;  %v6640_v9 = vld [vmem:[#allocation6 + $0x111c] ss:$72 sps:$4 sm:$0xff]   ;;  %v6638_v11 = vld [vmem:[#allocation6 + $0x1118] ss:$72 sps:$4 sm:$0xff]  }
 0x338   :  { %v4565_v35 = vadd.f32 %v4564_v24, %v4563_v62  ;;  %v4585_v36 = vrot.slane %v4584_v25, 1  ;;  %4491 = vmatprep.subr.bf16.mxu0 %v6607_v20  ;;  %v6643_v10 = vld [vmem:[#allocation6 + $0x1124] ss:$72 sps:$4 sm:$0xff]   ;;  %v6641_v12 = vld [vmem:[#allocation6 + $0x1120] ss:$72 sps:$4 sm:$0xff]  }
 0x339   :  { %v4572_v38 = vadd.f32 %v4571_v0, %v4570_v23  ;;  %v4579_v42 = vadd.f32 %v4578_v29, %v4577_v22  ;;  %v6646_v13 = vld [vmem:[#allocation6 + $0x11ac] ss:$72 sps:$4 sm:$0xff]   ;;  %v6644_v15 = vld [vmem:[#allocation6 + $0x11a8] ss:$72 sps:$4 sm:$0xff]  }
 0x33a   :  { %v4647_v40 = vadd.f32 %v6950_v30, %v4565_v35  ;;  %4410 = vmatpush1.bf16.msra.mxu1 %v6602_v28  ;;  %v4586_v45 = vadd.f32 %v4585_v36, %v4584_v25  ;;  %v6617_v30 = vld [vmem:[#allocation6 + $0xee0] ss:$72 sps:$4 sm:$0xff]   ;;  %v6649_v14 = vld [vmem:[#allocation6 + $0x11b4] ss:$72 sps:$4 sm:$0xff]   ;;  %v6647_v16 = vld [vmem:[#allocation6 + $0x11b0] ss:$72 sps:$4 sm:$0xff]  }
 0x33b   :  { %v4648_v44 = vadd.f32 %v6952_v32, %v4572_v38  ;;  %4492 = vmatpush1.bf16.msra.mxu0 %v6605_v31  ;;  %4411 = vmatprep.subr.bf16.mxu1 %v6610_v34  ;;  %v6620_v32 = vld [vmem:[#allocation6 + $0xf68] ss:$72 sps:$4 sm:$0xff]  }
 0x33c   :  { %v6980_v49 = vadd.f32 %v4647_v40, %v4579_v42  ;;  %4493 = vmatprep.subr.bf16.mxu0 %v6613_v1 }
 0x33d   :  { %v6982_v55 = vadd.f32 %v4648_v44, %v4586_v45 }
 0x33e   :  { %4412 = vmatpush1.bf16.msra.mxu1 %v6608_v43 }
 0x33f   :  { %4494 = vmatpush1.bf16.msra.mxu0 %v6611_v47  ;;  %4413 = vmatprep.subr.bf16.mxu1 %v6616_v48 }
 0x340   :  { %4495 = vmatprep.subr.bf16.mxu0 %v6619_v53 }
 0x342   :  { %4414 = vmatpush1.bf16.msra.mxu1 %v6614_v56 }
 0x343   :  { %4496 = vmatpush1.bf16.msra.mxu0 %v6617_v30  ;;  %4415 = vmatprep.subr.bf16.mxu1 %v6622_v57 }
 0x344   :  { %4497 = vmatprep.subr.bf16.mxu0 %v6625_v58 }
 0x346   :  { %4416 = vmatpush1.bf16.msra.mxu1 %v6620_v32 }
 0x347   :  { %4498 = vmatpush1.bf16.msra.mxu0 %v6623_v60  ;;  %4417 = vmatprep.subr.bf16.mxu1 %v6628_v63 }
 0x348   :  { %4499 = vmatprep.subr.bf16.mxu0 %v6631_v2 }
 0x34a   :  { %4418 = vmatpush1.bf16.msra.mxu1 %v6626_v3 }
 0x34b   :  { %4500 = vmatpush1.bf16.msra.mxu0 %v6629_v4  ;;  %4419 = vmatprep.subr.bf16.mxu1 %v6634_v5 }
 0x34c   :  { %4501 = vmatprep.subr.bf16.mxu0 %v6637_v6 }
 0x34e   :  { %4420 = vmatpush1.bf16.msra.mxu1 %v6632_v7 }
 0x34f   :  { %4502 = vmatpush1.bf16.msra.mxu0 %v6635_v8  ;;  %4421 = vmatprep.subr.bf16.mxu1 %v6640_v9 }
 0x350   :  { %4503 = vmatprep.subr.bf16.mxu0 %v6643_v10 }
 0x352   :  { %4422 = vmatpush1.bf16.msra.mxu1 %v6638_v11 }
 0x353   :  { %4504 = vmatpush1.bf16.msra.mxu0 %v6641_v12  ;;  %4423 = vmatprep.subr.bf16.mxu1 %v6646_v13 }
 0x354   :  { %4505 = vmatprep.subr.bf16.mxu0 %v6649_v14 }
 0x356   :  { %4424 = vmatpush1.bf16.msra.mxu1 %v6644_v15 }
 0x357   :  { %4506 = vmatpush1.bf16.msra.mxu0 %v6647_v16 }
 0x359   :  { %4426 = vmatmul.mubr.bf16.vlgmr.msra.gmra.mrb[20].mxu1 %v6892_v61 }
 0x35a   :  { %4508 = vmatmul.mubr.bf16.vlgmr.msra.gmra.mrb[20].mxu0 %v6892_v61 }
 0x3ac   :  { %v6986_v17 = vpop.f32.mrb[16].mxu1 }
 0x3ad   :  { %v4587_v18 = vsel %vm4516_vm0, %v6986_v17, 0.0  ;;  %v6990_v62 = vpop.f32.mrb[16].mxu0  ;;  %v6992_v19 = vpop.f32.mrb[17].mxu1 }
 0x3ae   :  { %v4588_v20 = vrot.slane %v4587_v18, 4  ;;  %v4601_v22 = vsel %vm4516_vm0, %v6990_v62, 0.0  ;;  %v4594_v23 = vsel %vm4516_vm0, %v6992_v19, 0.0  ;;  %v6998_v24 = vpop.f32.mrb[17].mxu0  ;;  %v4267_v25 = vpop.f32.mrb[18].mxu1 }
 0x3af   :  { %v4602_v61 = vrot.slane %v4601_v22, 4  ;;  %v4595_v28 = vrot.slane %v4594_v23, 4  ;;  %v4608_v29 = vsel %vm4516_vm0, %v6998_v24, 0.0  ;;  %v4349_v0 = vpop.f32.mrb[18].mxu0  ;;  %v4268_v31 = vpop.f32.mrb[19].mxu1 }
 0x3b0   :  { %v4589_v34 = vadd.f32 %v4588_v20, %v4587_v18  ;;  %v4609_v35 = vrot.slane %v4608_v29, 4  ;;  %v4350_v36 = vpop.f32.mrb[19].mxu0 }
 0x3b1   :  { %v4603_v1 = vadd.f32 %v4602_v61, %v4601_v22  ;;  %v4596_v38 = vadd.f32 %v4595_v28, %v4594_v23 }
 0x3b2   :  { %v4590_v40 = vrot.slane %v4589_v34, 2  ;;  %v4610_v42 = vadd.f32 %v4609_v35, %v4608_v29 }
 0x3b3   :  { %v4604_v43 = vrot.slane %v4603_v1, 2  ;;  %v4597_v44 = vrot.slane %v4596_v38, 2 }
 0x3b4   :  { %v4591_v45 = vadd.f32 %v4590_v40, %v4589_v34  ;;  %v4611_v47 = vrot.slane %v4610_v42, 2 }
 0x3b5   :  { %v4605_v48 = vadd.f32 %v4604_v43, %v4603_v1  ;;  %v4598_v53 = vadd.f32 %v4597_v44, %v4596_v38 }
 0x3b6   :  { %v4592_v56 = vrot.slane %v4591_v45, 1  ;;  %v4612_v30 = vadd.f32 %v4611_v47, %v4610_v42 }
 0x3b7   :  { %v4606_v57 = vrot.slane %v4605_v48, 1  ;;  %v4599_v58 = vrot.slane %v4598_v53, 1 }
 0x3b8   :  { %v4593_v32 = vadd.f32 %v4592_v56, %v4591_v45  ;;  %v4613_v60 = vrot.slane %v4612_v30, 1 }
 0x3b9   :  { %v4600_v63 = vadd.f32 %v4599_v58, %v4598_v53  ;;  %v4607_v3 = vadd.f32 %v4606_v57, %v4605_v48 }
 0x3ba   :  { %v4651_v2 = vadd.f32 %v6980_v49, %v4593_v32  ;;  %v4614_v5 = vadd.f32 %v4613_v60, %v4612_v30 }
 0x3bb   :  { %v4652_v4 = vadd.f32 %v6982_v55, %v4600_v63 }
 0x3bc   :  { %v4653_v6 = vadd.f32 %v4651_v2, %v4607_v3 }
 0x3bd   :  { %v4654_v7 = vadd.f32 %v4652_v4, %v4614_v5 }
 0x42c   :  { %v7004_v8 = vpop.f32.mrb[20].mxu1 }
 0x42d   :  { %v4615_v9 = vsel %vm4516_vm0, %v7004_v8, 0.0  ;;  %v7008_v10 = vpop.f32.mrb[20].mxu0  ;;  %v7010_v11 = vpop.f32.mrb[21].mxu1 }
 0x42e   :  { %v4616_v12 = vrot.slane %v4615_v9, 4  ;;  %v4629_v13 = vsel %vm4516_vm0, %v7008_v10, 0.0  ;;  %v4622_v49 = vsel %vm4516_vm0, %v7010_v11, 0.0  ;;  %v7016_v55 = vpop.f32.mrb[21].mxu0  ;;  %v4431_v14 = vpop.f32.mrb[22].mxu1 }
 0x42f   :  { %v4630_v15 = vrot.slane %v4629_v13, 4  ;;  %v4623_v16 = vrot.slane %v4622_v49, 4  ;;  %v4636_v18 = vsel %vm4516_vm0, %v7016_v55, 0.0  ;;  %v4513_v20 = vpop.f32.mrb[22].mxu0  ;;  %v4432_v22 = vpop.f32.mrb[23].mxu1 }
 0x430   :  { %v4617_v23 = vadd.f32 %v4616_v12, %v4615_v9  ;;  %v4637_v25 = vrot.slane %v4636_v18, 4  ;;  %v4514_v61 = vpop.f32.mrb[23].mxu0 }
 0x431   :  { %v4631_v28 = vadd.f32 %v4630_v15, %v4629_v13  ;;  %v4624_v29 = vadd.f32 %v4623_v16, %v4622_v49 }
 0x432   :  { %v4618_v0 = vrot.slane %v4617_v23, 2  ;;  %v4638_v31 = vadd.f32 %v4637_v25, %v4636_v18 }
 0x433   :  { %v4632_v34 = vrot.slane %v4631_v28, 2  ;;  %v4625_v35 = vrot.slane %v4624_v29, 2 }
 0x434   :  { %v4619_v36 = vadd.f32 %v4618_v0, %v4617_v23  ;;  %v4639_v1 = vrot.slane %v4638_v31, 2 }
 0x435   :  { %v4633_v38 = vadd.f32 %v4632_v34, %v4631_v28  ;;  %v4626_v40 = vadd.f32 %v4625_v35, %v4624_v29 }
 0x436   :  { %v4620_v42 = vrot.slane %v4619_v36, 1  ;;  %v4640_v43 = vadd.f32 %v4639_v1, %v4638_v31 }
 0x437   :  { %v4634_v44 = vrot.slane %v4633_v38, 1  ;;  %v4627_v45 = vrot.slane %v4626_v40, 1 }
 0x438   :  { %v4621_v47 = vadd.f32 %v4620_v42, %v4619_v36  ;;  %v4641_v48 = vrot.slane %v4640_v43, 1 }
 0x439   :  { %v4628_v53 = vadd.f32 %v4627_v45, %v4626_v40  ;;  %v4635_v30 = vadd.f32 %v4634_v44, %v4633_v38 }
 0x43a   :  { %v4655_v56 = vadd.f32 %v4653_v6, %v4621_v47  ;;  %v4642_v58 = vadd.f32 %v4641_v48, %v4640_v43 }
 0x43b   :  { %v4656_v57 = vadd.f32 %v4654_v7, %v4628_v53 }
 0x43c   :  { %v4657_v32 = vadd.f32 %v4655_v56, %v4635_v30 }
 0x43d   :  { %v4658_v60 = vadd.f32 %v4656_v57, %v4642_v58 }
 0x43e   :  { %v7020_v63 = vmul.f32 0.055555556, %v4657_v32 }
 0x43f   :  { %v7022_v2 = vmul.f32 0.055555556, %v4658_v60 }
 0x440   :  { %v4665_v3 = vrot.slane %v7020_v63, %v6883_v39 }
 0x441   :  { %v7028_v4 = vrot.slane %v7022_v2, %v6883_v39 }
 0x442   :  { %v4670_v5 = vsub.f32 %v6918_v50, %v4665_v3  ;;  %v4672_v6 = vsub.f32 %v6934_v21, %v4665_v3  ;;  %v4674_v7 = vsub.f32 %v6938_v26, %v4665_v3  ;;  %v4676_v9 = vsub.f32 %v6962_v46, %v4665_v3 }
 0x443   :  { %v4678_v12 = vsub.f32 %v6966_v51, %v4665_v3  ;;  %v4680_v13 = vsub.f32 %v6986_v17, %v4665_v3  ;;  %v4682_v49 = vsub.f32 %v6990_v62, %v4665_v3  ;;  %v4684_v14 = vsub.f32 %v7004_v8, %v4665_v3 }
 0x444   :  { %v4686_v15 = vsub.f32 %v7008_v10, %v4665_v3  ;;  %v4688_v16 = vmul.f32 %v4670_v5, %v4670_v5  ;;  %v4690_v18 = vmul.f32 %v4672_v6, %v4672_v6  ;;  %v4692_v20 = vmul.f32 %v4674_v7, %v4674_v7 }
 0x445   :  { %v4694_v22 = vmul.f32 %v4676_v9, %v4676_v9  ;;  %v4696_v23 = vmul.f32 %v4678_v12, %v4678_v12  ;;  %v4698_v25 = vmul.f32 %v4680_v13, %v4680_v13  ;;  %v4700_v61 = vmul.f32 %v4682_v49, %v4682_v49 }
 0x446   :  { %v4702_v28 = vmul.f32 %v4684_v14, %v4684_v14  ;;  %v4704_v29 = vmul.f32 %v4686_v15, %v4686_v15  ;;  %v4706_v0 = vsel %vm4516_vm0, %v4688_v16, 0.0  ;;  %v4720_v31 = vsel %vm4516_vm0, %v4690_v18, 0.0 }
 0x447   :  { %v4707_v34 = vrot.slane %v4706_v0, 4  ;;  %v4721_v35 = vrot.slane %v4720_v31, 4  ;;  %v4734_v36 = vsel %vm4516_vm0, %v4692_v20, 0.0  ;;  %v4748_v1 = vsel %vm4516_vm0, %v4694_v22, 0.0 }
 0x448   :  { %v4735_v38 = vrot.slane %v4734_v36, 4  ;;  %v4749_v40 = vrot.slane %v4748_v1, 4  ;;  %v4762_v42 = vsel %vm4516_vm0, %v4696_v23, 0.0  ;;  %v4776_v43 = vsel %vm4516_vm0, %v4698_v25, 0.0 }
 0x449   :  { %v4708_v44 = vadd.f32 %v4707_v34, %v4706_v0  ;;  %v4722_v45 = vadd.f32 %v4721_v35, %v4720_v31  ;;  %v4763_v47 = vrot.slane %v4762_v42, 4  ;;  %v4777_v48 = vrot.slane %v4776_v43, 4 }
 0x44a   :  { %v4736_v53 = vadd.f32 %v4735_v38, %v4734_v36  ;;  %v4750_v56 = vadd.f32 %v4749_v40, %v4748_v1  ;;  %v4790_v30 = vsel %vm4516_vm0, %v4700_v61, 0.0  ;;  %v4804_v57 = vsel %vm4516_vm0, %v4702_v28, 0.0 }
 0x44b   :  { %v4709_v58 = vrot.slane %v4708_v44, 2  ;;  %v4723_v32 = vrot.slane %v4722_v45, 2  ;;  %v4764_v60 = vadd.f32 %v4763_v47, %v4762_v42  ;;  %v4778_v3 = vadd.f32 %v4777_v48, %v4776_v43 }
 0x44c   :  { %v4737_v5 = vrot.slane %v4736_v53, 2  ;;  %v4751_v6 = vrot.slane %v4750_v56, 2  ;;  %v4791_v7 = vrot.slane %v4790_v30, 4  ;;  %v4805_v9 = vrot.slane %v4804_v57, 4 }
 0x44d   :  { %v4710_v12 = vadd.f32 %v4709_v58, %v4708_v44  ;;  %v4724_v13 = vadd.f32 %v4723_v32, %v4722_v45  ;;  %v4765_v49 = vrot.slane %v4764_v60, 2  ;;  %v4779_v14 = vrot.slane %v4778_v3, 2 }
 0x44e   :  { %v4738_v15 = vadd.f32 %v4737_v5, %v4736_v53  ;;  %v4752_v16 = vadd.f32 %v4751_v6, %v4750_v56  ;;  %v4792_v18 = vadd.f32 %v4791_v7, %v4790_v30  ;;  %v4806_v20 = vadd.f32 %v4805_v9, %v4804_v57 }
 0x44f   :  { %v4711_v22 = vrot.slane %v4710_v12, 1  ;;  %v4725_v23 = vrot.slane %v4724_v13, 1  ;;  %v4766_v25 = vadd.f32 %v4765_v49, %v4764_v60  ;;  %v4780_v61 = vadd.f32 %v4779_v14, %v4778_v3 }
 0x450   :  { %v4739_v28 = vrot.slane %v4738_v15, 1  ;;  %v4753_v0 = vrot.slane %v4752_v16, 1  ;;  %v4793_v31 = vrot.slane %v4792_v18, 2  ;;  %v4807_v34 = vrot.slane %v4806_v20, 2 }
 0x451   :  { %v4712_v35 = vadd.f32 %v4711_v22, %v4710_v12  ;;  %v4726_v36 = vadd.f32 %v4725_v23, %v4724_v13  ;;  %v4767_v1 = vrot.slane %v4766_v25, 1  ;;  %v4781_v38 = vrot.slane %v4780_v61, 1 }
 0x452   :  { %v4740_v40 = vadd.f32 %v4739_v28, %v4738_v15  ;;  %v4794_v42 = vadd.f32 %v4793_v31, %v4792_v18  ;;  %v4808_v43 = vadd.f32 %v4807_v34, %v4806_v20  ;;  %v4754_v44 = vadd.f32 %v4753_v0, %v4752_v16 }
 0x453   :  { %v4768_v45 = vadd.f32 %v4767_v1, %v4766_v25  ;;  %v4818_v47 = vsel %vm4516_vm0, %v4704_v29, 0.0  ;;  %v4832_v48 = vadd.f32 %v4726_v36, %v4712_v35  ;;  %v4782_v53 = vadd.f32 %v4781_v38, %v4780_v61 }
 0x454   :  { %v4795_v56 = vrot.slane %v4794_v42, 1  ;;  %v4819_v30 = vrot.slane %v4818_v47, 4  ;;  %v4671_v57 = vsub.f32 %v6920_v54, %v7028_v4  ;;  %v4673_v32 = vsub.f32 %v6940_v27, %v7028_v4 }
 0x455   :  { %v4834_v58 = vadd.f32 %v4832_v48, %v4740_v40  ;;  %v4675_v60 = vsub.f32 %v6946_v33, %v7028_v4  ;;  %v4677_v3 = vsub.f32 %v6968_v52, %v7028_v4  ;;  %v4809_v6 = vrot.slane %v4808_v43, 1 }
 0x456   :  { %v4796_v5 = vadd.f32 %v4795_v56, %v4794_v42  ;;  %v4820_v29 = vadd.f32 %v4819_v30, %v4818_v47  ;;  %v4679_v7 = vsub.f32 %v6974_v59, %v7028_v4  ;;  %v4681_v12 = vsub.f32 %v6992_v19, %v7028_v4 }
 0x457   :  { %v4836_v9 = vadd.f32 %v4834_v58, %v4754_v44  ;;  %v4683_v13 = vsub.f32 %v6998_v24, %v7028_v4  ;;  %v4685_v49 = vsub.f32 %v7010_v11, %v7028_v4  ;;  %v4687_v15 = vsub.f32 %v7016_v55, %v7028_v4 }
 0x458   :  { %v4821_v14 = vrot.slane %v4820_v29, 2  ;;  %v4689_v16 = vmul.f32 %v4671_v57, %v4671_v57  ;;  %v4691_v18 = vmul.f32 %v4673_v32, %v4673_v32  ;;  %v4693_v22 = vmul.f32 %v4675_v60, %v4675_v60 }
 0x459   :  { %v4838_v20 = vadd.f32 %v4836_v9, %v4768_v45  ;;  %v4695_v23 = vmul.f32 %v4677_v3, %v4677_v3  ;;  %v4697_v25 = vmul.f32 %v4679_v7, %v4679_v7  ;;  %v4810_v61 = vadd.f32 %v4809_v6, %v4808_v43 }
 0x45a   :  { %v4822_v28 = vadd.f32 %v4821_v14, %v4820_v29  ;;  %v4699_v0 = vmul.f32 %v4681_v12, %v4681_v12  ;;  %v4701_v31 = vmul.f32 %v4683_v13, %v4683_v13  ;;  %v4703_v35 = vmul.f32 %v4685_v49, %v4685_v49 }
 0x45b   :  { %v4840_v34 = vadd.f32 %v4838_v20, %v4782_v53  ;;  %v4713_v36 = vsel %vm4516_vm0, %v4689_v16, 0.0  ;;  %v4727_v1 = vsel %vm4516_vm0, %v4691_v18, 0.0  ;;  %v4741_v4 = vsel %vm4516_vm0, %v4693_v22, 0.0 }
 0x45c   :  { %v4823_v38 = vrot.slane %v4822_v28, 1  ;;  %v4714_v40 = vrot.slane %v4713_v36, 4  ;;  %v4728_v42 = vrot.slane %v4727_v1, 4  ;;  %v4742_v45 = vrot.slane %v4741_v4, 4 }
 0x45d   :  { %v4842_v44 = vadd.f32 %v4840_v34, %v4796_v5  ;;  %v4755_v47 = vsel %vm4516_vm0, %v4695_v23, 0.0  ;;  %v4769_v43 = vsel %vm4516_vm0, %v4697_v25, 0.0  ;;  %v4783_v60 = vsel %vm4516_vm0, %v4699_v0, 0.0 }
 0x45e   :  { %v4824_v48 = vadd.f32 %v4823_v38, %v4822_v28  ;;  %v4715_v56 = vadd.f32 %v4714_v40, %v4713_v36  ;;  %v4729_v30 = vadd.f32 %v4728_v42, %v4727_v1  ;;  %v4756_v53 = vrot.slane %v4755_v47, 4 }
 0x45f   :  { %v4844_v57 = vadd.f32 %v4842_v44, %v4810_v61  ;;  %v4743_v58 = vadd.f32 %v4742_v45, %v4741_v4  ;;  %v4770_v32 = vrot.slane %v4769_v43, 4  ;;  %v4784_v7 = vrot.slane %v4783_v60, 4 }
 0x460   :  { %v4716_v3 = vrot.slane %v4715_v56, 2  ;;  %v4730_v6 = vrot.slane %v4729_v30, 2  ;;  %v4757_v29 = vadd.f32 %v4756_v53, %v4755_v47  ;;  %v4797_v13 = vsel %vm4516_vm0, %v4701_v31, 0.0 }
 0x461   :  { %v4846_v9 = vadd.f32 %v4844_v57, %v4824_v48  ;;  %v4744_v5 = vrot.slane %v4743_v58, 2  ;;  %v4771_v12 = vadd.f32 %v4770_v32, %v4769_v43  ;;  %v4785_v18 = vadd.f32 %v4784_v7, %v4783_v60 }
 0x462   :  { %v4717_v49 = vadd.f32 %v4716_v3, %v4715_v56  ;;  %v4731_v14 = vadd.f32 %v4730_v6, %v4729_v30  ;;  %v4758_v16 = vrot.slane %v4757_v29, 2  ;;  %v4705_v20 = vmul.f32 %v4687_v15, %v4687_v15 }
 0x463   :  { %v4745_v22 = vadd.f32 %v4744_v5, %v4743_v58  ;;  %v4772_v23 = vrot.slane %v4771_v12, 2  ;;  %v4798_v25 = vrot.slane %v4797_v13, 4  ;;  %v4786_v34 = vrot.slane %v4785_v18, 2 }
 0x464   :  { %v4718_v61 = vrot.slane %v4717_v49, 1  ;;  %v4732_v28 = vrot.slane %v4731_v14, 1  ;;  %v4759_v0 = vadd.f32 %v4758_v16, %v4757_v29  ;;  %v4811_v45 = vsel %vm4516_vm0, %v4703_v35, 0.0 }
 0x465   :  { %v4799_v36 = vadd.f32 %v4798_v25, %v4797_v13  ;;  %v4746_v40 = vrot.slane %v4745_v22, 1  ;;  %v4773_v42 = vadd.f32 %v4772_v23, %v4771_v12  ;;  %v4787_v31 = vadd.f32 %v4786_v34, %v4785_v18 }
 0x466   :  { %v4719_v1 = vadd.f32 %v4718_v61, %v4717_v49  ;;  %v4733_v38 = vadd.f32 %v4732_v28, %v4731_v14  ;;  %v4760_v44 = vrot.slane %v4759_v0, 1  ;;  %v4825_v47 = vsel %vm4516_vm0, %v4705_v20, 0.0 }
 0x467   :  { %v4800_v4 = vrot.slane %v4799_v36, 2  ;;  %v4812_v15 = vrot.slane %v4811_v45, 4  ;;  %v4826_v43 = vrot.slane %v4825_v47, 4  ;;  %v4747_v48 = vadd.f32 %v4746_v40, %v4745_v22 }
 0x468   :  { %v4774_v56 = vrot.slane %v4773_v42, 1  ;;  %v4833_v53 = vadd.f32 %v4733_v38, %v4719_v1  ;;  %v4761_v32 = vadd.f32 %v4760_v44, %v4759_v0  ;;  %v4788_v60 = vrot.slane %v4787_v31, 1 }
 0x469   :  { %v4801_v30 = vadd.f32 %v4800_v4, %v4799_v36  ;;  %v4813_v57 = vadd.f32 %v4812_v15, %v4811_v45  ;;  %v4827_v58 = vadd.f32 %v4826_v43, %v4825_v47  ;;  %v4848_v23 = vmul.f32 0.055555556, %v4846_v9  ;;  %v4850_v9 = vld [vmem:[#allocation7] sm:$0x3] }
 0x46a   :  { %v4835_v3 = vadd.f32 %v4833_v53, %v4747_v48  ;;  %v4775_v7 = vadd.f32 %v4774_v56, %v4773_v42  ;;  %v4789_v49 = vadd.f32 %v4788_v60, %v4787_v31  ;;  %v6780_v40 = vmov 1966171168  }
 0x46b   :  { %v4814_v6 = vrot.slane %v4813_v57, 2  ;;  %v4828_v29 = vrot.slane %v4827_v58, 2  ;;  %v4802_v5 = vrot.slane %v4801_v30, 1  ;;  %v4851_v34 = vadd.f32 1e-05, %v4848_v23 }
 0x46c   :  { %v4837_v12 = vadd.f32 %v4835_v3, %v4761_v32  ;;  %v4859_v42 = vunpack.c.l.s4 %v6780_v40  ;;  %v6781_v60 = vmov 1983009808  }
 0x46d   :  { %v4815_v13 = vadd.f32 %v4814_v6, %v4813_v57  ;;  %v4829_v35 = vadd.f32 %v4828_v29, %v4827_v58  ;;  %v4803_v18 = vadd.f32 %v4802_v5, %v4801_v30  ;;  %6650 = vrsqrt.f32 %v4851_v34 }
 0x46e   :  { %v4839_v14 = vadd.f32 %v4837_v12, %v4775_v7  ;;  %v4860_v4 = vunpack.c.0.s8 %v4859_v42  ;;  %v5009_v3 = vunpack.c.l.s4 %v6781_v60 }
 0x46f   :  { %v4816_v16 = vrot.slane %v4815_v13, 1  ;;  %v4830_v20 = vrot.slane %v4829_v35, 1 }
 0x470   :  { %v4841_v22 = vadd.f32 %v4839_v14, %v4789_v49  ;;  %v4863_v31 = vsub.s32 %v4860_v4, %v6880_v37  ;;  %v4874_v14 = vld [vmem:[#allocation9] sm:$0x3] }
 0x471   :  { %v4817_v25 = vadd.f32 %v4816_v16, %v4815_v13  ;;  %v4831_v28 = vadd.f32 %v4830_v20, %v4829_v35 }
 0x472   :  { %v4843_v61 = vadd.f32 %v4841_v22, %v4803_v18 }
 0x474   :  { %v4845_v0 = vadd.f32 %v4843_v61, %v4817_v25 }
 0x476   :  { %v4847_v36 = vadd.f32 %v4845_v0, %v4831_v28 }
 0x477   :  { %v6651_v44 = vpop.eup %6650 }
 0x478   :  { %v4849_v1 = vmul.f32 0.055555556, %v4847_v36 }
 0x47a   :  { %v4852_v38 = vadd.f32 1e-05, %v4849_v1 }
 0x47c   :  { %6652 = vrsqrt.f32 %v4852_v38 }
 0x486   :  { %v6653_v45 = vpop.eup %6652 }
 0x487   :  { %v4857_v47 = vcombine.low %v6651_v44, %v6653_v45 }
 0x489   :  { %v4864_v15 = vrot.slane %v4857_v47, %v4863_v31 }
 0x48b   :  { %v4871_v43 = vrot.slane %v4864_v15, %v4863_v31 }
 0x48d   :  { %v4873_v48 = vmul.f32 %v4871_v43, %v4850_v9 }
 0x48f   :  { %v4879_v56 = vrot.slane %v4873_v48, %v6883_v39  ;;  %v4883_v30 = vrot.slane %v4873_v48, %v6887_v41 }
 0x491   :  { %v4886_v53 = vmul.f32 %v4879_v56, %v7020_v63  ;;  %v4887_v57 = vmul.f32 %v4883_v30, %v7022_v2  ;;  %v4921_v58 = vrot.slane %v4879_v56, %v6883_v39  ;;  %v4925_v32 = vrot.slane %v4883_v30, %v6883_v39 }
 0x493   :  { %v4890_v6 = vcombine.low %v4886_v53, %v4887_v57  ;;  %v4928_v29 = vmul.f32 %v4921_v58, %v6934_v21  ;;  %v4929_v7 = vmul.f32 %v4925_v32, %v6940_v27  ;;  %v4930_v5 = vmul.f32 %v4921_v58, %v6938_v26 }
 0x494   :  { %v4931_v12 = vmul.f32 %v4925_v32, %v6946_v33  ;;  %v4932_v13 = vmul.f32 %v4921_v58, %v6962_v46  ;;  %v4933_v2 = vmul.f32 %v4925_v32, %v6968_v52  ;;  %v4934_v35 = vmul.f32 %v4921_v58, %v6966_v51 }
 0x495   :  { %v4897_v63 = vrot.slane %v4890_v6, %v4863_v31  ;;  %v4935_v49 = vmul.f32 %v4925_v32, %v6974_v59  ;;  %v4936_v16 = vmul.f32 %v4921_v58, %v6986_v17  ;;  %v4937_v21 = vmul.f32 %v4925_v32, %v6992_v19 }
 0x496   :  { %v4938_v27 = vmul.f32 %v4921_v58, %v6990_v62  ;;  %v4939_v26 = vmul.f32 %v4925_v32, %v6998_v24  ;;  %v4940_v33 = vmul.f32 %v4921_v58, %v7004_v8  ;;  %v4941_v46 = vmul.f32 %v4925_v32, %v7010_v11 }
 0x497   :  { %v4904_v18 = vrot.slane %v4897_v63, %v4863_v31  ;;  %v4942_v52 = vmul.f32 %v4921_v58, %v7008_v10  ;;  %v4943_v51 = vmul.f32 %v4925_v32, %v7016_v55  ;;  %v5010_v59 = vunpack.c.0.s8 %v5009_v3 }
 0x498   :  { %v4926_v19 = vmul.f32 %v4921_v58, %v6918_v50  ;;  %v4927_v62 = vmul.f32 %v4925_v32, %v6920_v54 }
 0x499   :  { %v4906_v20 = vsub.f32 %v4874_v14, %v4904_v18  ;;  %v5013_v11 = vsub.s32 %v5010_v59, %v6880_v37 }
 0x49b   :  { %v4911_v22 = vrot.slane %v4906_v20, %v6883_v39  ;;  %v4915_v17 = vrot.slane %v4906_v20, %v6887_v41 }
 0x49d   :  { %v4947_v24 = vrot.slane %v4911_v22, %v6883_v39  ;;  %v4951_v8 = vrot.slane %v4915_v17, %v6883_v39 }
 0x49f   :  { %v4952_v23 = vadd.f32 %v4947_v24, %v4926_v19  ;;  %v4953_v10 = vadd.f32 %v4951_v8, %v4927_v62  ;;  %v4954_v25 = vadd.f32 %v4947_v24, %v4928_v29  ;;  %v4955_v55 = vadd.f32 %v4951_v8, %v4929_v7 }
 0x4a0   :  { %v4956_v61 = vadd.f32 %v4947_v24, %v4930_v5  ;;  %v4957_v28 = vadd.f32 %v4951_v8, %v4931_v12  ;;  %v4958_v0 = vadd.f32 %v4947_v24, %v4932_v13  ;;  %v4959_v34 = vadd.f32 %v4951_v8, %v4933_v2 }
 0x4a1   :  { %v4960_v36 = vadd.f32 %v4947_v24, %v4934_v35  ;;  %v4961_v41 = vadd.f32 %v4951_v8, %v4935_v49  ;;  %v4962_v1 = vadd.f32 %v4947_v24, %v4936_v16  ;;  %v4963_v50 = vadd.f32 %v4951_v8, %v4937_v21 }
 0x4a2   :  { %v4964_v38 = vadd.f32 %v4947_v24, %v4938_v27  ;;  %v4965_v54 = vadd.f32 %v4951_v8, %v4939_v26  ;;  %v4966_v40 = vadd.f32 %v4947_v24, %v4940_v33  ;;  %v4967_v42 = vadd.f32 %v4951_v8, %v4941_v46 }
 0x4a3   :  { %v4968_v4 = vadd.f32 %v4947_v24, %v4942_v52  ;;  %v4969_v39 = vadd.f32 %v4951_v8, %v4943_v51  ;;  %v4970_v44 = vmax.f32 %v4952_v23, 0.0  ;;  %v4971_v37 = vmax.f32 %v4953_v10, 0.0 }
 0x4a4   :  { %v4972_v31 = vmax.f32 %v4954_v25, 0.0  ;;  %v4973_v45 = vmax.f32 %v4955_v55, 0.0  ;;  %v4974_v47 = vmax.f32 %v4956_v61, 0.0  ;;  %v4975_v15 = vmax.f32 %v4957_v28, 0.0 }
 0x4a5   :  { %v4976_v9 = vmax.f32 %v4958_v0, 0.0  ;;  %v4977_v43 = vmax.f32 %v4959_v34, 0.0  ;;  %v4978_v48 = vmax.f32 %v4960_v36, 0.0  ;;  %v4979_v56 = vmax.f32 %v4961_v41, 0.0 }
 0x4a6   :  { %v4980_v30 = vmax.f32 %v4962_v1, 0.0  ;;  %v4981_v53 = vmax.f32 %v4963_v50, 0.0  ;;  %v4982_v57 = vmax.f32 %v4964_v38, 0.0  ;;  %v4983_v58 = vmax.f32 %v4965_v54, 0.0 }
 0x4a7   :  { %v4984_v32 = vmax.f32 %v4966_v40, 0.0  ;;  %v4985_v60 = vmax.f32 %v4967_v42, 0.0  ;;  %v4986_v3 = vmax.f32 %v4968_v4, 0.0  ;;  %v4987_v6 = vmax.f32 %v4969_v39, 0.0 }
 0x4a8   :  { %v5006_v29 = vcombine.low %v4970_v44, %v4971_v37  ;;  %v5007_v7 = vcombine.low %v4972_v31, %v4973_v45  ;;  %v5023_v5 = vcombine.low %v4974_v47, %v4975_v15  ;;  %v5024_v12 = vcombine.low %v4976_v9, %v4977_v43 }
 0x4a9   :  { %v5040_v13 = vcombine.low %v4978_v48, %v4979_v56  ;;  %v5041_v63 = vcombine.low %v4980_v30, %v4981_v53  ;;  %v5057_v2 = vcombine.low %v4982_v57, %v4983_v58  ;;  %v5058_v35 = vcombine.low %v4984_v32, %v4985_v60 }
 0x4aa   :  { %v5014_v49 = vrot.slane %v5006_v29, %v5013_v11  ;;  %v5021_v14 = vrot.slane %v5007_v7, %v5013_v11  ;;  %v5031_v16 = vrot.slane %v5023_v5, %v5013_v11  ;;  %v5038_v21 = vrot.slane %v5024_v12, %v5013_v11 }
 0x4ab   :  { %v5048_v27 = vrot.slane %v5040_v13, %v5013_v11  ;;  %v5055_v26 = vrot.slane %v5041_v63, %v5013_v11  ;;  %v5065_v18 = vrot.slane %v5057_v2, %v5013_v11  ;;  %v5072_v33 = vrot.slane %v5058_v35, %v5013_v11 }
 0x4ac   :  { %v5022_v46 = vcombine.low %v5014_v49, %v5021_v14  ;;  %v5039_v52 = vcombine.low %v5031_v16, %v5038_v21  ;;  %v5074_v51 = vcombine.low %v4986_v3, %v4987_v6 }
 0x4ad   :  { %v5056_v20 = vcombine.low %v5048_v27, %v5055_v26  ;;  %v5073_v59 = vcombine.low %v5065_v18, %v5072_v33 }
 0x4ae   :  { %5087 = vst [vmem:[%s7126_s6] sm:$0xff] %v5022_v46  ;;  %5088 = vst [vmem:[%s7126_s6 + $0x8] sm:$0xff] %v5039_v52 }
 0x4af   :  { %5675 = vst.sshfl [vmem:[%s7126_s6 + $0x20] sm:$0x33 pattern:$0x76325410] %v5074_v51  ;;  %5089 = vst [vmem:[%s7126_s6 + $0x10] sm:$0xff] %v5056_v20 }
 0x4b0   :  { %5090 = vst [vmem:[%s7126_s6 + $0x18] sm:$0xff] %v5073_v59 }
 0x4b1   :  { %5096 = vsyncpa [#allocation3], 1 }
 0x4b2   :  { %5097 = vsyncpa [#allocation5], 1 }
 0x4b3   :  { %5098 = vsyncpa [#allocation8], 1 }

// kernel: generator_forward.6
= control target key start
LH: loop header
LB: loop body
LE: loop exit
PB: predicated region body
PF: predicated region fallthrough
CT: control target
= control target key end

     0   :  { %s2025_s12 = smov 0   ;;  %s2027_s13 = smov 0   ;;  %s3015_s0 = inlined_call_operand.vmem [shape: bf16[456,1152], index: 0, kind: input, shape index: {}]   ;;  %s3016_s1 = inlined_call_operand.vmem [shape: bf16[1152,128], index: 1, kind: input, shape index: {}]   ;;  %s3017_s2 = inlined_call_operand.vmem [shape: f32[456,128], index: 2, kind: output, shape index: {0}]   ;;  %s3018_s3 = inlined_call_operand.vmem [shape: f32[1,8,256], index: 3, kind: output, shape index: {1}]  }
   0x1   :  { %s2029_s14 = smov 0   ;;  %s2031_s15 = smov 0  }
   0x2   :  { %s2033_s16 = smov 0  }
   0x3 LB: > { %s23_s17 = sadd.s32 1, %s1996_s15  ;;  %p42_p1 = scmp.ne.s32.totalorder %s1988_s13, %s1984_s12  ;;  %s2000_s16 = sphi %s2033_s16, %s14_s16   ;;  %s1996_s15 = sphi %s2031_s15, %s3022_s15   ;;  %s1992_s14 = sphi %s2029_s14, %s3021_s14   ;;  %s1988_s13 = sphi %s2027_s13, %s3020_s13   ;;  %s1984_s12 = sphi %s2025_s12, %s3019_s12  }
   0x4   : > { %p24_p0 = scmp.ge.s32.totalorder %s23_s17, 9  ;;  %p43_p2 = scmp.eq.s32.totalorder %s2000_s16, 0 }
   0x5   : > { %s35_s19 = sadd.s32 1, %s1988_s13  ;;  %p1646_p5 = scmp.ge.s32.totalorder %s2000_s16, 9 }
   0x6   : > { %s3024_s17 = smov (%p24_p0, %s23_s17), 0  ;;  %p44_p3 = por %p43_p2, %p42_p1 }
   0x7   : > { %s31_s18 = ssub.s32 %s1996_s15, %s3024_s17  ;;  %146 = sbr.rel (%p1646_p5) target bundleno = 56 (0x38), region = 16 }
   0x8   : > { %p33_p4 = scmp.eq.s32.totalorder %s31_s18, 0 }
   0xa   : > { %s2060_s20 = scalar_select %p33_p4, %s1988_s13, %s35_s19  }
   0xe   : > { %149 = sbr.rel (!%p44_p3) target bundleno = 56 (0x38), region = 20  ;;  %s151_s21 = sand.u32 (%p44_p3), 1, %s1988_s13  }
   0xf   : > { %s1647_s22 = sshll.u32 (%p44_p3), %s1996_s15, 2  ;;  %s1880_s23 = smul.u32 (%p44_p3), 228, %s151_s21 }
  0x10   : > { %s2068_s26 = scalar_lea.vmem (%p44_p3), %s3015_s0, %s1647_s22 }
  0x11   : > { %v174_v0 = vld [vmem:[%s2068_s26] sm:$0xf] (%p44_p3)  ;;  %v176_v1 = vld [vmem:[%s2068_s26 + $0x24] sm:$0xf] (%p44_p3)  ;;  %v178_v2 = vld [vmem:[%s2068_s26 + $0x48] sm:$0xf] (%p44_p3) }
  0x12   : > { %v180_v3 = vld [vmem:[%s2068_s26 + $0x6c] sm:$0xf] (%p44_p3)  ;;  %v182_v4 = vld [vmem:[%s2068_s26 + $0x90] sm:$0xf] (%p44_p3)  ;;  %s2075_s27 = scalar_lea.vmem (%p44_p3), [#allocation2], %s1880_s23 }
  0x13   : > { %175 = vst [vmem:[%s2075_s27] sm:$0xf] (%p44_p3), %v174_v0  ;;  %177 = vst [vmem:[%s2075_s27 + $0x4] sm:$0xf] (%p44_p3), %v176_v1  ;;  %v184_v5 = vld [vmem:[%s2068_s26 + $0xb4] sm:$0xf] (%p44_p3) }
  0x14   : > { %179 = vst [vmem:[%s2075_s27 + $0x8] sm:$0xf] (%p44_p3), %v178_v2  ;;  %181 = vst [vmem:[%s2075_s27 + $0xc] sm:$0xf] (%p44_p3), %v180_v3  ;;  %v186_v6 = vld [vmem:[%s2068_s26 + $0xd8] sm:$0xf] (%p44_p3) }
  0x15   : > { %183 = vst [vmem:[%s2075_s27 + $0x10] sm:$0xf] %v182_v4  ;;  %v188_v7 = vld [vmem:[%s2068_s26 + $0xfc] sm:$0xf]  ;;  %185 = vst [vmem:[%s2075_s27 + $0x14] sm:$0xf] %v184_v5 }
  0x16   : > { %187 = vst [vmem:[%s2075_s27 + $0x18] sm:$0xf] %v186_v6  ;;  %189 = vst [vmem:[%s2075_s27 + $0x1c] sm:$0xf] %v188_v7  ;;  %v190_v8 = vld [vmem:[%s2068_s26 + $0x120] sm:$0xf] }
  0x17   : > { %v192_v9 = vld [vmem:[%s2068_s26 + $0x144] sm:$0xf]  ;;  %v194_v10 = vld [vmem:[%s2068_s26 + $0x168] sm:$0xf]  ;;  %191 = vst [vmem:[%s2075_s27 + $0x20] sm:$0xf] %v190_v8 }
  0x18   : > { %193 = vst [vmem:[%s2075_s27 + $0x24] sm:$0xf] %v192_v9  ;;  %195 = vst [vmem:[%s2075_s27 + $0x28] sm:$0xf] %v194_v10  ;;  %v196_v11 = vld [vmem:[%s2068_s26 + $0x18c] sm:$0xf] }
  0x19   : > { %v198_v12 = vld [vmem:[%s2068_s26 + $0x1b0] sm:$0xf]  ;;  %v200_v13 = vld [vmem:[%s2068_s26 + $0x1d4] sm:$0xf]  ;;  %197 = vst [vmem:[%s2075_s27 + $0x2c] sm:$0xf] %v196_v11 }
  0x1a   : > { %199 = vst [vmem:[%s2075_s27 + $0x30] sm:$0xf] %v198_v12  ;;  %201 = vst [vmem:[%s2075_s27 + $0x34] sm:$0xf] %v200_v13  ;;  %v202_v14 = vld [vmem:[%s2068_s26 + $0x1f8] sm:$0xf] }
  0x1b   : > { %v204_v15 = vld [vmem:[%s2068_s26 + $0x21c] sm:$0xf]  ;;  %v206_v16 = vld [vmem:[%s2068_s26 + $0x240] sm:$0xf]  ;;  %203 = vst [vmem:[%s2075_s27 + $0x38] sm:$0xf] %v202_v14 }
  0x1c   : > { %205 = vst [vmem:[%s2075_s27 + $0x3c] sm:$0xf] %v204_v15  ;;  %207 = vst [vmem:[%s2075_s27 + $0x40] sm:$0xf] %v206_v16  ;;  %v208_v17 = vld [vmem:[%s2068_s26 + $0x264] sm:$0xf] }
  0x1d   : > { %v210_v18 = vld [vmem:[%s2068_s26 + $0x288] sm:$0xf]  ;;  %v212_v19 = vld [vmem:[%s2068_s26 + $0x2ac] sm:$0xf]  ;;  %209 = vst [vmem:[%s2075_s27 + $0x44] sm:$0xf] %v208_v17 }
  0x1e   : > { %211 = vst [vmem:[%s2075_s27 + $0x48] sm:$0xf] %v210_v18  ;;  %213 = vst [vmem:[%s2075_s27 + $0x4c] sm:$0xf] %v212_v19  ;;  %v214_v20 = vld [vmem:[%s2068_s26 + $0x2d0] sm:$0xf] }
  0x1f   : > { %v216_v21 = vld [vmem:[%s2068_s26 + $0x2f4] sm:$0xf]  ;;  %v218_v22 = vld [vmem:[%s2068_s26 + $0x318] sm:$0xf]  ;;  %215 = vst [vmem:[%s2075_s27 + $0x50] sm:$0xf] %v214_v20 }
  0x20   : > { %217 = vst [vmem:[%s2075_s27 + $0x54] sm:$0xf] %v216_v21  ;;  %219 = vst [vmem:[%s2075_s27 + $0x58] sm:$0xf] %v218_v22  ;;  %v220_v23 = vld [vmem:[%s2068_s26 + $0x33c] sm:$0xf] }
  0x21   : > { %v222_v24 = vld [vmem:[%s2068_s26 + $0x360] sm:$0xf]  ;;  %v224_v25 = vld [vmem:[%s2068_s26 + $0x384] sm:$0xf]  ;;  %221 = vst [vmem:[%s2075_s27 + $0x5c] sm:$0xf] %v220_v23 }
  0x22   : > { %223 = vst [vmem:[%s2075_s27 + $0x60] sm:$0xf] %v222_v24  ;;  %225 = vst [vmem:[%s2075_s27 + $0x64] sm:$0xf] %v224_v25  ;;  %v226_v26 = vld [vmem:[%s2068_s26 + $0x3a8] sm:$0xf] }
  0x23   : > { %v228_v27 = vld [vmem:[%s2068_s26 + $0x3cc] sm:$0xf]  ;;  %v230_v28 = vld [vmem:[%s2068_s26 + $0x3f0] sm:$0xf]  ;;  %227 = vst [vmem:[%s2075_s27 + $0x68] sm:$0xf] %v226_v26 }
  0x24   : > { %229 = vst [vmem:[%s2075_s27 + $0x6c] sm:$0xf] %v228_v27  ;;  %231 = vst [vmem:[%s2075_s27 + $0x70] sm:$0xf] %v230_v28  ;;  %v232_v29 = vld [vmem:[%s2068_s26 + $0x414] sm:$0xf] }
  0x25   : > { %v234_v30 = vld [vmem:[%s2068_s26 + $0x438] sm:$0xf]  ;;  %v236_v31 = vld [vmem:[%s2068_s26 + $0x45c] sm:$0xf]  ;;  %233 = vst [vmem:[%s2075_s27 + $0x74] sm:$0xf] %v232_v29 }
  0x26   : > { %235 = vst [vmem:[%s2075_s27 + $0x78] sm:$0xf] %v234_v30  ;;  %237 = vst [vmem:[%s2075_s27 + $0x7c] sm:$0xf] %v236_v31  ;;  %v238_v32 = vld [vmem:[%s2068_s26 + $0x480] sm:$0xf] }
  0x27   : > { %v240_v33 = vld [vmem:[%s2068_s26 + $0x4a4] sm:$0xf]  ;;  %v242_v34 = vld [vmem:[%s2068_s26 + $0x4c8] sm:$0xf]  ;;  %239 = vst [vmem:[%s2075_s27 + $0x80] sm:$0xf] %v238_v32 }
  0x28   : > { %241 = vst [vmem:[%s2075_s27 + $0x84] sm:$0xf] %v240_v33  ;;  %243 = vst [vmem:[%s2075_s27 + $0x88] sm:$0xf] %v242_v34  ;;  %v244_v35 = vld [vmem:[%s2068_s26 + $0x4ec] sm:$0xf] }
  0x29   : > { %v246_v36 = vld [vmem:[%s2068_s26 + $0x510] sm:$0xf]  ;;  %v248_v37 = vld [vmem:[%s2068_s26 + $0x534] sm:$0xf]  ;;  %245 = vst [vmem:[%s2075_s27 + $0x8c] sm:$0xf] %v244_v35 }
  0x2a   : > { %247 = vst [vmem:[%s2075_s27 + $0x90] sm:$0xf] %v246_v36  ;;  %249 = vst [vmem:[%s2075_s27 + $0x94] sm:$0xf] %v248_v37  ;;  %v250_v38 = vld [vmem:[%s2068_s26 + $0x558] sm:$0xf] }
  0x2b   : > { %v252_v39 = vld [vmem:[%s2068_s26 + $0x57c] sm:$0xf]  ;;  %v254_v40 = vld [vmem:[%s2068_s26 + $0x5a0] sm:$0xf]  ;;  %251 = vst [vmem:[%s2075_s27 + $0x98] sm:$0xf] %v250_v38 }
  0x2c   : > { %253 = vst [vmem:[%s2075_s27 + $0x9c] sm:$0xf] %v252_v39  ;;  %255 = vst [vmem:[%s2075_s27 + $0xa0] sm:$0xf] %v254_v40  ;;  %v256_v41 = vld [vmem:[%s2068_s26 + $0x5c4] sm:$0xf] }
  0x2d   : > { %v258_v42 = vld [vmem:[%s2068_s26 + $0x5e8] sm:$0xf]  ;;  %v260_v43 = vld [vmem:[%s2068_s26 + $0x60c] sm:$0xf]  ;;  %257 = vst [vmem:[%s2075_s27 + $0xa4] sm:$0xf] %v256_v41 }
  0x2e   : > { %259 = vst [vmem:[%s2075_s27 + $0xa8] sm:$0xf] %v258_v42  ;;  %261 = vst [vmem:[%s2075_s27 + $0xac] sm:$0xf] %v260_v43  ;;  %v262_v44 = vld [vmem:[%s2068_s26 + $0x630] sm:$0xf] }
  0x2f   : > { %v264_v45 = vld [vmem:[%s2068_s26 + $0x654] sm:$0xf]  ;;  %v266_v46 = vld [vmem:[%s2068_s26 + $0x678] sm:$0xf]  ;;  %263 = vst [vmem:[%s2075_s27 + $0xb0] sm:$0xf] %v262_v44 }
  0x30   : > { %265 = vst [vmem:[%s2075_s27 + $0xb4] sm:$0xf] %v264_v45  ;;  %267 = vst [vmem:[%s2075_s27 + $0xb8] sm:$0xf] %v266_v46  ;;  %v268_v47 = vld [vmem:[%s2068_s26 + $0x69c] sm:$0xf] }
  0x31   : > { %v270_v48 = vld [vmem:[%s2068_s26 + $0x6c0] sm:$0xf]  ;;  %v272_v49 = vld [vmem:[%s2068_s26 + $0x6e4] sm:$0xf]  ;;  %269 = vst [vmem:[%s2075_s27 + $0xbc] sm:$0xf] %v268_v47 }
  0x32   : > { %271 = vst [vmem:[%s2075_s27 + $0xc0] sm:$0xf] %v270_v48  ;;  %273 = vst [vmem:[%s2075_s27 + $0xc4] sm:$0xf] %v272_v49  ;;  %v274_v50 = vld [vmem:[%s2068_s26 + $0x708] sm:$0xf] }
  0x33   : > { %v276_v51 = vld [vmem:[%s2068_s26 + $0x72c] sm:$0xf]  ;;  %v278_v52 = vld [vmem:[%s2068_s26 + $0x750] sm:$0xf]  ;;  %275 = vst [vmem:[%s2075_s27 + $0xc8] sm:$0xf] %v274_v50 }
  0x34   : > { %277 = vst [vmem:[%s2075_s27 + $0xcc] sm:$0xf] %v276_v51  ;;  %279 = vst [vmem:[%s2075_s27 + $0xd0] sm:$0xf] %v278_v52  ;;  %v280_v53 = vld [vmem:[%s2068_s26 + $0x774] sm:$0xf] }
  0x35   : > { %v282_v54 = vld [vmem:[%s2068_s26 + $0x798] sm:$0xf]  ;;  %v284_v55 = vld [vmem:[%s2068_s26 + $0x7bc] sm:$0xf]  ;;  %281 = vst [vmem:[%s2075_s27 + $0xd4] sm:$0xf] %v280_v53 }
  0x36   : > { %283 = vst [vmem:[%s2075_s27 + $0xd8] sm:$0xf] %v282_v54  ;;  %285 = vst [vmem:[%s2075_s27 + $0xdc] sm:$0xf] %v284_v55  ;;  %v286_v56 = vld [vmem:[%s2068_s26 + $0x7e0] sm:$0xf] }
  0x37   : > { %287 = vst [vmem:[%s2075_s27 + $0xe0] sm:$0xf] %v286_v56 }
  0x38 PF: > { %p1648_p6 = scmp.ge.s32.totalorder %s2000_s16, 1  ;;  %p432_p7 = scmp.lt.s32.totalorder %s2000_s16, 10 }
  0x3a   : > { %p433_p8 = pnand %p1648_p6, %p432_p7 }
  0x3b   : > { %s439_s28 = sand.u32 (!%p433_p8), 1, %s1984_s12   ;;  %s1649_s29 = sshll.u32 (!%p433_p8), %s1992_s14, 4 }
  0x3c   : > { %436 = sbr.rel (%p433_p8) target bundleno = 560 (0x230), region = 65  ;;  %p474_p9 = scmp.lt.s32.totalorder (!%p433_p8), %s1649_s29, 143 }
  0x3d   : > { %s1881_s30 = smul.u32 (!%p433_p8), 228, %s439_s28  ;;  %p1651_p10 = scmp.ne.s32.totalorder (!%p433_p8), %s1992_s14, 0 }
  0x3f   : > { %s2195_s8 = scalar_lea.vmem (!%p433_p8), [#allocation2], %s1881_s30 }
  0x43   : > { %s3026_s29 = smov (!%p474_p9, %s1649_s29), 143  ;;  %494 = sbr.rel (%p1651_p10) target bundleno = 98 (0x62), region = 73 }
  0x44   : > { %s1650_s4 = sshll.u32 %s3026_s29, 2  ;;  %v2002_v57 = vmov (!%p1651_p10), 0.0  }
  0x45   : > { %s2193_s7 = scalar_lea.vmem %s3016_s1, %s1650_s4  ;;  %495 = vst [vmem:[%s3017_s2] sm:$0xff] (!%p1651_p10), %v2002_v57  ;;  %496 = vst [vmem:[%s3017_s2 + $0x8] sm:$0xff] (!%p1651_p10), %v2002_v57 }
  0x46   : > { %497 = vst [vmem:[%s3017_s2 + $0x10] sm:$0xff] (!%p1651_p10), %v2002_v57  ;;  %498 = vst [vmem:[%s3017_s2 + $0x18] sm:$0xff] (!%p1651_p10), %v2002_v57 }
  0x47   : > { %499 = vst [vmem:[%s3017_s2 + $0x20] sm:$0xff] (!%p1651_p10), %v2002_v57  ;;  %500 = vst [vmem:[%s3017_s2 + $0x28] sm:$0xff] (!%p1651_p10), %v2002_v57 }
  0x48   : > { %501 = vst [vmem:[%s3017_s2 + $0x30] sm:$0xff] (!%p1651_p10), %v2002_v57  ;;  %502 = vst [vmem:[%s3017_s2 + $0x38] sm:$0xff] (!%p1651_p10), %v2002_v57 }
  0x49   : > { %503 = vst [vmem:[%s3017_s2 + $0x40] sm:$0xff] (!%p1651_p10), %v2002_v57  ;;  %504 = vst [vmem:[%s3017_s2 + $0x48] sm:$0xff] (!%p1651_p10), %v2002_v57 }
  0x4a   : > { %505 = vst [vmem:[%s3017_s2 + $0x50] sm:$0xff] %v2002_v57  ;;  %506 = vst [vmem:[%s3017_s2 + $0x58] sm:$0xff] %v2002_v57 }
  0x4b   : > { %507 = vst [vmem:[%s3017_s2 + $0x60] sm:$0xff] %v2002_v57  ;;  %508 = vst [vmem:[%s3017_s2 + $0x68] sm:$0xff] %v2002_v57 }
  0x4c   : > { %509 = vst [vmem:[%s3017_s2 + $0x70] sm:$0xff] %v2002_v57  ;;  %510 = vst [vmem:[%s3017_s2 + $0x78] sm:$0xff] %v2002_v57 }
  0x4d   : > { %511 = vst [vmem:[%s3017_s2 + $0x80] sm:$0xff] %v2002_v57  ;;  %512 = vst [vmem:[%s3017_s2 + $0x88] sm:$0xff] %v2002_v57 }
  0x4e   : > { %513 = vst [vmem:[%s3017_s2 + $0x90] sm:$0xff] %v2002_v57  ;;  %514 = vst [vmem:[%s3017_s2 + $0x98] sm:$0xff] %v2002_v57 }
  0x4f   : > { %515 = vst [vmem:[%s3017_s2 + $0xa0] sm:$0xff] %v2002_v57  ;;  %516 = vst [vmem:[%s3017_s2 + $0xa8] sm:$0xff] %v2002_v57 }
  0x50   : > { %517 = vst [vmem:[%s3017_s2 + $0xb0] sm:$0xff] %v2002_v57  ;;  %518 = vst [vmem:[%s3017_s2 + $0xb8] sm:$0xff] %v2002_v57 }
  0x51   : > { %519 = vst [vmem:[%s3017_s2 + $0xc0] sm:$0xff] %v2002_v57  ;;  %520 = vst [vmem:[%s3017_s2 + $0xc8] sm:$0xff] %v2002_v57 }
  0x52   : > { %521 = vst [vmem:[%s3017_s2 + $0xd0] sm:$0xff] %v2002_v57  ;;  %522 = vst [vmem:[%s3017_s2 + $0xd8] sm:$0xff] %v2002_v57 }
  0x53   : > { %523 = vst [vmem:[%s3017_s2 + $0xe0] sm:$0xff] %v2002_v57  ;;  %524 = vst [vmem:[%s3017_s2 + $0xe8] sm:$0xff] %v2002_v57 }
  0x54   : > { %525 = vst [vmem:[%s3017_s2 + $0xf0] sm:$0xff] %v2002_v57  ;;  %526 = vst [vmem:[%s3017_s2 + $0xf8] sm:$0xff] %v2002_v57 }
  0x55   : > { %527 = vst [vmem:[%s3017_s2 + $0x100] sm:$0xff] %v2002_v57  ;;  %528 = vst [vmem:[%s3017_s2 + $0x108] sm:$0xff] %v2002_v57 }
  0x56   : > { %529 = vst [vmem:[%s3017_s2 + $0x110] sm:$0xff] %v2002_v57  ;;  %530 = vst [vmem:[%s3017_s2 + $0x118] sm:$0xff] %v2002_v57 }
  0x57   : > { %531 = vst [vmem:[%s3017_s2 + $0x120] sm:$0xff] %v2002_v57  ;;  %532 = vst [vmem:[%s3017_s2 + $0x128] sm:$0xff] %v2002_v57 }
  0x58   : > { %533 = vst [vmem:[%s3017_s2 + $0x130] sm:$0xff] %v2002_v57  ;;  %534 = vst [vmem:[%s3017_s2 + $0x138] sm:$0xff] %v2002_v57 }
  0x59   : > { %535 = vst [vmem:[%s3017_s2 + $0x140] sm:$0xff] %v2002_v57  ;;  %536 = vst [vmem:[%s3017_s2 + $0x148] sm:$0xff] %v2002_v57 }
  0x5a   : > { %537 = vst [vmem:[%s3017_s2 + $0x150] sm:$0xff] %v2002_v57  ;;  %538 = vst [vmem:[%s3017_s2 + $0x158] sm:$0xff] %v2002_v57 }
  0x5b   : > { %539 = vst [vmem:[%s3017_s2 + $0x160] sm:$0xff] %v2002_v57  ;;  %540 = vst [vmem:[%s3017_s2 + $0x168] sm:$0xff] %v2002_v57 }
  0x5c   : > { %541 = vst [vmem:[%s3017_s2 + $0x170] sm:$0xff] %v2002_v57  ;;  %542 = vst [vmem:[%s3017_s2 + $0x178] sm:$0xff] %v2002_v57 }
  0x5d   : > { %543 = vst [vmem:[%s3017_s2 + $0x180] sm:$0xff] %v2002_v57  ;;  %544 = vst [vmem:[%s3017_s2 + $0x188] sm:$0xff] %v2002_v57 }
  0x5e   : > { %545 = vst [vmem:[%s3017_s2 + $0x190] sm:$0xff] %v2002_v57  ;;  %546 = vst [vmem:[%s3017_s2 + $0x198] sm:$0xff] %v2002_v57 }
  0x5f   : > { %547 = vst [vmem:[%s3017_s2 + $0x1a0] sm:$0xff] %v2002_v57  ;;  %548 = vst [vmem:[%s3017_s2 + $0x1a8] sm:$0xff] %v2002_v57 }
  0x60   : > { %549 = vst [vmem:[%s3017_s2 + $0x1b0] sm:$0xff] %v2002_v57  ;;  %550 = vst [vmem:[%s3017_s2 + $0x1b8] sm:$0xff] %v2002_v57 }
  0x61   : > { %551 = vst [vmem:[%s3017_s2 + $0x1c0] sm:$0xff] %v2002_v57 }
  0x62 PF: > { %v1925_v58 = vld [vmem:[%s2193_s7] sm:$0xff]   ;;  %v2003_v59 = vmov 0.0   ;;  %v1926_v60 = vld [vmem:[%s2193_s7 + $0x8] sm:$0xff]   ;;  %vm2004_vm0 = vmmov 0   ;;  %v1927_v61 = vld [vmem:[%s2193_s7 + $0x10] sm:$0xff]   ;;  %p1689_p11 = scmp.ne.s32.totalorder %s1992_s14, 8 }
  0x63   : > { %1732 = vmatprep.subr.bf16.mxu0 %v2003_v59  ;;  %1864 = vmatprep.subr.bf16.mxu1 %v2003_v59  ;;  %v1928_v62 = vld [vmem:[%s2193_s7 + $0x18] sm:$0xff]   ;;  %v1929_v63 = vld [vmem:[%s2193_s7 + $0x20] sm:$0xff]   ;;  %v1930_v0 = vld [vmem:[%s2193_s7 + $0x28] sm:$0xff]  }
  0x64   : > { %1733 = vmatpush3.bf16.msra.mxu0 %v1925_v58  ;;  %1872 = vmatpush3.bf16.msra.mxu1 %v1925_v58  ;;  %v1931_v1 = vld [vmem:[%s2193_s7 + $0x30] sm:$0xff]   ;;  %v1932_v2 = vld [vmem:[%s2193_s7 + $0x38] sm:$0xff]   ;;  %v1933_v3 = vld [vmem:[%s2195_s8] sm:$0xff]  }
  0x65   : > { %1734 = vmatprep.subr.bf16.mxu0 %v2003_v59  ;;  %1865 = vmatprep.subr.bf16.mxu1 %v2003_v59  ;;  %v1934_v4 = vld [vmem:[%s2195_s8 + $0x78] sm:$0xff]   ;;  %v1935_v5 = vld [vmem:[%s2195_s8 + $0x8] sm:$0xff]   ;;  %v1936_v6 = vld [vmem:[%s2195_s8 + $0x80] sm:$0xff]  }
  0x66   : > { %1748 = vmatprep.mubr.msk.bf16.mxu0 %vm2004_vm0, %v2003_v59  ;;  %1808 = vmatprep.mubr.msk.bf16.mxu1 %vm2004_vm0, %v2003_v59  ;;  %v1937_v7 = vld [vmem:[%s2195_s8 + $0x10] sm:$0xff]   ;;  %v1938_v8 = vld [vmem:[%s2195_s8 + $0x88] sm:$0xff]   ;;  %v1939_v9 = vld [vmem:[%s2195_s8 + $0x18] sm:$0xff]  }
  0x67   : > { %v1940_v10 = vld [vmem:[%s2195_s8 + $0x90] sm:$0xff]   ;;  %v1941_v11 = vld [vmem:[%s2195_s8 + $0x20] sm:$0xff]   ;;  %v1942_v12 = vld [vmem:[%s2195_s8 + $0x98] sm:$0xff]  }
  0x68   : > { %1735 = vmatpush3.bf16.msra.mxu0 %v1926_v60  ;;  %1873 = vmatpush3.bf16.msra.mxu1 %v1926_v60  ;;  %v1943_v13 = vld [vmem:[%s2195_s8 + $0x28] sm:$0xff]   ;;  %v1944_v14 = vld [vmem:[%s2195_s8 + $0xa0] sm:$0xff]   ;;  %v1945_v15 = vld [vmem:[%s2195_s8 + $0x30] sm:$0xff]  }
  0x69   : > { %1736 = vmatprep.subr.bf16.mxu0 %v2003_v59  ;;  %1866 = vmatprep.subr.bf16.mxu1 %v2003_v59  ;;  %v1946_v16 = vld [vmem:[%s2195_s8 + $0xa8] sm:$0xff]   ;;  %v1947_v17 = vld [vmem:[%s2195_s8 + $0x38] sm:$0xff]   ;;  %v1948_v18 = vld [vmem:[%s2195_s8 + $0xb0] sm:$0xff]  }
  0x6a   : > { %v1949_v19 = vld [vmem:[%s2195_s8 + $0x40] sm:$0xff]   ;;  %v1950_v20 = vld [vmem:[%s2195_s8 + $0xb8] sm:$0xff]   ;;  %v1951_v21 = vld [vmem:[%s2195_s8 + $0x48] sm:$0xff]  }
  0x6b   : > { %v1952_v22 = vld [vmem:[%s2195_s8 + $0xc0] sm:$0xff]   ;;  %v1953_v23 = vld [vmem:[%s2195_s8 + $0x50] sm:$0xff]   ;;  %v1954_v24 = vld [vmem:[%s2195_s8 + $0xc8] sm:$0xff]  }
  0x6c   : > { %1737 = vmatpush3.bf16.msra.mxu0 %v1927_v61  ;;  %1874 = vmatpush3.bf16.msra.mxu1 %v1927_v61  ;;  %v1955_v25 = vld [vmem:[%s2195_s8 + $0x58] sm:$0xff]   ;;  %v1956_v26 = vld [vmem:[%s2195_s8 + $0xd0] sm:$0xff]   ;;  %v1957_v27 = vld [vmem:[%s2195_s8 + $0x60] sm:$0xff]  }
  0x6d   : > { %1738 = vmatprep.subr.bf16.mxu0 %v2003_v59  ;;  %1867 = vmatprep.subr.bf16.mxu1 %v2003_v59  ;;  %v1958_v28 = vld [vmem:[%s2195_s8 + $0xd8] sm:$0xff]   ;;  %v1959_v29 = vld [vmem:[%s2195_s8 + $0x68] sm:$0xff]   ;;  %v1960_v30 = vld [vmem:[%s2195_s8 + $0xe0] ss:$0 sps:$4 sm:$0xff]  }
  0x6e   : > { %v1961_v31 = vld [vmem:[%s2195_s8 + $0x70] sm:$0xff]   ;;  %v552_v32 = vld [vmem:[%s3017_s2] sm:$0xff]  ;;  %v553_v35 = vld [vmem:[%s3017_s2 + $0x8] sm:$0xff] }
  0x6f   : > { %v582_v33 = vld [vmem:[%s3017_s2 + $0xf0] sm:$0xff]  ;;  %v583_v37 = vld [vmem:[%s3017_s2 + $0xf8] sm:$0xff]  ;;  %v584_v49 = vld [vmem:[%s3017_s2 + $0x100] sm:$0xff] }
  0x70   : > { %1739 = vmatpush3.bf16.msra.mxu0 %v1928_v62  ;;  %1875 = vmatpush3.bf16.msra.mxu1 %v1928_v62  ;;  %v554_v48 = vld [vmem:[%s3017_s2 + $0x10] sm:$0xff]  ;;  %v555_v51 = vld [vmem:[%s3017_s2 + $0x18] sm:$0xff]  ;;  %v585_v53 = vld [vmem:[%s3017_s2 + $0x108] sm:$0xff] }
  0x71   : > { %1740 = vmatprep.subr.bf16.mxu0 %v2003_v59  ;;  %1868 = vmatprep.subr.bf16.mxu1 %v2003_v59 }
  0x74   : > { %1741 = vmatpush3.bf16.msra.mxu0 %v1929_v63  ;;  %1876 = vmatpush3.bf16.msra.mxu1 %v1929_v63 }
  0x75   : > { %1742 = vmatprep.subr.bf16.mxu0 %v2003_v59  ;;  %1869 = vmatprep.subr.bf16.mxu1 %v2003_v59 }
  0x78   : > { %1743 = vmatpush3.bf16.msra.mxu0 %v1930_v0  ;;  %1877 = vmatpush3.bf16.msra.mxu1 %v1930_v0  ;;  %v556_v0 = vld [vmem:[%s3017_s2 + $0x20] sm:$0xff] }
  0x79   : > { %1744 = vmatprep.subr.bf16.mxu0 %v2003_v59  ;;  %1870 = vmatprep.subr.bf16.mxu1 %v2003_v59 }
  0x7c   : > { %1745 = vmatpush3.bf16.msra.mxu0 %v1931_v1  ;;  %1878 = vmatpush3.bf16.msra.mxu1 %v1931_v1  ;;  %v586_v1 = vld [vmem:[%s3017_s2 + $0x110] sm:$0xff] }
  0x7d   : > { %1746 = vmatprep.subr.bf16.mxu0 %v2003_v59  ;;  %1871 = vmatprep.subr.bf16.mxu1 %v2003_v59 }
  0x80   : > { %1747 = vmatpush3.bf16.msra.mxu0 %v1932_v2  ;;  %1879 = vmatpush3.bf16.msra.mxu1 %v1932_v2 }
  0x83   : > { %1749 = vmatmul.mubr.bf16.vlgmr.msra.gmra.mrb[0].mxu0 %v1933_v3  ;;  %1809 = vmatmul.mubr.bf16.vlgmr.msra.gmra.mrb[0].mxu1 %v1934_v4  ;;  %v557_v3 = vld [vmem:[%s3017_s2 + $0x28] sm:$0xff] }
  0x84   : > { %1752 = vmatprep.mubr.msk.bf16.mxu0 %vm2004_vm0, %v2003_v59  ;;  %1812 = vmatprep.mubr.msk.bf16.mxu1 %vm2004_vm0, %v2003_v59 }
  0x8b   : > { %1753 = vmatmul.mubr.bf16.gmra.mrb[4].mxu0 %v1935_v5  ;;  %1813 = vmatmul.mubr.bf16.gmra.mrb[4].mxu1 %v1936_v6  ;;  %v587_v5 = vld [vmem:[%s3017_s2 + $0x118] sm:$0xff] }
  0x8c   : > { %1756 = vmatprep.mubr.msk.bf16.mxu0 %vm2004_vm0, %v2003_v59  ;;  %1816 = vmatprep.mubr.msk.bf16.mxu1 %vm2004_vm0, %v2003_v59 }
  0x93   : > { %1757 = vmatmul.mubr.bf16.gmra.mrb[8].mxu0 %v1937_v7  ;;  %1817 = vmatmul.mubr.bf16.gmra.mrb[8].mxu1 %v1938_v8 }
  0x94   : > { %1760 = vmatprep.mubr.msk.bf16.mxu0 %vm2004_vm0, %v2003_v59  ;;  %1820 = vmatprep.mubr.msk.bf16.mxu1 %vm2004_vm0, %v2003_v59 }
  0x9b   : > { %1761 = vmatmul.mubr.bf16.gmra.mrb[12].mxu0 %v1939_v9  ;;  %1821 = vmatmul.mubr.bf16.gmra.mrb[12].mxu1 %v1940_v10 }
  0x9c   : > { %1764 = vmatprep.mubr.msk.bf16.mxu0 %vm2004_vm0, %v2003_v59  ;;  %1824 = vmatprep.mubr.msk.bf16.mxu1 %vm2004_vm0, %v2003_v59 }
  0xa3   : > { %1765 = vmatmul.mubr.bf16.gmra.mrb[16].mxu0 %v1941_v11  ;;  %1825 = vmatmul.mubr.bf16.gmra.mrb[16].mxu1 %v1942_v12 }
  0xa4   : > { %1768 = vmatprep.mubr.msk.bf16.mxu0 %vm2004_vm0, %v2003_v59  ;;  %1828 = vmatprep.mubr.msk.bf16.mxu1 %vm2004_vm0, %v2003_v59 }
  0xab   : > { %1769 = vmatmul.mubr.bf16.gmra.mrb[20].mxu0 %v1943_v13  ;;  %1829 = vmatmul.mubr.bf16.gmra.mrb[20].mxu1 %v1944_v14 }
  0xac   : > { %1772 = vmatprep.mubr.msk.bf16.mxu0 %vm2004_vm0, %v2003_v59  ;;  %1832 = vmatprep.mubr.msk.bf16.mxu1 %vm2004_vm0, %v2003_v59 }
  0xb3   : > { %1773 = vmatmul.mubr.bf16.gmra.mrb[24].mxu0 %v1945_v15  ;;  %1833 = vmatmul.mubr.bf16.gmra.mrb[24].mxu1 %v1946_v16  ;;  %v558_v16 = vld [vmem:[%s3017_s2 + $0x30] sm:$0xff] }
  0xb4   : > { %1776 = vmatprep.mubr.msk.bf16.mxu0 %vm2004_vm0, %v2003_v59  ;;  %1836 = vmatprep.mubr.msk.bf16.mxu1 %vm2004_vm0, %v2003_v59 }
  0xbb   : > { %1777 = vmatmul.mubr.bf16.gmra.mrb[28].mxu0 %v1947_v17  ;;  %1837 = vmatmul.mubr.bf16.gmra.mrb[28].mxu1 %v1948_v18  ;;  %v588_v17 = vld [vmem:[%s3017_s2 + $0x120] sm:$0xff] }
  0xbc   : > { %1780 = vmatprep.mubr.msk.bf16.mxu0 %vm2004_vm0, %v2003_v59  ;;  %1840 = vmatprep.mubr.msk.bf16.mxu1 %vm2004_vm0, %v2003_v59 }
  0xc3   : > { %1781 = vmatmul.mubr.bf16.gmra.mrb[32].mxu0 %v1949_v19  ;;  %1841 = vmatmul.mubr.bf16.gmra.mrb[32].mxu1 %v1950_v20  ;;  %v559_v19 = vld [vmem:[%s3017_s2 + $0x38] sm:$0xff] }
  0xc4   : > { %1784 = vmatprep.mubr.msk.bf16.mxu0 %vm2004_vm0, %v2003_v59  ;;  %1844 = vmatprep.mubr.msk.bf16.mxu1 %vm2004_vm0, %v2003_v59 }
  0xcb   : > { %1785 = vmatmul.mubr.bf16.gmra.mrb[36].mxu0 %v1951_v21  ;;  %1845 = vmatmul.mubr.bf16.gmra.mrb[36].mxu1 %v1952_v22  ;;  %v589_v21 = vld [vmem:[%s3017_s2 + $0x128] sm:$0xff] }
  0xcc   : > { %1788 = vmatprep.mubr.msk.bf16.mxu0 %vm2004_vm0, %v2003_v59  ;;  %1848 = vmatprep.mubr.msk.bf16.mxu1 %vm2004_vm0, %v2003_v59 }
  0xd3   : > { %1789 = vmatmul.mubr.bf16.gmra.mrb[40].mxu0 %v1953_v23  ;;  %1849 = vmatmul.mubr.bf16.gmra.mrb[40].mxu1 %v1954_v24 }
  0xd4   : > { %1792 = vmatprep.mubr.msk.bf16.mxu0 %vm2004_vm0, %v2003_v59  ;;  %1852 = vmatprep.mubr.msk.bf16.mxu1 %vm2004_vm0, %v2003_v59 }
  0xdb   : > { %1793 = vmatmul.mubr.bf16.gmra.mrb[44].mxu0 %v1955_v25  ;;  %1853 = vmatmul.mubr.bf16.gmra.mrb[44].mxu1 %v1956_v26 }
  0xdc   : > { %1796 = vmatprep.mubr.msk.bf16.mxu0 %vm2004_vm0, %v2003_v59  ;;  %1856 = vmatprep.mubr.msk.bf16.mxu1 %vm2004_vm0, %v2003_v59 }
  0xe3   : > { %1797 = vmatmul.mubr.bf16.gmra.mrb[48].mxu0 %v1957_v27  ;;  %1857 = vmatmul.mubr.bf16.gmra.mrb[48].mxu1 %v1958_v28 }
  0xe4   : > { %1800 = vmatprep.mubr.msk.bf16.mxu0 %vm2004_vm0, %v2003_v59  ;;  %1860 = vmatprep.mubr.msk.bf16.mxu1 %vm2004_vm0, %v2003_v59 }
  0xeb   : > { %1801 = vmatmul.mubr.bf16.gmra.mrb[52].mxu0 %v1959_v29  ;;  %1861 = vmatmul.mubr.bf16.gmra.mrb[52].mxu1 %v1960_v30 }
  0xec   : > { %1804 = vmatprep.mubr.msk.bf16.mxu0 %vm2004_vm0, %v2003_v59 }
  0xf3   : > { %1805 = vmatmul.mubr.bf16.gmra.mrb[56].mxu0 %v1961_v31 }
 0x156   : > { %v936_v34 = vpop.f32.mrb[0].mxu0  ;;  %v1056_v36 = vpop.f32.mrb[0].mxu1 }
 0x157   : > { %v1166_v38 = vadd.f32 %v936_v34, %v552_v32  ;;  %v1750_v39 = vpop.f32.mrb[1].mxu0  ;;  %v1196_v40 = vadd.f32 %v1056_v36, %v582_v33  ;;  %v1810_v41 = vpop.f32.mrb[1].mxu1  ;;  %v560_v32 = vld [vmem:[%s3017_s2 + $0x40] sm:$0xff]  ;;  %v590_v33 = vld [vmem:[%s3017_s2 + $0x130] sm:$0xff] }
 0x158   : > { %v939_v42 = vpop.f32.mrb[2].mxu0  ;;  %v1059_v43 = vpop.f32.mrb[2].mxu1 }
 0x159   : > { %1223 = vst [vmem:[%s3017_s2] sm:$0xff] %v1166_v38  ;;  %v1167_v44 = vadd.f32 %v939_v42, %v553_v35  ;;  %v1751_v45 = vpop.f32.mrb[3].mxu0  ;;  %1253 = vst [vmem:[%s3017_s2 + $0xf0] sm:$0xff] %v1196_v40  ;;  %v1197_v46 = vadd.f32 %v1059_v43, %v583_v37  ;;  %v1811_v47 = vpop.f32.mrb[3].mxu1  ;;  %v561_v35 = vld [vmem:[%s3017_s2 + $0x48] sm:$0xff]  ;;  %v591_v37 = vld [vmem:[%s3017_s2 + $0x138] sm:$0xff] }
 0x15b   : > { %1224 = vst [vmem:[%s3017_s2 + $0x8] sm:$0xff] %v1167_v44  ;;  %1254 = vst [vmem:[%s3017_s2 + $0xf8] sm:$0xff] %v1197_v46 }
 0x15e   : > { %v944_v50 = vpop.f32.mrb[4].mxu0  ;;  %v1064_v52 = vpop.f32.mrb[4].mxu1 }
 0x15f   : > { %v1168_v54 = vadd.f32 %v944_v50, %v554_v48  ;;  %v1754_v55 = vpop.f32.mrb[5].mxu0  ;;  %v1198_v56 = vadd.f32 %v1064_v52, %v584_v49  ;;  %v1814_v57 = vpop.f32.mrb[5].mxu1  ;;  %v562_v48 = vld [vmem:[%s3017_s2 + $0x50] sm:$0xff]  ;;  %v592_v49 = vld [vmem:[%s3017_s2 + $0x140] sm:$0xff] }
 0x160   : > { %v947_v58 = vpop.f32.mrb[6].mxu0  ;;  %v1067_v59 = vpop.f32.mrb[6].mxu1 }
 0x161   : > { %1225 = vst [vmem:[%s3017_s2 + $0x10] sm:$0xff] %v1168_v54  ;;  %v1169_v60 = vadd.f32 %v947_v58, %v555_v51  ;;  %v1755_v61 = vpop.f32.mrb[7].mxu0  ;;  %1255 = vst [vmem:[%s3017_s2 + $0x100] sm:$0xff] %v1198_v56  ;;  %v1199_v62 = vadd.f32 %v1067_v59, %v585_v53  ;;  %v1815_v63 = vpop.f32.mrb[7].mxu1  ;;  %v563_v51 = vld [vmem:[%s3017_s2 + $0x58] sm:$0xff]  ;;  %v593_v53 = vld [vmem:[%s3017_s2 + $0x148] sm:$0xff] }
 0x163   : > { %1226 = vst [vmem:[%s3017_s2 + $0x18] sm:$0xff] %v1169_v60  ;;  %1256 = vst [vmem:[%s3017_s2 + $0x108] sm:$0xff] %v1199_v62 }
 0x166   : > { %v952_v2 = vpop.f32.mrb[8].mxu0  ;;  %v1072_v4 = vpop.f32.mrb[8].mxu1 }
 0x167   : > { %v1170_v6 = vadd.f32 %v952_v2, %v556_v0  ;;  %v1758_v7 = vpop.f32.mrb[9].mxu0  ;;  %v1200_v8 = vadd.f32 %v1072_v4, %v586_v1  ;;  %v1818_v9 = vpop.f32.mrb[9].mxu1  ;;  %v564_v0 = vld [vmem:[%s3017_s2 + $0x60] sm:$0xff]  ;;  %v594_v1 = vld [vmem:[%s3017_s2 + $0x150] sm:$0xff] }
 0x168   : > { %v955_v10 = vpop.f32.mrb[10].mxu0  ;;  %v1075_v11 = vpop.f32.mrb[10].mxu1 }
 0x169   : > { %1227 = vst [vmem:[%s3017_s2 + $0x20] sm:$0xff] %v1170_v6  ;;  %v1171_v12 = vadd.f32 %v955_v10, %v557_v3  ;;  %v1759_v13 = vpop.f32.mrb[11].mxu0  ;;  %1257 = vst [vmem:[%s3017_s2 + $0x110] sm:$0xff] %v1200_v8  ;;  %v1201_v14 = vadd.f32 %v1075_v11, %v587_v5  ;;  %v1819_v15 = vpop.f32.mrb[11].mxu1  ;;  %v565_v3 = vld [vmem:[%s3017_s2 + $0x68] sm:$0xff]  ;;  %v595_v5 = vld [vmem:[%s3017_s2 + $0x158] sm:$0xff] }
 0x16b   : > { %1228 = vst [vmem:[%s3017_s2 + $0x28] sm:$0xff] %v1171_v12  ;;  %1258 = vst [vmem:[%s3017_s2 + $0x118] sm:$0xff] %v1201_v14 }
 0x16e   : > { %v960_v18 = vpop.f32.mrb[12].mxu0  ;;  %v1080_v20 = vpop.f32.mrb[12].mxu1 }
 0x16f   : > { %v1172_v22 = vadd.f32 %v960_v18, %v558_v16  ;;  %v1762_v23 = vpop.f32.mrb[13].mxu0  ;;  %v1202_v24 = vadd.f32 %v1080_v20, %v588_v17  ;;  %v1822_v25 = vpop.f32.mrb[13].mxu1  ;;  %v566_v16 = vld [vmem:[%s3017_s2 + $0x70] sm:$0xff]  ;;  %v596_v17 = vld [vmem:[%s3017_s2 + $0x160] sm:$0xff] }
 0x170   : > { %v963_v26 = vpop.f32.mrb[14].mxu0  ;;  %v1083_v27 = vpop.f32.mrb[14].mxu1 }
 0x171   : > { %1229 = vst [vmem:[%s3017_s2 + $0x30] sm:$0xff] %v1172_v22  ;;  %v1173_v28 = vadd.f32 %v963_v26, %v559_v19  ;;  %v1763_v29 = vpop.f32.mrb[15].mxu0  ;;  %1259 = vst [vmem:[%s3017_s2 + $0x120] sm:$0xff] %v1202_v24  ;;  %v1203_v30 = vadd.f32 %v1083_v27, %v589_v21  ;;  %v1823_v31 = vpop.f32.mrb[15].mxu1  ;;  %v567_v19 = vld [vmem:[%s3017_s2 + $0x78] sm:$0xff]  ;;  %v597_v21 = vld [vmem:[%s3017_s2 + $0x168] sm:$0xff] }
 0x173   : > { %1230 = vst [vmem:[%s3017_s2 + $0x38] sm:$0xff] %v1173_v28  ;;  %1260 = vst [vmem:[%s3017_s2 + $0x128] sm:$0xff] %v1203_v30 }
 0x176   : > { %v968_v34 = vpop.f32.mrb[16].mxu0  ;;  %v1088_v36 = vpop.f32.mrb[16].mxu1 }
 0x177   : > { %v1174_v38 = vadd.f32 %v968_v34, %v560_v32  ;;  %v1766_v39 = vpop.f32.mrb[17].mxu0  ;;  %v1204_v40 = vadd.f32 %v1088_v36, %v590_v33  ;;  %v1826_v41 = vpop.f32.mrb[17].mxu1  ;;  %v568_v32 = vld [vmem:[%s3017_s2 + $0x80] sm:$0xff]  ;;  %v598_v33 = vld [vmem:[%s3017_s2 + $0x170] sm:$0xff] }
 0x178   : > { %v971_v42 = vpop.f32.mrb[18].mxu0  ;;  %v1091_v43 = vpop.f32.mrb[18].mxu1 }
 0x179   : > { %1231 = vst [vmem:[%s3017_s2 + $0x40] sm:$0xff] %v1174_v38  ;;  %v1175_v44 = vadd.f32 %v971_v42, %v561_v35  ;;  %v1767_v45 = vpop.f32.mrb[19].mxu0  ;;  %1261 = vst [vmem:[%s3017_s2 + $0x130] sm:$0xff] %v1204_v40  ;;  %v1205_v46 = vadd.f32 %v1091_v43, %v591_v37  ;;  %v1827_v47 = vpop.f32.mrb[19].mxu1  ;;  %v569_v35 = vld [vmem:[%s3017_s2 + $0x88] sm:$0xff]  ;;  %v599_v37 = vld [vmem:[%s3017_s2 + $0x178] sm:$0xff] }
 0x17b   : > { %1232 = vst [vmem:[%s3017_s2 + $0x48] sm:$0xff] %v1175_v44  ;;  %1262 = vst [vmem:[%s3017_s2 + $0x138] sm:$0xff] %v1205_v46 }
 0x17e   : > { %v976_v50 = vpop.f32.mrb[20].mxu0  ;;  %v1096_v52 = vpop.f32.mrb[20].mxu1 }
 0x17f   : > { %v1176_v54 = vadd.f32 %v976_v50, %v562_v48  ;;  %v1770_v55 = vpop.f32.mrb[21].mxu0  ;;  %v1206_v56 = vadd.f32 %v1096_v52, %v592_v49  ;;  %v1830_v57 = vpop.f32.mrb[21].mxu1  ;;  %v570_v48 = vld [vmem:[%s3017_s2 + $0x90] sm:$0xff]  ;;  %v600_v49 = vld [vmem:[%s3017_s2 + $0x180] sm:$0xff] }
 0x180   : > { %v979_v58 = vpop.f32.mrb[22].mxu0  ;;  %v1099_v59 = vpop.f32.mrb[22].mxu1 }
 0x181   : > { %1233 = vst [vmem:[%s3017_s2 + $0x50] sm:$0xff] %v1176_v54  ;;  %v1177_v60 = vadd.f32 %v979_v58, %v563_v51  ;;  %v1771_v61 = vpop.f32.mrb[23].mxu0  ;;  %1263 = vst [vmem:[%s3017_s2 + $0x140] sm:$0xff] %v1206_v56  ;;  %v1207_v62 = vadd.f32 %v1099_v59, %v593_v53  ;;  %v1831_v63 = vpop.f32.mrb[23].mxu1  ;;  %v571_v51 = vld [vmem:[%s3017_s2 + $0x98] sm:$0xff]  ;;  %v601_v53 = vld [vmem:[%s3017_s2 + $0x188] sm:$0xff] }
 0x183   : > { %1234 = vst [vmem:[%s3017_s2 + $0x58] sm:$0xff] %v1177_v60  ;;  %1264 = vst [vmem:[%s3017_s2 + $0x148] sm:$0xff] %v1207_v62 }
 0x186   : > { %v984_v2 = vpop.f32.mrb[24].mxu0  ;;  %v1104_v4 = vpop.f32.mrb[24].mxu1 }
 0x187   : > { %v1178_v6 = vadd.f32 %v984_v2, %v564_v0  ;;  %v1774_v7 = vpop.f32.mrb[25].mxu0  ;;  %v1208_v8 = vadd.f32 %v1104_v4, %v594_v1  ;;  %v1834_v9 = vpop.f32.mrb[25].mxu1  ;;  %v572_v0 = vld [vmem:[%s3017_s2 + $0xa0] sm:$0xff]  ;;  %v602_v1 = vld [vmem:[%s3017_s2 + $0x190] sm:$0xff] }
 0x188   : > { %v987_v10 = vpop.f32.mrb[26].mxu0  ;;  %v1107_v11 = vpop.f32.mrb[26].mxu1 }
 0x189   : > { %1235 = vst [vmem:[%s3017_s2 + $0x60] sm:$0xff] %v1178_v6  ;;  %v1179_v12 = vadd.f32 %v987_v10, %v565_v3  ;;  %v1775_v13 = vpop.f32.mrb[27].mxu0  ;;  %1265 = vst [vmem:[%s3017_s2 + $0x150] sm:$0xff] %v1208_v8  ;;  %v1209_v14 = vadd.f32 %v1107_v11, %v595_v5  ;;  %v1835_v15 = vpop.f32.mrb[27].mxu1  ;;  %v573_v3 = vld [vmem:[%s3017_s2 + $0xa8] sm:$0xff]  ;;  %v603_v5 = vld [vmem:[%s3017_s2 + $0x198] sm:$0xff] }
 0x18b   : > { %1236 = vst [vmem:[%s3017_s2 + $0x68] sm:$0xff] %v1179_v12  ;;  %1266 = vst [vmem:[%s3017_s2 + $0x158] sm:$0xff] %v1209_v14 }
 0x18e   : > { %v992_v18 = vpop.f32.mrb[28].mxu0  ;;  %v1112_v20 = vpop.f32.mrb[28].mxu1 }
 0x18f   : > { %v1180_v22 = vadd.f32 %v992_v18, %v566_v16  ;;  %v1778_v23 = vpop.f32.mrb[29].mxu0  ;;  %v1210_v24 = vadd.f32 %v1112_v20, %v596_v17  ;;  %v1838_v25 = vpop.f32.mrb[29].mxu1  ;;  %v574_v16 = vld [vmem:[%s3017_s2 + $0xb0] sm:$0xff]  ;;  %v604_v17 = vld [vmem:[%s3017_s2 + $0x1a0] sm:$0xff] }
 0x190   : > { %v995_v26 = vpop.f32.mrb[30].mxu0  ;;  %v1115_v27 = vpop.f32.mrb[30].mxu1 }
 0x191   : > { %1237 = vst [vmem:[%s3017_s2 + $0x70] sm:$0xff] %v1180_v22  ;;  %v1181_v28 = vadd.f32 %v995_v26, %v567_v19  ;;  %v1779_v29 = vpop.f32.mrb[31].mxu0  ;;  %1267 = vst [vmem:[%s3017_s2 + $0x160] sm:$0xff] %v1210_v24  ;;  %v1211_v30 = vadd.f32 %v1115_v27, %v597_v21  ;;  %v1839_v31 = vpop.f32.mrb[31].mxu1  ;;  %v575_v19 = vld [vmem:[%s3017_s2 + $0xb8] sm:$0xff]  ;;  %v605_v21 = vld [vmem:[%s3017_s2 + $0x1a8] sm:$0xff] }
 0x193   : > { %1238 = vst [vmem:[%s3017_s2 + $0x78] sm:$0xff] %v1181_v28  ;;  %1268 = vst [vmem:[%s3017_s2 + $0x168] sm:$0xff] %v1211_v30 }
 0x196   : > { %v1000_v34 = vpop.f32.mrb[32].mxu0  ;;  %v1120_v36 = vpop.f32.mrb[32].mxu1 }
 0x197   : > { %v1182_v38 = vadd.f32 %v1000_v34, %v568_v32  ;;  %v1782_v39 = vpop.f32.mrb[33].mxu0  ;;  %v1212_v40 = vadd.f32 %v1120_v36, %v598_v33  ;;  %v1842_v41 = vpop.f32.mrb[33].mxu1  ;;  %v576_v32 = vld [vmem:[%s3017_s2 + $0xc0] sm:$0xff]  ;;  %v606_v33 = vld [vmem:[%s3017_s2 + $0x1b0] sm:$0xff] }
 0x198   : > { %v1003_v42 = vpop.f32.mrb[34].mxu0  ;;  %v1123_v43 = vpop.f32.mrb[34].mxu1 }
 0x199   : > { %1239 = vst [vmem:[%s3017_s2 + $0x80] sm:$0xff] %v1182_v38  ;;  %v1183_v44 = vadd.f32 %v1003_v42, %v569_v35  ;;  %v1783_v45 = vpop.f32.mrb[35].mxu0  ;;  %1269 = vst [vmem:[%s3017_s2 + $0x170] sm:$0xff] %v1212_v40  ;;  %v1213_v46 = vadd.f32 %v1123_v43, %v599_v37  ;;  %v1843_v47 = vpop.f32.mrb[35].mxu1  ;;  %v577_v35 = vld [vmem:[%s3017_s2 + $0xc8] sm:$0xff]  ;;  %v607_v37 = vld [vmem:[%s3017_s2 + $0x1b8] sm:$0xff] }
 0x19b   : > { %1240 = vst [vmem:[%s3017_s2 + $0x88] sm:$0xff] %v1183_v44  ;;  %1270 = vst [vmem:[%s3017_s2 + $0x178] sm:$0xff] %v1213_v46 }
 0x19e   : > { %v1008_v50 = vpop.f32.mrb[36].mxu0  ;;  %v1128_v52 = vpop.f32.mrb[36].mxu1 }
 0x19f   : > { %v1184_v54 = vadd.f32 %v1008_v50, %v570_v48  ;;  %v1786_v55 = vpop.f32.mrb[37].mxu0  ;;  %v1214_v56 = vadd.f32 %v1128_v52, %v600_v49  ;;  %v1846_v57 = vpop.f32.mrb[37].mxu1  ;;  %v578_v48 = vld [vmem:[%s3017_s2 + $0xd0] sm:$0xff]  ;;  %v608_v49 = vld [vmem:[%s3017_s2 + $0x1c0] sm:$0xff] }
 0x1a0   : > { %v1011_v58 = vpop.f32.mrb[38].mxu0  ;;  %v1131_v59 = vpop.f32.mrb[38].mxu1 }
 0x1a1   : > { %1241 = vst [vmem:[%s3017_s2 + $0x90] sm:$0xff] %v1184_v54  ;;  %v1185_v60 = vadd.f32 %v1011_v58, %v571_v51  ;;  %v1787_v61 = vpop.f32.mrb[39].mxu0  ;;  %1271 = vst [vmem:[%s3017_s2 + $0x180] sm:$0xff] %v1214_v56  ;;  %v1215_v62 = vadd.f32 %v1131_v59, %v601_v53  ;;  %v1847_v63 = vpop.f32.mrb[39].mxu1  ;;  %v579_v51 = vld [vmem:[%s3017_s2 + $0xd8] sm:$0xff] }
 0x1a3   : > { %1242 = vst [vmem:[%s3017_s2 + $0x98] sm:$0xff] %v1185_v60  ;;  %1272 = vst [vmem:[%s3017_s2 + $0x188] sm:$0xff] %v1215_v62  ;;  %v580_v62 = vld [vmem:[%s3017_s2 + $0xe0] sm:$0xff] }
 0x1a6   : > { %v1016_v2 = vpop.f32.mrb[40].mxu0  ;;  %v1136_v4 = vpop.f32.mrb[40].mxu1 }
 0x1a7   : > { %v1186_v6 = vadd.f32 %v1016_v2, %v572_v0  ;;  %v1790_v7 = vpop.f32.mrb[41].mxu0  ;;  %v1216_v8 = vadd.f32 %v1136_v4, %v602_v1  ;;  %v1850_v9 = vpop.f32.mrb[41].mxu1  ;;  %v581_v0 = vld [vmem:[%s3017_s2 + $0xe8] sm:$0xff] }
 0x1a8   : > { %v1019_v10 = vpop.f32.mrb[42].mxu0  ;;  %v1139_v11 = vpop.f32.mrb[42].mxu1  ;;  %v1285_v7 = vld [vmem:[%s3017_s2 + $0x8] sm:$0xff] (!%p1689_p11)  ;;  %v1287_v9 = vld [vmem:[%s3017_s2 + $0x18] sm:$0xff] (!%p1689_p11) }
 0x1a9   : > { %1243 = vst [vmem:[%s3017_s2 + $0xa0] sm:$0xff] %v1186_v6  ;;  %v1187_v12 = vadd.f32 %v1019_v10, %v573_v3  ;;  %v1791_v13 = vpop.f32.mrb[43].mxu0  ;;  %1273 = vst [vmem:[%s3017_s2 + $0x190] sm:$0xff] %v1216_v8  ;;  %v1217_v14 = vadd.f32 %v1139_v11, %v603_v5  ;;  %v1851_v15 = vpop.f32.mrb[43].mxu1  ;;  %v1284_v6 = vld [vmem:[%s3017_s2] sm:$0xff] (!%p1689_p11)  ;;  %v1286_v8 = vld [vmem:[%s3017_s2 + $0x10] sm:$0xff] (!%p1689_p11) }
 0x1aa   : > { %v1341_v10 = vadd.f32 (!%p1689_p11), %v1285_v7, %v1284_v6  ;;  %v1403_v11 = vmul.f32 (!%p1689_p11), %v1284_v6, %v1284_v6  ;;  %v1405_v13 = vmul.f32 (!%p1689_p11), %v1286_v8, %v1286_v8  ;;  %v1302_v6 = vld [vmem:[%s3017_s2 + $0x90] sm:$0xff] (!%p1689_p11) }
 0x1ab   : > { %1244 = vst [vmem:[%s3017_s2 + $0xa8] sm:$0xff] %v1187_v12  ;;  %1274 = vst [vmem:[%s3017_s2 + $0x198] sm:$0xff] %v1217_v14  ;;  %v1404_v12 = vmul.f32 (!%p1689_p11), %v1285_v7, %v1285_v7  ;;  %v1288_v14 = vld [vmem:[%s3017_s2 + $0x20] sm:$0xff] (!%p1689_p11) }
 0x1ac   : > { %v1342_v15 = vadd.f32 (!%p1689_p11), %v1341_v10, %v1286_v8  ;;  %v1303_v10 = vld [vmem:[%s3017_s2 + $0x98] sm:$0xff] (!%p1689_p11) }
 0x1ae   : > { %v1024_v18 = vpop.f32.mrb[44].mxu0  ;;  %v1144_v20 = vpop.f32.mrb[44].mxu1 }
 0x1af   : > { %v1188_v22 = vadd.f32 %v1024_v18, %v574_v16  ;;  %v1794_v23 = vpop.f32.mrb[45].mxu0  ;;  %v1218_v24 = vadd.f32 %v1144_v20, %v604_v17  ;;  %v1854_v25 = vpop.f32.mrb[45].mxu1  ;;  %v1406_v16 = vmul.f32 (!%p1689_p11), %v1287_v9, %v1287_v9  ;;  %v1460_v17 = vadd.f32 (!%p1689_p11), %v1404_v12, %v1403_v11  ;;  %v1289_v18 = vld [vmem:[%s3017_s2 + $0x28] sm:$0xff] (!%p1689_p11) }
 0x1b0   : > { %v1027_v26 = vpop.f32.mrb[46].mxu0  ;;  %v1147_v27 = vpop.f32.mrb[46].mxu1  ;;  %v1407_v20 = vmul.f32 (!%p1689_p11), %v1288_v14, %v1288_v14  ;;  %v1421_v12 = vmul.f32 (!%p1689_p11), %v1302_v6, %v1302_v6 }
 0x1b1   : > { %1245 = vst [vmem:[%s3017_s2 + $0xb0] sm:$0xff] %v1188_v22  ;;  %v1189_v28 = vadd.f32 %v1027_v26, %v575_v19  ;;  %v1795_v29 = vpop.f32.mrb[47].mxu0  ;;  %1275 = vst [vmem:[%s3017_s2 + $0x1a0] sm:$0xff] %v1218_v24  ;;  %v1219_v30 = vadd.f32 %v1147_v27, %v605_v21  ;;  %v1855_v31 = vpop.f32.mrb[47].mxu1  ;;  %v1343_v19 = vadd.f32 (!%p1689_p11), %v1342_v15, %v1287_v9  ;;  %v1290_v22 = vld [vmem:[%s3017_s2 + $0x30] sm:$0xff] (!%p1689_p11)  ;;  %v1291_v26 = vld [vmem:[%s3017_s2 + $0x38] sm:$0xff] (!%p1689_p11) }
 0x1b2   : > { %v1461_v21 = vadd.f32 (!%p1689_p11), %v1460_v17, %v1405_v13  ;;  %v1408_v24 = vmul.f32 (!%p1689_p11), %v1289_v18, %v1289_v18 }
 0x1b3   : > { %1246 = vst [vmem:[%s3017_s2 + $0xb8] sm:$0xff] %v1189_v28  ;;  %1276 = vst [vmem:[%s3017_s2 + $0x1a8] sm:$0xff] %v1219_v30  ;;  %v1344_v23 = vadd.f32 (!%p1689_p11), %v1343_v19, %v1288_v14  ;;  %v1409_v28 = vmul.f32 (!%p1689_p11), %v1290_v22, %v1290_v22  ;;  %v1292_v30 = vld [vmem:[%s3017_s2 + $0x40] sm:$0xff] (!%p1689_p11) }
 0x1b4   : > { %v1462_v25 = vadd.f32 (!%p1689_p11), %v1461_v21, %v1406_v16  ;;  %v1304_v14 = vld [vmem:[%s3017_s2 + $0xa0] sm:$0xff] (!%p1689_p11)  ;;  %v1422_v16 = vmul.f32 (!%p1689_p11), %v1303_v10, %v1303_v10 }
 0x1b5   : > { %v1345_v27 = vadd.f32 (!%p1689_p11), %v1344_v23, %v1289_v18  ;;  %v1305_v18 = vld [vmem:[%s3017_s2 + $0xa8] sm:$0xff] (!%p1689_p11) }
 0x1b6   : > { %v1032_v34 = vpop.f32.mrb[48].mxu0  ;;  %v1152_v36 = vpop.f32.mrb[48].mxu1  ;;  %v1463_v29 = vadd.f32 (!%p1689_p11), %v1462_v25, %v1407_v20  ;;  %v1423_v20 = vmul.f32 (!%p1689_p11), %v1304_v14, %v1304_v14 }
 0x1b7   : > { %v1190_v38 = vadd.f32 %v1032_v34, %v576_v32  ;;  %v1798_v39 = vpop.f32.mrb[49].mxu0  ;;  %v1220_v40 = vadd.f32 %v1152_v36, %v606_v33  ;;  %v1858_v41 = vpop.f32.mrb[49].mxu1  ;;  %v1346_v31 = vadd.f32 (!%p1689_p11), %v1345_v27, %v1290_v22  ;;  %v1410_v32 = vmul.f32 (!%p1689_p11), %v1291_v26, %v1291_v26  ;;  %v1293_v34 = vld [vmem:[%s3017_s2 + $0x48] sm:$0xff] (!%p1689_p11) }
 0x1b8   : > { %v1035_v42 = vpop.f32.mrb[50].mxu0  ;;  %v1155_v43 = vpop.f32.mrb[50].mxu1  ;;  %v1464_v33 = vadd.f32 (!%p1689_p11), %v1463_v29, %v1408_v24  ;;  %v1411_v36 = vmul.f32 (!%p1689_p11), %v1292_v30, %v1292_v30  ;;  %v1306_v22 = vld [vmem:[%s3017_s2 + $0xb0] sm:$0xff] (!%p1689_p11)  ;;  %v1424_v24 = vmul.f32 (!%p1689_p11), %v1305_v18, %v1305_v18 }
 0x1b9   : > { %1247 = vst [vmem:[%s3017_s2 + $0xc0] sm:$0xff] %v1190_v38  ;;  %v1191_v44 = vadd.f32 %v1035_v42, %v577_v35  ;;  %v1799_v45 = vpop.f32.mrb[51].mxu0  ;;  %1277 = vst [vmem:[%s3017_s2 + $0x1b0] sm:$0xff] %v1220_v40  ;;  %v1221_v46 = vadd.f32 %v1155_v43, %v607_v37  ;;  %v1859_v47 = vpop.f32.mrb[51].mxu1  ;;  %v1347_v35 = vadd.f32 (!%p1689_p11), %v1346_v31, %v1291_v26  ;;  %v1294_v38 = vld [vmem:[%s3017_s2 + $0x50] sm:$0xff] (!%p1689_p11)  ;;  %v1295_v42 = vld [vmem:[%s3017_s2 + $0x58] sm:$0xff] (!%p1689_p11) }
 0x1ba   : > { %v1465_v37 = vadd.f32 (!%p1689_p11), %v1464_v33, %v1409_v28  ;;  %v1412_v40 = vmul.f32 (!%p1689_p11), %v1293_v34, %v1293_v34  ;;  %v1307_v26 = vld [vmem:[%s3017_s2 + $0xb8] sm:$0xff] (!%p1689_p11)  ;;  %v1425_v28 = vmul.f32 (!%p1689_p11), %v1306_v22, %v1306_v22 }
 0x1bb   : > { %1248 = vst [vmem:[%s3017_s2 + $0xc8] sm:$0xff] %v1191_v44  ;;  %1278 = vst [vmem:[%s3017_s2 + $0x1b8] sm:$0xff] %v1221_v46  ;;  %v1348_v39 = vadd.f32 (!%p1689_p11), %v1347_v35, %v1292_v30  ;;  %v1413_v44 = vmul.f32 (!%p1689_p11), %v1294_v38, %v1294_v38  ;;  %v1296_v46 = vld [vmem:[%s3017_s2 + $0x60] sm:$0xff] (!%p1689_p11) }
 0x1bc   : > { %v1466_v41 = vadd.f32 (!%p1689_p11), %v1465_v37, %v1410_v32  ;;  %v1426_v32 = vmul.f32 (!%p1689_p11), %v1307_v26, %v1307_v26 }
 0x1bd   : > { %v1349_v43 = vadd.f32 (!%p1689_p11), %v1348_v39, %v1293_v34 }
 0x1be   : > { %v1040_v50 = vpop.f32.mrb[52].mxu0  ;;  %v1160_v52 = vpop.f32.mrb[52].mxu1  ;;  %v1467_v45 = vadd.f32 (!%p1689_p11), %v1466_v41, %v1411_v36 }
 0x1bf   : > { %v1192_v53 = vadd.f32 %v1040_v50, %v578_v48  ;;  %v1802_v54 = vpop.f32.mrb[53].mxu0  ;;  %v1222_v55 = vadd.f32 %v1160_v52, %v608_v49  ;;  %v1862_v56 = vpop.f32.mrb[53].mxu1  ;;  %v1350_v47 = vadd.f32 (!%p1689_p11), %v1349_v43, %v1294_v38  ;;  %v1414_v48 = vmul.f32 (!%p1689_p11), %v1295_v42, %v1295_v42  ;;  %v1297_v50 = vld [vmem:[%s3017_s2 + $0x68] sm:$0xff] (!%p1689_p11) }
 0x1c0   : > { %v1043_v57 = vpop.f32.mrb[54].mxu0  ;;  %v1163_v58 = vpop.f32.mrb[54].mxu1  ;;  %v1468_v49 = vadd.f32 (!%p1689_p11), %v1467_v45, %v1412_v40  ;;  %v1415_v52 = vmul.f32 (!%p1689_p11), %v1296_v46, %v1296_v46  ;;  %v1298_v54 = vld [vmem:[%s3017_s2 + $0x70] sm:$0xff] (!%p1689_p11)  ;;  %v1416_v56 = vmul.f32 (!%p1689_p11), %v1297_v50, %v1297_v50  ;;  %v1308_v30 = vld [vmem:[%s3017_s2 + $0xc0] sm:$0xff] (!%p1689_p11) }
 0x1c1   : > { %1249 = vst [vmem:[%s3017_s2 + $0xd0] sm:$0xff] %v1192_v53  ;;  %v1193_v59 = vadd.f32 %v1043_v57, %v579_v51  ;;  %v1803_v60 = vpop.f32.mrb[55].mxu0  ;;  %1279 = vst [vmem:[%s3017_s2 + $0x1c0] sm:$0xff] %v1222_v55  ;;  %v1863_v61 = vpop.f32.mrb[55].mxu1  ;;  %v1351_v51 = vadd.f32 (!%p1689_p11), %v1350_v47, %v1295_v42  ;;  %v1299_v58 = vld [vmem:[%s3017_s2 + $0x78] sm:$0xff] (!%p1689_p11)  ;;  %v1427_v36 = vmul.f32 (!%p1689_p11), %v1308_v30, %v1308_v30 }
 0x1c2   : > { %v1469_v53 = vadd.f32 (!%p1689_p11), %v1468_v49, %v1413_v44  ;;  %v1417_v60 = vmul.f32 (!%p1689_p11), %v1298_v54, %v1298_v54  ;;  %v1309_v34 = vld [vmem:[%s3017_s2 + $0xc8] sm:$0xff] (!%p1689_p11) }
 0x1c3   : > { %1250 = vst [vmem:[%s3017_s2 + $0xd8] sm:$0xff] %v1193_v59  ;;  %v1352_v55 = vadd.f32 (!%p1689_p11), %v1351_v51, %v1296_v46  ;;  %v1428_v40 = vmul.f32 (!%p1689_p11), %v1309_v34, %v1309_v34 }
 0x1c4   : > { %v1470_v57 = vadd.f32 (!%p1689_p11), %v1469_v53, %v1414_v48 }
 0x1c5   : > { %1283 = sbr.rel (%p1689_p11) target bundleno = 560 (0x230), region = 77  ;;  %v1353_v59 = vadd.f32 (!%p1689_p11), %v1352_v55, %v1297_v50 }
 0x1c6   : > { %v1048_v63 = vpop.f32.mrb[56].mxu0  ;;  %v1471_v61 = vadd.f32 (!%p1689_p11), %v1470_v57, %v1415_v52 }
 0x1c7   : > { %v1194_v1 = vadd.f32 %v1048_v63, %v580_v62  ;;  %v1806_v2 = vpop.f32.mrb[57].mxu0  ;;  %v1300_v62 = vld [vmem:[%s3017_s2 + $0x80] sm:$0xff] (!%p1689_p11)  ;;  %v1354_v63 = vadd.f32 (!%p1689_p11), %v1353_v59, %v1298_v54  ;;  %v1314_v54 = vld [vmem:[%s3017_s2 + $0xf0] sm:$0xff] (!%p1689_p11) }
 0x1c8   : > { %v1051_v3 = vpop.f32.mrb[58].mxu0  ;;  %v1301_v2 = vld [vmem:[%s3017_s2 + $0x88] sm:$0xff] (!%p1689_p11)  ;;  %v1310_v38 = vld [vmem:[%s3017_s2 + $0xd0] sm:$0xff] (!%p1689_p11) }
 0x1c9   : > { %1251 = vst [vmem:[%s3017_s2 + $0xe0] sm:$0xff] %v1194_v1  ;;  %v1195_v4 = vadd.f32 %v1051_v3, %v581_v0  ;;  %v1807_v5 = vpop.f32.mrb[59].mxu0  ;;  %v1418_v0 = vmul.f32 (!%p1689_p11), %v1299_v58, %v1299_v58  ;;  %v1472_v1 = vadd.f32 (!%p1689_p11), %v1471_v61, %v1416_v56  ;;  %v1355_v3 = vadd.f32 (!%p1689_p11), %v1354_v63, %v1299_v58  ;;  %v1315_v58 = vld [vmem:[%s3017_s2 + $0xf8] sm:$0xff] (!%p1689_p11) }
 0x1ca   : > { %v1420_v8 = vmul.f32 (!%p1689_p11), %v1301_v2, %v1301_v2  ;;  %v1311_v42 = vld [vmem:[%s3017_s2 + $0xd8] sm:$0xff] (!%p1689_p11)  ;;  %v1429_v44 = vmul.f32 (!%p1689_p11), %v1310_v38, %v1310_v38 }
 0x1cb   : > { %1252 = vst [vmem:[%s3017_s2 + $0xe8] sm:$0xff] %v1195_v4  ;;  %v1419_v4 = vmul.f32 (!%p1689_p11), %v1300_v62, %v1300_v62  ;;  %v1473_v5 = vadd.f32 (!%p1689_p11), %v1472_v1, %v1417_v60  ;;  %v1356_v7 = vadd.f32 (!%p1689_p11), %v1355_v3, %v1300_v62  ;;  %v1430_v48 = vmul.f32 (!%p1689_p11), %v1311_v42, %v1311_v42  ;;  %v1316_v62 = vld [vmem:[%s3017_s2 + $0x100] sm:$0xff] (!%p1689_p11) }
 0x1cc   : > { %v1433_v60 = vmul.f32 %v1314_v54, %v1314_v54 }
 0x1cd   : > { %v1474_v9 = vadd.f32 %v1473_v5, %v1418_v0  ;;  %v1357_v11 = vadd.f32 %v1356_v7, %v1301_v2  ;;  %v1434_v0 = vmul.f32 %v1315_v58, %v1315_v58  ;;  %v1317_v2 = vld [vmem:[%s3017_s2 + $0x108] sm:$0xff] }
 0x1cf   : > { %v1475_v13 = vadd.f32 %v1474_v9, %v1419_v4  ;;  %v1358_v15 = vadd.f32 %v1357_v11, %v1302_v6  ;;  %v1435_v4 = vmul.f32 %v1316_v62, %v1316_v62  ;;  %v1318_v6 = vld [vmem:[%s3017_s2 + $0x110] sm:$0xff] }
 0x1d0   : > { %v1312_v46 = vld [vmem:[%s3017_s2 + $0xe0] sm:$0xff] }
 0x1d1   : > { %v1476_v17 = vadd.f32 %v1475_v13, %v1420_v8  ;;  %v1359_v19 = vadd.f32 %v1358_v15, %v1303_v10  ;;  %v1431_v52 = vmul.f32 %v1312_v46, %v1312_v46  ;;  %v1436_v8 = vmul.f32 %v1317_v2, %v1317_v2  ;;  %v1319_v10 = vld [vmem:[%s3017_s2 + $0x118] sm:$0xff] }
 0x1d2   : > { %v1313_v50 = vld [vmem:[%s3017_s2 + $0xe8] sm:$0xff] }
 0x1d3   : > { %v1477_v21 = vadd.f32 %v1476_v17, %v1421_v12  ;;  %v1360_v23 = vadd.f32 %v1359_v19, %v1304_v14  ;;  %v1432_v56 = vmul.f32 %v1313_v50, %v1313_v50  ;;  %v1437_v12 = vmul.f32 %v1318_v6, %v1318_v6  ;;  %v1320_v14 = vld [vmem:[%s3017_s2 + $0x120] sm:$0xff] }
 0x1d5   : > { %v1478_v25 = vadd.f32 %v1477_v21, %v1422_v16  ;;  %v1361_v27 = vadd.f32 %v1360_v23, %v1305_v18  ;;  %v1438_v16 = vmul.f32 %v1319_v10, %v1319_v10  ;;  %v1321_v18 = vld [vmem:[%s3017_s2 + $0x128] sm:$0xff] }
 0x1d7   : > { %v1479_v29 = vadd.f32 %v1478_v25, %v1423_v20  ;;  %v1362_v31 = vadd.f32 %v1361_v27, %v1306_v22  ;;  %v1439_v20 = vmul.f32 %v1320_v14, %v1320_v14  ;;  %v1322_v22 = vld [vmem:[%s3017_s2 + $0x130] sm:$0xff] }
 0x1d9   : > { %v1480_v33 = vadd.f32 %v1479_v29, %v1424_v24  ;;  %v1363_v35 = vadd.f32 %v1362_v31, %v1307_v26  ;;  %v1440_v24 = vmul.f32 %v1321_v18, %v1321_v18  ;;  %v1323_v26 = vld [vmem:[%s3017_s2 + $0x138] sm:$0xff] }
 0x1db   : > { %v1481_v37 = vadd.f32 %v1480_v33, %v1425_v28  ;;  %v1364_v39 = vadd.f32 %v1363_v35, %v1308_v30  ;;  %v1441_v28 = vmul.f32 %v1322_v22, %v1322_v22  ;;  %v1324_v30 = vld [vmem:[%s3017_s2 + $0x140] sm:$0xff] }
 0x1dd   : > { %v1482_v41 = vadd.f32 %v1481_v37, %v1426_v32  ;;  %v1365_v43 = vadd.f32 %v1364_v39, %v1309_v34  ;;  %v1442_v32 = vmul.f32 %v1323_v26, %v1323_v26  ;;  %v1325_v34 = vld [vmem:[%s3017_s2 + $0x148] sm:$0xff] }
 0x1df   : > { %v1483_v45 = vadd.f32 %v1482_v41, %v1427_v36  ;;  %v1366_v47 = vadd.f32 %v1365_v43, %v1310_v38  ;;  %v1443_v36 = vmul.f32 %v1324_v30, %v1324_v30  ;;  %v1326_v38 = vld [vmem:[%s3017_s2 + $0x150] sm:$0xff] }
 0x1e1   : > { %v1484_v49 = vadd.f32 %v1483_v45, %v1428_v40  ;;  %v1367_v51 = vadd.f32 %v1366_v47, %v1311_v42  ;;  %v1444_v40 = vmul.f32 %v1325_v34, %v1325_v34  ;;  %v1327_v42 = vld [vmem:[%s3017_s2 + $0x158] sm:$0xff] }
 0x1e3   : > { %v1485_v53 = vadd.f32 %v1484_v49, %v1429_v44  ;;  %v1368_v55 = vadd.f32 %v1367_v51, %v1312_v46  ;;  %v1445_v44 = vmul.f32 %v1326_v38, %v1326_v38  ;;  %v1328_v46 = vld [vmem:[%s3017_s2 + $0x160] sm:$0xff] }
 0x1e5   : > { %v1486_v57 = vadd.f32 %v1485_v53, %v1430_v48  ;;  %v1369_v59 = vadd.f32 %v1368_v55, %v1313_v50  ;;  %v1446_v48 = vmul.f32 %v1327_v42, %v1327_v42  ;;  %v1329_v50 = vld [vmem:[%s3017_s2 + $0x168] sm:$0xff] }
 0x1e7   : > { %v1487_v61 = vadd.f32 %v1486_v57, %v1431_v52  ;;  %v1370_v63 = vadd.f32 %v1369_v59, %v1314_v54  ;;  %v1447_v52 = vmul.f32 %v1328_v46, %v1328_v46  ;;  %v1330_v54 = vld [vmem:[%s3017_s2 + $0x170] sm:$0xff] }
 0x1e9   : > { %v1488_v1 = vadd.f32 %v1487_v61, %v1432_v56  ;;  %v1371_v3 = vadd.f32 %v1370_v63, %v1315_v58  ;;  %v1448_v56 = vmul.f32 %v1329_v50, %v1329_v50  ;;  %v1331_v58 = vld [vmem:[%s3017_s2 + $0x178] sm:$0xff] }
 0x1eb   : > { %v1489_v5 = vadd.f32 %v1488_v1, %v1433_v60  ;;  %v1372_v7 = vadd.f32 %v1371_v3, %v1316_v62  ;;  %v1449_v60 = vmul.f32 %v1330_v54, %v1330_v54  ;;  %v1332_v62 = vld [vmem:[%s3017_s2 + $0x180] sm:$0xff] }
 0x1ed   : > { %v1490_v9 = vadd.f32 %v1489_v5, %v1434_v0  ;;  %v1373_v11 = vadd.f32 %v1372_v7, %v1317_v2  ;;  %v1450_v0 = vmul.f32 %v1331_v58, %v1331_v58  ;;  %v1333_v2 = vld [vmem:[%s3017_s2 + $0x188] sm:$0xff] }
 0x1ef   : > { %v1491_v13 = vadd.f32 %v1490_v9, %v1435_v4  ;;  %v1374_v15 = vadd.f32 %v1373_v11, %v1318_v6  ;;  %v1451_v4 = vmul.f32 %v1332_v62, %v1332_v62  ;;  %v1334_v6 = vld [vmem:[%s3017_s2 + $0x190] sm:$0xff] }
 0x1f1   : > { %v1492_v17 = vadd.f32 %v1491_v13, %v1436_v8  ;;  %v1375_v19 = vadd.f32 %v1374_v15, %v1319_v10  ;;  %v1452_v8 = vmul.f32 %v1333_v2, %v1333_v2  ;;  %v1335_v10 = vld [vmem:[%s3017_s2 + $0x198] sm:$0xff] }
 0x1f3   : > { %v1493_v21 = vadd.f32 %v1492_v17, %v1437_v12  ;;  %v1376_v23 = vadd.f32 %v1375_v19, %v1320_v14  ;;  %v1453_v12 = vmul.f32 %v1334_v6, %v1334_v6  ;;  %v1336_v14 = vld [vmem:[%s3017_s2 + $0x1a0] sm:$0xff] }
 0x1f5   : > { %v1494_v25 = vadd.f32 %v1493_v21, %v1438_v16  ;;  %v1377_v27 = vadd.f32 %v1376_v23, %v1321_v18  ;;  %v1454_v16 = vmul.f32 %v1335_v10, %v1335_v10  ;;  %v1337_v18 = vld [vmem:[%s3017_s2 + $0x1a8] sm:$0xff] }
 0x1f7   : > { %v1495_v29 = vadd.f32 %v1494_v25, %v1439_v20  ;;  %v1378_v31 = vadd.f32 %v1377_v27, %v1322_v22  ;;  %v1455_v20 = vmul.f32 %v1336_v14, %v1336_v14  ;;  %v1338_v22 = vld [vmem:[%s3017_s2 + $0x1b0] sm:$0xff] }
 0x1f9   : > { %v1496_v33 = vadd.f32 %v1495_v29, %v1440_v24  ;;  %v1379_v35 = vadd.f32 %v1378_v31, %v1323_v26  ;;  %v1456_v24 = vmul.f32 %v1337_v18, %v1337_v18  ;;  %v1339_v26 = vld [vmem:[%s3017_s2 + $0x1b8] sm:$0xff] }
 0x1fb   : > { %v1497_v37 = vadd.f32 %v1496_v33, %v1441_v28  ;;  %v1380_v39 = vadd.f32 %v1379_v35, %v1324_v30  ;;  %v1457_v28 = vmul.f32 %v1338_v22, %v1338_v22  ;;  %v1340_v30 = vld [vmem:[%s3017_s2 + $0x1c0] sm:$0xff] }
 0x1fc   : > { %v1459_v35 = vmul.f32 %v1340_v30, %v1340_v30 }
 0x1fd   : > { %v1498_v41 = vadd.f32 %v1497_v37, %v1442_v32  ;;  %v1381_v43 = vadd.f32 %v1380_v39, %v1325_v34  ;;  %v1458_v32 = vmul.f32 %v1339_v26, %v1339_v26 }
 0x1ff   : > { %v1499_v45 = vadd.f32 %v1498_v41, %v1443_v36  ;;  %v1382_v47 = vadd.f32 %v1381_v43, %v1326_v38 }
 0x201   : > { %v1500_v49 = vadd.f32 %v1499_v45, %v1444_v40  ;;  %v1383_v51 = vadd.f32 %v1382_v47, %v1327_v42  ;;  %v1522_v40 = vlaneseq }
 0x203   : > { %v1501_v53 = vadd.f32 %v1500_v49, %v1445_v44  ;;  %v1384_v55 = vadd.f32 %v1383_v51, %v1328_v46  ;;  %v1523_v45 = vshrl.u32 %v1522_v40, 7 }
 0x205   : > { %v1502_v57 = vadd.f32 %v1501_v53, %v1446_v48  ;;  %v1385_v59 = vadd.f32 %v1384_v55, %v1329_v50  ;;  %v1524_v50 = vsub.s32 0, %v1523_v45 }
 0x207   : > { %v1503_v61 = vadd.f32 %v1502_v57, %v1447_v52  ;;  %v1386_v63 = vadd.f32 %v1385_v59, %v1330_v54 }
 0x209   : > { %v1504_v1 = vadd.f32 %v1503_v61, %v1448_v56  ;;  %v1387_v3 = vadd.f32 %v1386_v63, %v1331_v58 }
 0x20b   : > { %v1505_v5 = vadd.f32 %v1504_v1, %v1449_v60  ;;  %v1388_v7 = vadd.f32 %v1387_v3, %v1332_v62 }
 0x20d   : > { %v1506_v9 = vadd.f32 %v1505_v5, %v1450_v0  ;;  %v1389_v11 = vadd.f32 %v1388_v7, %v1333_v2 }
 0x20f   : > { %v1507_v13 = vadd.f32 %v1506_v9, %v1451_v4  ;;  %v1390_v15 = vadd.f32 %v1389_v11, %v1334_v6 }
 0x211   : > { %v1508_v17 = vadd.f32 %v1507_v13, %v1452_v8  ;;  %v1391_v19 = vadd.f32 %v1390_v15, %v1335_v10 }
 0x213   : > { %v1509_v21 = vadd.f32 %v1508_v17, %v1453_v12  ;;  %v1392_v23 = vadd.f32 %v1391_v19, %v1336_v14 }
 0x215   : > { %v1510_v25 = vadd.f32 %v1509_v21, %v1454_v16  ;;  %v1393_v27 = vadd.f32 %v1392_v23, %v1337_v18 }
 0x217   : > { %v1511_v29 = vadd.f32 %v1510_v25, %v1455_v20  ;;  %v1394_v31 = vadd.f32 %v1393_v27, %v1338_v22 }
 0x219   : > { %v1512_v33 = vadd.f32 %v1511_v29, %v1456_v24  ;;  %v1395_v34 = vadd.f32 %v1394_v31, %v1339_v26 }
 0x21b   : > { %v1513_v36 = vadd.f32 %v1512_v33, %v1457_v28  ;;  %v1396_v37 = vadd.f32 %v1395_v34, %v1340_v30 }
 0x21d   : > { %v1514_v38 = vadd.f32 %v1513_v36, %v1458_v32  ;;  %v1397_v39 = vrot.slane %v1396_v37, 4 }
 0x21f   : > { %v1515_v41 = vadd.f32 %v1514_v38, %v1459_v35  ;;  %v1398_v42 = vadd.f32 %v1397_v39, %v1396_v37 }
 0x221   : > { %v1516_v43 = vrot.slane %v1515_v41, 4  ;;  %v1399_v44 = vrot.slane %v1398_v42, 2 }
 0x223   : > { %v1517_v46 = vadd.f32 %v1516_v43, %v1515_v41  ;;  %v1400_v47 = vadd.f32 %v1399_v44, %v1398_v42 }
 0x225   : > { %v1518_v48 = vrot.slane %v1517_v46, 2  ;;  %v1401_v49 = vrot.slane %v1400_v47, 1 }
 0x227   : > { %v1519_v51 = vadd.f32 %v1518_v48, %v1517_v46  ;;  %v1402_v52 = vadd.f32 %v1401_v49, %v1400_v47 }
 0x229   : > { %v1520_v53 = vrot.slane %v1519_v51, 1  ;;  %v1525_v54 = vrot.slane %v1402_v52, %v1524_v50 }
 0x22b   : > { %v1521_v55 = vadd.f32 %v1520_v53, %v1519_v51  ;;  %1530 = vst [vmem:[%s3018_s3] sm:$0xff] %v1525_v54 }
 0x22d   : > { %v1529_v56 = vrot.slane %v1521_v55, %v1524_v50 }
 0x22f   : > { %1531 = vst [vmem:[%s3018_s3 + $0x8] sm:$0xff] %v1529_v56 }
 0x230 PF: > { %s14_s16 = sadd.s32 1, %s2000_s16   ;;  %s3019_s12 = smov %s1988_s13 }
 0x231   : > { %p11_p12 = scmp.ge.s32.totalorder %s14_s16, 11   ;;  %s3020_s13 = smov %s2060_s20 }
 0x232   : > { %s3021_s14 = smov %s1996_s15  ;;  %s3022_s15 = smov %s3024_s17 }
 0x233   :  { %13 = sbr.rel (!%p11_p12) target bundleno = 3 (0x3), region = 127 }

// kernel: generator_forward.7
= control target key start
LH: loop header
LB: loop body
LE: loop exit
PB: predicated region body
PF: predicated region fallthrough
CT: control target
= control target key end

     0   :  { %s7358_s12 = smov 0   ;;  %s9475_s0 = inlined_call_operand.vmem [shape: bf16[2048,576], index: 0, kind: input, shape index: {}]   ;;  %s9476_s1 = inlined_call_operand.vmem [shape: bf16[576,8], index: 1, kind: input, shape index: {}]   ;;  %s9477_s2 = inlined_call_operand.vmem [shape: f32[1,8], index: 2, kind: input, shape index: {}]   ;;  %s9478_s3 = inlined_call_operand.vmem [shape: f32[2048,8], index: 3, kind: output, shape index: {}]  }
   0x1 LB: > { %s5366_s13 = sadd.s32 4294967295, %s7335_s12   ;;  %p5370_p0 = scmp.ge.s32.totalorder %s7335_s12, 1  ;;  %s7335_s12 = sphi %s7358_s12, %s13_s12  }
   0x2   : > { %p139_p1 = scmp.lt.s32.totalorder %s7335_s12, 3 }
   0x4   : > { %p140_p2 = pnand %p5370_p0, %p139_p1 }
   0x6   : > { %143 = sbr.rel (%p140_p2) target bundleno = 989 (0x3dd), region = 32 }
   0xd   : > { %v6332_v0 = vld [vmem:[%s9476_s1] sm:$0xff]   ;;  %v7337_v1 = vmov 0   ;;  %s5371_s16 = sshll.u32 %s5366_s13, 7  ;;  %v6333_v2 = vld [vmem:[%s9476_s1 + $0x8] sm:$0xff]   ;;  %v6334_v3 = vld [vmem:[%s9476_s1 + $0x10] sm:$0xff]   ;;  %vm2457_vm0 = vcmask 523264  }
   0xe   : > { %2650 = vmatprep.subr.bf16.mxu0 %v7337_v1  ;;  %6002 = vmatprep.subr.bf16.mxu1 %v7337_v1  ;;  %p165_p3 = scmp.lt.s32.totalorder %s5371_s16, 255  ;;  %v6335_v4 = vld [vmem:[%s9476_s1 + $0x18] sm:$0xff]   ;;  %v6336_v5 = vld [vmem:[%s9476_s1 + $0x20] sm:$0xff]   ;;  %v6337_v7 = vld [vmem:[%s9476_s1 + $0x28] sm:$0xff]   ;;  %vm5181_vm1 = vcmask 64512  }
   0xf   : > { %2651 = vmatpush1.bf16.msra.mxu0 %v6332_v0  ;;  %6018 = vmatpush1.bf16.msra.mxu1 %v6332_v0  ;;  %v6338_v9 = vld [vmem:[%s9476_s1 + $0x30] sm:$0xff]   ;;  %v6339_v10 = vld [vmem:[%s9476_s1 + $0x38] sm:$0xff]   ;;  %v6340_v11 = vld [vmem:[%s9476_s1 + $0x40] sm:$0xff]  }
  0x10   : > { %2652 = vmatprep.subr.bf16.mxu0 %v7337_v1  ;;  %6003 = vmatprep.subr.bf16.mxu1 %v7337_v1  ;;  %s9784_s16 = smov (!%p165_p3, %s5371_s16), 255  ;;  %v6341_v12 = vld [vmem:[%s9476_s1 + $0x48] sm:$0xff]   ;;  %v6342_v13 = vld [vmem:[%s9476_s1 + $0x50] sm:$0xff]   ;;  %v6343_v14 = vld [vmem:[%s9476_s1 + $0x58] sm:$0xff]  }
  0x11   : > { %s6322_s23 = smul.u32 20, %s9784_s16  ;;  %v6344_v15 = vld [vmem:[%s9476_s1 + $0x60] sm:$0xff]   ;;  %v6345_v16 = vld [vmem:[%s9476_s1 + $0x68] sm:$0xff]   ;;  %v6346_v17 = vld [vmem:[%s9476_s1 + $0x70] sm:$0xff]   ;;  %s5374_s22 = sshll.u32 %s9784_s16, 3 }
  0x12   : > { %v6347_v18 = vld [vmem:[%s9476_s1 + $0x78] sm:$0xff]   ;;  %v6355_v19 = vld [vmem:[%s9476_s1 + $0x100] sm:$0xff]   ;;  %v6440_v25 = vld [vmem:[%s9476_s1 + $0x108] sm:$0xff]   ;;  %s8731_s24 = scalar_lea.vmem %s9478_s3, %s5374_s22 }
  0x13   : > { %2653 = vmatpush1.bf16.msra.mxu0 %v6333_v2  ;;  %6019 = vmatpush1.bf16.msra.mxu1 %v6333_v2  ;;  %s7395_s28 = scalar_lea.vmem %s9475_s0, %s6322_s23  ;;  %v6354_v22 = vld [vmem:[%s9476_s1 + $0x80] sm:$0xff]   ;;  %v6362_v26 = vld [vmem:[%s9476_s1 + $0x88] sm:$0xff]   ;;  %v6369_v31 = vld [vmem:[%s9476_s1 + $0x90] sm:$0xff]  }
  0x14   : > { %2654 = vmatprep.subr.bf16.mxu0 %v7337_v1  ;;  %6004 = vmatprep.subr.bf16.mxu1 %v7337_v1  ;;  %v6350_v6 = vld [vmem:[%s7395_s28 + $0x4] ss:$20 sps:$4 sm:$0xff]   ;;  %v6348_v20 = vld [vmem:[%s7395_s28] ss:$20 sps:$4 sm:$0xff]   ;;  %v6360_v27 = vld [vmem:[%s7395_s28 + $0x28] ss:$20 sps:$4 sm:$0xff]  }
  0x15   : > { %v6353_v8 = vld [vmem:[%s7395_s28 + $0x284] ss:$20 sps:$4 sm:$0xff]   ;;  %2682 = vmatprep.mubr.bf16.mxu0 %v6350_v6  ;;  %v6351_v21 = vld [vmem:[%s7395_s28 + $0x280] ss:$20 sps:$4 sm:$0xff]   ;;  %v6361_v28 = vld [vmem:[%s7395_s28 + $0x2a8] ss:$20 sps:$4 sm:$0xff]  }
  0x16   : > { %2810 = vmatprep.mubr.bf16.mxu1 %v6353_v8  ;;  %v6356_v23 = vld [vmem:[%s7395_s28 + $0x2c] ss:$20 sps:$4 sm:$0xff]   ;;  %v6363_v29 = vld [vmem:[%s7395_s28 + $0x54] ss:$20 sps:$4 sm:$0xff]   ;;  %v6376_v32 = vld [vmem:[%s9476_s1 + $0x98] sm:$0xff]  }
  0x17   : > { %2655 = vmatpush1.bf16.msra.mxu0 %v6334_v3  ;;  %6020 = vmatpush1.bf16.msra.mxu1 %v6334_v3  ;;  %v6358_v24 = vld [vmem:[%s7395_s28 + $0x2ac] ss:$20 sps:$4 sm:$0xff]   ;;  %v6365_v30 = vld [vmem:[%s7395_s28 + $0x2d4] ss:$20 sps:$4 sm:$0xff]   ;;  %v6367_v33 = vld [vmem:[%s7395_s28 + $0x50] ss:$20 sps:$4 sm:$0xff]  }
  0x18   : > { %2656 = vmatprep.subr.bf16.mxu0 %v7337_v1  ;;  %6005 = vmatprep.subr.bf16.mxu1 %v7337_v1  ;;  %v6368_v34 = vld [vmem:[%s7395_s28 + $0x2d0] ss:$20 sps:$4 sm:$0xff]   ;;  %v6390_v38 = vld [vmem:[%s9476_s1 + $0xa8] sm:$0xff]   ;;  %v6404_v44 = vld [vmem:[%s9476_s1 + $0xb8] sm:$0xff]  }
  0x19   : > { %v6370_v35 = vld [vmem:[%s7395_s28 + $0x7c] ss:$20 sps:$4 sm:$0xff]   ;;  %v6383_v37 = vld [vmem:[%s9476_s1 + $0xa0] sm:$0xff]   ;;  %v6374_v39 = vld [vmem:[%s7395_s28 + $0x78] ss:$20 sps:$4 sm:$0xff]  }
  0x1a   : > { %v6372_v36 = vld [vmem:[%s7395_s28 + $0x2fc] ss:$20 sps:$4 sm:$0xff]   ;;  %v6375_v40 = vld [vmem:[%s7395_s28 + $0x2f8] ss:$20 sps:$4 sm:$0xff]   ;;  %v6381_v45 = vld [vmem:[%s7395_s28 + $0xa0] ss:$20 sps:$4 sm:$0xff]  }
  0x1b   : > { %2657 = vmatpush1.bf16.msra.mxu0 %v6335_v4  ;;  %6021 = vmatpush1.bf16.msra.mxu1 %v6335_v4  ;;  %v6377_v41 = vld [vmem:[%s7395_s28 + $0xa4] ss:$20 sps:$4 sm:$0xff]   ;;  %v6397_v43 = vld [vmem:[%s9476_s1 + $0xb0] sm:$0xff]   ;;  %v6384_v47 = vld [vmem:[%s7395_s28 + $0xcc] ss:$20 sps:$4 sm:$0xff]  }
  0x1c   : > { %2658 = vmatprep.subr.bf16.mxu0 %v7337_v1  ;;  %6006 = vmatprep.subr.bf16.mxu1 %v7337_v1  ;;  %v6379_v42 = vld [vmem:[%s7395_s28 + $0x324] ss:$20 sps:$4 sm:$0xff]   ;;  %v6382_v46 = vld [vmem:[%s7395_s28 + $0x320] ss:$20 sps:$4 sm:$0xff]   ;;  %v6418_v50 = vld [vmem:[%s9476_s1 + $0xc8] sm:$0xff]  }
  0x1d   : > { %v6386_v48 = vld [vmem:[%s7395_s28 + $0x34c] ss:$20 sps:$4 sm:$0xff]   ;;  %v6388_v51 = vld [vmem:[%s7395_s28 + $0xc8] ss:$20 sps:$4 sm:$0xff]   ;;  %v6425_v55 = vld [vmem:[%s9476_s1 + $0xd0] sm:$0xff]  }
  0x1e   : > { %v6411_v49 = vld [vmem:[%s9476_s1 + $0xc0] sm:$0xff]   ;;  %v6389_v52 = vld [vmem:[%s7395_s28 + $0x348] ss:$20 sps:$4 sm:$0xff]   ;;  %v6402_v63 = vld [vmem:[%s7395_s28 + $0x118] ss:$20 sps:$4 sm:$0xff]  }
  0x1f   : > { %2659 = vmatpush1.bf16.msra.mxu0 %v6336_v5  ;;  %6022 = vmatpush1.bf16.msra.mxu1 %v6336_v5  ;;  %v6391_v53 = vld [vmem:[%s7395_s28 + $0xf4] ss:$20 sps:$4 sm:$0xff]   ;;  %v6432_v56 = vld [vmem:[%s9476_s1 + $0xd8] sm:$0xff]   ;;  %v6395_v57 = vld [vmem:[%s7395_s28 + $0xf0] ss:$20 sps:$4 sm:$0xff]  }
  0x20   : > { %2660 = vmatprep.subr.bf16.mxu0 %v7337_v1  ;;  %6007 = vmatprep.subr.bf16.mxu1 %v7337_v1  ;;  %v6393_v54 = vld [vmem:[%s7395_s28 + $0x374] ss:$20 sps:$4 sm:$0xff]   ;;  %v6396_v58 = vld [vmem:[%s7395_s28 + $0x370] ss:$20 sps:$4 sm:$0xff]   ;;  %v6403_v0 = vld [vmem:[%s7395_s28 + $0x398] ss:$20 sps:$4 sm:$0xff]  }
  0x21   : > { %v6398_v59 = vld [vmem:[%s7395_s28 + $0x11c] ss:$20 sps:$4 sm:$0xff]   ;;  %v6439_v61 = vld [vmem:[%s9476_s1 + $0xe0] sm:$0xff]   ;;  %v6447_v62 = vld [vmem:[%s9476_s1 + $0xe8] sm:$0xff]  }
  0x22   : > { %v6400_v60 = vld [vmem:[%s7395_s28 + $0x39c] ss:$20 sps:$4 sm:$0xff]   ;;  %v6405_v2 = vld [vmem:[%s7395_s28 + $0x144] ss:$20 sps:$4 sm:$0xff]   ;;  %v6409_v6 = vld [vmem:[%s7395_s28 + $0x140] ss:$20 sps:$4 sm:$0xff]  }
  0x23   : > { %2661 = vmatpush1.bf16.msra.mxu0 %v6337_v7  ;;  %6023 = vmatpush1.bf16.msra.mxu1 %v6337_v7  ;;  %v6407_v3 = vld [vmem:[%s7395_s28 + $0x3c4] ss:$20 sps:$4 sm:$0xff]   ;;  %v6454_v4 = vld [vmem:[%s9476_s1 + $0xf0] sm:$0xff]   ;;  %v6412_v8 = vld [vmem:[%s7395_s28 + $0x16c] ss:$20 sps:$4 sm:$0xff]  }
  0x24   : > { %2662 = vmatprep.subr.bf16.mxu0 %v7337_v1  ;;  %6008 = vmatprep.subr.bf16.mxu1 %v7337_v1  ;;  %v6461_v5 = vld [vmem:[%s9476_s1 + $0xf8] sm:$0xff]   ;;  %v6410_v7 = vld [vmem:[%s7395_s28 + $0x3c0] ss:$20 sps:$4 sm:$0xff]  }
  0x27   : > { %2663 = vmatpush1.bf16.msra.mxu0 %v6338_v9  ;;  %6024 = vmatpush1.bf16.msra.mxu1 %v6338_v9  ;;  %v6414_v9 = vld [vmem:[%s7395_s28 + $0x3ec] ss:$20 sps:$4 sm:$0xff]  }
  0x28   : > { %2664 = vmatprep.subr.bf16.mxu0 %v7337_v1  ;;  %6009 = vmatprep.subr.bf16.mxu1 %v7337_v1 }
  0x2b   : > { %2665 = vmatpush1.bf16.msra.mxu0 %v6339_v10  ;;  %6025 = vmatpush1.bf16.msra.mxu1 %v6339_v10  ;;  %v6516_v10 = vld [vmem:[%s9476_s1 + $0x110] sm:$0xff]  }
  0x2c   : > { %2666 = vmatprep.subr.bf16.mxu0 %v7337_v1  ;;  %6010 = vmatprep.subr.bf16.mxu1 %v7337_v1 }
  0x2f   : > { %2667 = vmatpush1.bf16.msra.mxu0 %v6340_v11  ;;  %6026 = vmatpush1.bf16.msra.mxu1 %v6340_v11  ;;  %v6416_v11 = vld [vmem:[%s7395_s28 + $0x168] ss:$20 sps:$4 sm:$0xff]  }
  0x30   : > { %2668 = vmatprep.subr.bf16.mxu0 %v7337_v1  ;;  %6011 = vmatprep.subr.bf16.mxu1 %v7337_v1 }
  0x33   : > { %2669 = vmatpush1.bf16.msra.mxu0 %v6341_v12  ;;  %6027 = vmatpush1.bf16.msra.mxu1 %v6341_v12  ;;  %v6417_v12 = vld [vmem:[%s7395_s28 + $0x3e8] ss:$20 sps:$4 sm:$0xff]  }
  0x34   : > { %2670 = vmatprep.subr.bf16.mxu0 %v7337_v1  ;;  %6012 = vmatprep.subr.bf16.mxu1 %v7337_v1 }
  0x37   : > { %2671 = vmatpush1.bf16.msra.mxu0 %v6342_v13  ;;  %6028 = vmatpush1.bf16.msra.mxu1 %v6342_v13  ;;  %v6419_v13 = vld [vmem:[%s7395_s28 + $0x194] ss:$20 sps:$4 sm:$0xff]  }
  0x38   : > { %2672 = vmatprep.subr.bf16.mxu0 %v7337_v1  ;;  %6013 = vmatprep.subr.bf16.mxu1 %v7337_v1 }
  0x3b   : > { %2673 = vmatpush1.bf16.msra.mxu0 %v6343_v14  ;;  %6029 = vmatpush1.bf16.msra.mxu1 %v6343_v14  ;;  %v6423_v14 = vld [vmem:[%s7395_s28 + $0x190] ss:$20 sps:$4 sm:$0xff]  }
  0x3c   : > { %2674 = vmatprep.subr.bf16.mxu0 %v7337_v1  ;;  %6014 = vmatprep.subr.bf16.mxu1 %v7337_v1 }
  0x3f   : > { %2675 = vmatpush1.bf16.msra.mxu0 %v6344_v15  ;;  %6030 = vmatpush1.bf16.msra.mxu1 %v6344_v15  ;;  %v6424_v15 = vld [vmem:[%s7395_s28 + $0x410] ss:$20 sps:$4 sm:$0xff]  }
  0x40   : > { %2676 = vmatprep.subr.bf16.mxu0 %v7337_v1  ;;  %6015 = vmatprep.subr.bf16.mxu1 %v7337_v1 }
  0x43   : > { %2677 = vmatpush1.bf16.msra.mxu0 %v6345_v16  ;;  %6031 = vmatpush1.bf16.msra.mxu1 %v6345_v16  ;;  %v6426_v16 = vld [vmem:[%s7395_s28 + $0x1bc] ss:$20 sps:$4 sm:$0xff]  }
  0x44   : > { %2678 = vmatprep.subr.bf16.mxu0 %v7337_v1  ;;  %6016 = vmatprep.subr.bf16.mxu1 %v7337_v1 }
  0x47   : > { %2679 = vmatpush1.bf16.msra.mxu0 %v6346_v17  ;;  %6032 = vmatpush1.bf16.msra.mxu1 %v6346_v17  ;;  %v6428_v17 = vld [vmem:[%s7395_s28 + $0x43c] ss:$20 sps:$4 sm:$0xff]  }
  0x48   : > { %2680 = vmatprep.subr.bf16.mxu0 %v7337_v1  ;;  %6017 = vmatprep.subr.bf16.mxu1 %v7337_v1 }
  0x4b   : > { %2681 = vmatpush1.bf16.msra.mxu0 %v6347_v18  ;;  %6033 = vmatpush1.bf16.msra.mxu1 %v6347_v18  ;;  %v6430_v18 = vld [vmem:[%s7395_s28 + $0x1b8] ss:$20 sps:$4 sm:$0xff]  }
  0x4c   : > { %3195 = vmatprep.subr.bf16.mxu0 %v7337_v1  ;;  %5866 = vmatprep.subr.bf16.mxu1 %v6355_v19 }
  0x4e   : > { %2683 = vmatmul.mubr.bf16.vlgmr.msra.gmra.mrb[0].mxu0 %v6348_v20  ;;  %2811 = vmatmul.mubr.bf16.vlgmr.msra.gmra.mrb[0].mxu1 %v6351_v21  ;;  %v6433_v20 = vld [vmem:[%s7395_s28 + $0x1e4] ss:$20 sps:$4 sm:$0xff]  }
  0x4f   : > { %3196 = vmatpush1.bf16.msra.mxu0 %v6354_v22  ;;  %5867 = vmatpush3.bf16.msra.mxu1 %v6355_v19  ;;  %v6431_v19 = vld [vmem:[%s7395_s28 + $0x438] ss:$20 sps:$4 sm:$0xff]   ;;  %v6437_v22 = vld [vmem:[%s7395_s28 + $0x1e0] ss:$20 sps:$4 sm:$0xff]  }
  0x50   : > { %2690 = vmatprep.mubr.bf16.mxu0 %v6356_v23  ;;  %2818 = vmatprep.mubr.bf16.mxu1 %v6358_v24  ;;  %v6435_v21 = vld [vmem:[%s7395_s28 + $0x464] ss:$20 sps:$4 sm:$0xff]   ;;  %v6438_v23 = vld [vmem:[%s7395_s28 + $0x460] ss:$20 sps:$4 sm:$0xff]  }
  0x51   : > { %3197 = vmatprep.subr.bf16.mxu0 %v7337_v1  ;;  %5868 = vmatprep.subr.bf16.mxu1 %v6440_v25  ;;  %v6441_v24 = vld [vmem:[%s7395_s28 + $0x20c] ss:$20 sps:$4 sm:$0xff]  }
  0x53   : > { %3198 = vmatpush1.bf16.msra.mxu0 %v6362_v26  ;;  %5869 = vmatpush3.bf16.msra.mxu1 %v6440_v25  ;;  %v6443_v25 = vld [vmem:[%s7395_s28 + $0x48c] ss:$20 sps:$4 sm:$0xff]   ;;  %v6445_v26 = vld [vmem:[%s7395_s28 + $0x208] ss:$20 sps:$4 sm:$0xff]  }
  0x54   : > { %3199 = vmatprep.subr.bf16.mxu0 %v7337_v1  ;;  %5870 = vmatprep.subr.bf16.mxu1 %v6516_v10 }
  0x56   : > { %2691 = vmatmul.mubr.bf16.gmra.mrb[4].mxu0 %v6360_v27  ;;  %2819 = vmatmul.mubr.bf16.gmra.mrb[4].mxu1 %v6361_v28  ;;  %v6446_v27 = vld [vmem:[%s7395_s28 + $0x488] ss:$20 sps:$4 sm:$0xff]  }
  0x57   : > { %2698 = vmatprep.mubr.bf16.mxu0 %v6363_v29  ;;  %2826 = vmatprep.mubr.bf16.mxu1 %v6365_v30  ;;  %v6448_v28 = vld [vmem:[%s7395_s28 + $0x234] ss:$20 sps:$4 sm:$0xff]   ;;  %v6452_v30 = vld [vmem:[%s7395_s28 + $0x230] ss:$20 sps:$4 sm:$0xff]  }
  0x58   : > { %3200 = vmatpush1.bf16.msra.mxu0 %v6369_v31  ;;  %5871 = vmatpush3.bf16.msra.mxu1 %v6516_v10  ;;  %v6450_v29 = vld [vmem:[%s7395_s28 + $0x4b4] ss:$20 sps:$4 sm:$0xff]   ;;  %v6453_v31 = vld [vmem:[%s7395_s28 + $0x4b0] ss:$20 sps:$4 sm:$0xff]   ;;  %v6517_v10 = vld [vmem:[%s7395_s28 + $0x66c] ss:$20 sps:$4 sm:$0xff]  }
  0x59   : > { %3201 = vmatprep.subr.bf16.mxu0 %v7337_v1 }
  0x5c   : > { %3202 = vmatpush1.bf16.msra.mxu0 %v6376_v32  ;;  %v6455_v32 = vld [vmem:[%s7395_s28 + $0x25c] ss:$20 sps:$4 sm:$0xff]  }
  0x5d   : > { %3203 = vmatprep.subr.bf16.mxu0 %v7337_v1 }
  0x5e   : > { %2699 = vmatmul.mubr.bf16.gmra.mrb[8].mxu0 %v6367_v33  ;;  %2827 = vmatmul.mubr.bf16.gmra.mrb[8].mxu1 %v6368_v34  ;;  %v6457_v33 = vld [vmem:[%s7395_s28 + $0x4dc] ss:$20 sps:$4 sm:$0xff]   ;;  %v6459_v34 = vld [vmem:[%s7395_s28 + $0x258] ss:$20 sps:$4 sm:$0xff]  }
  0x5f   : > { %2706 = vmatprep.mubr.bf16.mxu0 %v6370_v35  ;;  %2834 = vmatprep.mubr.bf16.mxu1 %v6372_v36  ;;  %v6460_v35 = vld [vmem:[%s7395_s28 + $0x4d8] ss:$20 sps:$4 sm:$0xff]  }
  0x60   : > { %3204 = vmatpush1.bf16.msra.mxu0 %v6383_v37  ;;  %v6462_v36 = vld [vmem:[%s7395_s28 + $0x504] ss:$20 sps:$4 sm:$0xff]   ;;  %v6466_v37 = vld [vmem:[%s7395_s28 + $0xc] ss:$20 sps:$4 sm:$0xff]  }
  0x61   : > { %3205 = vmatprep.subr.bf16.mxu0 %v7337_v1 }
  0x64   : > { %3206 = vmatpush1.bf16.msra.mxu0 %v6390_v38  ;;  %v6464_v38 = vld [vmem:[%s7395_s28 + $0x8] ss:$20 sps:$4 sm:$0xff]  }
  0x65   : > { %3207 = vmatprep.subr.bf16.mxu0 %v7337_v1 }
  0x66   : > { %2707 = vmatmul.mubr.bf16.gmra.mrb[12].mxu0 %v6374_v39  ;;  %2835 = vmatmul.mubr.bf16.gmra.mrb[12].mxu1 %v6375_v40  ;;  %v6467_v39 = vld [vmem:[%s7395_s28 + $0x500] ss:$20 sps:$4 sm:$0xff]  }
  0x67   : > { %2714 = vmatprep.mubr.bf16.mxu0 %v6377_v41  ;;  %2842 = vmatprep.mubr.bf16.mxu1 %v6379_v42  ;;  %v6468_v40 = vld [vmem:[%s7395_s28 + $0x52c] ss:$20 sps:$4 sm:$0xff]   ;;  %v6470_v41 = vld [vmem:[%s7395_s28 + $0x34] ss:$20 sps:$4 sm:$0xff]  }
  0x68   : > { %3208 = vmatpush1.bf16.msra.mxu0 %v6397_v43  ;;  %v6472_v42 = vld [vmem:[%s7395_s28 + $0x528] ss:$20 sps:$4 sm:$0xff]   ;;  %v6473_v43 = vld [vmem:[%s7395_s28 + $0x30] ss:$20 sps:$4 sm:$0xff]  }
  0x69   : > { %3209 = vmatprep.subr.bf16.mxu0 %v7337_v1 }
  0x6c   : > { %3210 = vmatpush1.bf16.msra.mxu0 %v6404_v44  ;;  %v6474_v44 = vld [vmem:[%s7395_s28 + $0x554] ss:$20 sps:$4 sm:$0xff]  }
  0x6d   : > { %3211 = vmatprep.subr.bf16.mxu0 %v7337_v1 }
  0x6e   : > { %2715 = vmatmul.mubr.bf16.gmra.mrb[16].mxu0 %v6381_v45  ;;  %2843 = vmatmul.mubr.bf16.gmra.mrb[16].mxu1 %v6382_v46  ;;  %v6476_v45 = vld [vmem:[%s7395_s28 + $0x5c] ss:$20 sps:$4 sm:$0xff]  }
  0x6f   : > { %2722 = vmatprep.mubr.bf16.mxu0 %v6384_v47  ;;  %2850 = vmatprep.mubr.bf16.mxu1 %v6386_v48  ;;  %v6478_v46 = vld [vmem:[%s7395_s28 + $0x550] ss:$20 sps:$4 sm:$0xff]   ;;  %v6479_v47 = vld [vmem:[%s7395_s28 + $0x58] ss:$20 sps:$4 sm:$0xff]  }
  0x70   : > { %3212 = vmatpush1.bf16.msra.mxu0 %v6411_v49  ;;  %v6480_v48 = vld [vmem:[%s7395_s28 + $0x57c] ss:$20 sps:$4 sm:$0xff]   ;;  %v6482_v49 = vld [vmem:[%s7395_s28 + $0x84] ss:$20 sps:$4 sm:$0xff]  }
  0x71   : > { %3213 = vmatprep.subr.bf16.mxu0 %v7337_v1 }
  0x74   : > { %3214 = vmatpush1.bf16.msra.mxu0 %v6418_v50  ;;  %v6484_v50 = vld [vmem:[%s7395_s28 + $0x578] ss:$20 sps:$4 sm:$0xff]  }
  0x75   : > { %3215 = vmatprep.subr.bf16.mxu0 %v7337_v1 }
  0x76   : > { %2723 = vmatmul.mubr.bf16.gmra.mrb[20].mxu0 %v6388_v51  ;;  %2851 = vmatmul.mubr.bf16.gmra.mrb[20].mxu1 %v6389_v52  ;;  %v6485_v51 = vld [vmem:[%s7395_s28 + $0x80] ss:$20 sps:$4 sm:$0xff]   ;;  %v6486_v52 = vld [vmem:[%s7395_s28 + $0x5a4] ss:$20 sps:$4 sm:$0xff]  }
  0x77   : > { %2730 = vmatprep.mubr.bf16.mxu0 %v6391_v53  ;;  %2858 = vmatprep.mubr.bf16.mxu1 %v6393_v54  ;;  %v6488_v53 = vld [vmem:[%s7395_s28 + $0xac] ss:$20 sps:$4 sm:$0xff]  }
  0x78   : > { %3216 = vmatpush1.bf16.msra.mxu0 %v6425_v55  ;;  %v6490_v54 = vld [vmem:[%s7395_s28 + $0x5a0] ss:$20 sps:$4 sm:$0xff]   ;;  %v6491_v55 = vld [vmem:[%s7395_s28 + $0xa8] ss:$20 sps:$4 sm:$0xff]  }
  0x79   : > { %3217 = vmatprep.subr.bf16.mxu0 %v7337_v1 }
  0x7c   : > { %3218 = vmatpush1.bf16.msra.mxu0 %v6432_v56  ;;  %v6492_v56 = vld [vmem:[%s7395_s28 + $0x5cc] ss:$20 sps:$4 sm:$0xff]  }
  0x7d   : > { %3219 = vmatprep.subr.bf16.mxu0 %v7337_v1 }
  0x7e   : > { %2731 = vmatmul.mubr.bf16.gmra.mrb[24].mxu0 %v6395_v57  ;;  %2859 = vmatmul.mubr.bf16.gmra.mrb[24].mxu1 %v6396_v58  ;;  %v6494_v57 = vld [vmem:[%s7395_s28 + $0xd4] ss:$20 sps:$4 sm:$0xff]   ;;  %v6589_v58 = vld [vmem:[%s9476_s1 + $0x118] sm:$0xff]  }
  0x7f   : > { %2738 = vmatprep.mubr.bf16.mxu0 %v6398_v59  ;;  %2866 = vmatprep.mubr.bf16.mxu1 %v6400_v60  ;;  %v6496_v59 = vld [vmem:[%s7395_s28 + $0x5c8] ss:$20 sps:$4 sm:$0xff]   ;;  %v6497_v60 = vld [vmem:[%s7395_s28 + $0xd0] ss:$20 sps:$4 sm:$0xff]  }
  0x80   : > { %3220 = vmatpush1.bf16.msra.mxu0 %v6439_v61  ;;  %5872 = vmatprep.subr.bf16.mxu1 %v6589_v58  ;;  %v6498_v61 = vld [vmem:[%s7395_s28 + $0x5f4] ss:$20 sps:$4 sm:$0xff]  }
  0x81   : > { %3221 = vmatprep.subr.bf16.mxu0 %v7337_v1  ;;  %5873 = vmatpush3.bf16.msra.mxu1 %v6589_v58 }
  0x84   : > { %3222 = vmatpush1.bf16.msra.mxu0 %v6447_v62  ;;  %v6500_v62 = vld [vmem:[%s7395_s28 + $0xfc] ss:$20 sps:$4 sm:$0xff]  }
  0x85   : > { %3223 = vmatprep.subr.bf16.mxu0 %v7337_v1 }
  0x86   : > { %2739 = vmatmul.mubr.bf16.gmra.mrb[28].mxu0 %v6402_v63  ;;  %2867 = vmatmul.mubr.bf16.gmra.mrb[28].mxu1 %v6403_v0  ;;  %v6502_v63 = vld [vmem:[%s7395_s28 + $0x5f0] ss:$20 sps:$4 sm:$0xff]   ;;  %v6503_v0 = vld [vmem:[%s7395_s28 + $0xf8] ss:$20 sps:$4 sm:$0xff]  }
  0x87   : > { %2746 = vmatprep.mubr.bf16.mxu0 %v6405_v2  ;;  %2874 = vmatprep.mubr.bf16.mxu1 %v6407_v3  ;;  %v6504_v2 = vld [vmem:[%s7395_s28 + $0x61c] ss:$20 sps:$4 sm:$0xff]   ;;  %v6506_v3 = vld [vmem:[%s7395_s28 + $0x124] ss:$20 sps:$4 sm:$0xff]  }
  0x88   : > { %3224 = vmatpush1.bf16.msra.mxu0 %v6454_v4  ;;  %v6508_v4 = vld [vmem:[%s7395_s28 + $0x618] ss:$20 sps:$4 sm:$0xff]  }
  0x89   : > { %3225 = vmatprep.subr.bf16.mxu0 %v7337_v1  ;;  %v6421_v1 = vld [vmem:[%s7395_s28 + $0x414] ss:$20 sps:$4 sm:$0xff]  }
  0x8c   : > { %3226 = vmatpush1.bf16.msra.mxu0 %v6461_v5  ;;  %v6509_v5 = vld [vmem:[%s7395_s28 + $0x120] ss:$20 sps:$4 sm:$0xff]  }
  0x8e   : > { %2747 = vmatmul.mubr.bf16.gmra.mrb[32].mxu0 %v6409_v6  ;;  %2875 = vmatmul.mubr.bf16.gmra.mrb[32].mxu1 %v6410_v7  ;;  %v6510_v6 = vld [vmem:[%s7395_s28 + $0x644] ss:$20 sps:$4 sm:$0xff]   ;;  %v6512_v7 = vld [vmem:[%s7395_s28 + $0x14c] ss:$20 sps:$4 sm:$0xff]  }
  0x8f   : > { %2754 = vmatprep.mubr.bf16.mxu0 %v6412_v8  ;;  %2882 = vmatprep.mubr.bf16.mxu1 %v6414_v9  ;;  %v6514_v8 = vld [vmem:[%s7395_s28 + $0x640] ss:$20 sps:$4 sm:$0xff]   ;;  %v6515_v9 = vld [vmem:[%s7395_s28 + $0x148] ss:$20 sps:$4 sm:$0xff]  }
  0x96   : > { %2755 = vmatmul.mubr.bf16.gmra.mrb[36].mxu0 %v6416_v11  ;;  %2883 = vmatmul.mubr.bf16.gmra.mrb[36].mxu1 %v6417_v12  ;;  %v6519_v11 = vld [vmem:[%s7395_s28 + $0x174] ss:$20 sps:$4 sm:$0xff]  }
  0x97   : > { %2762 = vmatprep.mubr.bf16.mxu0 %v6419_v13  ;;  %2890 = vmatprep.mubr.bf16.mxu1 %v6421_v1  ;;  %v6521_v12 = vld [vmem:[%s7395_s28 + $0x668] ss:$20 sps:$4 sm:$0xff]   ;;  %v6522_v13 = vld [vmem:[%s7395_s28 + $0x170] ss:$20 sps:$4 sm:$0xff]  }
  0x98   : > { %v6523_v1 = vld [vmem:[%s7395_s28 + $0x694] ss:$20 sps:$4 sm:$0xff]  }
  0x9e   : > { %2763 = vmatmul.mubr.bf16.gmra.mrb[40].mxu0 %v6423_v14  ;;  %2891 = vmatmul.mubr.bf16.gmra.mrb[40].mxu1 %v6424_v15  ;;  %v6525_v14 = vld [vmem:[%s7395_s28 + $0x19c] ss:$20 sps:$4 sm:$0xff]  }
  0x9f   : > { %2770 = vmatprep.mubr.bf16.mxu0 %v6426_v16  ;;  %2898 = vmatprep.mubr.bf16.mxu1 %v6428_v17  ;;  %v6527_v15 = vld [vmem:[%s7395_s28 + $0x690] ss:$20 sps:$4 sm:$0xff]   ;;  %v6528_v16 = vld [vmem:[%s7395_s28 + $0x198] ss:$20 sps:$4 sm:$0xff]  }
  0xa0   : > { %v6529_v17 = vld [vmem:[%s7395_s28 + $0x6bc] ss:$20 sps:$4 sm:$0xff]  }
  0xa6   : > { %2771 = vmatmul.mubr.bf16.gmra.mrb[44].mxu0 %v6430_v18  ;;  %2899 = vmatmul.mubr.bf16.gmra.mrb[44].mxu1 %v6431_v19  ;;  %v6531_v18 = vld [vmem:[%s7395_s28 + $0x1c4] ss:$20 sps:$4 sm:$0xff]  }
  0xa7   : > { %2778 = vmatprep.mubr.bf16.mxu0 %v6433_v20  ;;  %2906 = vmatprep.mubr.bf16.mxu1 %v6435_v21  ;;  %v6533_v21 = vld [vmem:[%s7395_s28 + $0x6b8] ss:$20 sps:$4 sm:$0xff]  }
  0xae   : > { %2779 = vmatmul.mubr.bf16.gmra.mrb[48].mxu0 %v6437_v22  ;;  %2907 = vmatmul.mubr.bf16.gmra.mrb[48].mxu1 %v6438_v23  ;;  %v6534_v22 = vld [vmem:[%s7395_s28 + $0x1c0] ss:$20 sps:$4 sm:$0xff]  }
  0xaf   : > { %2786 = vmatprep.mubr.bf16.mxu0 %v6441_v24  ;;  %2914 = vmatprep.mubr.bf16.mxu1 %v6443_v25  ;;  %v6535_v24 = vld [vmem:[%s7395_s28 + $0x6e4] ss:$20 sps:$4 sm:$0xff]   ;;  %v6537_v25 = vld [vmem:[%s7395_s28 + $0x1ec] ss:$20 sps:$4 sm:$0xff]  }
  0xb6   : > { %2787 = vmatmul.mubr.bf16.gmra.mrb[52].mxu0 %v6445_v26  ;;  %2915 = vmatmul.mubr.bf16.gmra.mrb[52].mxu1 %v6446_v27 }
  0xb7   : > { %2794 = vmatprep.mubr.bf16.mxu0 %v6448_v28  ;;  %2922 = vmatprep.mubr.bf16.mxu1 %v6450_v29  ;;  %v6539_v29 = vld [vmem:[%s7395_s28 + $0x6e0] ss:$20 sps:$4 sm:$0xff]  }
  0xbe   : > { %2795 = vmatmul.mubr.bf16.gmra.mrb[56].mxu0 %v6452_v30  ;;  %2923 = vmatmul.mubr.bf16.gmra.mrb[56].mxu1 %v6453_v31  ;;  %v6540_v30 = vld [vmem:[%s7395_s28 + $0x1e8] ss:$20 sps:$4 sm:$0xff]  }
  0xbf   : > { %2802 = vmatprep.mubr.bf16.mxu0 %v6455_v32  ;;  %2930 = vmatprep.mubr.bf16.mxu1 %v6457_v33  ;;  %v6541_v32 = vld [vmem:[%s7395_s28 + $0x70c] ss:$20 sps:$4 sm:$0xff]   ;;  %v6543_v33 = vld [vmem:[%s7395_s28 + $0x214] ss:$20 sps:$4 sm:$0xff]  }
  0xc6   : > { %2803 = vmatmul.mubr.bf16.gmra.mrb[60].mxu0 %v6459_v34  ;;  %2931 = vmatmul.mubr.bf16.gmra.mrb[60].mxu1 %v6460_v35 }
  0xc7   : > { %2938 = vmatprep.mubr.bf16.mxu1 %v6462_v36  ;;  %3227 = vmatprep.mubr.bf16.mxu0 %v6466_v37  ;;  %v6545_v37 = vld [vmem:[%s7395_s28 + $0x708] ss:$20 sps:$4 sm:$0xff]  }
  0xce   : > { %2939 = vmatmul.mubr.bf16.gmra.mrb[64].mxu1 %v6467_v39  ;;  %3228 = vmatmul.mubr.bf16.vlgmr.msra.gmra.mrb[0].mxu0 %v6464_v38  ;;  %v6546_v38 = vld [vmem:[%s7395_s28 + $0x210] ss:$20 sps:$4 sm:$0xff]  }
  0xcf   : > { %2946 = vmatprep.mubr.bf16.mxu1 %v6468_v40  ;;  %3235 = vmatprep.mubr.bf16.mxu0 %v6470_v41  ;;  %v6547_v40 = vld [vmem:[%s7395_s28 + $0x734] ss:$20 sps:$4 sm:$0xff]   ;;  %v6549_v41 = vld [vmem:[%s7395_s28 + $0x23c] ss:$20 sps:$4 sm:$0xff]  }
  0xd6   : > { %2947 = vmatmul.mubr.bf16.gmra.mrb[68].mxu1 %v6472_v42  ;;  %3236 = vmatmul.mubr.bf16.gmra.mrb[4].mxu0 %v6473_v43 }
  0xd7   : > { %2954 = vmatprep.mubr.bf16.mxu1 %v6474_v44  ;;  %3243 = vmatprep.mubr.bf16.mxu0 %v6476_v45  ;;  %v6551_v45 = vld [vmem:[%s7395_s28 + $0x730] ss:$20 sps:$4 sm:$0xff]  }
  0xde   : > { %2955 = vmatmul.mubr.bf16.gmra.mrb[72].mxu1 %v6478_v46  ;;  %3244 = vmatmul.mubr.bf16.gmra.mrb[8].mxu0 %v6479_v47  ;;  %v6552_v46 = vld [vmem:[%s7395_s28 + $0x238] ss:$20 sps:$4 sm:$0xff]  }
  0xdf   : > { %2962 = vmatprep.mubr.bf16.mxu1 %v6480_v48  ;;  %3251 = vmatprep.mubr.bf16.mxu0 %v6482_v49  ;;  %v6553_v48 = vld [vmem:[%s7395_s28 + $0x75c] ss:$20 sps:$4 sm:$0xff]   ;;  %v6555_v49 = vld [vmem:[%s7395_s28 + $0x264] ss:$20 sps:$4 sm:$0xff]  }
  0xe6   : > { %2963 = vmatmul.mubr.bf16.gmra.mrb[76].mxu1 %v6484_v50  ;;  %3252 = vmatmul.mubr.bf16.gmra.mrb[12].mxu0 %v6485_v51 }
  0xe7   : > { %2970 = vmatprep.mubr.bf16.mxu1 %v6486_v52  ;;  %3259 = vmatprep.mubr.bf16.mxu0 %v6488_v53  ;;  %v6557_v53 = vld [vmem:[%s7395_s28 + $0x758] ss:$20 sps:$4 sm:$0xff]  }
  0xee   : > { %2971 = vmatmul.mubr.bf16.gmra.mrb[80].mxu1 %v6490_v54  ;;  %3260 = vmatmul.mubr.bf16.gmra.mrb[16].mxu0 %v6491_v55  ;;  %v6558_v54 = vld [vmem:[%s7395_s28 + $0x260] ss:$20 sps:$4 sm:$0xff]  }
  0xef   : > { %2978 = vmatprep.mubr.bf16.mxu1 %v6492_v56  ;;  %3267 = vmatprep.mubr.bf16.mxu0 %v6494_v57  ;;  %v6559_v56 = vld [vmem:[%s7395_s28 + $0x784] ss:$20 sps:$4 sm:$0xff]   ;;  %v6561_v57 = vld [vmem:[%s7395_s28 + $0x28c] ss:$20 sps:$4 sm:$0xff]  }
  0xf6   : > { %2979 = vmatmul.mubr.bf16.gmra.mrb[84].mxu1 %v6496_v59  ;;  %3268 = vmatmul.mubr.bf16.gmra.mrb[20].mxu0 %v6497_v60 }
  0xf7   : > { %2986 = vmatprep.mubr.bf16.mxu1 %v6498_v61  ;;  %3275 = vmatprep.mubr.bf16.mxu0 %v6500_v62  ;;  %v6563_v61 = vld [vmem:[%s7395_s28 + $0x780] ss:$20 sps:$4 sm:$0xff]   ;;  %v6564_v62 = vld [vmem:[%s7395_s28 + $0x288] ss:$20 sps:$4 sm:$0xff]  }
  0xfe   : > { %2987 = vmatmul.mubr.bf16.gmra.mrb[88].mxu1 %v6502_v63  ;;  %3276 = vmatmul.mubr.bf16.gmra.mrb[24].mxu0 %v6503_v0  ;;  %v6565_v0 = vld [vmem:[%s7395_s28 + $0x7ac] ss:$20 sps:$4 sm:$0xff]  }
  0xff   : > { %2994 = vmatprep.mubr.bf16.mxu1 %v6504_v2  ;;  %3283 = vmatprep.mubr.bf16.mxu0 %v6506_v3  ;;  %v6567_v2 = vld [vmem:[%s7395_s28 + $0x2b4] ss:$20 sps:$4 sm:$0xff]  }
 0x106   : > { %2995 = vmatmul.mubr.bf16.gmra.mrb[92].mxu1 %v6508_v4  ;;  %3284 = vmatmul.mubr.bf16.gmra.mrb[28].mxu0 %v6509_v5 }
 0x107   : > { %3002 = vmatprep.mubr.bf16.mxu1 %v6510_v6  ;;  %3291 = vmatprep.mubr.bf16.mxu0 %v6512_v7  ;;  %v6569_v6 = vld [vmem:[%s7395_s28 + $0x7a8] ss:$20 sps:$4 sm:$0xff]   ;;  %v6570_v7 = vld [vmem:[%s7395_s28 + $0x2b0] ss:$20 sps:$4 sm:$0xff]  }
 0x10e   : > { %3003 = vmatmul.mubr.bf16.gmra.mrb[96].mxu1 %v6514_v8  ;;  %3292 = vmatmul.mubr.bf16.gmra.mrb[32].mxu0 %v6515_v9  ;;  %v6571_v9 = vld [vmem:[%s7395_s28 + $0x7d4] ss:$20 sps:$4 sm:$0xff]  }
 0x10f   : > { %3010 = vmatprep.mubr.bf16.mxu1 %v6517_v10  ;;  %3299 = vmatprep.mubr.bf16.mxu0 %v6519_v11  ;;  %v6573_v10 = vld [vmem:[%s7395_s28 + $0x2dc] ss:$20 sps:$4 sm:$0xff]  }
 0x116   : > { %3011 = vmatmul.mubr.bf16.gmra.mrb[100].mxu1 %v6521_v12  ;;  %3300 = vmatmul.mubr.bf16.gmra.mrb[36].mxu0 %v6522_v13 }
 0x117   : > { %3018 = vmatprep.mubr.bf16.mxu1 %v6523_v1  ;;  %3307 = vmatprep.mubr.bf16.mxu0 %v6525_v14  ;;  %v6575_v1 = vld [vmem:[%s7395_s28 + $0x7d0] ss:$20 sps:$4 sm:$0xff]   ;;  %v6576_v14 = vld [vmem:[%s7395_s28 + $0x2d8] ss:$20 sps:$4 sm:$0xff]  }
 0x11e   : > { %3019 = vmatmul.mubr.bf16.gmra.mrb[104].mxu1 %v6527_v15  ;;  %3308 = vmatmul.mubr.bf16.gmra.mrb[40].mxu0 %v6528_v16  ;;  %v6577_v16 = vld [vmem:[%s7395_s28 + $0x7fc] ss:$20 sps:$4 sm:$0xff]  }
 0x11f   : > { %3026 = vmatprep.mubr.bf16.mxu1 %v6529_v17  ;;  %3315 = vmatprep.mubr.bf16.mxu0 %v6531_v18  ;;  %v6579_v17 = vld [vmem:[%s7395_s28 + $0x304] ss:$20 sps:$4 sm:$0xff]  }
 0x121   : > { %v7640_v19 = vpop.f32.mrb[0].mxu1 }
 0x122   : > { %v2814_v20 = vpop.f32.mrb[1].mxu1 }
 0x123   : > { %v7644_v23 = vpop.f32.mrb[2].mxu1 }
 0x124   : > { %v2817_v26 = vpop.f32.mrb[3].mxu1 }
 0x125   : > { %v6583_v26 = vld [vmem:[%s7395_s28 + $0x824] ss:$20 sps:$4 sm:$0xff]  }
 0x126   : > { %3027 = vmatmul.mubr.bf16.gmra.mrb[108].mxu1 %v6533_v21  ;;  %3316 = vmatmul.mubr.bf16.gmra.mrb[44].mxu0 %v6534_v22  ;;  %v6581_v22 = vld [vmem:[%s7395_s28 + $0x7f8] ss:$20 sps:$4 sm:$0xff]  }
 0x127   : > { %3034 = vmatprep.mubr.bf16.mxu1 %v6535_v24  ;;  %3323 = vmatprep.mubr.bf16.mxu0 %v6537_v25  ;;  %v6582_v24 = vld [vmem:[%s7395_s28 + $0x300] ss:$20 sps:$4 sm:$0xff]  }
 0x129   : > { %v7648_v27 = vpop.f32.mrb[4].mxu1 }
 0x12a   : > { %v2822_v28 = vpop.f32.mrb[5].mxu1 }
 0x12b   : > { %v7652_v31 = vpop.f32.mrb[6].mxu1  ;;  %v6585_v28 = vld [vmem:[%s7395_s28 + $0x32c] ss:$20 sps:$4 sm:$0xff]  }
 0x12c   : > { %v2825_v34 = vpop.f32.mrb[7].mxu1 }
 0x12d   : > { %v6588_v34 = vld [vmem:[%s7395_s28 + $0x328] ss:$20 sps:$4 sm:$0xff]  }
 0x12e   : > { %3035 = vmatmul.mubr.bf16.gmra.mrb[112].mxu1 %v6539_v29  ;;  %3324 = vmatmul.mubr.bf16.gmra.mrb[48].mxu0 %v6540_v30 }
 0x12f   : > { %3042 = vmatprep.mubr.bf16.mxu1 %v6541_v32  ;;  %3331 = vmatprep.mubr.bf16.mxu0 %v6543_v33  ;;  %v6587_v33 = vld [vmem:[%s7395_s28 + $0x820] ss:$20 sps:$4 sm:$0xff]  }
 0x131   : > { %v7656_v35 = vpop.f32.mrb[8].mxu1 }
 0x132   : > { %v2830_v36 = vpop.f32.mrb[9].mxu1 }
 0x133   : > { %v7660_v39 = vpop.f32.mrb[10].mxu1 }
 0x134   : > { %v2833_v42 = vpop.f32.mrb[11].mxu1 }
 0x136   : > { %3043 = vmatmul.mubr.bf16.gmra.mrb[116].mxu1 %v6545_v37  ;;  %3332 = vmatmul.mubr.bf16.gmra.mrb[52].mxu0 %v6546_v38  ;;  %v6590_v37 = vld [vmem:[%s7395_s28 + $0x84c] ss:$20 sps:$4 sm:$0xff]   ;;  %v6592_v38 = vld [vmem:[%s7395_s28 + $0x354] ss:$20 sps:$4 sm:$0xff]  }
 0x137   : > { %3050 = vmatprep.mubr.bf16.mxu1 %v6547_v40  ;;  %3339 = vmatprep.mubr.bf16.mxu0 %v6549_v41 }
 0x139   : > { %v7664_v43 = vpop.f32.mrb[12].mxu1 }
 0x13a   : > { %v2838_v44 = vpop.f32.mrb[13].mxu1 }
 0x13b   : > { %v7668_v47 = vpop.f32.mrb[14].mxu1  ;;  %v6594_v44 = vld [vmem:[%s7395_s28 + $0x848] ss:$20 sps:$4 sm:$0xff]  }
 0x13c   : > { %v2841_v50 = vpop.f32.mrb[15].mxu1 }
 0x13e   : > { %3051 = vmatmul.mubr.bf16.gmra.mrb[120].mxu1 %v6551_v45  ;;  %3340 = vmatmul.mubr.bf16.gmra.mrb[56].mxu0 %v6552_v46  ;;  %v6595_v45 = vld [vmem:[%s7395_s28 + $0x350] ss:$20 sps:$4 sm:$0xff]  }
 0x13f   : > { %3058 = vmatprep.mubr.bf16.mxu1 %v6553_v48  ;;  %3347 = vmatprep.mubr.bf16.mxu0 %v6555_v49  ;;  %v6596_v48 = vld [vmem:[%s7395_s28 + $0x874] ss:$20 sps:$4 sm:$0xff]   ;;  %v6598_v49 = vld [vmem:[%s7395_s28 + $0x37c] ss:$20 sps:$4 sm:$0xff]  }
 0x141   : > { %v7672_v51 = vpop.f32.mrb[16].mxu1 }
 0x142   : > { %v2846_v52 = vpop.f32.mrb[17].mxu1 }
 0x143   : > { %v7676_v55 = vpop.f32.mrb[18].mxu1 }
 0x144   : > { %v2849_v58 = vpop.f32.mrb[19].mxu1 }
 0x145   : > { %v6602_v58 = vld [vmem:[%s7395_s28 + $0x89c] ss:$20 sps:$4 sm:$0xff]  }
 0x146   : > { %3059 = vmatmul.mubr.bf16.gmra.mrb[124].mxu1 %v6557_v53  ;;  %3348 = vmatmul.mubr.bf16.gmra.mrb[60].mxu0 %v6558_v54  ;;  %v6600_v54 = vld [vmem:[%s7395_s28 + $0x870] ss:$20 sps:$4 sm:$0xff]  }
 0x147   : > { %3066 = vmatprep.mubr.bf16.mxu1 %v6559_v56  ;;  %3355 = vmatprep.mubr.bf16.mxu0 %v6561_v57  ;;  %v6601_v56 = vld [vmem:[%s7395_s28 + $0x378] ss:$20 sps:$4 sm:$0xff]  }
 0x149   : > { %v7680_v59 = vpop.f32.mrb[20].mxu1 }
 0x14a   : > { %v2854_v60 = vpop.f32.mrb[21].mxu1 }
 0x14b   : > { %v7684_v63 = vpop.f32.mrb[22].mxu1  ;;  %v6604_v60 = vld [vmem:[%s7395_s28 + $0x3a4] ss:$20 sps:$4 sm:$0xff]  }
 0x14c   : > { %v2857_v3 = vpop.f32.mrb[23].mxu1 }
 0x14d   : > { %v6607_v3 = vld [vmem:[%s7395_s28 + $0x3a0] ss:$20 sps:$4 sm:$0xff]  }
 0x14e   : > { %3067 = vmatmul.mubr.bf16.gmra.mrb[128].mxu1 %v6563_v61  ;;  %3356 = vmatmul.mubr.bf16.gmra.mrb[64].mxu0 %v6564_v62 }
 0x14f   : > { %3074 = vmatprep.mubr.bf16.mxu1 %v6565_v0  ;;  %3363 = vmatprep.mubr.bf16.mxu0 %v6567_v2  ;;  %v6606_v2 = vld [vmem:[%s7395_s28 + $0x898] ss:$20 sps:$4 sm:$0xff]  }
 0x151   : > { %v7688_v4 = vpop.f32.mrb[24].mxu1 }
 0x152   : > { %v2862_v5 = vpop.f32.mrb[25].mxu1 }
 0x153   : > { %v7692_v8 = vpop.f32.mrb[26].mxu1 }
 0x154   : > { %v2865_v11 = vpop.f32.mrb[27].mxu1 }
 0x156   : > { %3075 = vmatmul.mubr.bf16.gmra.mrb[132].mxu1 %v6569_v6  ;;  %3364 = vmatmul.mubr.bf16.gmra.mrb[68].mxu0 %v6570_v7  ;;  %v6608_v6 = vld [vmem:[%s7395_s28 + $0x8c4] ss:$20 sps:$4 sm:$0xff]   ;;  %v6610_v7 = vld [vmem:[%s7395_s28 + $0x3cc] ss:$20 sps:$4 sm:$0xff]  }
 0x157   : > { %3082 = vmatprep.mubr.bf16.mxu1 %v6571_v9  ;;  %3371 = vmatprep.mubr.bf16.mxu0 %v6573_v10 }
 0x159   : > { %v7696_v12 = vpop.f32.mrb[28].mxu1 }
 0x15a   : > { %v2870_v13 = vpop.f32.mrb[29].mxu1 }
 0x15b   : > { %v7700_v15 = vpop.f32.mrb[30].mxu1  ;;  %v6612_v13 = vld [vmem:[%s7395_s28 + $0x8c0] ss:$20 sps:$4 sm:$0xff]  }
 0x15c   : > { %v2873_v18 = vpop.f32.mrb[31].mxu1 }
 0x15e   : > { %3083 = vmatmul.mubr.bf16.gmra.mrb[136].mxu1 %v6575_v1  ;;  %3372 = vmatmul.mubr.bf16.gmra.mrb[72].mxu0 %v6576_v14  ;;  %v6613_v1 = vld [vmem:[%s7395_s28 + $0x3c8] ss:$20 sps:$4 sm:$0xff]  }
 0x15f   : > { %3090 = vmatprep.mubr.bf16.mxu1 %v6577_v16  ;;  %3379 = vmatprep.mubr.bf16.mxu0 %v6579_v17  ;;  %v6614_v16 = vld [vmem:[%s7395_s28 + $0x8ec] ss:$20 sps:$4 sm:$0xff]   ;;  %v6616_v17 = vld [vmem:[%s7395_s28 + $0x3f4] ss:$20 sps:$4 sm:$0xff]  }
 0x161   : > { %v7704_v20 = vpop.f32.mrb[32].mxu1 }
 0x162   : > { %v2878_v21 = vpop.f32.mrb[33].mxu1 }
 0x163   : > { %v7708_v25 = vpop.f32.mrb[34].mxu1 }
 0x164   : > { %v2881_v29 = vpop.f32.mrb[35].mxu1 }
 0x165   : > { %v6620_v29 = vld [vmem:[%s7395_s28 + $0x914] ss:$20 sps:$4 sm:$0xff]  }
 0x166   : > { %3091 = vmatmul.mubr.bf16.gmra.mrb[140].mxu1 %v6581_v22  ;;  %3380 = vmatmul.mubr.bf16.gmra.mrb[76].mxu0 %v6582_v24  ;;  %v6618_v24 = vld [vmem:[%s7395_s28 + $0x8e8] ss:$20 sps:$4 sm:$0xff]  }
 0x167   : > { %3098 = vmatprep.mubr.bf16.mxu1 %v6583_v26  ;;  %3387 = vmatprep.mubr.bf16.mxu0 %v6585_v28  ;;  %v6619_v26 = vld [vmem:[%s7395_s28 + $0x3f0] ss:$20 sps:$4 sm:$0xff]  }
 0x169   : > { %v7712_v30 = vpop.f32.mrb[36].mxu1 }
 0x16a   : > { %v2886_v32 = vpop.f32.mrb[37].mxu1 }
 0x16b   : > { %v7716_v36 = vpop.f32.mrb[38].mxu1  ;;  %v6622_v32 = vld [vmem:[%s7395_s28 + $0x41c] ss:$20 sps:$4 sm:$0xff]  }
 0x16c   : > { %v2889_v40 = vpop.f32.mrb[39].mxu1 }
 0x16d   : > { %v6625_v40 = vld [vmem:[%s7395_s28 + $0x418] ss:$20 sps:$4 sm:$0xff]  }
 0x16e   : > { %3099 = vmatmul.mubr.bf16.gmra.mrb[144].mxu1 %v6587_v33  ;;  %3388 = vmatmul.mubr.bf16.gmra.mrb[80].mxu0 %v6588_v34 }
 0x16f   : > { %3106 = vmatprep.mubr.bf16.mxu1 %v6590_v37  ;;  %3395 = vmatprep.mubr.bf16.mxu0 %v6592_v38  ;;  %v6624_v38 = vld [vmem:[%s7395_s28 + $0x910] ss:$20 sps:$4 sm:$0xff]  }
 0x171   : > { %v7720_v41 = vpop.f32.mrb[40].mxu1 }
 0x172   : > { %v2894_v42 = vpop.f32.mrb[41].mxu1 }
 0x173   : > { %v7724_v46 = vpop.f32.mrb[42].mxu1 }
 0x174   : > { %v2897_v50 = vpop.f32.mrb[43].mxu1 }
 0x176   : > { %3107 = vmatmul.mubr.bf16.gmra.mrb[148].mxu1 %v6594_v44  ;;  %3396 = vmatmul.mubr.bf16.gmra.mrb[84].mxu0 %v6595_v45  ;;  %v6626_v44 = vld [vmem:[%s7395_s28 + $0x93c] ss:$20 sps:$4 sm:$0xff]   ;;  %v6628_v45 = vld [vmem:[%s7395_s28 + $0x444] ss:$20 sps:$4 sm:$0xff]  }
 0x177   : > { %3114 = vmatprep.mubr.bf16.mxu1 %v6596_v48  ;;  %3403 = vmatprep.mubr.bf16.mxu0 %v6598_v49 }
 0x179   : > { %v7728_v52 = vpop.f32.mrb[44].mxu1 }
 0x17a   : > { %v2902_v53 = vpop.f32.mrb[45].mxu1 }
 0x17b   : > { %v7732_v57 = vpop.f32.mrb[46].mxu1 }
 0x17c   : > { %v2905_v61 = vpop.f32.mrb[47].mxu1 }
 0x17e   : > { %3115 = vmatmul.mubr.bf16.gmra.mrb[152].mxu1 %v6600_v54  ;;  %3404 = vmatmul.mubr.bf16.gmra.mrb[88].mxu0 %v6601_v56  ;;  %v6630_v56 = vld [vmem:[%s7395_s28 + $0x938] ss:$20 sps:$4 sm:$0xff]  }
 0x17f   : > { %3122 = vmatprep.mubr.bf16.mxu1 %v6602_v58  ;;  %3411 = vmatprep.mubr.bf16.mxu0 %v6604_v60  ;;  %v6631_v58 = vld [vmem:[%s7395_s28 + $0x440] ss:$20 sps:$4 sm:$0xff]  }
 0x181   : > { %v7736_v62 = vpop.f32.mrb[48].mxu1 }
 0x182   : > { %v2910_v0 = vpop.f32.mrb[49].mxu1 }
 0x183   : > { %v7740_v5 = vpop.f32.mrb[50].mxu1  ;;  %v6632_v0 = vld [vmem:[%s7395_s28 + $0x964] ss:$20 sps:$4 sm:$0xff]  }
 0x184   : > { %v2913_v9 = vpop.f32.mrb[51].mxu1 }
 0x186   : > { %3123 = vmatmul.mubr.bf16.gmra.mrb[156].mxu1 %v6606_v2  ;;  %3412 = vmatmul.mubr.bf16.gmra.mrb[92].mxu0 %v6607_v3  ;;  %v6634_v2 = vld [vmem:[%s7395_s28 + $0x46c] ss:$20 sps:$4 sm:$0xff]  }
 0x187   : > { %3130 = vmatprep.mubr.bf16.mxu1 %v6608_v6  ;;  %3419 = vmatprep.mubr.bf16.mxu0 %v6610_v7 }
 0x189   : > { %v7744_v10 = vpop.f32.mrb[52].mxu1 }
 0x18a   : > { %v2918_v11 = vpop.f32.mrb[53].mxu1 }
 0x18b   : > { %v7748_v14 = vpop.f32.mrb[54].mxu1 }
 0x18c   : > { %v2921_v18 = vpop.f32.mrb[55].mxu1 }
 0x18e   : > { %3131 = vmatmul.mubr.bf16.gmra.mrb[160].mxu1 %v6612_v13  ;;  %3420 = vmatmul.mubr.bf16.gmra.mrb[96].mxu0 %v6613_v1  ;;  %v6636_v1 = vld [vmem:[%s7395_s28 + $0x960] ss:$20 sps:$4 sm:$0xff]  }
 0x18f   : > { %3138 = vmatprep.mubr.bf16.mxu1 %v6614_v16  ;;  %3427 = vmatprep.mubr.bf16.mxu0 %v6616_v17  ;;  %v6637_v16 = vld [vmem:[%s7395_s28 + $0x468] ss:$20 sps:$4 sm:$0xff]  }
 0x191   : > { %v7752_v21 = vpop.f32.mrb[56].mxu1 }
 0x192   : > { %v2926_v22 = vpop.f32.mrb[57].mxu1 }
 0x193   : > { %v7756_v28 = vpop.f32.mrb[58].mxu1  ;;  %v6638_v22 = vld [vmem:[%s7395_s28 + $0x98c] ss:$20 sps:$4 sm:$0xff]  }
 0x194   : > { %v2929_v33 = vpop.f32.mrb[59].mxu1 }
 0x196   : > { %3139 = vmatmul.mubr.bf16.gmra.mrb[164].mxu1 %v6618_v24  ;;  %3428 = vmatmul.mubr.bf16.gmra.mrb[100].mxu0 %v6619_v26  ;;  %v6640_v24 = vld [vmem:[%s7395_s28 + $0x494] ss:$20 sps:$4 sm:$0xff]  }
 0x197   : > { %3146 = vmatprep.mubr.bf16.mxu1 %v6620_v29  ;;  %3435 = vmatprep.mubr.bf16.mxu0 %v6622_v32 }
 0x199   : > { %v7760_v34 = vpop.f32.mrb[60].mxu1 }
 0x19a   : > { %v2934_v37 = vpop.f32.mrb[61].mxu1 }
 0x19b   : > { %v7764_v42 = vpop.f32.mrb[62].mxu1 }
 0x19c   : > { %v2937_v48 = vpop.f32.mrb[63].mxu1 }
 0x19e   : > { %3147 = vmatmul.mubr.bf16.gmra.mrb[168].mxu1 %v6624_v38  ;;  %3436 = vmatmul.mubr.bf16.gmra.mrb[104].mxu0 %v6625_v40  ;;  %v6642_v40 = vld [vmem:[%s7395_s28 + $0x988] ss:$20 sps:$4 sm:$0xff]  }
 0x19f   : > { %3154 = vmatprep.mubr.bf16.mxu1 %v6626_v44  ;;  %3443 = vmatprep.mubr.bf16.mxu0 %v6628_v45  ;;  %v6643_v44 = vld [vmem:[%s7395_s28 + $0x490] ss:$20 sps:$4 sm:$0xff]  }
 0x1a1   : > { %v7768_v49 = vpop.f32.mrb[64].mxu1  ;;  %v7770_v50 = vpop.f32.mrb[0].mxu0 }
 0x1a2   : > { %v2942_v53 = vpop.f32.mrb[65].mxu1  ;;  %v3231_v54 = vpop.f32.mrb[1].mxu0 }
 0x1a3   : > { %v7774_v60 = vpop.f32.mrb[66].mxu1  ;;  %v7776_v61 = vpop.f32.mrb[2].mxu0  ;;  %v6644_v53 = vld [vmem:[%s7395_s28 + $0x9b4] ss:$20 sps:$4 sm:$0xff]   ;;  %v6646_v54 = vld [vmem:[%s7395_s28 + $0x4bc] ss:$20 sps:$4 sm:$0xff]  }
 0x1a4   : > { %v2945_v3 = vpop.f32.mrb[67].mxu1  ;;  %v3234_v6 = vpop.f32.mrb[3].mxu0 }
 0x1a6   : > { %3155 = vmatmul.mubr.bf16.gmra.mrb[172].mxu1 %v6630_v56  ;;  %3444 = vmatmul.mubr.bf16.gmra.mrb[108].mxu0 %v6631_v58 }
 0x1a7   : > { %3162 = vmatprep.mubr.bf16.mxu1 %v6632_v0  ;;  %3451 = vmatprep.mubr.bf16.mxu0 %v6634_v2 }
 0x1a9   : > { %v7780_v7 = vpop.f32.mrb[68].mxu1  ;;  %v7782_v9 = vpop.f32.mrb[4].mxu0 }
 0x1aa   : > { %v2950_v11 = vpop.f32.mrb[69].mxu1  ;;  %v3239_v13 = vpop.f32.mrb[5].mxu0 }
 0x1ab   : > { %v7786_v17 = vpop.f32.mrb[70].mxu1  ;;  %v7788_v18 = vpop.f32.mrb[6].mxu0  ;;  %v6648_v11 = vld [vmem:[%s7395_s28 + $0x9b0] ss:$20 sps:$4 sm:$0xff]   ;;  %v6649_v13 = vld [vmem:[%s7395_s28 + $0x4b8] ss:$20 sps:$4 sm:$0xff]  }
 0x1ac   : > { %v2953_v26 = vpop.f32.mrb[71].mxu1  ;;  %v3242_v29 = vpop.f32.mrb[7].mxu0 }
 0x1ae   : > { %3163 = vmatmul.mubr.bf16.gmra.mrb[176].mxu1 %v6636_v1  ;;  %3452 = vmatmul.mubr.bf16.gmra.mrb[112].mxu0 %v6637_v16 }
 0x1af   : > { %3170 = vmatprep.mubr.bf16.mxu1 %v6638_v22  ;;  %3459 = vmatprep.mubr.bf16.mxu0 %v6640_v24  ;;  %v6650_v22 = vld [vmem:[%s7395_s28 + $0x9dc] ss:$20 sps:$4 sm:$0xff]   ;;  %v6652_v24 = vld [vmem:[%s7395_s28 + $0x4e4] ss:$20 sps:$4 sm:$0xff]  }
 0x1b1   : > { %v7792_v32 = vpop.f32.mrb[72].mxu1  ;;  %v7794_v33 = vpop.f32.mrb[8].mxu0 }
 0x1b2   : > { %v2958_v37 = vpop.f32.mrb[73].mxu1  ;;  %v3247_v38 = vpop.f32.mrb[9].mxu0 }
 0x1b3   : > { %v7798_v45 = vpop.f32.mrb[74].mxu1  ;;  %v7800_v48 = vpop.f32.mrb[10].mxu0 }
 0x1b4   : > { %v2961_v56 = vpop.f32.mrb[75].mxu1  ;;  %v3250_v58 = vpop.f32.mrb[11].mxu0 }
 0x1b6   : > { %3171 = vmatmul.mubr.bf16.gmra.mrb[180].mxu1 %v6642_v40  ;;  %3460 = vmatmul.mubr.bf16.gmra.mrb[116].mxu0 %v6643_v44 }
 0x1b7   : > { %3178 = vmatprep.mubr.bf16.mxu1 %v6644_v53  ;;  %3467 = vmatprep.mubr.bf16.mxu0 %v6646_v54  ;;  %v6654_v53 = vld [vmem:[%s7395_s28 + $0x9d8] ss:$20 sps:$4 sm:$0xff]   ;;  %v6655_v54 = vld [vmem:[%s7395_s28 + $0x4e0] ss:$20 sps:$4 sm:$0xff]  }
 0x1b9   : > { %v7804_v0 = vpop.f32.mrb[76].mxu1  ;;  %v7806_v2 = vpop.f32.mrb[12].mxu0 }
 0x1ba   : > { %v2966_v3 = vpop.f32.mrb[77].mxu1  ;;  %v3255_v6 = vpop.f32.mrb[13].mxu0 }
 0x1bb   : > { %v7810_v1 = vpop.f32.mrb[78].mxu1  ;;  %v7812_v16 = vpop.f32.mrb[14].mxu0  ;;  %v6656_v3 = vld [vmem:[%s7395_s28 + $0x50c] ss:$20 sps:$4 sm:$0xff]   ;;  %v6658_v6 = vld [vmem:[%s7395_s28 + $0x10] ss:$20 sps:$4 sm:$0xff]  }
 0x1bc   : > { %v2969_v26 = vpop.f32.mrb[79].mxu1  ;;  %v3258_v29 = vpop.f32.mrb[15].mxu0 }
 0x1be   : > { %3179 = vmatmul.mubr.bf16.gmra.mrb[184].mxu1 %v6648_v11  ;;  %3468 = vmatmul.mubr.bf16.gmra.mrb[120].mxu0 %v6649_v13 }
 0x1bf   : > { %3186 = vmatprep.mubr.bf16.mxu1 %v6650_v22  ;;  %3475 = vmatprep.mubr.bf16.mxu0 %v6652_v24 }
 0x1c1   : > { %v7816_v37 = vpop.f32.mrb[80].mxu1  ;;  %v7818_v38 = vpop.f32.mrb[16].mxu0 }
 0x1c2   : > { %9479 = vst [vmem:[#allocation2_spill] sm:$0xff] %v7818_v38  ;;  %v2974_v40 = vpop.f32.mrb[81].mxu1  ;;  %v3263_v44 = vpop.f32.mrb[17].mxu0 }
 0x1c3   : > { %v7822_v56 = vpop.f32.mrb[82].mxu1  ;;  %v7824_v58 = vpop.f32.mrb[18].mxu0  ;;  %v6659_v40 = vld [vmem:[%s7395_s28 + $0x508] ss:$20 sps:$4 sm:$0xff]   ;;  %v6660_v44 = vld [vmem:[%s7395_s28 + $0x38] ss:$20 sps:$4 sm:$0xff]  }
 0x1c4   : > { %9480 = vst [vmem:[#allocation3_spill] sm:$0xff] %v7822_v56  ;;  %9481 = vst [vmem:[#allocation4_spill] sm:$0xff] %v7824_v58  ;;  %v2977_v11 = vpop.f32.mrb[83].mxu1  ;;  %v3266_v13 = vpop.f32.mrb[19].mxu0 }
 0x1c5   : > { %v6661_v13 = vld [vmem:[%s7395_s28 + $0x534] ss:$20 sps:$4 sm:$0xff]  }
 0x1c6   : > { %3187 = vmatmul.mubr.bf16.gmra.mrb[188].mxu1 %v6654_v53  ;;  %3476 = vmatmul.mubr.bf16.gmra.mrb[124].mxu0 %v6655_v54  ;;  %v6663_v53 = vld [vmem:[%s7395_s28 + $0x60] ss:$20 sps:$4 sm:$0xff]  }
 0x1c7   : > { %3483 = vmatprep.mubr.bf16.mxu0 %v6656_v3  ;;  %5874 = vmatprep.mubr.msk.bf16.mxu1 %vm2457_vm0, %v6658_v6 }
 0x1c9   : > { %v7829_v22 = vpop.f32.mrb[84].mxu1  ;;  %v7831_v24 = vpop.f32.mrb[20].mxu0 }
 0x1ca   : > { %9482 = vst [vmem:[#allocation5_spill] sm:$0xff] %v7829_v22  ;;  %9483 = vst [vmem:[#allocation6_spill] sm:$0xff] %v7831_v24  ;;  %v2982_v26 = vpop.f32.mrb[85].mxu1  ;;  %v3271_v29 = vpop.f32.mrb[21].mxu0  ;;  %v6664_v24 = vld [vmem:[%s7395_s28 + $0x530] ss:$20 sps:$4 sm:$0xff]  }
 0x1cb   : > { %v7835_v58 = vpop.f32.mrb[86].mxu1  ;;  %v7837_v11 = vpop.f32.mrb[22].mxu0 }
 0x1cc   : > { %9484 = vst [vmem:[#allocation7_spill] sm:$0xff] %v7835_v58  ;;  %9485 = vst [vmem:[#allocation8_spill] sm:$0xff] %v7837_v11  ;;  %v2985_v54 = vpop.f32.mrb[87].mxu1  ;;  %v3274_v3 = vpop.f32.mrb[23].mxu0  ;;  %v6665_v11 = vld [vmem:[%s7395_s28 + $0x88] ss:$20 sps:$4 sm:$0xff]  }
 0x1ce   : > { %3484 = vmatmul.mubr.bf16.gmra.mrb[128].mxu0 %v6659_v40  ;;  %5875 = vmatmul.mubr.msk.bf16.vlgmr.msra.gmra.mrb[192].mxu1 %vm2457_vm0, %v6660_v44  ;;  %v6666_v40 = vld [vmem:[%s7395_s28 + $0x55c] ss:$20 sps:$4 sm:$0xff]  }
 0x1cf   : > { %3491 = vmatprep.mubr.bf16.mxu0 %v6661_v13  ;;  %5878 = vmatprep.mubr.msk.bf16.mxu1 %vm2457_vm0, %v6663_v53  ;;  %v6668_v44 = vld [vmem:[%s7395_s28 + $0xb0] ss:$20 sps:$4 sm:$0xff]  }
 0x1d1   : > { %v7843_v6 = vpop.f32.mrb[88].mxu1  ;;  %v7845_v26 = vpop.f32.mrb[24].mxu0 }
 0x1d2   : > { %9486 = vst [vmem:[#allocation9_spill] sm:$0xff] %v7843_v6  ;;  %9487 = vst [vmem:[#allocation10_spill] sm:$0xff] %v7845_v26  ;;  %v2990_v29 = vpop.f32.mrb[89].mxu1  ;;  %v3279_v58 = vpop.f32.mrb[25].mxu0  ;;  %v6669_v26 = vld [vmem:[%s7395_s28 + $0x558] ss:$20 sps:$4 sm:$0xff]  }
 0x1d3   : > { %v7849_v22 = vpop.f32.mrb[90].mxu1  ;;  %v7851_v54 = vpop.f32.mrb[26].mxu0 }
 0x1d4   : > { %9488 = vst [vmem:[#allocation11_spill] sm:$0xff] %v7849_v22  ;;  %9489 = vst [vmem:[#allocation12_spill] sm:$0xff] %v7851_v54  ;;  %v2993_v13 = vpop.f32.mrb[91].mxu1  ;;  %v3282_v53 = vpop.f32.mrb[27].mxu0  ;;  %v6670_v54 = vld [vmem:[%s7395_s28 + $0xd8] ss:$20 sps:$4 sm:$0xff]  }
 0x1d6   : > { %3492 = vmatmul.mubr.bf16.gmra.mrb[132].mxu0 %v6664_v24  ;;  %5879 = vmatmul.mubr.msk.bf16.gmra.mrb[196].mxu1 %vm2457_vm0, %v6665_v11  ;;  %v6671_v24 = vld [vmem:[%s7395_s28 + $0x584] ss:$20 sps:$4 sm:$0xff]   ;;  %v6673_v11 = vld [vmem:[%s7395_s28 + $0x100] ss:$20 sps:$4 sm:$0xff]  }
 0x1d7   : > { %3499 = vmatprep.mubr.bf16.mxu0 %v6666_v40  ;;  %5882 = vmatprep.mubr.msk.bf16.mxu1 %vm2457_vm0, %v6668_v44 }
 0x1d9   : > { %v7857_v58 = vpop.f32.mrb[92].mxu1  ;;  %v7859_v3 = vpop.f32.mrb[28].mxu0 }
 0x1da   : > { %9490 = vst [vmem:[#allocation13_spill] sm:$0xff] %v7857_v58  ;;  %9491 = vst [vmem:[#allocation14_spill] sm:$0xff] %v7859_v3  ;;  %v2998_v29 = vpop.f32.mrb[93].mxu1  ;;  %v3287_v22 = vpop.f32.mrb[29].mxu0  ;;  %v6674_v3 = vld [vmem:[%s7395_s28 + $0x580] ss:$20 sps:$4 sm:$0xff]  }
 0x1db   : > { %v7863_v6 = vpop.f32.mrb[94].mxu1  ;;  %v7865_v13 = vpop.f32.mrb[30].mxu0 }
 0x1dc   : > { %9492 = vst [vmem:[#allocation15_spill] sm:$0xff] %v7863_v6  ;;  %9493 = vst [vmem:[#allocation16_spill] sm:$0xff] %v7865_v13  ;;  %v3001_v40 = vpop.f32.mrb[95].mxu1  ;;  %v3290_v44 = vpop.f32.mrb[31].mxu0  ;;  %v6675_v13 = vld [vmem:[%s7395_s28 + $0x128] ss:$20 sps:$4 sm:$0xff]  }
 0x1de   : > { %3500 = vmatmul.mubr.bf16.gmra.mrb[136].mxu0 %v6669_v26  ;;  %5883 = vmatmul.mubr.msk.bf16.gmra.mrb[200].mxu1 %vm2457_vm0, %v6670_v54  ;;  %v6676_v26 = vld [vmem:[%s7395_s28 + $0x5ac] ss:$20 sps:$4 sm:$0xff]   ;;  %v6678_v54 = vld [vmem:[%s7395_s28 + $0x150] ss:$20 sps:$4 sm:$0xff]  }
 0x1df   : > { %3507 = vmatprep.mubr.bf16.mxu0 %v6671_v24  ;;  %5886 = vmatprep.mubr.msk.bf16.mxu1 %vm2457_vm0, %v6673_v11 }
 0x1e1   : > { %v7871_v22 = vpop.f32.mrb[96].mxu1  ;;  %v7873_v53 = vpop.f32.mrb[32].mxu0 }
 0x1e2   : > { %9494 = vst [vmem:[#allocation17_spill] sm:$0xff] %v7871_v22  ;;  %9495 = vst [vmem:[#allocation18_spill] sm:$0xff] %v7873_v53  ;;  %v3006_v29 = vpop.f32.mrb[97].mxu1  ;;  %v3295_v6 = vpop.f32.mrb[33].mxu0  ;;  %v6679_v53 = vld [vmem:[%s7395_s28 + $0x5a8] ss:$20 sps:$4 sm:$0xff]  }
 0x1e3   : > { %v7877_v58 = vpop.f32.mrb[98].mxu1  ;;  %v7879_v40 = vpop.f32.mrb[34].mxu0 }
 0x1e4   : > { %9496 = vst [vmem:[#allocation19_spill] sm:$0xff] %v7877_v58  ;;  %9497 = vst [vmem:[#allocation20_spill] sm:$0xff] %v7879_v40  ;;  %v3009_v24 = vpop.f32.mrb[99].mxu1  ;;  %v3298_v11 = vpop.f32.mrb[35].mxu0  ;;  %v6680_v40 = vld [vmem:[%s7395_s28 + $0x178] ss:$20 sps:$4 sm:$0xff]  }
 0x1e6   : > { %3508 = vmatmul.mubr.bf16.gmra.mrb[140].mxu0 %v6674_v3  ;;  %5887 = vmatmul.mubr.msk.bf16.gmra.mrb[204].mxu1 %vm2457_vm0, %v6675_v13  ;;  %v6681_v3 = vld [vmem:[%s7395_s28 + $0x5d4] ss:$20 sps:$4 sm:$0xff]  }
 0x1e7   : > { %3515 = vmatprep.mubr.bf16.mxu0 %v6676_v26  ;;  %5890 = vmatprep.mubr.msk.bf16.mxu1 %vm2457_vm0, %v6678_v54  ;;  %v6683_v13 = vld [vmem:[%s7395_s28 + $0x1a0] ss:$20 sps:$4 sm:$0xff]  }
 0x1e9   : > { %v7885_v6 = vpop.f32.mrb[100].mxu1  ;;  %v7887_v44 = vpop.f32.mrb[36].mxu0 }
 0x1ea   : > { %9498 = vst [vmem:[#allocation21_spill] sm:$0xff] %v7885_v6  ;;  %9499 = vst [vmem:[#allocation22_spill] sm:$0xff] %v7887_v44  ;;  %v3014_v29 = vpop.f32.mrb[101].mxu1  ;;  %v3303_v58 = vpop.f32.mrb[37].mxu0  ;;  %v6684_v44 = vld [vmem:[%s7395_s28 + $0x5d0] ss:$20 sps:$4 sm:$0xff]  }
 0x1eb   : > { %v7891_v22 = vpop.f32.mrb[102].mxu1  ;;  %v7893_v24 = vpop.f32.mrb[38].mxu0 }
 0x1ec   : > { %9500 = vst [vmem:[#allocation23_spill] sm:$0xff] %v7891_v22  ;;  %9501 = vst [vmem:[#allocation24_spill] sm:$0xff] %v7893_v24  ;;  %v3017_v26 = vpop.f32.mrb[103].mxu1  ;;  %v3306_v54 = vpop.f32.mrb[39].mxu0  ;;  %v6685_v24 = vld [vmem:[%s7395_s28 + $0x1c8] ss:$20 sps:$4 sm:$0xff]  }
 0x1ee   : > { %3516 = vmatmul.mubr.bf16.gmra.mrb[144].mxu0 %v6679_v53  ;;  %5891 = vmatmul.mubr.msk.bf16.gmra.mrb[208].mxu1 %vm2457_vm0, %v6680_v40  ;;  %v6686_v53 = vld [vmem:[%s7395_s28 + $0x5fc] ss:$20 sps:$4 sm:$0xff]  }
 0x1ef   : > { %3523 = vmatprep.mubr.bf16.mxu0 %v6681_v3  ;;  %5894 = vmatprep.mubr.msk.bf16.mxu1 %vm2457_vm0, %v6683_v13  ;;  %v6688_v40 = vld [vmem:[%s7395_s28 + $0x1f0] ss:$20 sps:$4 sm:$0xff]  }
 0x1f1   : > { %v7899_v58 = vpop.f32.mrb[104].mxu1  ;;  %v7901_v11 = vpop.f32.mrb[40].mxu0 }
 0x1f2   : > { %9502 = vst [vmem:[#allocation25_spill] sm:$0xff] %v7899_v58  ;;  %9503 = vst [vmem:[#allocation26_spill] sm:$0xff] %v7901_v11  ;;  %v3022_v29 = vpop.f32.mrb[105].mxu1  ;;  %v3311_v22 = vpop.f32.mrb[41].mxu0  ;;  %v6689_v11 = vld [vmem:[%s7395_s28 + $0x5f8] ss:$20 sps:$4 sm:$0xff]  }
 0x1f3   : > { %v7905_v6 = vpop.f32.mrb[106].mxu1  ;;  %v7907_v26 = vpop.f32.mrb[42].mxu0 }
 0x1f4   : > { %9504 = vst [vmem:[#allocation27_spill] sm:$0xff] %v7905_v6  ;;  %9505 = vst [vmem:[#allocation28_spill] sm:$0xff] %v7907_v26  ;;  %v3025_v3 = vpop.f32.mrb[107].mxu1  ;;  %v3314_v13 = vpop.f32.mrb[43].mxu0  ;;  %v6690_v26 = vld [vmem:[%s7395_s28 + $0x218] ss:$20 sps:$4 sm:$0xff]  }
 0x1f6   : > { %3524 = vmatmul.mubr.bf16.gmra.mrb[148].mxu0 %v6684_v44  ;;  %5895 = vmatmul.mubr.msk.bf16.gmra.mrb[212].mxu1 %vm2457_vm0, %v6685_v24  ;;  %v6691_v44 = vld [vmem:[%s7395_s28 + $0x624] ss:$20 sps:$4 sm:$0xff]   ;;  %v6693_v24 = vld [vmem:[%s7395_s28 + $0x240] ss:$20 sps:$4 sm:$0xff]  }
 0x1f7   : > { %3531 = vmatprep.mubr.bf16.mxu0 %v6686_v53  ;;  %5898 = vmatprep.mubr.msk.bf16.mxu1 %vm2457_vm0, %v6688_v40 }
 0x1f9   : > { %v7913_v22 = vpop.f32.mrb[108].mxu1  ;;  %v7915_v54 = vpop.f32.mrb[44].mxu0 }
 0x1fa   : > { %9506 = vst [vmem:[#allocation29_spill] sm:$0xff] %v7913_v22  ;;  %9507 = vst [vmem:[#allocation30_spill] sm:$0xff] %v7915_v54  ;;  %v3030_v29 = vpop.f32.mrb[109].mxu1  ;;  %v3319_v6 = vpop.f32.mrb[45].mxu0  ;;  %v6694_v54 = vld [vmem:[%s7395_s28 + $0x620] ss:$20 sps:$4 sm:$0xff]  }
 0x1fb   : > { %v7919_v58 = vpop.f32.mrb[110].mxu1  ;;  %v7921_v3 = vpop.f32.mrb[46].mxu0 }
 0x1fc   : > { %9508 = vst [vmem:[#allocation31_spill] sm:$0xff] %v7919_v58  ;;  %9509 = vst [vmem:[#allocation32_spill] sm:$0xff] %v7921_v3  ;;  %v3033_v53 = vpop.f32.mrb[111].mxu1  ;;  %v3322_v40 = vpop.f32.mrb[47].mxu0  ;;  %v6695_v3 = vld [vmem:[%s7395_s28 + $0x268] ss:$20 sps:$4 sm:$0xff]  }
 0x1fe   : > { %3532 = vmatmul.mubr.bf16.gmra.mrb[152].mxu0 %v6689_v11  ;;  %5899 = vmatmul.mubr.msk.bf16.gmra.mrb[216].mxu1 %vm2457_vm0, %v6690_v26  ;;  %v6696_v11 = vld [vmem:[%s7395_s28 + $0x64c] ss:$20 sps:$4 sm:$0xff]   ;;  %v6698_v26 = vld [vmem:[%s7395_s28 + $0x290] ss:$20 sps:$4 sm:$0xff]  }
 0x1ff   : > { %3539 = vmatprep.mubr.bf16.mxu0 %v6691_v44  ;;  %5902 = vmatprep.mubr.msk.bf16.mxu1 %vm2457_vm0, %v6693_v24 }
 0x201   : > { %v7927_v6 = vpop.f32.mrb[112].mxu1  ;;  %v7929_v13 = vpop.f32.mrb[48].mxu0 }
 0x202   : > { %9510 = vst [vmem:[#allocation33_spill] sm:$0xff] %v7927_v6  ;;  %9511 = vst [vmem:[#allocation34_spill] sm:$0xff] %v7929_v13  ;;  %v3038_v29 = vpop.f32.mrb[113].mxu1  ;;  %v3327_v58 = vpop.f32.mrb[49].mxu0  ;;  %v6699_v13 = vld [vmem:[%s7395_s28 + $0x648] ss:$20 sps:$4 sm:$0xff]  }
 0x203   : > { %v7933_v22 = vpop.f32.mrb[114].mxu1  ;;  %v7935_v53 = vpop.f32.mrb[50].mxu0 }
 0x204   : > { %9512 = vst [vmem:[#allocation35_spill] sm:$0xff] %v7933_v22  ;;  %9513 = vst [vmem:[#allocation36_spill] sm:$0xff] %v7935_v53  ;;  %v3041_v44 = vpop.f32.mrb[115].mxu1  ;;  %v3330_v24 = vpop.f32.mrb[51].mxu0  ;;  %v6700_v53 = vld [vmem:[%s7395_s28 + $0x2b8] ss:$20 sps:$4 sm:$0xff]  }
 0x206   : > { %3540 = vmatmul.mubr.bf16.gmra.mrb[156].mxu0 %v6694_v54  ;;  %5903 = vmatmul.mubr.msk.bf16.gmra.mrb[220].mxu1 %vm2457_vm0, %v6695_v3  ;;  %v6701_v54 = vld [vmem:[%s7395_s28 + $0x674] ss:$20 sps:$4 sm:$0xff]  }
 0x207   : > { %3547 = vmatprep.mubr.bf16.mxu0 %v6696_v11  ;;  %5906 = vmatprep.mubr.msk.bf16.mxu1 %vm2457_vm0, %v6698_v26  ;;  %v6703_v3 = vld [vmem:[%s7395_s28 + $0x2e0] ss:$20 sps:$4 sm:$0xff]  }
 0x209   : > { %v7941_v58 = vpop.f32.mrb[116].mxu1  ;;  %v7943_v40 = vpop.f32.mrb[52].mxu0 }
 0x20a   : > { %9514 = vst [vmem:[#allocation37_spill] sm:$0xff] %v7941_v58  ;;  %9515 = vst [vmem:[#allocation38_spill] sm:$0xff] %v7943_v40  ;;  %v3046_v29 = vpop.f32.mrb[117].mxu1  ;;  %v3335_v22 = vpop.f32.mrb[53].mxu0  ;;  %v6704_v40 = vld [vmem:[%s7395_s28 + $0x670] ss:$20 sps:$4 sm:$0xff]  }
 0x20b   : > { %v7947_v6 = vpop.f32.mrb[118].mxu1  ;;  %v7949_v44 = vpop.f32.mrb[54].mxu0 }
 0x20c   : > { %9516 = vst [vmem:[#allocation39_spill] sm:$0xff] %v7947_v6  ;;  %9517 = vst [vmem:[#allocation40_spill] sm:$0xff] %v7949_v44  ;;  %v3049_v11 = vpop.f32.mrb[119].mxu1  ;;  %v3338_v26 = vpop.f32.mrb[55].mxu0  ;;  %v6705_v44 = vld [vmem:[%s7395_s28 + $0x308] ss:$20 sps:$4 sm:$0xff]  }
 0x20e   : > { %3548 = vmatmul.mubr.bf16.gmra.mrb[160].mxu0 %v6699_v13  ;;  %5907 = vmatmul.mubr.msk.bf16.gmra.mrb[224].mxu1 %vm2457_vm0, %v6700_v53  ;;  %v6706_v13 = vld [vmem:[%s7395_s28 + $0x69c] ss:$20 sps:$4 sm:$0xff]  }
 0x20f   : > { %3555 = vmatprep.mubr.bf16.mxu0 %v6701_v54  ;;  %5910 = vmatprep.mubr.msk.bf16.mxu1 %vm2457_vm0, %v6703_v3  ;;  %v6708_v53 = vld [vmem:[%s7395_s28 + $0x330] ss:$20 sps:$4 sm:$0xff]  }
 0x211   : > { %v7955_v22 = vpop.f32.mrb[120].mxu1  ;;  %v7957_v24 = vpop.f32.mrb[56].mxu0 }
 0x212   : > { %9518 = vst [vmem:[#allocation41_spill] sm:$0xff] %v7955_v22  ;;  %9519 = vst [vmem:[#allocation42_spill] sm:$0xff] %v7957_v24  ;;  %v3054_v29 = vpop.f32.mrb[121].mxu1  ;;  %v3343_v6 = vpop.f32.mrb[57].mxu0  ;;  %v6709_v24 = vld [vmem:[%s7395_s28 + $0x698] ss:$20 sps:$4 sm:$0xff]  }
 0x213   : > { %v7961_v58 = vpop.f32.mrb[122].mxu1  ;;  %v7963_v11 = vpop.f32.mrb[58].mxu0 }
 0x214   : > { %9520 = vst [vmem:[#allocation43_spill] sm:$0xff] %v7961_v58  ;;  %9521 = vst [vmem:[#allocation44_spill] sm:$0xff] %v7963_v11  ;;  %v3057_v54 = vpop.f32.mrb[123].mxu1  ;;  %v3346_v3 = vpop.f32.mrb[59].mxu0  ;;  %v6710_v11 = vld [vmem:[%s7395_s28 + $0x358] ss:$20 sps:$4 sm:$0xff]  }
 0x215   : > { %v6711_v54 = vld [vmem:[%s7395_s28 + $0x6c4] ss:$20 sps:$4 sm:$0xff]  }
 0x216   : > { %3556 = vmatmul.mubr.bf16.gmra.mrb[164].mxu0 %v6704_v40  ;;  %5911 = vmatmul.mubr.msk.bf16.gmra.mrb[228].mxu1 %vm2457_vm0, %v6705_v44  ;;  %v6713_v40 = vld [vmem:[%s7395_s28 + $0x380] ss:$20 sps:$4 sm:$0xff]  }
 0x217   : > { %3563 = vmatprep.mubr.bf16.mxu0 %v6706_v13  ;;  %5914 = vmatprep.mubr.msk.bf16.mxu1 %vm2457_vm0, %v6708_v53  ;;  %v7984_v53 = vld [vmem:[%s9477_s2] ss:$0 sm:$0xff] }
 0x219   : > { %v7969_v6 = vpop.f32.mrb[124].mxu1  ;;  %v7971_v26 = vpop.f32.mrb[60].mxu0 }
 0x21a   : > { %9522 = vst [vmem:[#allocation45_spill] sm:$0xff] %v7969_v6  ;;  %9523 = vst [vmem:[#allocation46_spill] sm:$0xff] %v7971_v26  ;;  %v3062_v29 = vpop.f32.mrb[125].mxu1  ;;  %v3351_v58 = vpop.f32.mrb[61].mxu0  ;;  %v6715_v26 = vld [vmem:[%s7395_s28 + $0x3a8] ss:$20 sps:$4 sm:$0xff]  }
 0x21b   : > { %v7975_v22 = vpop.f32.mrb[126].mxu1  ;;  %v7977_v56 = vpop.f32.mrb[62].mxu0  ;;  %v2813_v58 = vadd.f32 %v7984_v53, %v7640_v19 }
 0x21c   : > { %9524 = vst [vmem:[#allocation47_spill] sm:$0xff] %v7975_v22  ;;  %9525 = vst [vmem:[#allocation48_spill] sm:$0xff] %v7977_v56  ;;  %v3065_v44 = vpop.f32.mrb[127].mxu1  ;;  %v3354_v13 = vpop.f32.mrb[63].mxu0  ;;  %v2816_v22 = vadd.f32 %v7984_v53, %v7644_v23  ;;  %v2821_v23 = vadd.f32 %v7984_v53, %v7648_v27 }
 0x21e   : > { %3564 = vmatmul.mubr.bf16.gmra.mrb[168].mxu0 %v6709_v24  ;;  %5915 = vmatmul.mubr.msk.bf16.gmra.mrb[232].mxu1 %vm2457_vm0, %v6710_v11  ;;  %v6714_v24 = vld [vmem:[%s7395_s28 + $0x6c0] ss:$20 sps:$4 sm:$0xff]  }
 0x21f   : > { %3571 = vmatprep.mubr.bf16.mxu0 %v6711_v54  ;;  %5918 = vmatprep.mubr.msk.bf16.mxu1 %vm2457_vm0, %v6713_v40  ;;  %v6716_v54 = vld [vmem:[%s7395_s28 + $0x6ec] ss:$20 sps:$4 sm:$0xff]   ;;  %v6718_v40 = vld [vmem:[%s7395_s28 + $0x3d0] ss:$20 sps:$4 sm:$0xff]  }
 0x221   : > { %v7990_v3 = vpop.f32.mrb[128].mxu1  ;;  %v3357_v29 = vpop.f32.mrb[64].mxu0 }
 0x222   : > { %9526 = vst [vmem:[#allocation49_spill] sm:$0xff] %v7990_v3  ;;  %v7992_v44 = vadd.f32 %v3357_v29, %v2813_v58  ;;  %v3070_v13 = vpop.f32.mrb[129].mxu1  ;;  %v3359_v56 = vpop.f32.mrb[65].mxu0 }
 0x223   : > { %v7998_v6 = vpop.f32.mrb[130].mxu1  ;;  %v3360_v11 = vpop.f32.mrb[66].mxu0 }
 0x224   : > { %9527 = vst [vmem:[#allocation50_spill] sm:$0xff] %v7992_v44  ;;  %v8002_v19 = vadd.f32 %v3360_v11, %v2816_v22  ;;  %v3073_v3 = vpop.f32.mrb[131].mxu1  ;;  %v3362_v38 = vpop.f32.mrb[67].mxu0 }
 0x225   : > { %v2824_v38 = vadd.f32 %v7984_v53, %v7652_v31  ;;  %v6719_v3 = vld [vmem:[%s7395_s28 + $0x6e8] ss:$20 sps:$4 sm:$0xff]   ;;  %v2829_v31 = vadd.f32 %v7984_v53, %v7656_v35 }
 0x226   : > { %9528 = vst [vmem:[#allocation51_spill] sm:$0xff] %v8002_v19  ;;  %3572 = vmatmul.mubr.bf16.gmra.mrb[172].mxu0 %v6714_v24  ;;  %5919 = vmatmul.mubr.msk.bf16.gmra.mrb[236].mxu1 %vm2457_vm0, %v6715_v26  ;;  %v6720_v24 = vld [vmem:[%s7395_s28 + $0x3f8] ss:$20 sps:$4 sm:$0xff]  }
 0x227   : > { %3579 = vmatprep.mubr.bf16.mxu0 %v6716_v54  ;;  %5922 = vmatprep.mubr.msk.bf16.mxu1 %vm2457_vm0, %v6718_v40  ;;  %v6721_v54 = vld [vmem:[%s7395_s28 + $0x714] ss:$20 sps:$4 sm:$0xff]  }
 0x228   : > { %v6723_v40 = vld [vmem:[%s7395_s28 + $0x420] ss:$20 sps:$4 sm:$0xff]  }
 0x229   : > { %v8008_v56 = vpop.f32.mrb[132].mxu1  ;;  %v3365_v58 = vpop.f32.mrb[68].mxu0 }
 0x22a   : > { %v8010_v29 = vadd.f32 %v3365_v58, %v2821_v23  ;;  %v3078_v22 = vpop.f32.mrb[133].mxu1  ;;  %v3367_v13 = vpop.f32.mrb[69].mxu0 }
 0x22b   : > { %v8016_v11 = vpop.f32.mrb[134].mxu1  ;;  %v3368_v26 = vpop.f32.mrb[70].mxu0 }
 0x22c   : > { %9529 = vst [vmem:[#allocation52_spill] sm:$0xff] %v8010_v29  ;;  %v8020_v27 = vadd.f32 %v3368_v26, %v2824_v38  ;;  %v3081_v19 = vpop.f32.mrb[135].mxu1  ;;  %v3370_v44 = vpop.f32.mrb[71].mxu0 }
 0x22d   : > { %v2832_v44 = vadd.f32 %v7984_v53, %v7660_v39  ;;  %v6724_v19 = vld [vmem:[%s7395_s28 + $0x710] ss:$20 sps:$4 sm:$0xff]   ;;  %v2837_v39 = vadd.f32 %v7984_v53, %v7664_v43 }
 0x22e   : > { %9530 = vst [vmem:[#allocation53_spill] sm:$0xff] %v8020_v27  ;;  %3580 = vmatmul.mubr.bf16.gmra.mrb[176].mxu0 %v6719_v3  ;;  %5923 = vmatmul.mubr.msk.bf16.gmra.mrb[240].mxu1 %vm2457_vm0, %v6720_v24  ;;  %v6725_v3 = vld [vmem:[%s7395_s28 + $0x448] ss:$20 sps:$4 sm:$0xff]  }
 0x22f   : > { %3587 = vmatprep.mubr.bf16.mxu0 %v6721_v54  ;;  %5926 = vmatprep.mubr.msk.bf16.mxu1 %vm2457_vm0, %v6723_v40  ;;  %v6726_v54 = vld [vmem:[%s7395_s28 + $0x73c] ss:$20 sps:$4 sm:$0xff]  }
 0x230   : > { %v6728_v40 = vld [vmem:[%s7395_s28 + $0x470] ss:$20 sps:$4 sm:$0xff]  }
 0x231   : > { %v8026_v23 = vpop.f32.mrb[136].mxu1  ;;  %v3373_v58 = vpop.f32.mrb[72].mxu0 }
 0x232   : > { %v8028_v22 = vadd.f32 %v3373_v58, %v2829_v31  ;;  %v3086_v13 = vpop.f32.mrb[137].mxu1  ;;  %v3375_v38 = vpop.f32.mrb[73].mxu0 }
 0x233   : > { %v8034_v26 = vpop.f32.mrb[138].mxu1  ;;  %v3376_v24 = vpop.f32.mrb[74].mxu0 }
 0x234   : > { %9531 = vst [vmem:[#allocation54_spill] sm:$0xff] %v8028_v22  ;;  %v8038_v35 = vadd.f32 %v3376_v24, %v2832_v44  ;;  %v3089_v27 = vpop.f32.mrb[139].mxu1  ;;  %v3378_v29 = vpop.f32.mrb[75].mxu0 }
 0x235   : > { %v2840_v29 = vadd.f32 %v7984_v53, %v7668_v47  ;;  %v6729_v27 = vld [vmem:[%s7395_s28 + $0x738] ss:$20 sps:$4 sm:$0xff]   ;;  %v2845_v47 = vadd.f32 %v7984_v53, %v7672_v51 }
 0x236   : > { %9532 = vst [vmem:[#allocation55_spill] sm:$0xff] %v8038_v35  ;;  %3588 = vmatmul.mubr.bf16.gmra.mrb[180].mxu0 %v6724_v19  ;;  %5927 = vmatmul.mubr.msk.bf16.gmra.mrb[244].mxu1 %vm2457_vm0, %v6725_v3  ;;  %v6730_v19 = vld [vmem:[%s7395_s28 + $0x498] ss:$20 sps:$4 sm:$0xff]  }
 0x237   : > { %3595 = vmatprep.mubr.bf16.mxu0 %v6726_v54  ;;  %5930 = vmatprep.mubr.msk.bf16.mxu1 %vm2457_vm0, %v6728_v40  ;;  %v6731_v54 = vld [vmem:[%s7395_s28 + $0x764] ss:$20 sps:$4 sm:$0xff]   ;;  %v6733_v40 = vld [vmem:[%s7395_s28 + $0x4c0] ss:$20 sps:$4 sm:$0xff]  }
 0x239   : > { %v8044_v31 = vpop.f32.mrb[140].mxu1  ;;  %v3381_v58 = vpop.f32.mrb[76].mxu0 }
 0x23a   : > { %v8046_v13 = vadd.f32 %v3381_v58, %v2837_v39  ;;  %v3094_v38 = vpop.f32.mrb[141].mxu1  ;;  %v3383_v44 = vpop.f32.mrb[77].mxu0 }
 0x23b   : > { %v8052_v24 = vpop.f32.mrb[142].mxu1  ;;  %v3384_v3 = vpop.f32.mrb[78].mxu0 }
 0x23c   : > { %9533 = vst [vmem:[#allocation56_spill] sm:$0xff] %v8046_v13  ;;  %v8056_v43 = vadd.f32 %v3384_v3, %v2840_v29  ;;  %v3097_v35 = vpop.f32.mrb[143].mxu1  ;;  %v3386_v22 = vpop.f32.mrb[79].mxu0 }
 0x23d   : > { %v2848_v22 = vadd.f32 %v7984_v53, %v7676_v55  ;;  %v6734_v35 = vld [vmem:[%s7395_s28 + $0x760] ss:$20 sps:$4 sm:$0xff]   ;;  %v2853_v55 = vadd.f32 %v7984_v53, %v7680_v59 }
 0x23e   : > { %9534 = vst [vmem:[#allocation57_spill] sm:$0xff] %v8056_v43  ;;  %3596 = vmatmul.mubr.bf16.gmra.mrb[184].mxu0 %v6729_v27  ;;  %5931 = vmatmul.mubr.msk.bf16.gmra.mrb[248].mxu1 %vm2457_vm0, %v6730_v19  ;;  %v6735_v27 = vld [vmem:[%s7395_s28 + $0x4e8] ss:$20 sps:$4 sm:$0xff]  }
 0x23f   : > { %3603 = vmatprep.mubr.bf16.mxu0 %v6731_v54  ;;  %5934 = vmatprep.mubr.msk.bf16.mxu1 %vm2457_vm0, %v6733_v40  ;;  %v6736_v54 = vld [vmem:[%s7395_s28 + $0x78c] ss:$20 sps:$4 sm:$0xff]   ;;  %v6738_v40 = vld [vmem:[%s7395_s28 + $0x510] ss:$20 sps:$4 sm:$0xff]  }
 0x241   : > { %v8062_v39 = vpop.f32.mrb[144].mxu1  ;;  %v3389_v58 = vpop.f32.mrb[80].mxu0 }
 0x242   : > { %v8064_v38 = vadd.f32 %v3389_v58, %v2845_v47  ;;  %v3102_v44 = vpop.f32.mrb[145].mxu1  ;;  %v3391_v29 = vpop.f32.mrb[81].mxu0 }
 0x243   : > { %v8070_v3 = vpop.f32.mrb[146].mxu1  ;;  %v3392_v19 = vpop.f32.mrb[82].mxu0 }
 0x244   : > { %9535 = vst [vmem:[#allocation58_spill] sm:$0xff] %v8064_v38  ;;  %v8074_v51 = vadd.f32 %v3392_v19, %v2848_v22  ;;  %v3105_v43 = vpop.f32.mrb[147].mxu1  ;;  %v3394_v13 = vpop.f32.mrb[83].mxu0 }
 0x245   : > { %v2856_v13 = vadd.f32 %v7984_v53, %v7684_v63  ;;  %v6739_v43 = vld [vmem:[%s7395_s28 + $0x788] ss:$20 sps:$4 sm:$0xff]   ;;  %v2861_v63 = vadd.f32 %v7984_v53, %v7688_v4 }
 0x246   : > { %9536 = vst [vmem:[#allocation59_spill] sm:$0xff] %v8074_v51  ;;  %3604 = vmatmul.mubr.bf16.gmra.mrb[188].mxu0 %v6734_v35  ;;  %5935 = vmatmul.mubr.msk.bf16.gmra.mrb[252].mxu1 %vm2457_vm0, %v6735_v27  ;;  %v6740_v35 = vld [vmem:[%s7395_s28 + $0x538] ss:$20 sps:$4 sm:$0xff]  }
 0x247   : > { %3611 = vmatprep.mubr.bf16.mxu0 %v6736_v54  ;;  %5938 = vmatprep.mubr.msk.bf16.mxu1 %vm2457_vm0, %v6738_v40  ;;  %v6741_v54 = vld [vmem:[%s7395_s28 + $0x7b4] ss:$20 sps:$4 sm:$0xff]  }
 0x248   : > { %v6743_v40 = vld [vmem:[%s7395_s28 + $0x560] ss:$20 sps:$4 sm:$0xff]  }
 0x249   : > { %v8080_v47 = vpop.f32.mrb[148].mxu1  ;;  %v3397_v58 = vpop.f32.mrb[84].mxu0 }
 0x24a   : > { %v8082_v44 = vadd.f32 %v3397_v58, %v2853_v55  ;;  %v3110_v29 = vpop.f32.mrb[149].mxu1  ;;  %v3399_v22 = vpop.f32.mrb[85].mxu0 }
 0x24b   : > { %v8088_v19 = vpop.f32.mrb[150].mxu1  ;;  %v3400_v27 = vpop.f32.mrb[86].mxu0 }
 0x24c   : > { %9537 = vst [vmem:[#allocation60_spill] sm:$0xff] %v8082_v44  ;;  %v8092_v59 = vadd.f32 %v3400_v27, %v2856_v13  ;;  %v3113_v51 = vpop.f32.mrb[151].mxu1  ;;  %v3402_v38 = vpop.f32.mrb[87].mxu0 }
 0x24d   : > { %v2864_v38 = vadd.f32 %v7984_v53, %v7692_v8  ;;  %v6744_v51 = vld [vmem:[%s7395_s28 + $0x7b0] ss:$20 sps:$4 sm:$0xff]   ;;  %v2869_v8 = vadd.f32 %v7984_v53, %v7696_v12 }
 0x24e   : > { %9538 = vst [vmem:[#allocation61_spill] sm:$0xff] %v8092_v59  ;;  %3612 = vmatmul.mubr.bf16.gmra.mrb[192].mxu0 %v6739_v43  ;;  %5939 = vmatmul.mubr.msk.bf16.gmra.mrb[0].mxu1 %vm2457_vm0, %v6740_v35  ;;  %v6745_v43 = vld [vmem:[%s7395_s28 + $0x588] ss:$20 sps:$4 sm:$0xff]  }
 0x24f   : > { %3619 = vmatprep.mubr.bf16.mxu0 %v6741_v54  ;;  %5942 = vmatprep.mubr.msk.bf16.mxu1 %vm2457_vm0, %v6743_v40  ;;  %v6746_v54 = vld [vmem:[%s7395_s28 + $0x7dc] ss:$20 sps:$4 sm:$0xff]  }
 0x250   : > { %v6748_v40 = vld [vmem:[%s7395_s28 + $0x5b0] ss:$20 sps:$4 sm:$0xff]  }
 0x251   : > { %v8098_v55 = vpop.f32.mrb[152].mxu1  ;;  %v3405_v58 = vpop.f32.mrb[88].mxu0 }
 0x252   : > { %v8100_v29 = vadd.f32 %v3405_v58, %v2861_v63  ;;  %v3118_v22 = vpop.f32.mrb[153].mxu1  ;;  %v3407_v13 = vpop.f32.mrb[89].mxu0 }
 0x253   : > { %v8106_v27 = vpop.f32.mrb[154].mxu1  ;;  %v3408_v35 = vpop.f32.mrb[90].mxu0 }
 0x254   : > { %9539 = vst [vmem:[#allocation62_spill] sm:$0xff] %v8100_v29  ;;  %v8110_v4 = vadd.f32 %v3408_v35, %v2864_v38  ;;  %v3121_v59 = vpop.f32.mrb[155].mxu1  ;;  %v3410_v44 = vpop.f32.mrb[91].mxu0 }
 0x255   : > { %v2872_v44 = vadd.f32 %v7984_v53, %v7700_v15  ;;  %v6749_v59 = vld [vmem:[%s7395_s28 + $0x7d8] ss:$20 sps:$4 sm:$0xff]   ;;  %v2877_v15 = vadd.f32 %v7984_v53, %v7704_v20 }
 0x256   : > { %9540 = vst [vmem:[#allocation63_spill] sm:$0xff] %v8110_v4  ;;  %3620 = vmatmul.mubr.bf16.gmra.mrb[196].mxu0 %v6744_v51  ;;  %5943 = vmatmul.mubr.msk.bf16.gmra.mrb[4].mxu1 %vm2457_vm0, %v6745_v43  ;;  %v6750_v51 = vld [vmem:[%s7395_s28 + $0x5d8] ss:$20 sps:$4 sm:$0xff]  }
 0x257   : > { %3627 = vmatprep.mubr.bf16.mxu0 %v6746_v54  ;;  %5946 = vmatprep.mubr.msk.bf16.mxu1 %vm2457_vm0, %v6748_v40  ;;  %v6751_v54 = vld [vmem:[%s7395_s28 + $0x804] ss:$20 sps:$4 sm:$0xff]   ;;  %v6753_v40 = vld [vmem:[%s7395_s28 + $0x600] ss:$20 sps:$4 sm:$0xff]  }
 0x259   : > { %v8116_v63 = vpop.f32.mrb[156].mxu1  ;;  %v3413_v58 = vpop.f32.mrb[92].mxu0 }
 0x25a   : > { %v8118_v22 = vadd.f32 %v3413_v58, %v2869_v8  ;;  %v3126_v13 = vpop.f32.mrb[157].mxu1  ;;  %v3415_v38 = vpop.f32.mrb[93].mxu0 }
 0x25b   : > { %v8124_v35 = vpop.f32.mrb[158].mxu1  ;;  %v3416_v43 = vpop.f32.mrb[94].mxu0 }
 0x25c   : > { %9541 = vst [vmem:[#allocation64_spill] sm:$0xff] %v8118_v22  ;;  %v8128_v12 = vadd.f32 %v3416_v43, %v2872_v44  ;;  %v3129_v4 = vpop.f32.mrb[159].mxu1  ;;  %v3418_v29 = vpop.f32.mrb[95].mxu0 }
 0x25d   : > { %v2880_v29 = vadd.f32 %v7984_v53, %v7708_v25  ;;  %v6754_v4 = vld [vmem:[%s7395_s28 + $0x800] ss:$20 sps:$4 sm:$0xff]   ;;  %v2885_v25 = vadd.f32 %v7984_v53, %v7712_v30 }
 0x25e   : > { %9542 = vst [vmem:[#allocation65_spill] sm:$0xff] %v8128_v12  ;;  %3628 = vmatmul.mubr.bf16.gmra.mrb[200].mxu0 %v6749_v59  ;;  %5947 = vmatmul.mubr.msk.bf16.gmra.mrb[8].mxu1 %vm2457_vm0, %v6750_v51  ;;  %v6755_v59 = vld [vmem:[%s7395_s28 + $0x628] ss:$20 sps:$4 sm:$0xff]  }
 0x25f   : > { %3635 = vmatprep.mubr.bf16.mxu0 %v6751_v54  ;;  %5950 = vmatprep.mubr.msk.bf16.mxu1 %vm2457_vm0, %v6753_v40  ;;  %v6756_v54 = vld [vmem:[%s7395_s28 + $0x82c] ss:$20 sps:$4 sm:$0xff]   ;;  %v6758_v40 = vld [vmem:[%s7395_s28 + $0x650] ss:$20 sps:$4 sm:$0xff]  }
 0x261   : > { %v8134_v8 = vpop.f32.mrb[160].mxu1  ;;  %v3421_v58 = vpop.f32.mrb[96].mxu0 }
 0x262   : > { %v8136_v13 = vadd.f32 %v3421_v58, %v2877_v15  ;;  %v3134_v38 = vpop.f32.mrb[161].mxu1  ;;  %v3423_v44 = vpop.f32.mrb[97].mxu0 }
 0x263   : > { %v8142_v43 = vpop.f32.mrb[162].mxu1  ;;  %v3424_v51 = vpop.f32.mrb[98].mxu0 }
 0x264   : > { %9543 = vst [vmem:[#allocation66_spill] sm:$0xff] %v8136_v13  ;;  %v8146_v20 = vadd.f32 %v3424_v51, %v2880_v29  ;;  %v3137_v12 = vpop.f32.mrb[163].mxu1  ;;  %v3426_v22 = vpop.f32.mrb[99].mxu0 }
 0x265   : > { %v2888_v22 = vadd.f32 %v7984_v53, %v7716_v36  ;;  %v6759_v12 = vld [vmem:[%s7395_s28 + $0x828] ss:$20 sps:$4 sm:$0xff]   ;;  %v2893_v36 = vadd.f32 %v7984_v53, %v7720_v41 }
 0x266   : > { %9544 = vst [vmem:[#allocation67_spill] sm:$0xff] %v8146_v20  ;;  %3636 = vmatmul.mubr.bf16.gmra.mrb[204].mxu0 %v6754_v4  ;;  %5951 = vmatmul.mubr.msk.bf16.gmra.mrb[12].mxu1 %vm2457_vm0, %v6755_v59  ;;  %v6760_v4 = vld [vmem:[%s7395_s28 + $0x678] ss:$20 sps:$4 sm:$0xff]  }
 0x267   : > { %3643 = vmatprep.mubr.bf16.mxu0 %v6756_v54  ;;  %5954 = vmatprep.mubr.msk.bf16.mxu1 %vm2457_vm0, %v6758_v40  ;;  %v6761_v54 = vld [vmem:[%s7395_s28 + $0x854] ss:$20 sps:$4 sm:$0xff]  }
 0x268   : > { %v6763_v40 = vld [vmem:[%s7395_s28 + $0x6a0] ss:$20 sps:$4 sm:$0xff]  }
 0x269   : > { %v8152_v15 = vpop.f32.mrb[164].mxu1  ;;  %v3429_v58 = vpop.f32.mrb[100].mxu0 }
 0x26a   : > { %v8154_v38 = vadd.f32 %v3429_v58, %v2885_v25  ;;  %v3142_v44 = vpop.f32.mrb[165].mxu1  ;;  %v3431_v29 = vpop.f32.mrb[101].mxu0 }
 0x26b   : > { %v8160_v51 = vpop.f32.mrb[166].mxu1  ;;  %v3432_v59 = vpop.f32.mrb[102].mxu0 }
 0x26c   : > { %9545 = vst [vmem:[#allocation68_spill] sm:$0xff] %v8154_v38  ;;  %v8164_v30 = vadd.f32 %v3432_v59, %v2888_v22  ;;  %v3145_v20 = vpop.f32.mrb[167].mxu1  ;;  %v3434_v13 = vpop.f32.mrb[103].mxu0 }
 0x26d   : > { %v2896_v13 = vadd.f32 %v7984_v53, %v7724_v46  ;;  %v6764_v20 = vld [vmem:[%s7395_s28 + $0x850] ss:$20 sps:$4 sm:$0xff]   ;;  %v2901_v46 = vadd.f32 %v7984_v53, %v7728_v52 }
 0x26e   : > { %9546 = vst [vmem:[#allocation69_spill] sm:$0xff] %v8164_v30  ;;  %3644 = vmatmul.mubr.bf16.gmra.mrb[208].mxu0 %v6759_v12  ;;  %5955 = vmatmul.mubr.msk.bf16.gmra.mrb[16].mxu1 %vm2457_vm0, %v6760_v4  ;;  %v6765_v12 = vld [vmem:[%s7395_s28 + $0x6c8] ss:$20 sps:$4 sm:$0xff]  }
 0x26f   : > { %3651 = vmatprep.mubr.bf16.mxu0 %v6761_v54  ;;  %5958 = vmatprep.mubr.msk.bf16.mxu1 %vm2457_vm0, %v6763_v40  ;;  %v6766_v54 = vld [vmem:[%s7395_s28 + $0x87c] ss:$20 sps:$4 sm:$0xff]  }
 0x270   : > { %v6768_v40 = vld [vmem:[%s7395_s28 + $0x6f0] ss:$20 sps:$4 sm:$0xff]  }
 0x271   : > { %v8170_v25 = vpop.f32.mrb[168].mxu1  ;;  %v3437_v58 = vpop.f32.mrb[104].mxu0 }
 0x272   : > { %v8172_v44 = vadd.f32 %v3437_v58, %v2893_v36  ;;  %v3150_v29 = vpop.f32.mrb[169].mxu1  ;;  %v3439_v22 = vpop.f32.mrb[105].mxu0 }
 0x273   : > { %v8178_v59 = vpop.f32.mrb[170].mxu1  ;;  %v3440_v4 = vpop.f32.mrb[106].mxu0 }
 0x274   : > { %9547 = vst [vmem:[#allocation70_spill] sm:$0xff] %v8172_v44  ;;  %v8182_v41 = vadd.f32 %v3440_v4, %v2896_v13  ;;  %v3153_v30 = vpop.f32.mrb[171].mxu1  ;;  %v3442_v38 = vpop.f32.mrb[107].mxu0 }
 0x275   : > { %v2904_v38 = vadd.f32 %v7984_v53, %v7732_v57  ;;  %v6769_v30 = vld [vmem:[%s7395_s28 + $0x878] ss:$20 sps:$4 sm:$0xff]   ;;  %v2909_v57 = vadd.f32 %v7984_v53, %v7736_v62 }
 0x276   : > { %9548 = vst [vmem:[#allocation71_spill] sm:$0xff] %v8182_v41  ;;  %3652 = vmatmul.mubr.bf16.gmra.mrb[212].mxu0 %v6764_v20  ;;  %5959 = vmatmul.mubr.msk.bf16.gmra.mrb[20].mxu1 %vm2457_vm0, %v6765_v12  ;;  %v6770_v20 = vld [vmem:[%s7395_s28 + $0x718] ss:$20 sps:$4 sm:$0xff]  }
 0x277   : > { %3659 = vmatprep.mubr.bf16.mxu0 %v6766_v54  ;;  %5962 = vmatprep.mubr.msk.bf16.mxu1 %vm2457_vm0, %v6768_v40  ;;  %v6771_v54 = vld [vmem:[%s7395_s28 + $0x8a4] ss:$20 sps:$4 sm:$0xff]   ;;  %v6773_v40 = vld [vmem:[%s7395_s28 + $0x740] ss:$20 sps:$4 sm:$0xff]  }
 0x279   : > { %v8188_v36 = vpop.f32.mrb[172].mxu1  ;;  %v3445_v58 = vpop.f32.mrb[108].mxu0 }
 0x27a   : > { %v8190_v29 = vadd.f32 %v3445_v58, %v2901_v46  ;;  %v3158_v22 = vpop.f32.mrb[173].mxu1  ;;  %v3447_v13 = vpop.f32.mrb[109].mxu0 }
 0x27b   : > { %v8196_v4 = vpop.f32.mrb[174].mxu1  ;;  %v3448_v12 = vpop.f32.mrb[110].mxu0 }
 0x27c   : > { %9549 = vst [vmem:[#allocation72_spill] sm:$0xff] %v8190_v29  ;;  %v8200_v52 = vadd.f32 %v3448_v12, %v2904_v38  ;;  %v3161_v41 = vpop.f32.mrb[175].mxu1  ;;  %v3450_v44 = vpop.f32.mrb[111].mxu0 }
 0x27d   : > { %v2912_v44 = vadd.f32 %v7984_v53, %v7740_v5  ;;  %v6774_v41 = vld [vmem:[%s7395_s28 + $0x8a0] ss:$20 sps:$4 sm:$0xff]   ;;  %v2917_v5 = vadd.f32 %v7984_v53, %v7744_v10 }
 0x27e   : > { %9550 = vst [vmem:[#allocation73_spill] sm:$0xff] %v8200_v52  ;;  %3660 = vmatmul.mubr.bf16.gmra.mrb[216].mxu0 %v6769_v30  ;;  %5963 = vmatmul.mubr.msk.bf16.gmra.mrb[24].mxu1 %vm2457_vm0, %v6770_v20  ;;  %v6775_v30 = vld [vmem:[%s7395_s28 + $0x768] ss:$20 sps:$4 sm:$0xff]  }
 0x27f   : > { %3667 = vmatprep.mubr.bf16.mxu0 %v6771_v54  ;;  %5966 = vmatprep.mubr.msk.bf16.mxu1 %vm2457_vm0, %v6773_v40  ;;  %v6776_v54 = vld [vmem:[%s7395_s28 + $0x8cc] ss:$20 sps:$4 sm:$0xff]   ;;  %v6778_v40 = vld [vmem:[%s7395_s28 + $0x790] ss:$20 sps:$4 sm:$0xff]  }
 0x281   : > { %v8206_v46 = vpop.f32.mrb[176].mxu1  ;;  %v3453_v58 = vpop.f32.mrb[112].mxu0 }
 0x282   : > { %v8208_v22 = vadd.f32 %v3453_v58, %v2909_v57  ;;  %v3166_v13 = vpop.f32.mrb[177].mxu1  ;;  %v3455_v38 = vpop.f32.mrb[113].mxu0 }
 0x283   : > { %v8214_v12 = vpop.f32.mrb[178].mxu1  ;;  %v3456_v20 = vpop.f32.mrb[114].mxu0 }
 0x284   : > { %9551 = vst [vmem:[#allocation74_spill] sm:$0xff] %v8208_v22  ;;  %v8218_v62 = vadd.f32 %v3456_v20, %v2912_v44  ;;  %v3169_v52 = vpop.f32.mrb[179].mxu1  ;;  %v3458_v29 = vpop.f32.mrb[115].mxu0 }
 0x285   : > { %v2920_v29 = vadd.f32 %v7984_v53, %v7748_v14  ;;  %v6779_v52 = vld [vmem:[%s7395_s28 + $0x8c8] ss:$20 sps:$4 sm:$0xff]   ;;  %v2925_v14 = vadd.f32 %v7984_v53, %v7752_v21  ;;  %v2936_v21 = vadd.f32 %v7984_v53, %v7764_v42 }
 0x286   : > { %9552 = vst [vmem:[#allocation75_spill] sm:$0xff] %v8218_v62  ;;  %3668 = vmatmul.mubr.bf16.gmra.mrb[220].mxu0 %v6774_v41  ;;  %5967 = vmatmul.mubr.msk.bf16.gmra.mrb[28].mxu1 %vm2457_vm0, %v6775_v30  ;;  %v6780_v41 = vld [vmem:[%s7395_s28 + $0x7b8] ss:$20 sps:$4 sm:$0xff]   ;;  %v6786_v42 = vld [vmem:[%s7395_s28 + $0x91c] ss:$20 sps:$4 sm:$0xff]  }
 0x287   : > { %3675 = vmatprep.mubr.bf16.mxu0 %v6776_v54  ;;  %5970 = vmatprep.mubr.msk.bf16.mxu1 %vm2457_vm0, %v6778_v40  ;;  %v6781_v54 = vld [vmem:[%s7395_s28 + $0x8f4] ss:$20 sps:$4 sm:$0xff]  }
 0x288   : > { %v6783_v40 = vld [vmem:[%s7395_s28 + $0x7e0] ss:$20 sps:$4 sm:$0xff]  }
 0x289   : > { %v8224_v57 = vpop.f32.mrb[180].mxu1  ;;  %v3461_v58 = vpop.f32.mrb[116].mxu0 }
 0x28a   : > { %v8226_v13 = vadd.f32 %v3461_v58, %v2917_v5  ;;  %v3174_v38 = vpop.f32.mrb[181].mxu1  ;;  %v3463_v44 = vpop.f32.mrb[117].mxu0 }
 0x28b   : > { %v8232_v20 = vpop.f32.mrb[182].mxu1  ;;  %v3464_v30 = vpop.f32.mrb[118].mxu0 }
 0x28c   : > { %9553 = vst [vmem:[#allocation76_spill] sm:$0xff] %v8226_v13  ;;  %9554 = vst [vmem:[#allocation77_spill] sm:$0xff] %v8232_v20  ;;  %v8236_v10 = vadd.f32 %v3464_v30, %v2920_v29  ;;  %v3177_v62 = vpop.f32.mrb[183].mxu1  ;;  %v3466_v22 = vpop.f32.mrb[119].mxu0  ;;  %v8256_v30 = vadd.f32 %v7984_v53, %v7768_v49  ;;  %v8276_v49 = vadd.f32 %v7984_v53, %v7780_v7  ;;  %v9575_v13 = vld [vmem:[#allocation10_spill] sm:$0xff] }
 0x28d   : > { %v2928_v22 = vadd.f32 %v7984_v53, %v7756_v28  ;;  %v6784_v62 = vld [vmem:[%s7395_s28 + $0x8f0] ss:$20 sps:$4 sm:$0xff]   ;;  %v8268_v28 = vadd.f32 %v7984_v53, %v7776_v61  ;;  %v8294_v7 = vadd.f32 %v7984_v53, %v7792_v32  ;;  %v8314_v32 = vadd.f32 %v7984_v53, %v7806_v2 }
 0x28e   : > { %9555 = vst [vmem:[#allocation78_spill] sm:$0xff] %v8236_v10  ;;  %3676 = vmatmul.mubr.bf16.gmra.mrb[224].mxu0 %v6779_v52  ;;  %5971 = vmatmul.mubr.msk.bf16.gmra.mrb[32].mxu1 %vm2457_vm0, %v6780_v41  ;;  %v6785_v52 = vld [vmem:[%s7395_s28 + $0x808] ss:$20 sps:$4 sm:$0xff]   ;;  %v2933_v41 = vadd.f32 %v7984_v53, %v7760_v34 }
 0x28f   : > { %3683 = vmatprep.mubr.bf16.mxu0 %v6781_v54  ;;  %5974 = vmatprep.mubr.msk.bf16.mxu1 %vm2457_vm0, %v6783_v40  ;;  %v8260_v54 = vadd.f32 %v7984_v53, %v7770_v50  ;;  %v8264_v40 = vadd.f32 %v7984_v53, %v7774_v60  ;;  %v8280_v50 = vadd.f32 %v7984_v53, %v7782_v9 }
 0x290   : > { %v8284_v60 = vadd.f32 %v7984_v53, %v7786_v17  ;;  %v8298_v9 = vadd.f32 %v7984_v53, %v7794_v33  ;;  %v8302_v17 = vadd.f32 %v7984_v53, %v7798_v45  ;;  %v8319_v33 = vadd.f32 %v7984_v53, %v7810_v1 }
 0x291   : > { %v8242_v5 = vpop.f32.mrb[184].mxu1  ;;  %v3469_v58 = vpop.f32.mrb[120].mxu0  ;;  %v8323_v45 = vadd.f32 %v7984_v53, %v7812_v16 }
 0x292   : > { %9556 = vst [vmem:[#allocation79_spill] sm:$0xff] %v8242_v5  ;;  %v8244_v38 = vadd.f32 %v3469_v58, %v2925_v14  ;;  %v3182_v44 = vpop.f32.mrb[185].mxu1  ;;  %v3471_v29 = vpop.f32.mrb[121].mxu0  ;;  %v6788_v58 = vld [vmem:[%s7395_s28 + $0x830] ss:$20 sps:$4 sm:$0xff]   ;;  %9560 = vst [vmem:[#allocation83_spill] sm:$0xff] %v8319_v33 }
 0x293   : > { %v8270_v34 = vpop.f32.mrb[186].mxu1  ;;  %v3472_v14 = vpop.f32.mrb[122].mxu0 }
 0x294   : > { %9557 = vst [vmem:[#allocation80_spill] sm:$0xff] %v8244_v38  ;;  %9558 = vst [vmem:[#allocation81_spill] sm:$0xff] %v8270_v34  ;;  %v8286_v44 = vadd.f32 %v3472_v14, %v2928_v22  ;;  %v3185_v61 = vpop.f32.mrb[187].mxu1  ;;  %v3474_v29 = vpop.f32.mrb[123].mxu0  ;;  %v8290_v38 = vadd.f32 %v7984_v53, %v7788_v18  ;;  %v8306_v22 = vadd.f32 %v7984_v53, %v7800_v48  ;;  %v9566_v14 = vld [vmem:[#allocation5_spill] sm:$0xff] }
 0x295   : > { %v8310_v18 = vadd.f32 %v7984_v53, %v7804_v0  ;;  %v8327_v48 = vadd.f32 %v7984_v53, %v7816_v37  ;;  %v9562_v0 = vld [vmem:[#allocation2_spill] sm:$0xff]  ;;  %v8344_v37 = vadd.f32 %v7984_v53, %v9566_v14  ;;  %v9569_v61 = vld [vmem:[#allocation7_spill] sm:$0xff]  ;;  %v9582_v34 = vld [vmem:[#allocation13_spill] sm:$0xff] }
 0x296   : > { %9559 = vst [vmem:[#allocation82_spill] sm:$0xff] %v8286_v44  ;;  %3684 = vmatmul.mubr.bf16.gmra.mrb[228].mxu0 %v6784_v62  ;;  %5975 = vmatmul.mubr.msk.bf16.gmra.mrb[36].mxu1 %vm2457_vm0, %v6785_v52  ;;  %v8332_v2 = vadd.f32 %v7984_v53, %v9562_v0  ;;  %v9563_v62 = vld [vmem:[#allocation3_spill] sm:$0xff]  ;;  %v9565_v52 = vld [vmem:[#allocation4_spill] sm:$0xff]  ;;  %v8352_v29 = vadd.f32 %v7984_v53, %v9569_v61  ;;  %v9572_v44 = vld [vmem:[#allocation9_spill] sm:$0xff] }
 0x297   : > { %9561 = vst [vmem:[#allocation84_spill] sm:$0xff] %v8327_v48  ;;  %3691 = vmatprep.mubr.bf16.mxu0 %v6786_v42  ;;  %5978 = vmatprep.mubr.msk.bf16.mxu1 %vm2457_vm0, %v6788_v58  ;;  %v8336_v1 = vadd.f32 %v7984_v53, %v9563_v62  ;;  %v8340_v16 = vadd.f32 %v7984_v53, %v9565_v52  ;;  %9567 = vst [vmem:[#allocation3_spill] sm:$0xff] %v8344_v37  ;;  %v9568_v42 = vld [vmem:[#allocation6_spill] sm:$0xff]  ;;  %v9571_v0 = vld [vmem:[#allocation8_spill] sm:$0xff] }
 0x298   : > { %v8348_v58 = vadd.f32 %v7984_v53, %v9568_v42  ;;  %9570 = vst [vmem:[#allocation4_spill] sm:$0xff] %v8352_v29  ;;  %v8356_v62 = vadd.f32 %v7984_v53, %v9571_v0  ;;  %v8360_v52 = vadd.f32 %v7984_v53, %v9572_v44  ;;  %v8366_v42 = vadd.f32 %v7984_v53, %v9575_v13  ;;  %v9577_v37 = vld [vmem:[#allocation11_spill] sm:$0xff]  ;;  %v9579_v29 = vld [vmem:[#allocation12_spill] sm:$0xff]  ;;  %v9584_v13 = vld [vmem:[#allocation14_spill] sm:$0xff] }
 0x299   : > { %9564 = vst [vmem:[#allocation2_spill] sm:$0xff] %v8336_v1  ;;  %v8362_v10 = vpop.f32.mrb[188].mxu1  ;;  %v3477_v14 = vpop.f32.mrb[124].mxu0  ;;  %v8370_v61 = vadd.f32 %v7984_v53, %v9577_v37  ;;  %v8374_v0 = vadd.f32 %v7984_v53, %v9579_v29  ;;  %v6789_v48 = vld [vmem:[%s7395_s28 + $0x918] ss:$20 sps:$4 sm:$0xff]   ;;  %v8382_v5 = vadd.f32 %v7984_v53, %v9582_v34  ;;  %v8386_v33 = vadd.f32 %v7984_v53, %v9584_v13  ;;  %v9588_v29 = vld [vmem:[#allocation16_spill] sm:$0xff] }
 0x29a   : > { %9573 = vst [vmem:[#allocation5_spill] sm:$0xff] %v8360_v52  ;;  %9574 = vst [vmem:[#allocation6_spill] sm:$0xff] %v8362_v10  ;;  %v8376_v1 = vadd.f32 %v3477_v14, %v2933_v41  ;;  %v3190_v44 = vpop.f32.mrb[189].mxu1  ;;  %v3479_v52 = vpop.f32.mrb[125].mxu0  ;;  %v6790_v10 = vld [vmem:[%s7395_s28 + $0x858] ss:$20 sps:$4 sm:$0xff]   ;;  %v8394_v41 = vadd.f32 %v7984_v53, %v9588_v29 }
 0x29b   : > { %9576 = vst [vmem:[#allocation7_spill] sm:$0xff] %v8366_v42  ;;  %9578 = vst [vmem:[#allocation8_spill] sm:$0xff] %v8370_v61  ;;  %v9586_v37 = vld [vmem:[#allocation15_spill] sm:$0xff]  ;;  %v8396_v14 = vpop.f32.mrb[190].mxu1  ;;  %v3480_v52 = vpop.f32.mrb[126].mxu0 }
 0x29c   : > { %9580 = vst [vmem:[#allocation9_spill] sm:$0xff] %v8374_v0  ;;  %9581 = vst [vmem:[#allocation10_spill] sm:$0xff] %v8376_v1  ;;  %v8390_v61 = vadd.f32 %v7984_v53, %v9586_v37  ;;  %v6791_v44 = vld [vmem:[%s7395_s28 + $0x944] ss:$20 sps:$4 sm:$0xff]   ;;  %v6793_v1 = vld [vmem:[%s7395_s28 + $0x880] ss:$20 sps:$4 sm:$0xff]  }
 0x29d   : > { %9583 = vst [vmem:[#allocation11_spill] sm:$0xff] %v8382_v5  ;;  %9585 = vst [vmem:[#allocation12_spill] sm:$0xff] %v8386_v33  ;;  %v9591_v0 = vld [vmem:[#allocation17_spill] sm:$0xff]  ;;  %v9593_v5 = vld [vmem:[#allocation18_spill] sm:$0xff]  ;;  %v3193_v29 = vpop.f32.mrb[191].mxu1 }
 0x29e   : > { %9587 = vst [vmem:[#allocation13_spill] sm:$0xff] %v8390_v61  ;;  %9589 = vst [vmem:[#allocation14_spill] sm:$0xff] %v8394_v41  ;;  %v8402_v34 = vadd.f32 %v7984_v53, %v9591_v0  ;;  %v8406_v13 = vadd.f32 %v7984_v53, %v9593_v5  ;;  %v9595_v42 = vld [vmem:[#allocation19_spill] sm:$0xff]  ;;  %v8412_v61 = vadd.f32 %v3480_v52, %v2936_v21  ;;  %v3482_v41 = vpop.f32.mrb[127].mxu0  ;;  %v9600_v33 = vld [vmem:[#allocation21_spill] sm:$0xff]  ;;  %3692 = vmatmul.mubr.bf16.gmra.mrb[232].mxu0 %v6789_v48 }
 0x29f   : > { %9590 = vst [vmem:[#allocation15_spill] sm:$0xff] %v8396_v14  ;;  %v8410_v37 = vadd.f32 %v7984_v53, %v9595_v42  ;;  %v9598_v14 = vld [vmem:[#allocation20_spill] sm:$0xff]  ;;  %v8420_v0 = vadd.f32 %v7984_v53, %v9600_v33  ;;  %v9607_v41 = vld [vmem:[#allocation25_spill] sm:$0xff]  ;;  %v9609_v29 = vld [vmem:[#allocation26_spill] sm:$0xff]  ;;  %5979 = vmatmul.mubr.msk.bf16.gmra.mrb[40].mxu1 %vm2457_vm0, %v6790_v10  ;;  %3699 = vmatprep.mubr.bf16.mxu0 %v6791_v44 }
 0x2a0   : > { %9592 = vst [vmem:[#allocation16_spill] sm:$0xff] %v8402_v34  ;;  %9594 = vst [vmem:[#allocation17_spill] sm:$0xff] %v8406_v13  ;;  %v8416_v20 = vadd.f32 %v7984_v53, %v9598_v14  ;;  %v9602_v34 = vld [vmem:[#allocation22_spill] sm:$0xff]  ;;  %v9603_v13 = vld [vmem:[#allocation23_spill] sm:$0xff]  ;;  %v8436_v14 = vadd.f32 %v7984_v53, %v9607_v41  ;;  %v8440_v33 = vadd.f32 %v7984_v53, %v9609_v29  ;;  %5982 = vmatprep.mubr.msk.bf16.mxu1 %vm2457_vm0, %v6793_v1 }
 0x2a1   : > { %9596 = vst [vmem:[#allocation18_spill] sm:$0xff] %v8410_v37  ;;  %9597 = vst [vmem:[#allocation19_spill] sm:$0xff] %v8412_v61  ;;  %v8424_v5 = vadd.f32 %v7984_v53, %v9602_v34  ;;  %v8428_v42 = vadd.f32 %v7984_v53, %v9603_v13  ;;  %v9605_v21 = vld [vmem:[#allocation24_spill] sm:$0xff]  ;;  %v9611_v34 = vld [vmem:[#allocation27_spill] sm:$0xff]  ;;  %v3485_v37 = vpop.f32.mrb[128].mxu0 }
 0x2a2   : > { %9599 = vst [vmem:[#allocation20_spill] sm:$0xff] %v8416_v20  ;;  %9601 = vst [vmem:[#allocation21_spill] sm:$0xff] %v8420_v0  ;;  %v8432_v52 = vadd.f32 %v7984_v53, %v9605_v21  ;;  %v8445_v61 = vadd.f32 %v7984_v53, %v9611_v34  ;;  %v9613_v13 = vld [vmem:[#allocation28_spill] sm:$0xff]  ;;  %v9615_v21 = vld [vmem:[#allocation29_spill] sm:$0xff] }
 0x2a3   : > { %9604 = vst [vmem:[#allocation22_spill] sm:$0xff] %v8428_v42  ;;  %9608 = vst [vmem:[#allocation24_spill] sm:$0xff] %v8436_v14  ;;  %v8449_v42 = vadd.f32 %v7984_v53, %v9613_v13  ;;  %v8453_v0 = vadd.f32 %v7984_v53, %v9615_v21  ;;  %v9617_v41 = vld [vmem:[#allocation30_spill] sm:$0xff]  ;;  %v9619_v10 = vld [vmem:[#allocation31_spill] sm:$0xff] }
 0x2a4   : > { %9606 = vst [vmem:[#allocation23_spill] sm:$0xff] %v8432_v52  ;;  %9610 = vst [vmem:[#allocation25_spill] sm:$0xff] %v8440_v33  ;;  %v8458_v48 = vadd.f32 %v7984_v53, %v9617_v41  ;;  %v8462_v29 = vadd.f32 %v7984_v53, %v9619_v10  ;;  %v9621_v34 = vld [vmem:[#allocation32_spill] sm:$0xff]  ;;  %v9625_v44 = vld [vmem:[#allocation34_spill] sm:$0xff] }
 0x2a5   : > { %9612 = vst [vmem:[#allocation26_spill] sm:$0xff] %v8445_v61  ;;  %9614 = vst [vmem:[#allocation27_spill] sm:$0xff] %v8449_v42  ;;  %v8466_v13 = vadd.f32 %v7984_v53, %v9621_v34  ;;  %v9623_v61 = vld [vmem:[#allocation33_spill] sm:$0xff]  ;;  %v8474_v1 = vadd.f32 %v7984_v53, %v9625_v44  ;;  %v9627_v41 = vld [vmem:[#allocation35_spill] sm:$0xff] }
 0x2a6   : > { %9616 = vst [vmem:[#allocation28_spill] sm:$0xff] %v8453_v0  ;;  %9618 = vst [vmem:[#allocation29_spill] sm:$0xff] %v8458_v48  ;;  %v8470_v21 = vadd.f32 %v7984_v53, %v9623_v61  ;;  %v8478_v0 = vadd.f32 %v7984_v53, %v9627_v41  ;;  %v9629_v14 = vld [vmem:[#allocation36_spill] sm:$0xff]  ;;  %v5876_v61 = vpop.f32.mrb[192].mxu1  ;;  %v6795_v42 = vld [vmem:[%s7395_s28 + $0x8a8] ss:$20 sps:$4 sm:$0xff]  }
 0x2a7   : > { %9620 = vst [vmem:[#allocation30_spill] sm:$0xff] %v8462_v29  ;;  %9622 = vst [vmem:[#allocation31_spill] sm:$0xff] %v8466_v13  ;;  %v8482_v10 = vadd.f32 %v7984_v53, %v9629_v14  ;;  %v9631_v29 = vld [vmem:[#allocation37_spill] sm:$0xff]  ;;  %v3783_v14 = vadd.f32 %v8280_v50, %v5876_v61  ;;  %v9638_v13 = vld [vmem:[#allocation40_spill] sm:$0xff]  ;;  %5983 = vmatmul.mubr.msk.bf16.gmra.mrb[44].mxu1 %vm2457_vm0, %v6795_v42  ;;  %v8558_v42 = vadd.f32 %v7984_v53, %v8008_v56 }
 0x2a8   : > { %9624 = vst [vmem:[#allocation32_spill] sm:$0xff] %v8470_v21  ;;  %9626 = vst [vmem:[#allocation33_spill] sm:$0xff] %v8474_v1  ;;  %v8486_v34 = vadd.f32 %v7984_v53, %v9631_v29  ;;  %v9633_v21 = vld [vmem:[#allocation38_spill] sm:$0xff]  ;;  %v9635_v1 = vld [vmem:[#allocation39_spill] sm:$0xff]  ;;  %v3774_v29 = vpop.f32.mrb[193].mxu1  ;;  %v8504_v33 = vadd.f32 %v7984_v53, %v9638_v13  ;;  %v8570_v56 = vadd.f32 %v7984_v53, %v8034_v26 }
 0x2a9   : > { %9628 = vst [vmem:[#allocation34_spill] sm:$0xff] %v8478_v0  ;;  %9630 = vst [vmem:[#allocation35_spill] sm:$0xff] %v8482_v10  ;;  %v8490_v44 = vadd.f32 %v7984_v53, %v9633_v21  ;;  %v8494_v41 = vadd.f32 %v7984_v53, %v9635_v1  ;;  %v8497_v0 = vadd.f32 %v3485_v37, %v8256_v30  ;;  %v3487_v10 = vpop.f32.mrb[129].mxu0  ;;  %v9640_v48 = vld [vmem:[#allocation41_spill] sm:$0xff]  ;;  %v5877_v50 = vpop.f32.mrb[194].mxu1  ;;  %v4287_v13 = vsub.f32 0.0, %v3783_v14 }
 0x2aa   : > { %9632 = vst [vmem:[#allocation36_spill] sm:$0xff] %v8486_v34  ;;  %v6794_v34 = vld [vmem:[%s7395_s28 + $0x940] ss:$20 sps:$4 sm:$0xff]   ;;  %9639 = vst [vmem:[#allocation40_spill] sm:$0xff] %v8504_v33  ;;  %v8508_v21 = vadd.f32 %v7984_v53, %v9640_v48  ;;  %v3775_v30 = vadd.f32 %v8260_v54, %v3774_v29  ;;  %v3488_v37 = vpop.f32.mrb[130].mxu0  ;;  %v3786_v48 = vadd.f32 %v8290_v38, %v5877_v50  ;;  %v3777_v20 = vpop.f32.mrb[195].mxu1 }
 0x2ab   : > { %9634 = vst [vmem:[#allocation37_spill] sm:$0xff] %v8490_v44  ;;  %9636 = vst [vmem:[#allocation38_spill] sm:$0xff] %v8494_v41  ;;  %v9642_v44 = vld [vmem:[#allocation42_spill] sm:$0xff]  ;;  %v8522_v33 = vadd.f32 %v3488_v37, %v8264_v40  ;;  %v9647_v54 = vld [vmem:[#allocation45_spill] sm:$0xff]  ;;  %3700 = vmatmul.mubr.bf16.gmra.mrb[236].mxu0 %v6794_v34 }
 0x2ac   : > { %9637 = vst [vmem:[#allocation39_spill] sm:$0xff] %v8497_v0  ;;  %9641 = vst [vmem:[#allocation41_spill] sm:$0xff] %v8508_v21  ;;  %v8512_v1 = vadd.f32 %v7984_v53, %v9642_v44  ;;  %v6796_v10 = vld [vmem:[%s7395_s28 + $0x96c] ss:$20 sps:$4 sm:$0xff]   ;;  %v6798_v61 = vld [vmem:[%s7395_s28 + $0x8d0] ss:$20 sps:$4 sm:$0xff]   ;;  %v8531_v29 = vadd.f32 %v7984_v53, %v9647_v54 }
 0x2ad   : > { %v9644_v0 = vld [vmem:[#allocation43_spill] sm:$0xff]  ;;  %v3490_v21 = vpop.f32.mrb[131].mxu0  ;;  %v9646_v44 = vld [vmem:[#allocation44_spill] sm:$0xff]  ;;  %v4285_v52 = vsub.f32 0.0, %v3775_v30  ;;  %v4288_v37 = vsub.f32 0.0, %v3786_v48  ;;  %v9651_v30 = vld [vmem:[#allocation49_spill] sm:$0xff]  ;;  %3707 = vmatprep.mubr.bf16.mxu0 %v6796_v10  ;;  %5986 = vmatprep.mubr.msk.bf16.mxu1 %vm2457_vm0, %v6798_v61  ;;  %v8562_v48 = vadd.f32 %v7984_v53, %v8016_v11 }
 0x2ae   : > { %9643 = vst [vmem:[#allocation42_spill] sm:$0xff] %v8512_v1  ;;  %v8519_v41 = vadd.f32 %v7984_v53, %v9644_v0  ;;  %v8527_v1 = vadd.f32 %v7984_v53, %v9646_v44  ;;  %v3778_v0 = vadd.f32 %v8268_v28, %v3777_v20  ;;  %v9649_v40 = vld [vmem:[#allocation47_spill] sm:$0xff]  ;;  %v4417_v21 = vmul.f32 1.442695, %v4287_v13  ;;  %v9650_v50 = vld [vmem:[#allocation48_spill] sm:$0xff]  ;;  %v5880_v61 = vpop.f32.mrb[196].mxu1 }
 0x2af   : > { %v8540_v38 = vadd.f32 %v7984_v53, %v9649_v40  ;;  %v8545_v44 = vadd.f32 %v7984_v53, %v9650_v50  ;;  %v8549_v20 = vadd.f32 %v7984_v53, %v9651_v30  ;;  %v4413_v28 = vmul.f32 1.442695, %v4285_v52  ;;  %v3790_v40 = vpop.f32.mrb[197].mxu1 }
 0x2b0   : > { %9645 = vst [vmem:[#allocation43_spill] sm:$0xff] %v8519_v41  ;;  %v9648_v41 = vld [vmem:[#allocation46_spill] sm:$0xff]  ;;  %v8554_v13 = vadd.f32 %v7984_v53, %v7998_v6  ;;  %6816 = vpow2.f32 %v4417_v21  ;;  %v4419_v34 = vmul.f32 1.442695, %v4288_v37  ;;  %v8566_v52 = vadd.f32 %v7984_v53, %v8026_v23  ;;  %v3493_v6 = vpop.f32.mrb[132].mxu0 }
 0x2b1   : > { %v8536_v14 = vadd.f32 %v7984_v53, %v9648_v41  ;;  %v4286_v41 = vsub.f32 0.0, %v3778_v0  ;;  %6818 = vpow2.f32 %v4413_v28  ;;  %v8573_v54 = vadd.f32 %v3493_v6, %v8276_v49  ;;  %v3495_v0 = vpop.f32.mrb[133].mxu0  ;;  %v6799_v23 = vld [vmem:[%s7395_s28 + $0x968] ss:$20 sps:$4 sm:$0xff]   ;;  %v6800_v21 = vld [vmem:[%s7395_s28 + $0x8f8] ss:$20 sps:$4 sm:$0xff]  }
 0x2b2   : > { %6820 = vpow2.f32 %v4419_v34  ;;  %v3799_v11 = vadd.f32 %v8314_v32, %v5880_v61  ;;  %v8580_v37 = vadd.f32 %v7984_v53, %v8044_v31  ;;  %v8584_v50 = vadd.f32 %v7984_v53, %v8052_v24  ;;  %v3496_v30 = vpop.f32.mrb[134].mxu0  ;;  %v5881_v49 = vpop.f32.mrb[198].mxu1  ;;  %v6801_v28 = vld [vmem:[%s7395_s28 + $0x994] ss:$20 sps:$4 sm:$0xff]   ;;  %5987 = vmatmul.mubr.msk.bf16.gmra.mrb[48].mxu1 %vm2457_vm0, %v6800_v21 }
 0x2b3   : > { %v4415_v10 = vmul.f32 1.442695, %v4286_v41  ;;  %v3791_v26 = vadd.f32 %v8298_v9, %v3790_v40  ;;  %v6803_v41 = vld [vmem:[%s7395_s28 + $0x920] ss:$20 sps:$4 sm:$0xff]   ;;  %v8591_v32 = vadd.f32 %v7984_v53, %v8062_v39  ;;  %v8594_v6 = vadd.f32 %v3496_v30, %v8284_v60  ;;  %v3498_v61 = vpop.f32.mrb[135].mxu0  ;;  %v3793_v24 = vpop.f32.mrb[199].mxu1  ;;  %3708 = vmatmul.mubr.bf16.gmra.mrb[240].mxu0 %v6799_v23 }
 0x2b4   : > { %v4291_v34 = vsub.f32 0.0, %v3799_v11  ;;  %v3802_v31 = vadd.f32 %v8323_v45, %v5881_v49  ;;  %v8603_v9 = vadd.f32 %v7984_v53, %v8080_v47  ;;  %v3794_v39 = vadd.f32 %v8306_v22, %v3793_v24  ;;  %3715 = vmatprep.mubr.bf16.mxu0 %v6801_v28  ;;  %5990 = vmatprep.mubr.msk.bf16.mxu1 %vm2457_vm0, %v6803_v41  ;;  %v5884_v30 = vpop.f32.mrb[200].mxu1  ;;  %v6804_v49 = vld [vmem:[%s7395_s28 + $0x990] ss:$20 sps:$4 sm:$0xff]  }
 0x2b5   : > { %6822 = vpow2.f32 %v4415_v10  ;;  %v8599_v10 = vadd.f32 %v7984_v53, %v8070_v3  ;;  %v4289_v0 = vsub.f32 0.0, %v3791_v26  ;;  %v8608_v11 = vadd.f32 %v7984_v53, %v8088_v19  ;;  %v6806_v61 = vld [vmem:[%s7395_s28 + $0x9bc] ss:$20 sps:$4 sm:$0xff]  }
 0x2b6   : > { %v8612_v60 = vadd.f32 %v7984_v53, %v8098_v55  ;;  %v4425_v45 = vmul.f32 1.442695, %v4291_v34  ;;  %v4292_v40 = vsub.f32 0.0, %v3802_v31  ;;  %v8617_v3 = vadd.f32 %v7984_v53, %v8106_v27  ;;  %v6805_v31 = vld [vmem:[%s7395_s28 + $0x948] ss:$20 sps:$4 sm:$0xff]  }
 0x2b7   : > { %v8621_v47 = vadd.f32 %v7984_v53, %v8116_v63  ;;  %v4421_v19 = vmul.f32 1.442695, %v4289_v0  ;;  %v4290_v22 = vsub.f32 0.0, %v3794_v39  ;;  %v8626_v55 = vadd.f32 %v7984_v53, %v8124_v35  ;;  %v3501_v35 = vpop.f32.mrb[136].mxu0 }
 0x2b8   : > { %9652 = vst [vmem:[#allocation44_spill] sm:$0xff] %v8612_v60  ;;  %9653 = vst [vmem:[#allocation45_spill] sm:$0xff] %v8617_v3  ;;  %v8630_v23 = vadd.f32 %v7984_v53, %v8134_v8  ;;  %6824 = vpow2.f32 %v4425_v45  ;;  %v4427_v27 = vmul.f32 1.442695, %v4292_v40  ;;  %v8634_v63 = vadd.f32 %v7984_v53, %v8142_v43  ;;  %v3503_v34 = vpop.f32.mrb[137].mxu0  ;;  %v9731_v60 = vld [vmem:[#allocation66_spill] sm:$0xff] }
 0x2b9   : > { %9654 = vst [vmem:[#allocation46_spill] sm:$0xff] %v8621_v47  ;;  %9655 = vst [vmem:[#allocation47_spill] sm:$0xff] %v8626_v55  ;;  %v8638_v21 = vadd.f32 %v7984_v53, %v8152_v15  ;;  %6826 = vpow2.f32 %v4421_v19  ;;  %v4423_v26 = vmul.f32 1.442695, %v4290_v22  ;;  %v8643_v8 = vadd.f32 %v7984_v53, %v8160_v51  ;;  %v3806_v15 = vpop.f32.mrb[201].mxu1  ;;  %v3504_v45 = vpop.f32.mrb[138].mxu0 }
 0x2ba   : > { %9656 = vst [vmem:[#allocation48_spill] sm:$0xff] %v8630_v23  ;;  %9657 = vst [vmem:[#allocation49_spill] sm:$0xff] %v8634_v63  ;;  %v6817_v28 = vpop.eup %6816  ;;  %6828 = vpow2.f32 %v4427_v27  ;;  %v8646_v41 = vadd.f32 %v3501_v35, %v8294_v7  ;;  %v3815_v43 = vadd.f32 %v8348_v58, %v5884_v30  ;;  %v8653_v0 = vadd.f32 %v7984_v53, %v8170_v25  ;;  %v5885_v40 = vpop.f32.mrb[202].mxu1  ;;  %v6808_v19 = vld [vmem:[%s7395_s28 + $0x970] ss:$20 sps:$4 sm:$0xff]  }
 0x2bb   : > { %9658 = vst [vmem:[#allocation85_spill] sm:$0xff] %v8638_v21  ;;  %9659 = vst [vmem:[#allocation86_spill] sm:$0xff] %v8643_v8  ;;  %v6819_v24 = vpop.eup %6818  ;;  %v4671_v39 = vadd.f32 1.0, %v6817_v28  ;;  %6830 = vpow2.f32 %v4423_v26  ;;  %v3807_v51 = vadd.f32 %v8332_v2, %v3806_v15  ;;  %v8658_v58 = vadd.f32 %v3504_v45, %v8302_v17  ;;  %v3506_v30 = vpop.f32.mrb[139].mxu0  ;;  %3716 = vmatmul.mubr.bf16.gmra.mrb[244].mxu0 %v6804_v49  ;;  %v8666_v17 = vld [vmem:[%s9477_s2] ss:$0 sm:$0xff] }
 0x2bc   : > { %9660 = vst [vmem:[#allocation87_spill] sm:$0xff] %v8653_v0  ;;  %v6821_v7 = vpop.eup %6820  ;;  %v4669_v22 = vadd.f32 1.0, %v6819_v24  ;;  %v4295_v27 = vsub.f32 0.0, %v3815_v43  ;;  %v3818_v35 = vadd.f32 %v8356_v62, %v5885_v40  ;;  %v3809_v34 = vpop.f32.mrb[203].mxu1  ;;  %5991 = vmatmul.mubr.msk.bf16.gmra.mrb[52].mxu1 %vm2457_vm0, %v6805_v31  ;;  %v8670_v62 = vadd.f32 %v8666_v17, %v8178_v59  ;;  %3723 = vmatprep.mubr.bf16.mxu0 %v6806_v61  ;;  %v9667_v40 = vld [vmem:[#allocation12_spill] sm:$0xff]  ;;  %v9668_v30 = vld [vmem:[#allocation77_spill] sm:$0xff] }
 0x2bd   : > { %6832 = vrcp.f32 %v4671_v39  ;;  %v4672_v53 = vadd.f32 1.0, %v6821_v7  ;;  %v4293_v25 = vsub.f32 0.0, %v3807_v51  ;;  %v3810_v26 = vadd.f32 %v8340_v16, %v3809_v34  ;;  %5994 = vmatprep.mubr.msk.bf16.mxu1 %vm2457_vm0, %v6808_v19  ;;  %v3509_v24 = vpop.f32.mrb[140].mxu0  ;;  %v5888_v39 = vpop.f32.mrb[204].mxu1  ;;  %v6809_v51 = vld [vmem:[%s7395_s28 + $0x9b8] ss:$20 sps:$4 sm:$0xff]  }
 0x2be   : > { %6834 = vrcp.f32 %v4669_v22  ;;  %v4433_v28 = vmul.f32 1.442695, %v4295_v27  ;;  %v4296_v15 = vsub.f32 0.0, %v3818_v35  ;;  %9661 = vst [vmem:[#allocation88_spill] sm:$0xff] %v8670_v62  ;;  %v8675_v49 = vadd.f32 %v8666_v17, %v8188_v36  ;;  %v3822_v7 = vpop.f32.mrb[205].mxu1 }
 0x2bf   : > { %v6823_v8 = vpop.eup %6822  ;;  %6836 = vrcp.f32 %v4672_v53  ;;  %v4429_v43 = vmul.f32 1.442695, %v4293_v25  ;;  %v4294_v16 = vsub.f32 0.0, %v3810_v26  ;;  %v8683_v59 = vadd.f32 %v8666_v17, %v8206_v46  ;;  %v6810_v22 = vld [vmem:[%s7395_s28 + $0x998] ss:$20 sps:$4 sm:$0xff]  }
 0x2c0   : > { %v4670_v2 = vadd.f32 1.0, %v6823_v8  ;;  %9662 = vst [vmem:[#allocation89_spill] sm:$0xff] %v8675_v49  ;;  %v8679_v8 = vadd.f32 %v8666_v17, %v8196_v4  ;;  %v4435_v31 = vmul.f32 1.442695, %v4296_v15  ;;  %v8687_v61 = vadd.f32 %v8666_v17, %v8214_v12  ;;  %v3511_v12 = vpop.f32.mrb[141].mxu0  ;;  %v9670_v25 = vld [vmem:[#allocation7_spill] sm:$0xff] }
 0x2c1   : > { %9664 = vst [vmem:[#allocation91_spill] sm:$0xff] %v8683_v59  ;;  %v4431_v36 = vmul.f32 1.442695, %v4294_v16  ;;  %v8692_v45 = vadd.f32 %v8666_v17, %v8224_v57  ;;  %v8695_v46 = vadd.f32 %v3509_v24, %v8310_v18  ;;  %v3831_v19 = vadd.f32 %v9667_v40, %v5888_v39  ;;  %v6811_v27 = vld [vmem:[%s7395_s28 + $0x9e4] ss:$20 sps:$4 sm:$0xff]   ;;  %v3512_v26 = vpop.f32.mrb[142].mxu0 }
 0x2c2   : > { %9663 = vst [vmem:[#allocation90_spill] sm:$0xff] %v8679_v8  ;;  %6838 = vrcp.f32 %v4670_v2  ;;  %9665 = vst [vmem:[#allocation92_spill] sm:$0xff] %v8687_v61  ;;  %v6825_v4 = vpop.eup %6824  ;;  %v8702_v34 = vadd.f32 %v8666_v17, %v9668_v30  ;;  %v3823_v57 = vadd.f32 %v9670_v25, %v3822_v7  ;;  %v5889_v2 = vpop.f32.mrb[206].mxu1  ;;  %v6813_v18 = vld [vmem:[%s7395_s28 + $0x9c0] ss:$20 sps:$4 sm:$0xff]   ;;  %v9671_v16 = vld [vmem:[#allocation83_spill] sm:$0xff] }
 0x2c3   : > { %6840 = vpow2.f32 %v4433_v28  ;;  %9666 = vst [vmem:[#allocation93_spill] sm:$0xff] %v8692_v45  ;;  %v6827_v35 = vpop.eup %6826  ;;  %v4675_v53 = vadd.f32 1.0, %v6825_v4  ;;  %v8707_v24 = vadd.f32 %v3512_v26, %v9671_v16  ;;  %v3514_v39 = vpop.f32.mrb[143].mxu0  ;;  %v9673_v45 = vld [vmem:[#allocation9_spill] sm:$0xff]  ;;  %3724 = vmatmul.mubr.bf16.gmra.mrb[248].mxu0 %v6809_v51 }
 0x2c4   : > { %6842 = vpow2.f32 %v4429_v43  ;;  %9669 = vst [vmem:[#allocation12_spill] sm:$0xff] %v8702_v34  ;;  %v6829_v28 = vpop.eup %6828  ;;  %v4673_v15 = vadd.f32 1.0, %v6827_v35  ;;  %v4299_v43 = vsub.f32 0.0, %v3831_v19  ;;  %v3825_v40 = vpop.f32.mrb[207].mxu1  ;;  %v4297_v4 = vsub.f32 0.0, %v3823_v57  ;;  %5995 = vmatmul.mubr.msk.bf16.gmra.mrb[56].mxu1 %vm2457_vm0, %v6810_v22  ;;  %v9674_v19 = vld [vmem:[#allocation79_spill] sm:$0xff]  ;;  %3731 = vmatprep.mubr.bf16.mxu0 %v6811_v27 }
 0x2c5   : > { %6844 = vpow2.f32 %v4435_v31  ;;  %v6831_v12 = vpop.eup %6830  ;;  %v4676_v30 = vadd.f32 1.0, %v6829_v28  ;;  %v9672_v31 = vld [vmem:[#allocation14_spill] sm:$0xff]  ;;  %v3826_v35 = vadd.f32 %v9673_v45, %v3825_v40  ;;  %v8715_v26 = vadd.f32 %v8666_v17, %v9674_v19  ;;  %5998 = vmatprep.mubr.msk.bf16.mxu1 %vm2457_vm0, %v6813_v18  ;;  %v9676_v28 = vld [vmem:[#allocation81_spill] sm:$0xff]  ;;  %v3517_v18 = vpop.f32.mrb[144].mxu0 }
 0x2c6   : > { %6846 = vpow2.f32 %v4431_v36  ;;  %v3834_v34 = vadd.f32 %v9672_v31, %v5889_v2  ;;  %v4674_v7 = vadd.f32 1.0, %v6831_v12  ;;  %v4441_v25 = vmul.f32 1.442695, %v4299_v43  ;;  %v6814_v22 = vld [vmem:[%s7395_s28 + $0x9e0] ss:$20 sps:$4 sm:$0xff]   ;;  %v5892_v12 = vpop.f32.mrb[208].mxu1 }
 0x2c7   : > { %6848 = vrcp.f32 %v4675_v53  ;;  %v6833_v36 = vpop.eup %6832  ;;  %9675 = vst [vmem:[#allocation77_spill] sm:$0xff] %v8715_v26  ;;  %v4437_v53 = vmul.f32 1.442695, %v4297_v4  ;;  %v4298_v51 = vsub.f32 0.0, %v3826_v35  ;;  %v6815_v43 = vld [vmem:[%s7395_s28 + $0x9e8] ss:$20 sps:$4 sm:$0xff]  }
 0x2c8   : > { %6850 = vrcp.f32 %v4673_v15  ;;  %v4300_v57 = vsub.f32 0.0, %v3834_v34  ;;  %v6835_v2 = vpop.eup %6834  ;;  %v8720_v15 = vadd.f32 %v8666_v17, %v9676_v28  ;;  %v4927_v45 = vmax.f32 %v6833_v36, 0.0  ;;  %v9678_v39 = vld [vmem:[#allocation6_spill] sm:$0xff]  ;;  %v3519_v35 = vpop.f32.mrb[145].mxu0 }
 0x2c9   : > { %6852 = vrcp.f32 %v4676_v30  ;;  %v6837_v16 = vpop.eup %6836  ;;  %v8726_v40 = vadd.f32 %v8666_v17, %v9678_v39  ;;  %v4925_v27 = vmax.f32 %v6835_v2, 0.0  ;;  %v3838_v36 = vpop.f32.mrb[209].mxu1  ;;  %v9682_v26 = vld [vmem:[#allocation2_spill] sm:$0xff] }
 0x2ca   : > { %9677 = vst [vmem:[#allocation7_spill] sm:$0xff] %v8720_v15  ;;  %6854 = vrcp.f32 %v4674_v7  ;;  %v4443_v34 = vmul.f32 1.442695, %v4300_v57  ;;  %v5055_v4 = vmin.f32 %v4927_v45, 1.0  ;;  %v4928_v31 = vmax.f32 %v6837_v16, 0.0  ;;  %v5893_v57 = vpop.f32.mrb[210].mxu1 }
 0x2cb   : > { %9679 = vst [vmem:[#allocation83_spill] sm:$0xff] %v8726_v40  ;;  %6856 = vpow2.f32 %v4441_v25  ;;  %v4439_v7 = vmul.f32 1.442695, %v4298_v51  ;;  %v5053_v28 = vmin.f32 %v4925_v27, 1.0  ;;  %v9680_v40 = vld [vmem:[#allocation84_spill] sm:$0xff]  ;;  %v3520_v25 = vpop.f32.mrb[146].mxu0  ;;  %3732 = vmatmul.mubr.bf16.gmra.mrb[252].mxu0 %v6814_v22 }
 0x2cc   : > { %v6839_v30 = vpop.eup %6838  ;;  %6858 = vpow2.f32 %v4437_v53  ;;  %v8734_v15 = vadd.f32 %v3517_v18, %v9680_v40  ;;  %5184 = vst.msk [vmem:[%s8731_s24 + $0x10] sm:$0xff] %vm5181_vm1, %v5055_v4  ;;  %v5056_v45 = vmin.f32 %v4928_v31, 1.0  ;;  %v3847_v53 = vadd.f32 %v8424_v5, %v5892_v12  ;;  %v3522_v51 = vpop.f32.mrb[147].mxu0  ;;  %v9681_v18 = vld [vmem:[#allocation17_spill] sm:$0xff]  ;;  %v9683_v5 = vld [vmem:[#allocation23_spill] sm:$0xff]  ;;  %5999 = vmatmul.mubr.msk.bf16.gmra.mrb[60].mxu1 %vm2457_vm0, %v6815_v43 }
 0x2cd   : > { %v6841_v19 = vpop.eup %6840  ;;  %v4926_v39 = vmax.f32 %v6839_v30, 0.0  ;;  %6860 = vpow2.f32 %v4443_v34  ;;  %v3841_v35 = vpop.f32.mrb[211].mxu1  ;;  %5182 = vst.msk [vmem:[%s8731_s24] sm:$0xff] %vm5181_vm1, %v5053_v28  ;;  %v3839_v30 = vadd.f32 %v9681_v18, %v3838_v36  ;;  %v8743_v61 = vadd.f32 %v3520_v25, %v9682_v26  ;;  %v9684_v28 = vld [vmem:[#allocation20_spill] sm:$0xff] }
 0x2ce   : > { %v6843_v2 = vpop.eup %6842  ;;  %v4679_v16 = vadd.f32 1.0, %v6841_v19  ;;  %6862 = vpow2.f32 %v4439_v7  ;;  %5185 = vst.msk [vmem:[%s8731_s24 + $0x18] sm:$0xff] %vm5181_vm1, %v5056_v45  ;;  %v4303_v31 = vsub.f32 0.0, %v3847_v53  ;;  %v3850_v12 = vadd.f32 %v9683_v5, %v5893_v57  ;;  %v3525_v51 = vpop.f32.mrb[148].mxu0 }
 0x2cf   : > { %v6845_v27 = vpop.eup %6844  ;;  %v5054_v34 = vmin.f32 %v4926_v39, 1.0  ;;  %v4677_v40 = vadd.f32 1.0, %v6843_v2  ;;  %v4301_v36 = vsub.f32 0.0, %v3839_v30  ;;  %v3842_v26 = vadd.f32 %v9684_v28, %v3841_v35  ;;  %v5896_v43 = vpop.f32.mrb[212].mxu1 }
 0x2d0   : > { %v6847_v59 = vpop.eup %6846  ;;  %6864 = vrcp.f32 %v4679_v16  ;;  %v4680_v4 = vadd.f32 1.0, %v6845_v27  ;;  %v4449_v2 = vmul.f32 1.442695, %v4303_v31  ;;  %v4304_v45 = vsub.f32 0.0, %v3850_v12  ;;  %v3527_v18 = vpop.f32.mrb[149].mxu0 }
 0x2d1   : > { %v6849_v7 = vpop.eup %6848  ;;  %5183 = vst.msk [vmem:[%s8731_s24 + $0x8] sm:$0xff] %vm5181_vm1, %v5054_v34  ;;  %6866 = vrcp.f32 %v4677_v40  ;;  %v4678_v19 = vadd.f32 1.0, %v6847_v59  ;;  %v4445_v57 = vmul.f32 1.442695, %v4301_v36  ;;  %v4302_v22 = vsub.f32 0.0, %v3842_v26  ;;  %v3854_v35 = vpop.f32.mrb[213].mxu1 }
 0x2d2   : > { %v6851_v39 = vpop.eup %6850  ;;  %v4931_v25 = vmax.f32 %v6849_v7, 0.0  ;;  %6868 = vrcp.f32 %v4680_v4  ;;  %v4451_v59 = vmul.f32 1.442695, %v4304_v45  ;;  %v3528_v12 = vpop.f32.mrb[150].mxu0  ;;  %v9685_v26 = vld [vmem:[#allocation3_spill] sm:$0xff]  ;;  %v9688_v18 = vld [vmem:[#allocation4_spill] sm:$0xff] }
 0x2d3   : > { %v6853_v16 = vpop.eup %6852  ;;  %v4929_v53 = vmax.f32 %v6851_v39, 0.0  ;;  %6870 = vrcp.f32 %v4678_v19  ;;  %v4447_v5 = vmul.f32 1.442695, %v4302_v22  ;;  %v5897_v7 = vpop.f32.mrb[214].mxu1  ;;  %v8755_v39 = vadd.f32 %v3525_v51, %v9685_v26  ;;  %v9690_v26 = vld [vmem:[#allocation15_spill] sm:$0xff] }
 0x2d4   : > { %v6855_v27 = vpop.eup %6854  ;;  %v5059_v34 = vmin.f32 %v4931_v25, 1.0  ;;  %v4932_v40 = vmax.f32 %v6853_v16, 0.0  ;;  %6872 = vpow2.f32 %v4449_v2  ;;  %v3530_v25 = vpop.f32.mrb[151].mxu0  ;;  %v8764_v51 = vadd.f32 %v3528_v12, %v9688_v18  ;;  %v9693_v18 = vld [vmem:[#allocation5_spill] sm:$0xff] }
 0x2d5   : > { %v6857_v30 = vpop.eup %6856  ;;  %v5057_v4 = vmin.f32 %v4929_v53, 1.0  ;;  %v4930_v31 = vmax.f32 %v6855_v27, 0.0  ;;  %6874 = vpow2.f32 %v4445_v57  ;;  %v3857_v2 = vpop.f32.mrb[215].mxu1  ;;  %v9686_v57 = vld [vmem:[#allocation29_spill] sm:$0xff] }
 0x2d6   : > { %v6859_v19 = vpop.eup %6858  ;;  %5188 = vst.msk [vmem:[%s8731_s24 + $0x30] sm:$0xff] %vm5181_vm1, %v5059_v34  ;;  %v5060_v36 = vmin.f32 %v4932_v40, 1.0  ;;  %v4683_v28 = vadd.f32 1.0, %v6857_v30  ;;  %6876 = vpow2.f32 %v4451_v59  ;;  %v3863_v22 = vadd.f32 %v9686_v57, %v5896_v43  ;;  %v9687_v40 = vld [vmem:[#allocation25_spill] sm:$0xff] }
 0x2d7   : > { %v6861_v45 = vpop.eup %6860  ;;  %5186 = vst.msk [vmem:[%s8731_s24 + $0x20] sm:$0xff] %vm5181_vm1, %v5057_v4  ;;  %v5058_v16 = vmin.f32 %v4930_v31, 1.0  ;;  %v4681_v53 = vadd.f32 1.0, %v6859_v19  ;;  %6878 = vpow2.f32 %v4447_v5  ;;  %v3855_v59 = vadd.f32 %v9687_v40, %v3854_v35  ;;  %v9689_v31 = vld [vmem:[#allocation31_spill] sm:$0xff] }
 0x2d8   : > { %v6863_v27 = vpop.eup %6862  ;;  %5189 = vst.msk [vmem:[%s8731_s24 + $0x38] sm:$0xff] %vm5181_vm1, %v5060_v36  ;;  %6880 = vrcp.f32 %v4683_v28  ;;  %v4684_v34 = vadd.f32 1.0, %v6861_v45  ;;  %v4307_v4 = vsub.f32 0.0, %v3863_v22  ;;  %v3866_v19 = vadd.f32 %v9689_v31, %v5897_v7  ;;  %v9692_v28 = vld [vmem:[#allocation27_spill] sm:$0xff] }
 0x2d9   : > { %5187 = vst.msk [vmem:[%s8731_s24 + $0x28] sm:$0xff] %vm5181_vm1, %v5058_v16  ;;  %6882 = vrcp.f32 %v4681_v53  ;;  %v4682_v30 = vadd.f32 1.0, %v6863_v27  ;;  %v8771_v43 = vadd.f32 %v8666_v17, %v9690_v26  ;;  %v4305_v36 = vsub.f32 0.0, %v3855_v59  ;;  %v3533_v16 = vpop.f32.mrb[152].mxu0  ;;  %v5900_v53 = vpop.f32.mrb[216].mxu1 }
 0x2da   : > { %v6865_v5 = vpop.eup %6864  ;;  %6884 = vrcp.f32 %v4684_v34  ;;  %v3858_v25 = vadd.f32 %v9692_v28, %v3857_v2  ;;  %v4457_v12 = vmul.f32 1.442695, %v4307_v4  ;;  %v4308_v57 = vsub.f32 0.0, %v3866_v19  ;;  %v3535_v17 = vpop.f32.mrb[153].mxu0 }
 0x2db   : > { %9691 = vst [vmem:[#allocation14_spill] sm:$0xff] %v8771_v43  ;;  %v6867_v35 = vpop.eup %6866  ;;  %v4935_v45 = vmax.f32 %v6865_v5, 0.0  ;;  %6886 = vrcp.f32 %v4682_v30  ;;  %v4453_v40 = vmul.f32 1.442695, %v4305_v36  ;;  %v8775_v31 = vadd.f32 %v3533_v16, %v9693_v18  ;;  %v3870_v26 = vpop.f32.mrb[217].mxu1 }
 0x2dc   : > { %v6869_v27 = vpop.eup %6868  ;;  %v4933_v22 = vmax.f32 %v6867_v35, 0.0  ;;  %v4306_v7 = vsub.f32 0.0, %v3858_v25  ;;  %6888 = vpow2.f32 %v4457_v12  ;;  %v4459_v5 = vmul.f32 1.442695, %v4308_v57  ;;  %v3536_v30 = vpop.f32.mrb[154].mxu0 }
 0x2dd   : > { %v6871_v34 = vpop.eup %6870  ;;  %v5063_v59 = vmin.f32 %v4935_v45, 1.0  ;;  %v4936_v2 = vmax.f32 %v6869_v27, 0.0  ;;  %v5901_v4 = vpop.f32.mrb[218].mxu1  ;;  %6890 = vpow2.f32 %v4453_v40  ;;  %v9694_v45 = vld [vmem:[#allocation37_spill] sm:$0xff] }
 0x2de   : > { %v6873_v19 = vpop.eup %6872  ;;  %v5061_v28 = vmin.f32 %v4933_v22, 1.0  ;;  %v4934_v43 = vmax.f32 %v6871_v34, 0.0  ;;  %v4455_v36 = vmul.f32 1.442695, %v4306_v7  ;;  %v3538_v25 = vpop.f32.mrb[155].mxu0  ;;  %6892 = vpow2.f32 %v4459_v5  ;;  %v9695_v40 = vld [vmem:[#allocation33_spill] sm:$0xff] }
 0x2df   : > { %v3873_v35 = vpop.f32.mrb[219].mxu1  ;;  %v6875_v16 = vpop.eup %6874  ;;  %5192 = vst.msk [vmem:[%s8731_s24 + $0x50] sm:$0xff] %vm5181_vm1, %v5063_v59  ;;  %v5064_v18 = vmin.f32 %v4936_v2, 1.0  ;;  %v4687_v17 = vadd.f32 1.0, %v6873_v19  ;;  %v3879_v12 = vadd.f32 %v9694_v45, %v5900_v53  ;;  %v3871_v7 = vadd.f32 %v9695_v40, %v3870_v26  ;;  %v9696_v2 = vld [vmem:[#allocation8_spill] sm:$0xff]  ;;  %v9698_v40 = vld [vmem:[#allocation35_spill] sm:$0xff] }
 0x2e0   : > { %v6877_v57 = vpop.eup %6876  ;;  %5190 = vst.msk [vmem:[%s8731_s24 + $0x40] sm:$0xff] %vm5181_vm1, %v5061_v28  ;;  %v5062_v27 = vmin.f32 %v4934_v43, 1.0  ;;  %v4685_v22 = vadd.f32 1.0, %v6875_v16  ;;  %6894 = vpow2.f32 %v4455_v36  ;;  %v8786_v19 = vadd.f32 %v3536_v30, %v9696_v2  ;;  %v9697_v43 = vld [vmem:[#allocation40_spill] sm:$0xff] }
 0x2e1   : > { %v6879_v34 = vpop.eup %6878  ;;  %5193 = vst.msk [vmem:[%s8731_s24 + $0x58] sm:$0xff] %vm5181_vm1, %v5064_v18  ;;  %6896 = vrcp.f32 %v4687_v17  ;;  %v4688_v25 = vadd.f32 1.0, %v6877_v57  ;;  %v4311_v59 = vsub.f32 0.0, %v3879_v12  ;;  %v4309_v28 = vsub.f32 0.0, %v3871_v7  ;;  %v3541_v17 = vpop.f32.mrb[156].mxu0 }
 0x2e2   : > { %v6881_v5 = vpop.eup %6880  ;;  %5191 = vst.msk [vmem:[%s8731_s24 + $0x48] sm:$0xff] %vm5181_vm1, %v5062_v27  ;;  %6898 = vrcp.f32 %v4685_v22  ;;  %v4686_v53 = vadd.f32 1.0, %v6879_v34  ;;  %v3882_v16 = vadd.f32 %v9697_v43, %v5901_v4  ;;  %v3874_v18 = vadd.f32 %v9698_v40, %v3873_v35  ;;  %v5904_v57 = vpop.f32.mrb[220].mxu1  ;;  %v9699_v40 = vld [vmem:[#allocation11_spill] sm:$0xff] }
 0x2e3   : > { %v6883_v36 = vpop.eup %6882  ;;  %v4939_v45 = vmax.f32 %v6881_v5, 0.0  ;;  %6900 = vrcp.f32 %v4688_v25  ;;  %v4465_v26 = vmul.f32 1.442695, %v4311_v59  ;;  %v4461_v30 = vmul.f32 1.442695, %v4309_v28  ;;  %v3543_v49 = vpop.f32.mrb[157].mxu0 }
 0x2e4   : > { %v6885_v12 = vpop.eup %6884  ;;  %v4937_v8 = vmax.f32 %v6883_v36, 0.0  ;;  %6902 = vrcp.f32 %v4686_v53  ;;  %v4312_v2 = vsub.f32 0.0, %v3882_v16  ;;  %v3886_v27 = vpop.f32.mrb[221].mxu1  ;;  %v4310_v4 = vsub.f32 0.0, %v3874_v18 }
 0x2e5   : > { %v6887_v22 = vpop.eup %6886  ;;  %v5067_v7 = vmin.f32 %v4939_v45, 1.0  ;;  %v4940_v34 = vmax.f32 %v6885_v12, 0.0  ;;  %6904 = vpow2.f32 %v4465_v26  ;;  %v3544_v25 = vpop.f32.mrb[158].mxu0  ;;  %v8795_v45 = vadd.f32 %v3541_v17, %v9699_v40 }
 0x2e6   : > { %v5905_v59 = vpop.f32.mrb[222].mxu1  ;;  %v5065_v5 = vmin.f32 %v4937_v8, 1.0  ;;  %v4938_v35 = vmax.f32 %v6887_v22, 0.0  ;;  %6906 = vpow2.f32 %v4461_v30  ;;  %v4467_v43 = vmul.f32 1.442695, %v4312_v2  ;;  %v3546_v36 = vpop.f32.mrb[159].mxu0 }
 0x2e7   : > { %v3889_v53 = vpop.f32.mrb[223].mxu1  ;;  %v6889_v28 = vpop.eup %6888  ;;  %5196 = vst.msk [vmem:[%s8731_s24 + $0x70] sm:$0xff] %vm5181_vm1, %v5067_v7  ;;  %v5068_v49 = vmin.f32 %v4940_v34, 1.0  ;;  %v4463_v16 = vmul.f32 1.442695, %v4310_v4  ;;  %v3895_v26 = vadd.f32 %v8536_v14, %v5904_v57  ;;  %v9700_v30 = vld [vmem:[#allocation42_spill] sm:$0xff] }
 0x2e8   : > { %v6891_v18 = vpop.eup %6890  ;;  %5194 = vst.msk [vmem:[%s8731_s24 + $0x60] sm:$0xff] %vm5181_vm1, %v5065_v5  ;;  %v5066_v8 = vmin.f32 %v4938_v35, 1.0  ;;  %v4691_v12 = vadd.f32 1.0, %v6889_v28  ;;  %6908 = vpow2.f32 %v4467_v43  ;;  %v3887_v2 = vadd.f32 %v9700_v30, %v3886_v27  ;;  %v9701_v4 = vld [vmem:[#allocation13_spill] sm:$0xff] }
 0x2e9   : > { %v6893_v22 = vpop.eup %6892  ;;  %5197 = vst.msk [vmem:[%s8731_s24 + $0x78] sm:$0xff] %vm5181_vm1, %v5068_v49  ;;  %v4689_v7 = vadd.f32 1.0, %v6891_v18  ;;  %6910 = vpow2.f32 %v4463_v16  ;;  %v4315_v34 = vsub.f32 0.0, %v3895_v26  ;;  %v8804_v36 = vadd.f32 %v3544_v25, %v9701_v4  ;;  %v3549_v49 = vpop.f32.mrb[160].mxu0 }
 0x2ea   : > { %v6895_v17 = vpop.eup %6894  ;;  %5195 = vst.msk [vmem:[%s8731_s24 + $0x68] sm:$0xff] %vm5181_vm1, %v5066_v8  ;;  %6912 = vrcp.f32 %v4691_v12  ;;  %v4692_v14 = vadd.f32 1.0, %v6893_v22  ;;  %v4313_v57 = vsub.f32 0.0, %v3887_v2  ;;  %v3898_v5 = vadd.f32 %v8545_v44, %v5905_v59  ;;  %v5908_v16 = vpop.f32.mrb[224].mxu1  ;;  %v9702_v44 = vld [vmem:[#allocation16_spill] sm:$0xff] }
 0x2eb   : > { %v6897_v35 = vpop.eup %6896  ;;  %6914 = vrcp.f32 %v4689_v7  ;;  %v4690_v27 = vadd.f32 1.0, %v6895_v17  ;;  %v4473_v43 = vmul.f32 1.442695, %v4315_v34  ;;  %v3890_v28 = vadd.f32 %v8527_v1, %v3889_v53  ;;  %v3551_v30 = vpop.f32.mrb[161].mxu0 }
 0x2ec   : > { %v6899_v40 = vpop.eup %6898  ;;  %v4943_v26 = vmax.f32 %v6897_v35, 0.0  ;;  %6916 = vrcp.f32 %v4692_v14  ;;  %v4469_v25 = vmul.f32 1.442695, %v4313_v57  ;;  %v4316_v18 = vsub.f32 0.0, %v3898_v5  ;;  %v3902_v8 = vpop.f32.mrb[225].mxu1 }
 0x2ed   : > { %v6901_v12 = vpop.eup %6900  ;;  %v4941_v22 = vmax.f32 %v6899_v40, 0.0  ;;  %6918 = vrcp.f32 %v4690_v27  ;;  %v4314_v2 = vsub.f32 0.0, %v3890_v28  ;;  %v8811_v59 = vadd.f32 %v3549_v49, %v9702_v44  ;;  %v3552_v7 = vpop.f32.mrb[162].mxu0  ;;  %v9704_v44 = vld [vmem:[#allocation50_spill] sm:$0xff] }
 0x2ee   : > { %v5909_v34 = vpop.f32.mrb[226].mxu1  ;;  %v6903_v1 = vpop.eup %6902  ;;  %v5071_v53 = vmin.f32 %v4943_v26, 1.0  ;;  %v4944_v4 = vmax.f32 %v6901_v12, 0.0  ;;  %6920 = vpow2.f32 %v4473_v43  ;;  %v4475_v17 = vmul.f32 1.442695, %v4316_v18  ;;  %v9703_v26 = vld [vmem:[#allocation52_spill] sm:$0xff] }
 0x2ef   : > { %v3554_v14 = vpop.f32.mrb[163].mxu0  ;;  %v3905_v57 = vpop.f32.mrb[227].mxu1  ;;  %v5069_v35 = vmin.f32 %v4941_v22, 1.0  ;;  %v4942_v40 = vmax.f32 %v6903_v1, 0.0  ;;  %6922 = vpow2.f32 %v4469_v25  ;;  %v4471_v27 = vmul.f32 1.442695, %v4314_v2 }
 0x2f0   : > { %v6905_v5 = vpop.eup %6904  ;;  %5200 = vst.msk [vmem:[%s8731_s24 + $0x90] sm:$0xff] %vm5181_vm1, %v5071_v53  ;;  %v5072_v49 = vmin.f32 %v4944_v4, 1.0  ;;  %6924 = vpow2.f32 %v4475_v17  ;;  %v3911_v12 = vadd.f32 %v5908_v16, %v9703_v26  ;;  %v3903_v22 = vadd.f32 %v3902_v8, %v9704_v44  ;;  %v9705_v2 = vld [vmem:[#allocation18_spill] sm:$0xff]  ;;  %v9706_v53 = vld [vmem:[#allocation53_spill] sm:$0xff]  ;;  %v5912_v8 = vpop.f32.mrb[228].mxu1 }
 0x2f1   : > { %v6907_v28 = vpop.eup %6906  ;;  %v4695_v30 = vadd.f32 1.0, %v6905_v5  ;;  %5198 = vst.msk [vmem:[%s8731_s24 + $0x80] sm:$0xff] %vm5181_vm1, %v5069_v35  ;;  %v5070_v43 = vmin.f32 %v4942_v40, 1.0  ;;  %6926 = vpow2.f32 %v4471_v27  ;;  %v8822_v1 = vadd.f32 %v3552_v7, %v9705_v2  ;;  %v9707_v35 = vld [vmem:[#allocation51_spill] sm:$0xff]  ;;  %v3557_v27 = vpop.f32.mrb[164].mxu0 }
 0x2f2   : > { %v4693_v18 = vadd.f32 1.0, %v6907_v28  ;;  %v6909_v14 = vpop.eup %6908  ;;  %5201 = vst.msk [vmem:[%s8731_s24 + $0x98] sm:$0xff] %vm5181_vm1, %v5072_v49  ;;  %v4319_v25 = vsub.f32 0.0, %v3911_v12  ;;  %v3914_v4 = vadd.f32 %v5909_v34, %v9706_v53  ;;  %v4317_v5 = vsub.f32 0.0, %v3903_v22  ;;  %v9708_v12 = vld [vmem:[#allocation21_spill] sm:$0xff]  ;;  %v3559_v7 = vpop.f32.mrb[165].mxu0 }
 0x2f3   : > { %6928 = vrcp.f32 %v4695_v30  ;;  %v6911_v17 = vpop.eup %6910  ;;  %5199 = vst.msk [vmem:[%s8731_s24 + $0x88] sm:$0xff] %vm5181_vm1, %v5070_v43  ;;  %v4696_v16 = vadd.f32 1.0, %v6909_v14  ;;  %v3906_v40 = vadd.f32 %v3905_v57, %v9707_v35  ;;  %v8829_v44 = vadd.f32 %v3557_v27, %v9708_v12  ;;  %v3918_v2 = vpop.f32.mrb[229].mxu1 }
 0x2f4   : > { %6930 = vrcp.f32 %v4693_v18  ;;  %v6913_v28 = vpop.eup %6912  ;;  %v4694_v26 = vadd.f32 1.0, %v6911_v17  ;;  %v4481_v49 = vmul.f32 1.442695, %v4319_v25  ;;  %v4320_v30 = vsub.f32 0.0, %v3914_v4  ;;  %v3560_v14 = vpop.f32.mrb[166].mxu0  ;;  %v9709_v17 = vld [vmem:[#allocation56_spill] sm:$0xff] }
 0x2f5   : > { %v6915_v34 = vpop.eup %6914  ;;  %v4947_v53 = vmax.f32 %v6913_v28, 0.0  ;;  %6932 = vrcp.f32 %v4696_v16  ;;  %v4477_v43 = vmul.f32 1.442695, %v4317_v5  ;;  %v4318_v18 = vsub.f32 0.0, %v3906_v40  ;;  %v5913_v22 = vpop.f32.mrb[230].mxu1 }
 0x2f6   : > { %v6917_v62 = vpop.eup %6916  ;;  %v4945_v57 = vmax.f32 %v6915_v34, 0.0  ;;  %6934 = vrcp.f32 %v4694_v26  ;;  %v4483_v35 = vmul.f32 1.442695, %v4320_v30  ;;  %v3927_v25 = vadd.f32 %v5912_v8, %v9709_v17  ;;  %v3562_v4 = vpop.f32.mrb[167].mxu0  ;;  %v9710_v8 = vld [vmem:[#allocation54_spill] sm:$0xff] }
 0x2f7   : > { %v3921_v0 = vpop.f32.mrb[231].mxu1  ;;  %v6919_v27 = vpop.eup %6918  ;;  %v5075_v12 = vmin.f32 %v4947_v53, 1.0  ;;  %v4948_v7 = vmax.f32 %v6917_v62, 0.0  ;;  %6936 = vpow2.f32 %v4481_v49  ;;  %v4479_v28 = vmul.f32 1.442695, %v4318_v18  ;;  %v9711_v4 = vld [vmem:[#allocation22_spill] sm:$0xff] }
 0x2f8   : > { %v6921_v16 = vpop.eup %6920  ;;  %v5073_v5 = vmin.f32 %v4945_v57, 1.0  ;;  %v4946_v40 = vmax.f32 %v6919_v27, 0.0  ;;  %6938 = vpow2.f32 %v4477_v43  ;;  %v4323_v21 = vsub.f32 0.0, %v3927_v25 }
 0x2f9   : > { %v6923_v34 = vpop.eup %6922  ;;  %5204 = vst.msk [vmem:[%s8731_s24 + $0xb0] sm:$0xff] %vm5181_vm1, %v5075_v12  ;;  %v5076_v26 = vmin.f32 %v4948_v7, 1.0  ;;  %v4699_v30 = vadd.f32 1.0, %v6921_v16  ;;  %6940 = vpow2.f32 %v4483_v35  ;;  %v3919_v17 = vadd.f32 %v3918_v2, %v9710_v8  ;;  %v3565_v35 = vpop.f32.mrb[168].mxu0  ;;  %v9712_v16 = vld [vmem:[#allocation57_spill] sm:$0xff] }
 0x2fa   : > { %v6925_v53 = vpop.eup %6924  ;;  %5202 = vst.msk [vmem:[%s8731_s24 + $0xa0] sm:$0xff] %vm5181_vm1, %v5073_v5  ;;  %v5074_v62 = vmin.f32 %v4946_v40, 1.0  ;;  %v4697_v49 = vadd.f32 1.0, %v6923_v34  ;;  %6942 = vpow2.f32 %v4479_v28  ;;  %v4489_v18 = vmul.f32 1.442695, %v4323_v21  ;;  %v5916_v12 = vpop.f32.mrb[232].mxu1 }
 0x2fb   : > { %v6927_v57 = vpop.eup %6926  ;;  %5205 = vst.msk [vmem:[%s8731_s24 + $0xb8] sm:$0xff] %vm5181_vm1, %v5076_v26  ;;  %6944 = vrcp.f32 %v4699_v30  ;;  %v4700_v43 = vadd.f32 1.0, %v6925_v53  ;;  %v4321_v25 = vsub.f32 0.0, %v3919_v17  ;;  %v8840_v27 = vadd.f32 %v3560_v14, %v9711_v4  ;;  %v9713_v28 = vld [vmem:[#allocation55_spill] sm:$0xff]  ;;  %v3567_v40 = vpop.f32.mrb[169].mxu0  ;;  %v9714_v17 = vld [vmem:[#allocation24_spill] sm:$0xff] }
 0x2fc   : > { %5203 = vst.msk [vmem:[%s8731_s24 + $0xa8] sm:$0xff] %vm5181_vm1, %v5074_v62  ;;  %6946 = vrcp.f32 %v4697_v49  ;;  %v4698_v7 = vadd.f32 1.0, %v6927_v57  ;;  %v3930_v5 = vadd.f32 %v5913_v22, %v9712_v16  ;;  %v3922_v21 = vadd.f32 %v3921_v0, %v9713_v28  ;;  %v3934_v34 = vpop.f32.mrb[233].mxu1  ;;  %v3568_v53 = vpop.f32.mrb[170].mxu0  ;;  %v9715_v28 = vld [vmem:[#allocation60_spill] sm:$0xff] }
 0x2fd   : > { %v6929_v2 = vpop.eup %6928  ;;  %6948 = vrcp.f32 %v4700_v43  ;;  %v4485_v8 = vmul.f32 1.442695, %v4321_v25  ;;  %v8847_v14 = vadd.f32 %v3565_v35, %v9714_v17  ;;  %v5917_v4 = vpop.f32.mrb[234].mxu1  ;;  %v9716_v43 = vld [vmem:[#allocation58_spill] sm:$0xff] }
 0x2fe   : > { %v6931_v26 = vpop.eup %6930  ;;  %v4951_v30 = vmax.f32 %v6929_v2, 0.0  ;;  %6950 = vrcp.f32 %v4698_v7  ;;  %v4324_v62 = vsub.f32 0.0, %v3930_v5  ;;  %v4322_v49 = vsub.f32 0.0, %v3922_v21  ;;  %v3570_v57 = vpop.f32.mrb[171].mxu0 }
 0x2ff   : > { %v4949_v63 = vmax.f32 %v6931_v26, 0.0  ;;  %v3937_v22 = vpop.f32.mrb[235].mxu1  ;;  %v6933_v16 = vpop.eup %6932  ;;  %6952 = vpow2.f32 %v4489_v18  ;;  %v3943_v2 = vadd.f32 %v5916_v12, %v9715_v28  ;;  %v3935_v25 = vadd.f32 %v3934_v34, %v9716_v43  ;;  %v9717_v34 = vld [vmem:[#allocation26_spill] sm:$0xff] }
 0x300   : > { %v5079_v0 = vmin.f32 %v4951_v30, 1.0  ;;  %v6935_v40 = vpop.eup %6934  ;;  %v4952_v17 = vmax.f32 %v6933_v16, 0.0  ;;  %6954 = vpow2.f32 %v4485_v8  ;;  %v4491_v23 = vmul.f32 1.442695, %v4324_v62 }
 0x301   : > { %v5077_v35 = vmin.f32 %v4949_v63, 1.0  ;;  %v6937_v26 = vpop.eup %6936  ;;  %v4950_v7 = vmax.f32 %v6935_v40, 0.0  ;;  %v4487_v5 = vmul.f32 1.442695, %v4322_v49  ;;  %v4327_v21 = vsub.f32 0.0, %v3943_v2  ;;  %v5920_v49 = vpop.f32.mrb[236].mxu1 }
 0x302   : > { %5208 = vst.msk [vmem:[%s8731_s24 + $0xd0] sm:$0xff] %vm5181_vm1, %v5079_v0  ;;  %v4325_v57 = vsub.f32 0.0, %v3935_v25  ;;  %v6939_v30 = vpop.eup %6938  ;;  %v5080_v18 = vmin.f32 %v4952_v17, 1.0  ;;  %v4703_v12 = vadd.f32 1.0, %v6937_v26  ;;  %6956 = vpow2.f32 %v4491_v23  ;;  %v3573_v0 = vpop.f32.mrb[172].mxu0  ;;  %v9719_v40 = vld [vmem:[#allocation61_spill] sm:$0xff] }
 0x303   : > { %5206 = vst.msk [vmem:[%s8731_s24 + $0xc0] sm:$0xff] %vm5181_vm1, %v5077_v35  ;;  %v8856_v28 = vadd.f32 %v3568_v53, %v9717_v34  ;;  %v6941_v63 = vpop.eup %6940  ;;  %v5078_v8 = vmin.f32 %v4950_v7, 1.0  ;;  %v4701_v62 = vadd.f32 1.0, %v6939_v30  ;;  %6958 = vpow2.f32 %v4487_v5  ;;  %v3575_v23 = vpop.f32.mrb[173].mxu0  ;;  %v9720_v7 = vld [vmem:[#allocation59_spill] sm:$0xff] }
 0x304   : > { %v4497_v16 = vmul.f32 1.442695, %v4327_v21  ;;  %v6943_v2 = vpop.eup %6942  ;;  %5209 = vst.msk [vmem:[%s8731_s24 + $0xd8] sm:$0xff] %vm5181_vm1, %v5080_v18  ;;  %6960 = vrcp.f32 %v4703_v12  ;;  %v4704_v43 = vadd.f32 1.0, %v6941_v63  ;;  %v4493_v25 = vmul.f32 1.442695, %v4325_v57 }
 0x305   : > { %9718 = vst [vmem:[#allocation9_spill] sm:$0xff] %v8856_v28  ;;  %v3946_v35 = vadd.f32 %v5917_v4, %v9719_v40  ;;  %v3950_v17 = vpop.f32.mrb[237].mxu1  ;;  %v6945_v53 = vpop.eup %6944  ;;  %5207 = vst.msk [vmem:[%s8731_s24 + $0xc8] sm:$0xff] %vm5181_vm1, %v5078_v8  ;;  %6962 = vrcp.f32 %v4701_v62  ;;  %v4702_v26 = vadd.f32 1.0, %v6943_v2  ;;  %v3938_v5 = vadd.f32 %v3937_v22, %v9720_v7  ;;  %v9721_v21 = vld [vmem:[#allocation28_spill] sm:$0xff]  ;;  %v9723_v2 = vld [vmem:[#allocation62_spill] sm:$0xff] }
 0x306   : > { %v8865_v30 = vadd.f32 %v3573_v0, %v9721_v21  ;;  %v3576_v34 = vpop.f32.mrb[174].mxu0  ;;  %v5921_v55 = vpop.f32.mrb[238].mxu1  ;;  %v4955_v12 = vmax.f32 %v6945_v53, 0.0  ;;  %6964 = vrcp.f32 %v4704_v43  ;;  %v9722_v63 = vld [vmem:[#allocation64_spill] sm:$0xff]  ;;  %v3951_v22 = vadd.f32 %v3950_v17, %v9723_v2  ;;  %v9726_v2 = vld [vmem:[#allocation65_spill] sm:$0xff] }
 0x307   : > { %v6947_v18 = vpop.eup %6946  ;;  %v4328_v57 = vsub.f32 0.0, %v3946_v35  ;;  %v3959_v4 = vadd.f32 %v5920_v49, %v9722_v63  ;;  %v3578_v40 = vpop.f32.mrb[175].mxu0  ;;  %6966 = vrcp.f32 %v4702_v26  ;;  %v4326_v62 = vsub.f32 0.0, %v3938_v5 }
 0x308   : > { %v3953_v23 = vpop.f32.mrb[239].mxu1  ;;  %v6949_v47 = vpop.eup %6948  ;;  %v4953_v8 = vmax.f32 %v6947_v18, 0.0  ;;  %v5083_v0 = vmin.f32 %v4955_v12, 1.0  ;;  %6968 = vpow2.f32 %v4497_v16  ;;  %v4329_v16 = vsub.f32 0.0, %v3951_v22 }
 0x309   : > { %v6951_v7 = vpop.eup %6950  ;;  %v4956_v21 = vmax.f32 %v6949_v47, 0.0  ;;  %v4499_v3 = vmul.f32 1.442695, %v4328_v57  ;;  %6970 = vpow2.f32 %v4493_v25  ;;  %v4495_v49 = vmul.f32 1.442695, %v4326_v62  ;;  %v3581_v12 = vpop.f32.mrb[176].mxu0 }
 0x30a   : > { %v6953_v53 = vpop.eup %6952  ;;  %v5081_v43 = vmin.f32 %v4953_v8, 1.0  ;;  %v4954_v35 = vmax.f32 %v6951_v7, 0.0  ;;  %5212 = vst.msk [vmem:[%s8731_s24 + $0xf0] sm:$0xff] %vm5181_vm1, %v5083_v0  ;;  %v4331_v5 = vsub.f32 0.0, %v3959_v4  ;;  %v5924_v57 = vpop.f32.mrb[240].mxu1  ;;  %v9724_v8 = vld [vmem:[#allocation30_spill] sm:$0xff] }
 0x30b   : > { %v6955_v63 = vpop.eup %6954  ;;  %v5084_v18 = vmin.f32 %v4956_v21, 1.0  ;;  %v4707_v26 = vadd.f32 1.0, %v6953_v53  ;;  %6972 = vpow2.f32 %v4499_v3  ;;  %v8876_v62 = vadd.f32 %v3576_v34, %v9724_v8  ;;  %v3583_v4 = vpop.f32.mrb[177].mxu0  ;;  %v9727_v53 = vld [vmem:[#allocation63_spill] sm:$0xff]  ;;  %v9728_v34 = vld [vmem:[#allocation32_spill] sm:$0xff] }
 0x30c   : > { %5210 = vst.msk [vmem:[%s8731_s24 + $0xe0] sm:$0xff] %vm5181_vm1, %v5081_v43  ;;  %v5082_v17 = vmin.f32 %v4954_v35, 1.0  ;;  %v4705_v47 = vadd.f32 1.0, %v6955_v63  ;;  %6974 = vpow2.f32 %v4495_v49  ;;  %v6957_v40 = vpop.eup %6956  ;;  %v4505_v25 = vmul.f32 1.442695, %v4331_v5  ;;  %v3966_v7 = vpop.f32.mrb[241].mxu1 }
 0x30d   : > { %5213 = vst.msk [vmem:[%s8731_s24 + $0xf8] sm:$0xff] %vm5181_vm1, %v5084_v18  ;;  %6976 = vrcp.f32 %v4707_v26  ;;  %9725 = vst [vmem:[#allocation79_spill] sm:$0xff] %v8876_v62  ;;  %v3962_v3 = vadd.f32 %v5921_v55, %v9726_v2  ;;  %v6959_v0 = vpop.eup %6958  ;;  %v4708_v21 = vadd.f32 1.0, %v6957_v40  ;;  %v4501_v22 = vmul.f32 1.442695, %v4329_v16  ;;  %v3584_v35 = vpop.f32.mrb[178].mxu0 }
 0x30e   : > { %5211 = vst.msk [vmem:[%s8731_s24 + $0xe8] sm:$0xff] %vm5181_vm1, %v5082_v17  ;;  %6978 = vrcp.f32 %v4705_v47  ;;  %v3954_v43 = vadd.f32 %v3953_v23, %v9727_v53  ;;  %v5925_v49 = vpop.f32.mrb[242].mxu1  ;;  %v6961_v63 = vpop.eup %6960  ;;  %v4706_v18 = vadd.f32 1.0, %v6959_v0  ;;  %v8883_v5 = vadd.f32 %v3581_v12, %v9728_v34  ;;  %v9730_v47 = vld [vmem:[#allocation68_spill] sm:$0xff] }
 0x30f   : > { %6980 = vpow2.f32 %v4505_v25  ;;  %v4332_v26 = vsub.f32 0.0, %v3962_v3  ;;  %v3586_v55 = vpop.f32.mrb[179].mxu0  ;;  %v3969_v8 = vpop.f32.mrb[243].mxu1  ;;  %v4959_v4 = vmax.f32 %v6961_v63, 0.0  ;;  %v3975_v40 = vadd.f32 %v5924_v57, %v9730_v47  ;;  %v9732_v47 = vld [vmem:[#allocation34_spill] sm:$0xff] }
 0x310   : > { %9729 = vst [vmem:[#allocation81_spill] sm:$0xff] %v8883_v5  ;;  %v6963_v2 = vpop.eup %6962  ;;  %6982 = vrcp.f32 %v4708_v21  ;;  %v4330_v17 = vsub.f32 0.0, %v3954_v43  ;;  %v3967_v0 = vadd.f32 %v3966_v7, %v9731_v60  ;;  %v3589_v60 = vpop.f32.mrb[180].mxu0 }
 0x311   : > { %v6965_v16 = vpop.eup %6964  ;;  %v4957_v23 = vmax.f32 %v6963_v2, 0.0  ;;  %6984 = vrcp.f32 %v4706_v18  ;;  %v4507_v53 = vmul.f32 1.442695, %v4332_v26  ;;  %v5087_v3 = vmin.f32 %v4959_v4, 1.0  ;;  %v5928_v7 = vpop.f32.mrb[244].mxu1 }
 0x312   : > { %v6967_v25 = vpop.eup %6966  ;;  %v4960_v28 = vmax.f32 %v6965_v16, 0.0  ;;  %6986 = vpow2.f32 %v4501_v22  ;;  %v4503_v12 = vmul.f32 1.442695, %v4330_v17  ;;  %v4335_v21 = vsub.f32 0.0, %v3975_v40  ;;  %v3591_v40 = vpop.f32.mrb[181].mxu0 }
 0x313   : > { %v6969_v34 = vpop.eup %6968  ;;  %v5085_v55 = vmin.f32 %v4957_v23, 1.0  ;;  %v4958_v63 = vmax.f32 %v6967_v25, 0.0  ;;  %6988 = vpow2.f32 %v4507_v53  ;;  %5216 = vst.msk [vmem:[%s8731_s24 + $0x110] sm:$0xff] %vm5181_vm1, %v5087_v3  ;;  %v4333_v26 = vsub.f32 0.0, %v3967_v0  ;;  %v3982_v23 = vpop.f32.mrb[245].mxu1  ;;  %v9734_v25 = vld [vmem:[#allocation69_spill] sm:$0xff] }
 0x314   : > { %v6971_v43 = vpop.eup %6970  ;;  %v5088_v57 = vmin.f32 %v4960_v28, 1.0  ;;  %v4711_v18 = vadd.f32 1.0, %v6969_v34  ;;  %6990 = vpow2.f32 %v4503_v12  ;;  %v4513_v17 = vmul.f32 1.442695, %v4335_v21  ;;  %v3592_v12 = vpop.f32.mrb[182].mxu0  ;;  %v9735_v21 = vld [vmem:[#allocation67_spill] sm:$0xff] }
 0x315   : > { %v6973_v2 = vpop.eup %6972  ;;  %5214 = vst.msk [vmem:[%s8731_s24 + $0x100] sm:$0xff] %vm5181_vm1, %v5085_v55  ;;  %v5086_v22 = vmin.f32 %v4958_v63, 1.0  ;;  %v4709_v4 = vadd.f32 1.0, %v6971_v43  ;;  %v8892_v16 = vadd.f32 %v3584_v35, %v9732_v47  ;;  %v4509_v0 = vmul.f32 1.442695, %v4333_v26  ;;  %v5929_v34 = vpop.f32.mrb[246].mxu1 }
 0x316   : > { %v6975_v53 = vpop.eup %6974  ;;  %5217 = vst.msk [vmem:[%s8731_s24 + $0x118] sm:$0xff] %vm5181_vm1, %v5088_v57  ;;  %6992 = vrcp.f32 %v4711_v18  ;;  %v4712_v28 = vadd.f32 1.0, %v6973_v2  ;;  %v3978_v3 = vadd.f32 %v5925_v49, %v9734_v25  ;;  %v3970_v35 = vadd.f32 %v3969_v8, %v9735_v21  ;;  %v9736_v43 = vld [vmem:[#allocation36_spill] sm:$0xff]  ;;  %v3594_v40 = vpop.f32.mrb[183].mxu0 }
 0x317   : > { %9733 = vst [vmem:[#allocation6_spill] sm:$0xff] %v8892_v16  ;;  %v6977_v55 = vpop.eup %6976  ;;  %5215 = vst.msk [vmem:[%s8731_s24 + $0x108] sm:$0xff] %vm5181_vm1, %v5086_v22  ;;  %6994 = vrcp.f32 %v4709_v4  ;;  %v4710_v63 = vadd.f32 1.0, %v6975_v53  ;;  %v8901_v47 = vadd.f32 %v3589_v60, %v9736_v43  ;;  %v3985_v16 = vpop.f32.mrb[247].mxu1  ;;  %v9738_v2 = vld [vmem:[#allocation72_spill] sm:$0xff]  ;;  %v9739_v4 = vld [vmem:[#allocation70_spill] sm:$0xff] }
 0x318   : > { %v6979_v57 = vpop.eup %6978  ;;  %v4963_v18 = vmax.f32 %v6977_v55, 0.0  ;;  %6996 = vrcp.f32 %v4712_v28  ;;  %v4336_v26 = vsub.f32 0.0, %v3978_v3  ;;  %v3991_v49 = vadd.f32 %v5928_v7, %v9738_v2 }
 0x319   : > { %9737 = vst [vmem:[#allocation84_spill] sm:$0xff] %v8901_v47  ;;  %v6981_v25 = vpop.eup %6980  ;;  %v4961_v5 = vmax.f32 %v6979_v57, 0.0  ;;  %6998 = vrcp.f32 %v4710_v63  ;;  %v4334_v22 = vsub.f32 0.0, %v3970_v35  ;;  %v3983_v53 = vadd.f32 %v3982_v23, %v9739_v4  ;;  %v3597_v57 = vpop.f32.mrb[184].mxu0 }
 0x31a   : > { %v6983_v62 = vpop.eup %6982  ;;  %v5091_v8 = vmin.f32 %v4963_v18, 1.0  ;;  %v4715_v21 = vadd.f32 1.0, %v6981_v25  ;;  %7000 = vpow2.f32 %v4513_v17  ;;  %v4515_v60 = vmul.f32 1.442695, %v4336_v26  ;;  %v5932_v23 = vpop.f32.mrb[248].mxu1 }
 0x31b   : > { %v6985_v43 = vpop.eup %6984  ;;  %v5089_v40 = vmin.f32 %v4961_v5, 1.0  ;;  %v4964_v55 = vmax.f32 %v6983_v62, 0.0  ;;  %7002 = vpow2.f32 %v4509_v0  ;;  %v4511_v28 = vmul.f32 1.442695, %v4334_v22  ;;  %v9740_v5 = vld [vmem:[#allocation38_spill] sm:$0xff]  ;;  %v3599_v0 = vpop.f32.mrb[185].mxu0 }
 0x31c   : > { %v6987_v3 = vpop.eup %6986  ;;  %5220 = vst.msk [vmem:[%s8731_s24 + $0x130] sm:$0xff] %vm5181_vm1, %v5091_v8  ;;  %v4962_v7 = vmax.f32 %v6985_v43, 0.0  ;;  %7004 = vrcp.f32 %v4715_v21  ;;  %v4339_v63 = vsub.f32 0.0, %v3991_v49  ;;  %v4337_v35 = vsub.f32 0.0, %v3983_v53  ;;  %v3998_v2 = vpop.f32.mrb[249].mxu1 }
 0x31d   : > { %v6989_v18 = vpop.eup %6988  ;;  %5218 = vst.msk [vmem:[%s8731_s24 + $0x120] sm:$0xff] %vm5181_vm1, %v5089_v40  ;;  %v5092_v17 = vmin.f32 %v4964_v55, 1.0  ;;  %v4713_v26 = vadd.f32 1.0, %v6987_v3  ;;  %7006 = vpow2.f32 %v4515_v60  ;;  %v8910_v62 = vadd.f32 %v3592_v12, %v9740_v5  ;;  %v3600_v53 = vpop.f32.mrb[186].mxu0  ;;  %v9742_v40 = vld [vmem:[#allocation73_spill] sm:$0xff]  ;;  %v9743_v5 = vld [vmem:[#allocation71_spill] sm:$0xff] }
 0x31e   : > { %v6991_v25 = vpop.eup %6990  ;;  %v5090_v22 = vmin.f32 %v4962_v7, 1.0  ;;  %v4716_v4 = vadd.f32 1.0, %v6989_v18  ;;  %7008 = vpow2.f32 %v4511_v28  ;;  %v4521_v49 = vmul.f32 1.442695, %v4339_v63  ;;  %v5933_v8 = vpop.f32.mrb[250].mxu1  ;;  %v9744_v18 = vld [vmem:[#allocation41_spill] sm:$0xff] }
 0x31f   : > { %9741 = vst [vmem:[#allocation17_spill] sm:$0xff] %v8910_v62  ;;  %5221 = vst.msk [vmem:[%s8731_s24 + $0x138] sm:$0xff] %vm5181_vm1, %v5092_v17  ;;  %7010 = vrcp.f32 %v4713_v26  ;;  %v4714_v21 = vadd.f32 1.0, %v6991_v25  ;;  %v4517_v43 = vmul.f32 1.442695, %v4337_v35  ;;  %v3994_v60 = vadd.f32 %v5929_v34, %v9742_v40  ;;  %v3602_v55 = vpop.f32.mrb[187].mxu0 }
 0x320   : > { %v4001_v12 = vpop.f32.mrb[251].mxu1  ;;  %v6993_v3 = vpop.eup %6992  ;;  %5219 = vst.msk [vmem:[%s8731_s24 + $0x128] sm:$0xff] %vm5181_vm1, %v5090_v22  ;;  %7012 = vrcp.f32 %v4716_v4  ;;  %v3986_v7 = vadd.f32 %v3985_v16, %v9743_v5  ;;  %v8919_v28 = vadd.f32 %v3597_v57, %v9744_v18  ;;  %v9745_v63 = vld [vmem:[#allocation76_spill] sm:$0xff]  ;;  %v9746_v35 = vld [vmem:[#allocation74_spill] sm:$0xff] }
 0x321   : > { %v4007_v0 = vadd.f32 %v5932_v23, %v9745_v63  ;;  %v6995_v62 = vpop.eup %6994  ;;  %v4967_v17 = vmax.f32 %v6993_v3, 0.0  ;;  %7014 = vrcp.f32 %v4714_v21  ;;  %v4340_v26 = vsub.f32 0.0, %v3994_v60  ;;  %v5936_v63 = vpop.f32.mrb[252].mxu1 }
 0x322   : > { %v3999_v25 = vadd.f32 %v3998_v2, %v9746_v35  ;;  %v6997_v34 = vpop.eup %6996  ;;  %v4965_v40 = vmax.f32 %v6995_v62, 0.0  ;;  %7016 = vpow2.f32 %v4521_v49  ;;  %v4338_v55 = vsub.f32 0.0, %v3986_v7  ;;  %v3605_v7 = vpop.f32.mrb[188].mxu0 }
 0x323   : > { %v4343_v22 = vsub.f32 0.0, %v4007_v0  ;;  %v6999_v4 = vpop.eup %6998  ;;  %v5095_v47 = vmin.f32 %v4967_v17, 1.0  ;;  %v4968_v16 = vmax.f32 %v6997_v34, 0.0  ;;  %7018 = vpow2.f32 %v4517_v43  ;;  %v3607_v34 = vpop.f32.mrb[189].mxu0 }
 0x324   : > { %v4523_v57 = vmul.f32 1.442695, %v4340_v26  ;;  %v7001_v5 = vpop.eup %7000  ;;  %v5093_v23 = vmin.f32 %v4965_v40, 1.0  ;;  %v4966_v18 = vmax.f32 %v6999_v4, 0.0  ;;  %v4519_v3 = vmul.f32 1.442695, %v4338_v55 }
 0x325   : > { %v4529_v21 = vmul.f32 1.442695, %v4343_v22  ;;  %v7003_v60 = vpop.eup %7002  ;;  %5224 = vst.msk [vmem:[%s8731_s24 + $0x150] sm:$0xff] %vm5181_vm1, %v5095_v47  ;;  %v5096_v2 = vmin.f32 %v4968_v16, 1.0  ;;  %v4719_v62 = vadd.f32 1.0, %v7001_v5  ;;  %v4341_v49 = vsub.f32 0.0, %v3999_v25 }
 0x326   : > { %7020 = vpow2.f32 %v4523_v57  ;;  %v7005_v0 = vpop.eup %7004  ;;  %5222 = vst.msk [vmem:[%s8731_s24 + $0x140] sm:$0xff] %vm5181_vm1, %v5093_v23  ;;  %v5094_v43 = vmin.f32 %v4966_v18, 1.0  ;;  %v4717_v17 = vadd.f32 1.0, %v7003_v60  ;;  %v9747_v26 = vld [vmem:[#allocation43_spill] sm:$0xff]  ;;  %v4014_v40 = vpop.f32.mrb[253].mxu1  ;;  %v9749_v22 = vld [vmem:[#allocation78_spill] sm:$0xff] }
 0x327   : > { %7022 = vpow2.f32 %v4519_v3  ;;  %v8928_v35 = vadd.f32 %v3600_v53, %v9747_v26  ;;  %v7007_v47 = vpop.eup %7006  ;;  %5225 = vst.msk [vmem:[%s8731_s24 + $0x158] sm:$0xff] %vm5181_vm1, %v5096_v2  ;;  %v4971_v55 = vmax.f32 %v7005_v0, 0.0  ;;  %v4525_v25 = vmul.f32 1.442695, %v4341_v49  ;;  %v3608_v16 = vpop.f32.mrb[190].mxu0  ;;  %v9750_v18 = vld [vmem:[#allocation75_spill] sm:$0xff] }
 0x328   : > { %7024 = vrcp.f32 %v4719_v62  ;;  %v4010_v4 = vadd.f32 %v5933_v8, %v9749_v22  ;;  %v5937_v57 = vpop.f32.mrb[254].mxu1  ;;  %v7009_v5 = vpop.eup %7008  ;;  %5223 = vst.msk [vmem:[%s8731_s24 + $0x148] sm:$0xff] %vm5181_vm1, %v5094_v43  ;;  %v4720_v23 = vadd.f32 1.0, %v7007_v47  ;;  %v4002_v53 = vadd.f32 %v4001_v12, %v9750_v18  ;;  %v9751_v43 = vld [vmem:[#allocation10_spill] sm:$0xff] }
 0x329   : > { %9748 = vst [vmem:[#allocation2_spill] sm:$0xff] %v8928_v35  ;;  %7026 = vrcp.f32 %v4717_v17  ;;  %v8937_v3 = vadd.f32 %v3605_v7, %v8531_v29  ;;  %v3610_v60 = vpop.f32.mrb[191].mxu0  ;;  %v4017_v2 = vpop.f32.mrb[255].mxu1  ;;  %v5099_v62 = vmin.f32 %v4971_v55, 1.0  ;;  %v4718_v49 = vadd.f32 1.0, %v7009_v5  ;;  %v9752_v7 = vld [vmem:[#allocation80_spill] sm:$0xff] }
 0x32a   : > { %v7011_v0 = vpop.eup %7010  ;;  %7028 = vpow2.f32 %v4529_v21  ;;  %v4344_v8 = vsub.f32 0.0, %v4010_v4  ;;  %v4342_v22 = vsub.f32 0.0, %v4002_v53  ;;  %v4023_v17 = vadd.f32 %v5936_v63, %v9751_v43  ;;  %v3613_v4 = vpop.f32.mrb[192].mxu0 }
 0x32b   : > { %v7013_v26 = vpop.eup %7012  ;;  %v4969_v34 = vmax.f32 %v7011_v0, 0.0  ;;  %7030 = vrcp.f32 %v4720_v23  ;;  %5228 = vst.msk [vmem:[%s8731_s24 + $0x170] sm:$0xff] %vm5181_vm1, %v5099_v62  ;;  %v4015_v18 = vadd.f32 %v4014_v40, %v9752_v7  ;;  %v5940_v0 = vpop.f32.mrb[0].mxu1 }
 0x32c   : > { %v7015_v47 = vpop.eup %7014  ;;  %v4972_v12 = vmax.f32 %v7013_v26, 0.0  ;;  %7032 = vrcp.f32 %v4718_v49  ;;  %v4531_v29 = vmul.f32 1.442695, %v4344_v8  ;;  %v4527_v21 = vmul.f32 1.442695, %v4342_v22  ;;  %v3615_v62 = vpop.f32.mrb[193].mxu0 }
 0x32d   : > { %v7017_v60 = vpop.eup %7016  ;;  %v5097_v55 = vmin.f32 %v4969_v34, 1.0  ;;  %v4970_v5 = vmax.f32 %v7015_v47, 0.0  ;;  %7034 = vpow2.f32 %v4525_v25  ;;  %v4347_v43 = vsub.f32 0.0, %v4023_v17  ;;  %v4030_v26 = vpop.f32.mrb[1].mxu1  ;;  %v9753_v17 = vld [vmem:[#allocation19_spill] sm:$0xff] }
 0x32e   : > { %v7019_v23 = vpop.eup %7018  ;;  %v5100_v53 = vmin.f32 %v4972_v12, 1.0  ;;  %v4723_v63 = vadd.f32 1.0, %v7017_v60  ;;  %7036 = vpow2.f32 %v4531_v29  ;;  %v4345_v8 = vsub.f32 0.0, %v4015_v18  ;;  %v3616_v34 = vpop.f32.mrb[194].mxu0 }
 0x32f   : > { %5226 = vst.msk [vmem:[%s8731_s24 + $0x160] sm:$0xff] %vm5181_vm1, %v5097_v55  ;;  %v5098_v49 = vmin.f32 %v4970_v5, 1.0  ;;  %v4721_v40 = vadd.f32 1.0, %v7019_v23  ;;  %7038 = vpow2.f32 %v4527_v21  ;;  %v8945_v25 = vpop.f32.mrb[2].mxu1  ;;  %v4537_v47 = vmul.f32 1.442695, %v4347_v43 }
 0x330   : > { %v7021_v22 = vpop.eup %7020  ;;  %5229 = vst.msk [vmem:[%s8731_s24 + $0x178] sm:$0xff] %vm5181_vm1, %v5100_v53  ;;  %7040 = vrcp.f32 %v4723_v63  ;;  %v8950_v12 = vadd.f32 %v3608_v16, %v8540_v38  ;;  %v4026_v29 = vadd.f32 %v5937_v57, %v9753_v17  ;;  %v3618_v7 = vpop.f32.mrb[195].mxu0  ;;  %v4533_v5 = vmul.f32 1.442695, %v4345_v8  ;;  %v9754_v21 = vld [vmem:[#allocation82_spill] sm:$0xff]  ;;  %v9755_v8 = vld [vmem:[#allocation39_spill] sm:$0xff] }
 0x331   : > { %v4033_v60 = vpop.f32.mrb[3].mxu1  ;;  %v7023_v55 = vpop.eup %7022  ;;  %5227 = vst.msk [vmem:[%s8731_s24 + $0x168] sm:$0xff] %vm5181_vm1, %v5098_v49  ;;  %7042 = vrcp.f32 %v4721_v40  ;;  %v4724_v18 = vadd.f32 1.0, %v7021_v22  ;;  %v4018_v23 = vadd.f32 %v4017_v2, %v9754_v21  ;;  %v8957_v63 = vadd.f32 %v3613_v4, %v8549_v20 }
 0x332   : > { %v7025_v62 = vpop.eup %7024  ;;  %v4722_v35 = vadd.f32 1.0, %v7023_v55  ;;  %7044 = vpow2.f32 %v4537_v47  ;;  %v4348_v53 = vsub.f32 0.0, %v4026_v29  ;;  %v4039_v43 = vadd.f32 %v5940_v0, %v8573_v54  ;;  %v3621_v20 = vpop.f32.mrb[196].mxu0 }
 0x333   : > { %v7027_v38 = vpop.eup %7026  ;;  %v4975_v16 = vmax.f32 %v7025_v62, 0.0  ;;  %7046 = vrcp.f32 %v4724_v18  ;;  %v4346_v57 = vsub.f32 0.0, %v4018_v23  ;;  %v4031_v22 = vadd.f32 %v4030_v26, %v9755_v8  ;;  %v5944_v4 = vpop.f32.mrb[4].mxu1 }
 0x334   : > { %v7029_v17 = vpop.eup %7028  ;;  %v4973_v49 = vmax.f32 %v7027_v38, 0.0  ;;  %7048 = vrcp.f32 %v4722_v35  ;;  %v4539_v40 = vmul.f32 1.442695, %v4348_v53  ;;  %v4351_v54 = vsub.f32 0.0, %v4039_v43  ;;  %v3623_v0 = vpop.f32.mrb[197].mxu0 }
 0x335   : > { %v7031_v2 = vpop.eup %7030  ;;  %v5103_v7 = vmin.f32 %v4975_v16, 1.0  ;;  %v4727_v47 = vadd.f32 1.0, %v7029_v17  ;;  %7050 = vpow2.f32 %v4533_v5  ;;  %v4535_v29 = vmul.f32 1.442695, %v4346_v57  ;;  %v4046_v23 = vpop.f32.mrb[5].mxu1 }
 0x336   : > { %v7033_v55 = vpop.eup %7032  ;;  %v5101_v18 = vmin.f32 %v4973_v49, 1.0  ;;  %v4976_v21 = vmax.f32 %v7031_v2, 0.0  ;;  %7052 = vpow2.f32 %v4539_v40  ;;  %v4349_v62 = vsub.f32 0.0, %v4031_v22  ;;  %v3624_v5 = vpop.f32.mrb[198].mxu0 }
 0x337   : > { %v7035_v35 = vpop.eup %7034  ;;  %5232 = vst.msk [vmem:[%s8731_s24 + $0x190] sm:$0xff] %vm5181_vm1, %v5103_v7  ;;  %v4974_v26 = vmax.f32 %v7033_v55, 0.0  ;;  %7054 = vrcp.f32 %v4727_v47  ;;  %v8964_v53 = vadd.f32 %v3616_v34, %v8554_v13  ;;  %v8966_v38 = vpop.f32.mrb[6].mxu1  ;;  %v4545_v17 = vmul.f32 1.442695, %v4351_v54 }
 0x338   : > { %v7037_v16 = vpop.eup %7036  ;;  %5230 = vst.msk [vmem:[%s8731_s24 + $0x180] sm:$0xff] %vm5181_vm1, %v5101_v18  ;;  %v5104_v57 = vmin.f32 %v4976_v21, 1.0  ;;  %v4725_v43 = vadd.f32 1.0, %v7035_v35  ;;  %7056 = vpow2.f32 %v4535_v29  ;;  %v3626_v49 = vpop.f32.mrb[199].mxu0  ;;  %v4541_v13 = vmul.f32 1.442695, %v4349_v62 }
 0x339   : > { %v8970_v40 = vpop.f32.mrb[7].mxu1  ;;  %v7039_v8 = vpop.eup %7038  ;;  %v5102_v22 = vmin.f32 %v4974_v26, 1.0  ;;  %v4728_v2 = vadd.f32 1.0, %v7037_v16  ;;  %v4042_v34 = vadd.f32 %v8945_v25, %v8594_v6  ;;  %v4034_v55 = vadd.f32 %v4033_v60, %v8522_v33 }
 0x33a   : > { %v7041_v7 = vpop.eup %7040  ;;  %5233 = vst.msk [vmem:[%s8731_s24 + $0x198] sm:$0xff] %vm5181_vm1, %v5104_v57  ;;  %7058 = vrcp.f32 %v4725_v43  ;;  %v4726_v47 = vadd.f32 1.0, %v7039_v8  ;;  %v8978_v29 = vadd.f32 %v3621_v20, %v8558_v42  ;;  %v4055_v0 = vadd.f32 %v5944_v4, %v8695_v46  ;;  %v3629_v20 = vpop.f32.mrb[200].mxu0 }
 0x33b   : > { %v7043_v18 = vpop.eup %7042  ;;  %5231 = vst.msk [vmem:[%s8731_s24 + $0x188] sm:$0xff] %vm5181_vm1, %v5102_v22  ;;  %v4979_v21 = vmax.f32 %v7041_v7, 0.0  ;;  %7060 = vrcp.f32 %v4728_v2  ;;  %v4352_v54 = vsub.f32 0.0, %v4042_v34  ;;  %v4350_v25 = vsub.f32 0.0, %v4034_v55  ;;  %v5948_v16 = vpop.f32.mrb[8].mxu1 }
 0x33c   : > { %v7045_v35 = vpop.eup %7044  ;;  %v4977_v6 = vmax.f32 %v7043_v18, 0.0  ;;  %7062 = vrcp.f32 %v4726_v47  ;;  %v4047_v26 = vadd.f32 %v4046_v23, %v8646_v41  ;;  %v3631_v4 = vpop.f32.mrb[201].mxu0  ;;  %v4355_v23 = vsub.f32 0.0, %v4055_v0 }
 0x33d   : > { %v7047_v62 = vpop.eup %7046  ;;  %v5107_v33 = vmin.f32 %v4979_v21, 1.0  ;;  %v4731_v60 = vadd.f32 1.0, %v7045_v35  ;;  %7064 = vpow2.f32 %v4545_v17  ;;  %v4547_v42 = vmul.f32 1.442695, %v4352_v54  ;;  %v4062_v8 = vpop.f32.mrb[9].mxu1 }
 0x33e   : > { %v7049_v57 = vpop.eup %7048  ;;  %v5105_v43 = vmin.f32 %v4977_v6, 1.0  ;;  %v4980_v49 = vmax.f32 %v7047_v62, 0.0  ;;  %7066 = vpow2.f32 %v4541_v13  ;;  %v4543_v46 = vmul.f32 1.442695, %v4350_v25  ;;  %v8986_v34 = vpop.f32.mrb[202].mxu0 }
 0x33f   : > { %v7051_v22 = vpop.eup %7050  ;;  %5236 = vst.msk [vmem:[%s8731_s24 + $0x1b0] sm:$0xff] %vm5181_vm1, %v5107_v33  ;;  %v4978_v41 = vmax.f32 %v7049_v57, 0.0  ;;  %7068 = vrcp.f32 %v4731_v60  ;;  %v4353_v2 = vsub.f32 0.0, %v4047_v26  ;;  %v8988_v17 = vpop.f32.mrb[10].mxu1  ;;  %v8993_v55 = vadd.f32 %v3624_v5, %v8562_v48 }
 0x340   : > { %v7053_v7 = vpop.eup %7052  ;;  %5234 = vst.msk [vmem:[%s8731_s24 + $0x1a0] sm:$0xff] %vm5181_vm1, %v5105_v43  ;;  %v5108_v47 = vmin.f32 %v4980_v49, 1.0  ;;  %v4729_v13 = vadd.f32 1.0, %v7051_v22  ;;  %7070 = vpow2.f32 %v4547_v42  ;;  %v3634_v18 = vpop.f32.mrb[203].mxu0  ;;  %v4553_v6 = vmul.f32 1.442695, %v4355_v23 }
 0x341   : > { %v8995_v21 = vpop.f32.mrb[11].mxu1  ;;  %v7055_v54 = vpop.eup %7054  ;;  %v5106_v0 = vmin.f32 %v4978_v41, 1.0  ;;  %v4732_v35 = vadd.f32 1.0, %v7053_v7  ;;  %7072 = vpow2.f32 %v4543_v46  ;;  %v4549_v62 = vmul.f32 1.442695, %v4353_v2 }
 0x342   : > { %v7057_v25 = vpop.eup %7056  ;;  %5237 = vst.msk [vmem:[%s8731_s24 + $0x1b8] sm:$0xff] %vm5181_vm1, %v5108_v47  ;;  %v4983_v26 = vmax.f32 %v7055_v54, 0.0  ;;  %7074 = vrcp.f32 %v4729_v13  ;;  %v4058_v33 = vadd.f32 %v8966_v38, %v8707_v24  ;;  %v4050_v5 = vadd.f32 %v8970_v40, %v8658_v58  ;;  %v3637_v22 = vpop.f32.mrb[204].mxu0 }
 0x343   : > { %5235 = vst.msk [vmem:[%s8731_s24 + $0x1a8] sm:$0xff] %vm5181_vm1, %v5106_v0  ;;  %7076 = vrcp.f32 %v4732_v35  ;;  %v4730_v48 = vadd.f32 1.0, %v7057_v25  ;;  %v9006_v60 = vadd.f32 %v3629_v20, %v8566_v52  ;;  %v4071_v49 = vadd.f32 %v5948_v16, %v8755_v39  ;;  %v5952_v41 = vpop.f32.mrb[12].mxu1  ;;  %v3639_v20 = vpop.f32.mrb[205].mxu0 }
 0x344   : > { %v7059_v42 = vpop.eup %7058  ;;  %v5111_v57 = vmin.f32 %v4983_v26, 1.0  ;;  %7078 = vpow2.f32 %v4553_v6  ;;  %v4356_v43 = vsub.f32 0.0, %v4058_v33  ;;  %v4354_v24 = vsub.f32 0.0, %v4050_v5  ;;  %v4078_v2 = vpop.f32.mrb[13].mxu1 }
 0x345   : > { %v7061_v46 = vpop.eup %7060  ;;  %v4981_v4 = vmax.f32 %v7059_v42, 0.0  ;;  %7080 = vrcp.f32 %v4730_v48  ;;  %v4063_v38 = vadd.f32 %v4062_v8, %v8734_v15  ;;  %v4359_v40 = vsub.f32 0.0, %v4071_v49  ;;  %v9012_v18 = vpop.f32.mrb[206].mxu0 }
 0x346   : > { %v7063_v23 = vpop.eup %7062  ;;  %5240 = vst.msk [vmem:[%s8731_s24 + $0x1d0] sm:$0xff] %vm5181_vm1, %v5111_v57  ;;  %v4984_v58 = vmax.f32 %v7061_v46, 0.0  ;;  %7082 = vpow2.f32 %v4549_v62  ;;  %v4555_v52 = vmul.f32 1.442695, %v4356_v43  ;;  %v4551_v47 = vmul.f32 1.442695, %v4354_v24 }
 0x347   : > { %v7065_v7 = vpop.eup %7064  ;;  %v5109_v39 = vmin.f32 %v4981_v4, 1.0  ;;  %v4982_v16 = vmax.f32 %v7063_v23, 0.0  ;;  %v4357_v13 = vsub.f32 0.0, %v4063_v38  ;;  %v4561_v0 = vmul.f32 1.442695, %v4359_v40  ;;  %v9014_v35 = vpop.f32.mrb[14].mxu1 }
 0x348   : > { %v7067_v15 = vpop.eup %7066  ;;  %v5112_v8 = vmin.f32 %v4984_v58, 1.0  ;;  %v4735_v54 = vadd.f32 1.0, %v7065_v7  ;;  %7084 = vpow2.f32 %v4555_v52  ;;  %v3642_v6 = vpop.f32.mrb[207].mxu0  ;;  %v9022_v57 = vadd.f32 %v8986_v34, %v8570_v56 }
 0x349   : > { %v7069_v25 = vpop.eup %7068  ;;  %5238 = vst.msk [vmem:[%s8731_s24 + $0x1c0] sm:$0xff] %vm5181_vm1, %v5109_v39  ;;  %v5110_v26 = vmin.f32 %v4982_v16, 1.0  ;;  %v4733_v62 = vadd.f32 1.0, %v7067_v15  ;;  %7086 = vpow2.f32 %v4551_v47  ;;  %v4557_v33 = vmul.f32 1.442695, %v4357_v13  ;;  %v4081_v48 = vpop.f32.mrb[15].mxu1 }
 0x34a   : > { %v7071_v5 = vpop.eup %7070  ;;  %5241 = vst.msk [vmem:[%s8731_s24 + $0x1d8] sm:$0xff] %vm5181_vm1, %v5112_v8  ;;  %v4987_v42 = vmax.f32 %v7069_v25, 0.0  ;;  %7088 = vrcp.f32 %v4735_v54  ;;  %v4074_v43 = vadd.f32 %v8988_v17, %v8764_v51  ;;  %v4066_v4 = vadd.f32 %v8995_v21, %v8743_v61  ;;  %v3645_v40 = vpop.f32.mrb[208].mxu0 }
 0x34b   : > { %v7073_v49 = vpop.eup %7072  ;;  %5239 = vst.msk [vmem:[%s8731_s24 + $0x1c8] sm:$0xff] %vm5181_vm1, %v5110_v26  ;;  %7090 = vrcp.f32 %v4733_v62  ;;  %v4736_v46 = vadd.f32 1.0, %v7071_v5  ;;  %v9031_v24 = vadd.f32 %v3637_v22, %v8580_v37  ;;  %v4087_v17 = vadd.f32 %v5952_v41, %v8795_v45  ;;  %v5956_v20 = vpop.f32.mrb[16].mxu1 }
 0x34c   : > { %v7075_v38 = vpop.eup %7074  ;;  %v5115_v23 = vmin.f32 %v4987_v42, 1.0  ;;  %v4734_v58 = vadd.f32 1.0, %v7073_v49  ;;  %7092 = vpow2.f32 %v4561_v0  ;;  %v4360_v56 = vsub.f32 0.0, %v4074_v43  ;;  %v3647_v22 = vpop.f32.mrb[209].mxu0 }
 0x34d   : > { %v7077_v34 = vpop.eup %7076  ;;  %v4985_v52 = vmax.f32 %v7075_v38, 0.0  ;;  %7094 = vrcp.f32 %v4736_v46  ;;  %v4358_v51 = vsub.f32 0.0, %v4066_v4  ;;  %v4079_v21 = vadd.f32 %v4078_v2, %v8775_v31  ;;  %v4094_v39 = vpop.f32.mrb[17].mxu1 }
 0x34e   : > { %v7079_v7 = vpop.eup %7078  ;;  %5244 = vst.msk [vmem:[%s8731_s24 + $0x1f0] sm:$0xff] %vm5181_vm1, %v5115_v23  ;;  %v4988_v61 = vmax.f32 %v7077_v34, 0.0  ;;  %7096 = vrcp.f32 %v4734_v58  ;;  %v4563_v37 = vmul.f32 1.442695, %v4360_v56  ;;  %v9037_v45 = vpop.f32.mrb[210].mxu0  ;;  %v4363_v6 = vsub.f32 0.0, %v4087_v17 }
 0x34f   : > { %v7081_v16 = vpop.eup %7080  ;;  %v5113_v47 = vmin.f32 %v4985_v52, 1.0  ;;  %v4739_v13 = vadd.f32 1.0, %v7079_v7  ;;  %7098 = vpow2.f32 %v4557_v33  ;;  %v4559_v15 = vmul.f32 1.442695, %v4358_v51  ;;  %v9039_v41 = vpop.f32.mrb[18].mxu1 }
 0x350   : > { %v7083_v8 = vpop.eup %7082  ;;  %v5116_v54 = vmin.f32 %v4988_v61, 1.0  ;;  %v4986_v0 = vmax.f32 %v7081_v16, 0.0  ;;  %7100 = vpow2.f32 %v4563_v37  ;;  %v3650_v25 = vpop.f32.mrb[211].mxu0  ;;  %v4361_v26 = vsub.f32 0.0, %v4079_v21 }
 0x351   : > { %v9041_v31 = vpop.f32.mrb[19].mxu1  ;;  %5242 = vst.msk [vmem:[%s8731_s24 + $0x1e0] sm:$0xff] %vm5181_vm1, %v5113_v47  ;;  %7102 = vrcp.f32 %v4739_v13  ;;  %v4737_v2 = vadd.f32 1.0, %v7083_v8  ;;  %v9047_v62 = vadd.f32 %v9012_v18, %v8584_v50  ;;  %v4569_v42 = vmul.f32 1.442695, %v4363_v6 }
 0x352   : > { %v7085_v33 = vpop.eup %7084  ;;  %5245 = vst.msk [vmem:[%s8731_s24 + $0x1f8] sm:$0xff] %vm5181_vm1, %v5116_v54  ;;  %v5114_v5 = vmin.f32 %v4986_v0, 1.0  ;;  %7104 = vpow2.f32 %v4559_v15  ;;  %v4090_v43 = vadd.f32 %v9014_v35, %v8804_v36  ;;  %v4565_v4 = vmul.f32 1.442695, %v4361_v26  ;;  %v3653_v35 = vpop.f32.mrb[212].mxu0 }
 0x353   : > { %v7087_v49 = vpop.eup %7086  ;;  %7106 = vrcp.f32 %v4737_v2  ;;  %v4740_v46 = vadd.f32 1.0, %v7085_v33  ;;  %v4082_v38 = vadd.f32 %v4081_v48, %v8786_v19  ;;  %v9057_v58 = vadd.f32 %v3645_v40, %v8591_v32  ;;  %v5960_v51 = vpop.f32.mrb[20].mxu1 }
 0x354   : > { %v7089_v23 = vpop.eup %7088  ;;  %5243 = vst.msk [vmem:[%s8731_s24 + $0x1e8] sm:$0xff] %vm5181_vm1, %v5114_v5  ;;  %v4738_v50 = vadd.f32 1.0, %v7087_v49  ;;  %7108 = vpow2.f32 %v4569_v42  ;;  %v4364_v18 = vsub.f32 0.0, %v4090_v43  ;;  %v4103_v36 = vadd.f32 %v5956_v20, %v8829_v44  ;;  %v3655_v61 = vpop.f32.mrb[213].mxu0 }
 0x355   : > { %v7091_v56 = vpop.eup %7090  ;;  %v4991_v34 = vmax.f32 %v7089_v23, 0.0  ;;  %7110 = vrcp.f32 %v4740_v46  ;;  %v4362_v52 = vsub.f32 0.0, %v4082_v38  ;;  %v4095_v48 = vadd.f32 %v4094_v39, %v8811_v59  ;;  %v9061_v37 = vpop.f32.mrb[21].mxu1 }
 0x356   : > { %v7093_v17 = vpop.eup %7092  ;;  %v4989_v7 = vmax.f32 %v7091_v56, 0.0  ;;  %7112 = vrcp.f32 %v4738_v50  ;;  %v4571_v19 = vmul.f32 1.442695, %v4364_v18  ;;  %v9063_v16 = vpop.f32.mrb[214].mxu0  ;;  %v4367_v15 = vsub.f32 0.0, %v4103_v36 }
 0x357   : > { %v7095_v32 = vpop.eup %7094  ;;  %v5119_v40 = vmin.f32 %v4991_v34, 1.0  ;;  %v4743_v21 = vadd.f32 1.0, %v7093_v17  ;;  %7114 = vpow2.f32 %v4565_v4  ;;  %v4567_v22 = vmul.f32 1.442695, %v4362_v52  ;;  %v9065_v44 = vpop.f32.mrb[22].mxu1 }
 0x358   : > { %v7097_v20 = vpop.eup %7096  ;;  %v5117_v47 = vmin.f32 %v4989_v7, 1.0  ;;  %v4992_v13 = vmax.f32 %v7095_v32, 0.0  ;;  %7116 = vpow2.f32 %v4571_v19  ;;  %v3658_v59 = vpop.f32.mrb[215].mxu0  ;;  %v4365_v0 = vsub.f32 0.0, %v4095_v48 }
 0x359   : > { %v9067_v39 = vpop.f32.mrb[23].mxu1  ;;  %v7099_v8 = vpop.eup %7098  ;;  %5248 = vst.msk [vmem:[%s8731_s24 + $0x210] sm:$0xff] %vm5181_vm1, %v5119_v40  ;;  %v4990_v54 = vmax.f32 %v7097_v20, 0.0  ;;  %7118 = vrcp.f32 %v4743_v21  ;;  %v9073_v6 = vadd.f32 %v9037_v45, %v8599_v10  ;;  %v4577_v33 = vmul.f32 1.442695, %v4367_v15 }
 0x35a   : > { %v7101_v25 = vpop.eup %7100  ;;  %5246 = vst.msk [vmem:[%s8731_s24 + $0x200] sm:$0xff] %vm5181_vm1, %v5117_v47  ;;  %v5120_v2 = vmin.f32 %v4992_v13, 1.0  ;;  %v4741_v26 = vadd.f32 1.0, %v7099_v8  ;;  %7120 = vpow2.f32 %v4567_v22  ;;  %v4573_v49 = vmul.f32 1.442695, %v4365_v0 }
 0x35b   : > { %v7103_v5 = vpop.eup %7102  ;;  %v5118_v42 = vmin.f32 %v4990_v54, 1.0  ;;  %v4744_v43 = vadd.f32 1.0, %v7101_v25  ;;  %v4106_v46 = vadd.f32 %v9039_v41, %v8840_v27  ;;  %v4098_v45 = vadd.f32 %v9041_v31, %v8822_v1  ;;  %v3661_v27 = vpop.f32.mrb[216].mxu0 }
 0x35c   : > { %v7105_v4 = vpop.eup %7104  ;;  %5249 = vst.msk [vmem:[%s8731_s24 + $0x218] sm:$0xff] %vm5181_vm1, %v5120_v2  ;;  %v4995_v10 = vmax.f32 %v7103_v5, 0.0  ;;  %7122 = vrcp.f32 %v4741_v26  ;;  %v9084_v38 = vadd.f32 %v3653_v35, %v8603_v9  ;;  %v4119_v56 = vadd.f32 %v5960_v51, %v8865_v30  ;;  %v5964_v41 = vpop.f32.mrb[24].mxu1 }
 0x35d   : > { %v7107_v23 = vpop.eup %7106  ;;  %5247 = vst.msk [vmem:[%s8731_s24 + $0x208] sm:$0xff] %vm5181_vm1, %v5118_v42  ;;  %7124 = vrcp.f32 %v4744_v43  ;;  %v4742_v50 = vadd.f32 1.0, %v7105_v4  ;;  %v4368_v18 = vsub.f32 0.0, %v4106_v46  ;;  %v4366_v17 = vsub.f32 0.0, %v4098_v45  ;;  %v3663_v1 = vpop.f32.mrb[217].mxu0  ;;  %v9757_v43 = vld [vmem:[#allocation9_spill] sm:$0xff] }
 0x35e   : > { %v7109_v34 = vpop.eup %7108  ;;  %v5123_v52 = vmin.f32 %v4995_v10, 1.0  ;;  %v4993_v36 = vmax.f32 %v7107_v23, 0.0  ;;  %7126 = vpow2.f32 %v4577_v33  ;;  %v4126_v31 = vpop.f32.mrb[25].mxu1  ;;  %v4371_v19 = vsub.f32 0.0, %v4119_v56  ;;  %v9758_v46 = vld [vmem:[#allocation44_spill] sm:$0xff]  ;;  %v9760_v1 = vld [vmem:[#allocation81_spill] sm:$0xff] }
 0x35f   : > { %v7111_v9 = vpop.eup %7110  ;;  %7128 = vrcp.f32 %v4742_v50  ;;  %v4747_v35 = vadd.f32 1.0, %v7109_v34  ;;  %v4579_v7 = vmul.f32 1.442695, %v4368_v18  ;;  %v9089_v48 = vpop.f32.mrb[218].mxu0  ;;  %v4575_v40 = vmul.f32 1.442695, %v4366_v17 }
 0x360   : > { %v9091_v61 = vpop.f32.mrb[26].mxu1  ;;  %v7113_v30 = vpop.eup %7112  ;;  %5252 = vst.msk [vmem:[%s8731_s24 + $0x230] sm:$0xff] %vm5181_vm1, %v5123_v52  ;;  %v5121_v51 = vmin.f32 %v4993_v36, 1.0  ;;  %v4996_v32 = vmax.f32 %v7111_v9, 0.0  ;;  %7130 = vpow2.f32 %v4573_v49  ;;  %v4585_v13 = vmul.f32 1.442695, %v4371_v19 }
 0x361   : > { %v3666_v21 = vpop.f32.mrb[219].mxu0  ;;  %v9095_v22 = vpop.f32.mrb[27].mxu1  ;;  %v4994_v47 = vmax.f32 %v7113_v30, 0.0  ;;  %7132 = vrcp.f32 %v4747_v35  ;;  %v4111_v15 = vadd.f32 %v9061_v37, %v8847_v14  ;;  %v9103_v0 = vadd.f32 %v9063_v16, %v8608_v11  ;;  %v9756_v37 = vld [vmem:[#allocation79_spill] sm:$0xff]  ;;  %v9759_v36 = vld [vmem:[#allocation84_spill] sm:$0xff] }
 0x362   : > { %v7115_v20 = vpop.eup %7114  ;;  %5250 = vst.msk [vmem:[%s8731_s24 + $0x220] sm:$0xff] %vm5181_vm1, %v5121_v51  ;;  %v5124_v8 = vmin.f32 %v4996_v32, 1.0  ;;  %7134 = vpow2.f32 %v4579_v7  ;;  %v4122_v42 = vadd.f32 %v9065_v44, %v9756_v37  ;;  %v4114_v49 = vadd.f32 %v9067_v39, %v9757_v43  ;;  %v3669_v10 = vpop.f32.mrb[220].mxu0 }
 0x363   : > { %v7117_v59 = vpop.eup %7116  ;;  %v4745_v54 = vadd.f32 1.0, %v7115_v20  ;;  %v5122_v2 = vmin.f32 %v4994_v47, 1.0  ;;  %7136 = vpow2.f32 %v4575_v40  ;;  %v4369_v33 = vsub.f32 0.0, %v4111_v15  ;;  %v9116_v45 = vpop.f32.mrb[28].mxu1 }
 0x364   : > { %v7119_v25 = vpop.eup %7118  ;;  %v4748_v26 = vadd.f32 1.0, %v7117_v59  ;;  %5253 = vst.msk [vmem:[%s8731_s24 + $0x238] sm:$0xff] %vm5181_vm1, %v5124_v8  ;;  %v9114_v4 = vadd.f32 %v3661_v27, %v9758_v46  ;;  %v4372_v18 = vsub.f32 0.0, %v4122_v42  ;;  %v4370_v44 = vsub.f32 0.0, %v4114_v49  ;;  %v3671_v56 = vpop.f32.mrb[221].mxu0  ;;  %v9761_v8 = vld [vmem:[#allocation45_spill] sm:$0xff] }
 0x365   : > { %v7121_v5 = vpop.eup %7120  ;;  %v4999_v14 = vmax.f32 %v7119_v25, 0.0  ;;  %7138 = vrcp.f32 %v4745_v54  ;;  %5251 = vst.msk [vmem:[%s8731_s24 + $0x228] sm:$0xff] %vm5181_vm1, %v5122_v2  ;;  %v4581_v16 = vmul.f32 1.442695, %v4369_v33  ;;  %v9118_v34 = vpop.f32.mrb[29].mxu1  ;;  %v4135_v17 = vadd.f32 %v5964_v41, %v9759_v36  ;;  %v9762_v42 = vld [vmem:[#allocation17_spill] sm:$0xff] }
 0x366   : > { %7140 = vrcp.f32 %v4748_v26  ;;  %v4746_v11 = vadd.f32 1.0, %v7121_v5  ;;  %v7123_v23 = vpop.eup %7122  ;;  %v4127_v27 = vadd.f32 %v4126_v31, %v9760_v1  ;;  %v9122_v9 = vpop.f32.mrb[222].mxu0  ;;  %v4587_v30 = vmul.f32 1.442695, %v4372_v18  ;;  %v9764_v46 = vld [vmem:[#allocation46_spill] sm:$0xff] }
 0x367   : > { %v5127_v50 = vmin.f32 %v4999_v14, 1.0  ;;  %7142 = vpow2.f32 %v4585_v13  ;;  %v7125_v39 = vpop.eup %7124  ;;  %v4997_v52 = vmax.f32 %v7123_v23, 0.0  ;;  %v9124_v35 = vpop.f32.mrb[30].mxu1  ;;  %v4583_v51 = vmul.f32 1.442695, %v4370_v44 }
 0x368   : > { %7144 = vrcp.f32 %v4746_v11  ;;  %v7127_v7 = vpop.eup %7126  ;;  %v5000_v19 = vmax.f32 %v7125_v39, 0.0  ;;  %v3674_v32 = vpop.f32.mrb[223].mxu0  ;;  %v4375_v41 = vsub.f32 0.0, %v4135_v17  ;;  %v4373_v47 = vsub.f32 0.0, %v4127_v27  ;;  %v9763_v11 = vld [vmem:[#allocation6_spill] sm:$0xff] }
 0x369   : > { %5256 = vst.msk [vmem:[%s8731_s24 + $0x250] sm:$0xff] %vm5181_vm1, %v5127_v50  ;;  %7146 = vpow2.f32 %v4581_v16  ;;  %v7129_v40 = vpop.eup %7128  ;;  %v5125_v21 = vmin.f32 %v4997_v52, 1.0  ;;  %v4751_v20 = vadd.f32 1.0, %v7127_v7  ;;  %v9128_v31 = vpop.f32.mrb[31].mxu1  ;;  %v9132_v54 = vadd.f32 %v9089_v48, %v9761_v8 }
 0x36a   : > { %v7131_v13 = vpop.eup %7130  ;;  %v5128_v15 = vmin.f32 %v5000_v19, 1.0  ;;  %v4998_v59 = vmax.f32 %v7129_v40, 0.0  ;;  %7148 = vpow2.f32 %v4587_v30  ;;  %v4593_v26 = vmul.f32 1.442695, %v4375_v41  ;;  %v3677_v50 = vpop.f32.mrb[224].mxu0 }
 0x36b   : > { %v7133_v25 = vpop.eup %7132  ;;  %5254 = vst.msk [vmem:[%s8731_s24 + $0x240] sm:$0xff] %vm5181_vm1, %v5125_v21  ;;  %7150 = vrcp.f32 %v4751_v20  ;;  %v4749_v2 = vadd.f32 1.0, %v7131_v13  ;;  %v4589_v33 = vmul.f32 1.442695, %v4373_v47  ;;  %v4138_v43 = vadd.f32 %v9091_v61, %v9762_v42  ;;  %v9145_v18 = vpop.f32.mrb[32].mxu1 }
 0x36c   : > { %v7135_v5 = vpop.eup %7134  ;;  %5257 = vst.msk [vmem:[%s8731_s24 + $0x258] sm:$0xff] %vm5181_vm1, %v5128_v15  ;;  %v5126_v14 = vmin.f32 %v4998_v59, 1.0  ;;  %v5003_v37 = vmax.f32 %v7133_v25, 0.0  ;;  %7152 = vpow2.f32 %v4583_v51  ;;  %v4130_v16 = vadd.f32 %v9095_v22, %v9763_v11  ;;  %v3679_v52 = vpop.f32.mrb[225].mxu0 }
 0x36d   : > { %v7137_v49 = vpop.eup %7136  ;;  %7154 = vrcp.f32 %v4749_v2  ;;  %v4752_v48 = vadd.f32 1.0, %v7135_v5  ;;  %v9143_v23 = vadd.f32 %v3669_v10, %v9764_v46  ;;  %v4376_v61 = vsub.f32 0.0, %v4138_v43  ;;  %v9149_v36 = vpop.f32.mrb[33].mxu1  ;;  %v9766_v43 = vld [vmem:[#allocation2_spill] sm:$0xff] }
 0x36e   : > { %5255 = vst.msk [vmem:[%s8731_s24 + $0x248] sm:$0xff] %vm5181_vm1, %v5126_v14  ;;  %v5131_v56 = vmin.f32 %v5003_v37, 1.0  ;;  %v4750_v39 = vadd.f32 1.0, %v7137_v49  ;;  %7156 = vpow2.f32 %v4593_v26  ;;  %v4374_v22 = vsub.f32 0.0, %v4130_v16  ;;  %v9153_v27 = vpop.f32.mrb[226].mxu0  ;;  %v9155_v7 = vpop.f32.mrb[34].mxu1 }
 0x36f   : > { %v7139_v44 = vpop.eup %7138  ;;  %7158 = vrcp.f32 %v4752_v48  ;;  %v4151_v10 = vadd.f32 %v9116_v45, %v8937_v3  ;;  %v4595_v51 = vmul.f32 1.442695, %v4376_v61  ;;  %v4143_v32 = vadd.f32 %v9118_v34, %v8919_v28  ;;  %v3682_v40 = vpop.f32.mrb[227].mxu0  ;;  %v9765_v28 = vld [vmem:[#allocation47_spill] sm:$0xff] }
 0x370   : > { %v7141_v17 = vpop.eup %7140  ;;  %v5001_v1 = vmax.f32 %v7139_v44, 0.0  ;;  %5260 = vst.msk [vmem:[%s8731_s24 + $0x270] sm:$0xff] %vm5181_vm1, %v5131_v56  ;;  %7160 = vrcp.f32 %v4750_v39  ;;  %v9161_v21 = vpop.f32.mrb[35].mxu1  ;;  %v4591_v41 = vmul.f32 1.442695, %v4374_v22  ;;  %v9167_v34 = vadd.f32 %v9122_v9, %v9765_v28  ;;  %v9767_v44 = vld [vmem:[#allocation48_spill] sm:$0xff] }
 0x371   : > { %v7143_v19 = vpop.eup %7142  ;;  %v5004_v30 = vmax.f32 %v7141_v17, 0.0  ;;  %7162 = vpow2.f32 %v4589_v33  ;;  %v4379_v59 = vsub.f32 0.0, %v4151_v10  ;;  %v4377_v25 = vsub.f32 0.0, %v4143_v32  ;;  %v9175_v48 = vpop.f32.mrb[228].mxu0 }
 0x372   : > { %v7145_v20 = vpop.eup %7144  ;;  %v5129_v3 = vmin.f32 %v5001_v1, 1.0  ;;  %v4755_v45 = vadd.f32 1.0, %v7143_v19  ;;  %7164 = vpow2.f32 %v4595_v51  ;;  %v4154_v5 = vadd.f32 %v9124_v35, %v8950_v12  ;;  %v9177_v9 = vpop.f32.mrb[36].mxu1 }
 0x373   : > { %v7147_v47 = vpop.eup %7146  ;;  %v5132_v13 = vmin.f32 %v5004_v30, 1.0  ;;  %v5002_v15 = vmax.f32 %v7145_v20, 0.0  ;;  %v4601_v33 = vmul.f32 1.442695, %v4379_v59  ;;  %v4597_v42 = vmul.f32 1.442695, %v4377_v25 }
 0x374   : > { %5258 = vst.msk [vmem:[%s8731_s24 + $0x260] sm:$0xff] %vm5181_vm1, %v5129_v3  ;;  %7166 = vrcp.f32 %v4755_v45  ;;  %v4753_v8 = vadd.f32 1.0, %v7147_v47  ;;  %v7149_v2 = vpop.eup %7148  ;;  %v4146_v49 = vadd.f32 %v9128_v31, %v9766_v43  ;;  %v4380_v46 = vsub.f32 0.0, %v4154_v5  ;;  %v3687_v12 = vpop.f32.mrb[229].mxu0  ;;  %v9768_v59 = vld [vmem:[#allocation49_spill] sm:$0xff] }
 0x375   : > { %5261 = vst.msk [vmem:[%s8731_s24 + $0x278] sm:$0xff] %vm5181_vm1, %v5132_v13  ;;  %v5130_v26 = vmin.f32 %v5002_v15, 1.0  ;;  %7168 = vpow2.f32 %v4591_v41  ;;  %v7151_v14 = vpop.eup %7150  ;;  %v4756_v37 = vadd.f32 1.0, %v7149_v2  ;;  %v9182_v56 = vadd.f32 %v3677_v50, %v9767_v44  ;;  %v9184_v35 = vpop.f32.mrb[37].mxu1  ;;  %v9769_v44 = vld [vmem:[#allocation85_spill] sm:$0xff] }
 0x376   : > { %7170 = vrcp.f32 %v4753_v8  ;;  %v7153_v11 = vpop.eup %7152  ;;  %v5007_v16 = vmax.f32 %v7151_v14, 0.0  ;;  %v4378_v31 = vsub.f32 0.0, %v4146_v49  ;;  %v4167_v52 = vadd.f32 %v9145_v18, %v8978_v29  ;;  %v9188_v17 = vpop.f32.mrb[230].mxu0 }
 0x377   : > { %5259 = vst.msk [vmem:[%s8731_s24 + $0x268] sm:$0xff] %vm5181_vm1, %v5130_v26  ;;  %7172 = vpow2.f32 %v4601_v33  ;;  %v7155_v39 = vpop.eup %7154  ;;  %v4754_v61 = vadd.f32 1.0, %v7153_v11  ;;  %v9190_v1 = vpop.f32.mrb[38].mxu1  ;;  %v4603_v50 = vmul.f32 1.442695, %v4380_v46  ;;  %v4159_v41 = vadd.f32 %v9149_v36, %v8957_v63 }
 0x378   : > { %7174 = vrcp.f32 %v4756_v37  ;;  %v7157_v22 = vpop.eup %7156  ;;  %v5135_v10 = vmin.f32 %v5007_v16, 1.0  ;;  %v5005_v19 = vmax.f32 %v7155_v39, 0.0  ;;  %v3690_v30 = vpop.f32.mrb[231].mxu0  ;;  %v4599_v20 = vmul.f32 1.442695, %v4378_v31 }
 0x379   : > { %7176 = vpow2.f32 %v4597_v42  ;;  %v9192_v51 = vpop.f32.mrb[39].mxu1  ;;  %v7159_v32 = vpop.eup %7158  ;;  %v4759_v40 = vadd.f32 1.0, %v7157_v22  ;;  %v4383_v3 = vsub.f32 0.0, %v4167_v52  ;;  %v9200_v8 = vadd.f32 %v9153_v27, %v9768_v59 }
 0x37a   : > { %7178 = vrcp.f32 %v4754_v61  ;;  %v7161_v29 = vpop.eup %7160  ;;  %5264 = vst.msk [vmem:[%s8731_s24 + $0x290] sm:$0xff] %vm5181_vm1, %v5135_v10  ;;  %v5133_v18 = vmin.f32 %v5005_v19, 1.0  ;;  %v5008_v45 = vmax.f32 %v7159_v32, 0.0  ;;  %v4381_v26 = vsub.f32 0.0, %v4159_v41  ;;  %v9206_v14 = vpop.f32.mrb[232].mxu0 }
 0x37b   : > { %7180 = vpow2.f32 %v4603_v50  ;;  %v7163_v47 = vpop.eup %7162  ;;  %v5006_v13 = vmax.f32 %v7161_v29, 0.0  ;;  %v4609_v15 = vmul.f32 1.442695, %v4383_v3  ;;  %v4170_v36 = vadd.f32 %v9155_v7, %v8993_v55  ;;  %v9208_v37 = vpop.f32.mrb[40].mxu1 }
 0x37c   : > { %7182 = vrcp.f32 %v4759_v40  ;;  %v7165_v25 = vpop.eup %7164  ;;  %5262 = vst.msk [vmem:[%s8731_s24 + $0x280] sm:$0xff] %vm5181_vm1, %v5133_v18  ;;  %v5136_v28 = vmin.f32 %v5008_v45, 1.0  ;;  %v4757_v2 = vadd.f32 1.0, %v7163_v47  ;;  %v4605_v43 = vmul.f32 1.442695, %v4381_v26  ;;  %v3695_v11 = vpop.f32.mrb[233].mxu0 }
 0x37d   : > { %7184 = vpow2.f32 %v4599_v20  ;;  %v5134_v5 = vmin.f32 %v5006_v13, 1.0  ;;  %v4760_v63 = vadd.f32 1.0, %v7165_v25  ;;  %v4162_v49 = vadd.f32 %v9161_v21, %v8964_v53  ;;  %v9214_v16 = vpop.f32.mrb[41].mxu1  ;;  %v9222_v39 = vpop.f32.mrb[234].mxu0  ;;  %v9770_v47 = vld [vmem:[#allocation86_spill] sm:$0xff] }
 0x37e   : > { %v7167_v33 = vpop.eup %7166  ;;  %7186 = vpow2.f32 %v4609_v15  ;;  %5265 = vst.msk [vmem:[%s8731_s24 + $0x298] sm:$0xff] %vm5181_vm1, %v5136_v28  ;;  %v4384_v7 = vsub.f32 0.0, %v4170_v36  ;;  %v9220_v12 = vadd.f32 %v9175_v48, %v9769_v44  ;;  %v9224_v61 = vpop.f32.mrb[42].mxu1  ;;  %v4183_v48 = vadd.f32 %v9177_v9, %v9031_v24  ;;  %v9771_v44 = vld [vmem:[#allocation87_spill] sm:$0xff] }
 0x37f   : > { %v7169_v27 = vpop.eup %7168  ;;  %v5011_v42 = vmax.f32 %v7167_v33, 0.0  ;;  %7188 = vrcp.f32 %v4757_v2  ;;  %5263 = vst.msk [vmem:[%s8731_s24 + $0x288] sm:$0xff] %vm5181_vm1, %v5134_v5  ;;  %v4382_v52 = vsub.f32 0.0, %v4162_v49  ;;  %v3698_v22 = vpop.f32.mrb[235].mxu0  ;;  %v4175_v29 = vadd.f32 %v9184_v35, %v9006_v60 }
 0x380   : > { %v7171_v46 = vpop.eup %7170  ;;  %7190 = vrcp.f32 %v4760_v63  ;;  %v4758_v55 = vadd.f32 1.0, %v7169_v27  ;;  %v9226_v10 = vpop.f32.mrb[43].mxu1  ;;  %v4611_v30 = vmul.f32 1.442695, %v4384_v7  ;;  %v4387_v41 = vsub.f32 0.0, %v4183_v48 }
 0x381   : > { %v7173_v31 = vpop.eup %7172  ;;  %v5139_v53 = vmin.f32 %v5011_v42, 1.0  ;;  %v5009_v21 = vmax.f32 %v7171_v46, 0.0  ;;  %7192 = vpow2.f32 %v4605_v43  ;;  %v4607_v3 = vmul.f32 1.442695, %v4382_v52  ;;  %v9242_v2 = vpop.f32.mrb[236].mxu0 }
 0x382   : > { %v7175_v19 = vpop.eup %7174  ;;  %7194 = vrcp.f32 %v4758_v55  ;;  %v4763_v50 = vadd.f32 1.0, %v7173_v31  ;;  %v9236_v13 = vadd.f32 %v9188_v17, %v9770_v47  ;;  %v4385_v59 = vsub.f32 0.0, %v4175_v29  ;;  %v9244_v26 = vpop.f32.mrb[44].mxu1  ;;  %v9772_v47 = vld [vmem:[#allocation88_spill] sm:$0xff] }
 0x383   : > { %v7177_v32 = vpop.eup %7176  ;;  %5268 = vst.msk [vmem:[%s8731_s24 + $0x2b0] sm:$0xff] %vm5181_vm1, %v5139_v53  ;;  %v5137_v40 = vmin.f32 %v5009_v21, 1.0  ;;  %v5012_v20 = vmax.f32 %v7175_v19, 0.0  ;;  %v4617_v60 = vmul.f32 1.442695, %v4387_v41  ;;  %v4186_v35 = vadd.f32 %v9190_v1, %v9047_v62  ;;  %v3703_v36 = vpop.f32.mrb[237].mxu0 }
 0x384   : > { %v7179_v18 = vpop.eup %7178  ;;  %7196 = vrcp.f32 %v4763_v50  ;;  %v4761_v45 = vadd.f32 1.0, %v7177_v32  ;;  %v4613_v63 = vmul.f32 1.442695, %v4385_v59  ;;  %v9248_v27 = vpop.f32.mrb[45].mxu1  ;;  %v4178_v62 = vadd.f32 %v9192_v51, %v9022_v57 }
 0x385   : > { %v7181_v15 = vpop.eup %7180  ;;  %5266 = vst.msk [vmem:[%s8731_s24 + $0x2a0] sm:$0xff] %vm5181_vm1, %v5137_v40  ;;  %v5140_v24 = vmin.f32 %v5012_v20, 1.0  ;;  %v5010_v9 = vmax.f32 %v7179_v18, 0.0  ;;  %7198 = vpow2.f32 %v4611_v30  ;;  %v4388_v49 = vsub.f32 0.0, %v4186_v35  ;;  %v9252_v1 = vpop.f32.mrb[238].mxu0 }
 0x386   : > { %v7183_v25 = vpop.eup %7182  ;;  %7200 = vrcp.f32 %v4761_v45  ;;  %v4764_v28 = vadd.f32 1.0, %v7181_v15  ;;  %v9254_v11 = vpop.f32.mrb[46].mxu1  ;;  %v9260_v31 = vadd.f32 %v9206_v14, %v9771_v44  ;;  %v4386_v22 = vsub.f32 0.0, %v4178_v62 }
 0x387   : > { %v7185_v17 = vpop.eup %7184  ;;  %5269 = vst.msk [vmem:[%s8731_s24 + $0x2b8] sm:$0xff] %vm5181_vm1, %v5140_v24  ;;  %v5138_v33 = vmin.f32 %v5010_v9, 1.0  ;;  %v5015_v5 = vmax.f32 %v7183_v25, 0.0  ;;  %7202 = vpow2.f32 %v4607_v3  ;;  %v3706_v53 = vpop.f32.mrb[239].mxu0  ;;  %v4619_v51 = vmul.f32 1.442695, %v4388_v49 }
 0x388   : > { %v7187_v42 = vpop.eup %7186  ;;  %7204 = vrcp.f32 %v4764_v28  ;;  %v4762_v43 = vadd.f32 1.0, %v7185_v17  ;;  %v9262_v21 = vpop.f32.mrb[47].mxu1  ;;  %v4199_v30 = vadd.f32 %v9208_v37, %v9084_v38  ;;  %v4191_v14 = vadd.f32 %v9214_v16, %v9057_v58 }
 0x389   : > { %v7189_v46 = vpop.eup %7188  ;;  %5267 = vst.msk [vmem:[%s8731_s24 + $0x2a8] sm:$0xff] %vm5181_vm1, %v5138_v33  ;;  %v5143_v55 = vmin.f32 %v5015_v5, 1.0  ;;  %v4767_v7 = vadd.f32 1.0, %v7187_v42  ;;  %7206 = vpow2.f32 %v4617_v60  ;;  %v4615_v20 = vmul.f32 1.442695, %v4386_v22  ;;  %v9278_v37 = vpop.f32.mrb[240].mxu0 }
 0x38a   : > { %v7191_v52 = vpop.eup %7190  ;;  %v5013_v57 = vmax.f32 %v7189_v46, 0.0  ;;  %7208 = vrcp.f32 %v4762_v43  ;;  %v4391_v18 = vsub.f32 0.0, %v4199_v30  ;;  %v4389_v41 = vsub.f32 0.0, %v4191_v14  ;;  %v9280_v16 = vpop.f32.mrb[48].mxu1  ;;  %v9773_v42 = vld [vmem:[#allocation89_spill] sm:$0xff] }
 0x38b   : > { %v7193_v19 = vpop.eup %7192  ;;  %5272 = vst.msk [vmem:[%s8731_s24 + $0x2d0] sm:$0xff] %vm5181_vm1, %v5143_v55  ;;  %v5016_v50 = vmax.f32 %v7191_v52, 0.0  ;;  %7210 = vrcp.f32 %v4767_v7  ;;  %v9274_v38 = vadd.f32 %v9222_v39, %v9772_v47  ;;  %v4202_v58 = vadd.f32 %v9224_v61, %v9103_v0  ;;  %v3711_v25 = vpop.f32.mrb[241].mxu0 }
 0x38c   : > { %v7195_v48 = vpop.eup %7194  ;;  %v5141_v32 = vmin.f32 %v5013_v57, 1.0  ;;  %v4765_v40 = vadd.f32 1.0, %v7193_v19  ;;  %7212 = vpow2.f32 %v4613_v63  ;;  %v4625_v59 = vmul.f32 1.442695, %v4391_v18  ;;  %v9284_v28 = vpop.f32.mrb[49].mxu1 }
 0x38d   : > { %v5144_v3 = vmin.f32 %v5016_v50, 1.0  ;;  %v5014_v29 = vmax.f32 %v7195_v48, 0.0  ;;  %7214 = vpow2.f32 %v4619_v51  ;;  %v4621_v35 = vmul.f32 1.442695, %v4389_v41  ;;  %v9288_v61 = vpop.f32.mrb[242].mxu0  ;;  %v9290_v33 = vpop.f32.mrb[50].mxu1 }
 0x38e   : > { %v7197_v45 = vpop.eup %7196  ;;  %5270 = vst.msk [vmem:[%s8731_s24 + $0x2c0] sm:$0xff] %vm5181_vm1, %v5141_v32  ;;  %7216 = vrcp.f32 %v4765_v40  ;;  %v4392_v17 = vsub.f32 0.0, %v4202_v58  ;;  %v4194_v0 = vadd.f32 %v9226_v10, %v9073_v6  ;;  %v9296_v43 = vadd.f32 %v9242_v2, %v9773_v42  ;;  %v3714_v49 = vpop.f32.mrb[243].mxu0 }
 0x38f   : > { %v7199_v15 = vpop.eup %7198  ;;  %5273 = vst.msk [vmem:[%s8731_s24 + $0x2d8] sm:$0xff] %vm5181_vm1, %v5144_v3  ;;  %v5142_v24 = vmin.f32 %v5014_v29, 1.0  ;;  %v5019_v9 = vmax.f32 %v7197_v45, 0.0  ;;  %7218 = vpow2.f32 %v4615_v20  ;;  %v9298_v62 = vpop.f32.mrb[51].mxu1  ;;  %v4215_v52 = vadd.f32 %v9244_v26, %v9143_v23  ;;  %v9774_v23 = vld [vmem:[#allocation90_spill] sm:$0xff] }
 0x390   : > { %v7201_v39 = vpop.eup %7200  ;;  %v4768_v60 = vadd.f32 1.0, %v7199_v15  ;;  %7220 = vpow2.f32 %v4625_v59  ;;  %v4627_v10 = vmul.f32 1.442695, %v4392_v17  ;;  %v4390_v55 = vsub.f32 0.0, %v4194_v0  ;;  %v9312_v20 = vpop.f32.mrb[244].mxu0 }
 0x391   : > { %v7203_v5 = vpop.eup %7202  ;;  %5271 = vst.msk [vmem:[%s8731_s24 + $0x2c8] sm:$0xff] %vm5181_vm1, %v5142_v24  ;;  %v5147_v63 = vmin.f32 %v5019_v9, 1.0  ;;  %v5017_v36 = vmax.f32 %v7201_v39, 0.0  ;;  %v4207_v22 = vadd.f32 %v9248_v27, %v9114_v4  ;;  %v4395_v14 = vsub.f32 0.0, %v4215_v52  ;;  %v9314_v3 = vpop.f32.mrb[52].mxu1  ;;  %v9776_v52 = vld [vmem:[#allocation92_spill] sm:$0xff] }
 0x392   : > { %v7205_v46 = vpop.eup %7204  ;;  %7222 = vrcp.f32 %v4768_v60  ;;  %v4766_v6 = vadd.f32 1.0, %v7203_v5  ;;  %v4623_v51 = vmul.f32 1.442695, %v4390_v55  ;;  %v9310_v26 = vadd.f32 %v9252_v1, %v9774_v23  ;;  %v3719_v45 = vpop.f32.mrb[245].mxu0 }
 0x393   : > { %v7207_v7 = vpop.eup %7206  ;;  %5276 = vst.msk [vmem:[%s8731_s24 + $0x2f0] sm:$0xff] %vm5181_vm1, %v5147_v63  ;;  %v5145_v44 = vmin.f32 %v5017_v36, 1.0  ;;  %v5020_v53 = vmax.f32 %v7205_v46, 0.0  ;;  %7224 = vpow2.f32 %v4621_v35  ;;  %v4393_v40 = vsub.f32 0.0, %v4207_v22  ;;  %v9318_v41 = vpop.f32.mrb[53].mxu1  ;;  %v9775_v35 = vld [vmem:[#allocation91_spill] sm:$0xff] }
 0x394   : > { %v7209_v2 = vpop.eup %7208  ;;  %7226 = vrcp.f32 %v4766_v6  ;;  %v4771_v57 = vadd.f32 1.0, %v7207_v7  ;;  %v4633_v18 = vmul.f32 1.442695, %v4395_v14  ;;  %v4218_v24 = vadd.f32 %v9254_v11, %v9167_v34  ;;  %v9322_v9 = vpop.f32.mrb[246].mxu0 }
 0x395   : > { %v7211_v19 = vpop.eup %7210  ;;  %5274 = vst.msk [vmem:[%s8731_s24 + $0x2e0] sm:$0xff] %vm5181_vm1, %v5145_v44  ;;  %v5148_v50 = vmin.f32 %v5020_v53, 1.0  ;;  %v5018_v30 = vmax.f32 %v7209_v2, 0.0  ;;  %7228 = vpow2.f32 %v4627_v10  ;;  %v4629_v15 = vmul.f32 1.442695, %v4393_v40  ;;  %v9324_v59 = vpop.f32.mrb[54].mxu1 }
 0x396   : > { %v7213_v48 = vpop.eup %7212  ;;  %v5023_v32 = vmax.f32 %v7211_v19, 0.0  ;;  %7230 = vrcp.f32 %v4771_v57  ;;  %v4210_v60 = vadd.f32 %v9262_v21, %v9132_v54  ;;  %v9332_v17 = vadd.f32 %v9278_v37, %v9775_v35  ;;  %v3722_v0 = vpop.f32.mrb[247].mxu0 }
 0x397   : > { %v7215_v4 = vpop.eup %7214  ;;  %5277 = vst.msk [vmem:[%s8731_s24 + $0x2f8] sm:$0xff] %vm5181_vm1, %v5148_v50  ;;  %v5146_v27 = vmin.f32 %v5018_v30, 1.0  ;;  %v4769_v29 = vadd.f32 1.0, %v7213_v48  ;;  %7232 = vpow2.f32 %v4623_v51  ;;  %v9334_v5 = vpop.f32.mrb[55].mxu1  ;;  %v4396_v11 = vsub.f32 0.0, %v4218_v24 }
 0x398   : > { %v7217_v47 = vpop.eup %7216  ;;  %v5151_v58 = vmin.f32 %v5023_v32, 1.0  ;;  %v4772_v1 = vadd.f32 1.0, %v7215_v4  ;;  %v4231_v63 = vadd.f32 %v9280_v16, %v9220_v12  ;;  %v4394_v54 = vsub.f32 0.0, %v4210_v60 }
 0x399   : > { %v7219_v25 = vpop.eup %7218  ;;  %5275 = vst.msk [vmem:[%s8731_s24 + $0x2e8] sm:$0xff] %vm5181_vm1, %v5146_v27  ;;  %v5021_v39 = vmax.f32 %v7217_v47, 0.0  ;;  %7234 = vrcp.f32 %v4769_v29  ;;  %v4223_v21 = vadd.f32 %v9284_v28, %v9182_v56  ;;  %v4635_v46 = vmul.f32 1.442695, %v4396_v11  ;;  %v9348_v56 = vpop.f32.mrb[248].mxu0 }
 0x39a   : > { %5280 = vst.msk [vmem:[%s8731_s24 + $0x310] sm:$0xff] %vm5181_vm1, %v5151_v58  ;;  %7236 = vrcp.f32 %v4772_v1  ;;  %v4770_v34 = vadd.f32 1.0, %v7219_v25  ;;  %v7221_v36 = vpop.eup %7220  ;;  %v4399_v6 = vsub.f32 0.0, %v4231_v63  ;;  %v4631_v7 = vmul.f32 1.442695, %v4394_v54  ;;  %v9350_v28 = vpop.f32.mrb[56].mxu1 }
 0x39b   : > { %v5149_v42 = vmin.f32 %v5021_v39, 1.0  ;;  %7238 = vpow2.f32 %v4633_v18  ;;  %v4775_v49 = vadd.f32 1.0, %v7221_v36  ;;  %v4397_v44 = vsub.f32 0.0, %v4223_v21  ;;  %v3727_v50 = vpop.f32.mrb[249].mxu0  ;;  %v9352_v30 = vpop.f32.mrb[57].mxu1  ;;  %v9777_v18 = vld [vmem:[#allocation93_spill] sm:$0xff] }
 0x39c   : > { %v7223_v37 = vpop.eup %7222  ;;  %7240 = vrcp.f32 %v4770_v34  ;;  %v4641_v53 = vmul.f32 1.442695, %v4399_v6  ;;  %v9346_v2 = vadd.f32 %v9288_v61, %v9776_v52  ;;  %v4234_v61 = vadd.f32 %v9290_v33, %v9236_v13  ;;  %v9358_v40 = vpop.f32.mrb[250].mxu0  ;;  %v9779_v50 = vld [vmem:[#allocation77_spill] sm:$0xff] }
 0x39d   : > { %v7225_v10 = vpop.eup %7224  ;;  %5278 = vst.msk [vmem:[%s8731_s24 + $0x300] sm:$0xff] %vm5181_vm1, %v5149_v42  ;;  %v5024_v55 = vmax.f32 %v7223_v37, 0.0  ;;  %7242 = vpow2.f32 %v4629_v15  ;;  %v4637_v19 = vmul.f32 1.442695, %v4397_v44  ;;  %v4226_v32 = vadd.f32 %v9298_v62, %v9200_v8  ;;  %v9360_v23 = vpop.f32.mrb[58].mxu1 }
 0x39e   : > { %v7227_v12 = vpop.eup %7226  ;;  %7244 = vrcp.f32 %v4775_v49  ;;  %v4773_v16 = vadd.f32 1.0, %v7225_v10  ;;  %v9366_v45 = vadd.f32 %v9312_v20, %v9777_v18  ;;  %v3730_v47 = vpop.f32.mrb[251].mxu0  ;;  %v4400_v33 = vsub.f32 0.0, %v4234_v61 }
 0x39f   : > { %v7229_v57 = vpop.eup %7228  ;;  %v5152_v51 = vmin.f32 %v5024_v55, 1.0  ;;  %v5022_v22 = vmax.f32 %v7227_v12, 0.0  ;;  %7246 = vpow2.f32 %v4635_v46  ;;  %v9368_v13 = vpop.f32.mrb[59].mxu1  ;;  %v4398_v62 = vsub.f32 0.0, %v4226_v32 }
 0x3a0   : > { %v7231_v14 = vpop.eup %7230  ;;  %7248 = vrcp.f32 %v4773_v16  ;;  %v4776_v48 = vadd.f32 1.0, %v7229_v57  ;;  %v4247_v15 = vadd.f32 %v9314_v3, %v9296_v43  ;;  %v4239_v20 = vadd.f32 %v9318_v41, %v9260_v31  ;;  %v9778_v43 = vld [vmem:[#allocation12_spill] sm:$0xff]  ;;  %v9382_v3 = vpop.f32.mrb[252].mxu0 }
 0x3a1   : > { %v7233_v4 = vpop.eup %7232  ;;  %5281 = vst.msk [vmem:[%s8731_s24 + $0x318] sm:$0xff] %vm5181_vm1, %v5152_v51  ;;  %v5150_v27 = vmin.f32 %v5022_v22, 1.0  ;;  %v5027_v29 = vmax.f32 %v7231_v14, 0.0  ;;  %7250 = vpow2.f32 %v4631_v7  ;;  %v4643_v39 = vmul.f32 1.442695, %v4400_v33  ;;  %v9384_v41 = vpop.f32.mrb[60].mxu1 }
 0x3a2   : > { %7252 = vrcp.f32 %v4776_v48  ;;  %v4774_v8 = vadd.f32 1.0, %v7233_v4  ;;  %v4639_v60 = vmul.f32 1.442695, %v4398_v62  ;;  %v4403_v34 = vsub.f32 0.0, %v4247_v15  ;;  %v3735_v46 = vpop.f32.mrb[253].mxu0  ;;  %v9386_v6 = vpop.f32.mrb[61].mxu1 }
 0x3a3   : > { %v7235_v58 = vpop.eup %7234  ;;  %5279 = vst.msk [vmem:[%s8731_s24 + $0x308] sm:$0xff] %vm5181_vm1, %v5150_v27  ;;  %v5155_v1 = vmin.f32 %v5027_v29, 1.0  ;;  %7254 = vpow2.f32 %v4641_v53  ;;  %v4401_v11 = vsub.f32 0.0, %v4239_v20  ;;  %v9380_v31 = vadd.f32 %v9322_v9, %v9778_v43  ;;  %v9392_v44 = vpop.f32.mrb[254].mxu0  ;;  %v9780_v15 = vld [vmem:[#allocation7_spill] sm:$0xff] }
 0x3a4   : > { %v7237_v24 = vpop.eup %7236  ;;  %v5025_v25 = vmax.f32 %v7235_v58, 0.0  ;;  %7256 = vrcp.f32 %v4774_v8  ;;  %v4649_v49 = vmul.f32 1.442695, %v4403_v34  ;;  %v4250_v7 = vadd.f32 %v9324_v59, %v9310_v26  ;;  %v9394_v12 = vpop.f32.mrb[62].mxu1 }
 0x3a5   : > { %v7239_v35 = vpop.eup %7238  ;;  %5284 = vst.msk [vmem:[%s8731_s24 + $0x330] sm:$0xff] %vm5181_vm1, %v5155_v1  ;;  %v5028_v0 = vmax.f32 %v7237_v24, 0.0  ;;  %7258 = vpow2.f32 %v4637_v19  ;;  %v4645_v9 = vmul.f32 1.442695, %v4401_v11  ;;  %v4242_v57 = vadd.f32 %v9334_v5, %v9274_v38  ;;  %v3738_v51 = vpop.f32.mrb[255].mxu0 }
 0x3a6   : > { %v7241_v63 = vpop.eup %7240  ;;  %v5153_v36 = vmin.f32 %v5025_v25, 1.0  ;;  %v4779_v42 = vadd.f32 1.0, %v7239_v35  ;;  %7260 = vpow2.f32 %v4643_v39  ;;  %v9400_v22 = vpop.f32.mrb[63].mxu1  ;;  %v4404_v59 = vsub.f32 0.0, %v4250_v7 }
 0x3a7   : > { %v7243_v54 = vpop.eup %7242  ;;  %v5156_v21 = vmin.f32 %v5028_v0, 1.0  ;;  %v5026_v37 = vmax.f32 %v7241_v63, 0.0  ;;  %7262 = vpow2.f32 %v4639_v60  ;;  %v3726_v14 = vadd.f32 %v9348_v56, %v9779_v50 }
 0x3a8   : > { %v7245_v10 = vpop.eup %7244  ;;  %5282 = vst.msk [vmem:[%s8731_s24 + $0x320] sm:$0xff] %vm5181_vm1, %v5153_v36  ;;  %7264 = vrcp.f32 %v4779_v42  ;;  %v4777_v55 = vadd.f32 1.0, %v7243_v54  ;;  %v4402_v4 = vsub.f32 0.0, %v4242_v57  ;;  %v4651_v5 = vmul.f32 1.442695, %v4404_v59 }
 0x3a9   : > { %v7247_v16 = vpop.eup %7246  ;;  %5285 = vst.msk [vmem:[%s8731_s24 + $0x338] sm:$0xff] %vm5181_vm1, %v5156_v21  ;;  %v5154_v53 = vmin.f32 %v5026_v37, 1.0  ;;  %v5031_v52 = vmax.f32 %v7245_v10, 0.0  ;;  %7266 = vpow2.f32 %v4649_v49  ;;  %v4263_v29 = vadd.f32 %v9350_v28, %v9366_v45 }
 0x3aa   : > { %v7249_v19 = vpop.eup %7248  ;;  %7268 = vrcp.f32 %v4777_v55  ;;  %v4780_v26 = vadd.f32 1.0, %v7247_v16  ;;  %v4647_v8 = vmul.f32 1.442695, %v4402_v4  ;;  %v4255_v33 = vadd.f32 %v9352_v30, %v9332_v17 }
 0x3ab   : > { %v7251_v48 = vpop.eup %7250  ;;  %5283 = vst.msk [vmem:[%s8731_s24 + $0x328] sm:$0xff] %vm5181_vm1, %v5154_v53  ;;  %v5159_v61 = vmin.f32 %v5031_v52, 1.0  ;;  %v5029_v32 = vmax.f32 %v7249_v19, 0.0  ;;  %7270 = vpow2.f32 %v4645_v9  ;;  %v4407_v1 = vsub.f32 0.0, %v4263_v29 }
 0x3ac   : > { %v7253_v27 = vpop.eup %7252  ;;  %7272 = vrcp.f32 %v4780_v26  ;;  %v4778_v38 = vadd.f32 1.0, %v7251_v48  ;;  %v3729_v20 = vadd.f32 %v9358_v40, %v9780_v15  ;;  %v4405_v25 = vsub.f32 0.0, %v4255_v33  ;;  %v9782_v26 = vld [vmem:[#allocation14_spill] sm:$0xff] }
 0x3ad   : > { %v7255_v18 = vpop.eup %7254  ;;  %5288 = vst.msk [vmem:[%s8731_s24 + $0x350] sm:$0xff] %vm5181_vm1, %v5159_v61  ;;  %v5157_v47 = vmin.f32 %v5029_v32, 1.0  ;;  %v5032_v56 = vmax.f32 %v7253_v27, 0.0  ;;  %v4657_v17 = vmul.f32 1.442695, %v4407_v1  ;;  %v4266_v30 = vadd.f32 %v9360_v23, %v9380_v31  ;;  %v9781_v23 = vld [vmem:[#allocation83_spill] sm:$0xff] }
 0x3ae   : > { %v7257_v62 = vpop.eup %7256  ;;  %7274 = vrcp.f32 %v4778_v38  ;;  %v4783_v58 = vadd.f32 1.0, %v7255_v18  ;;  %v4653_v34 = vmul.f32 1.442695, %v4405_v25  ;;  %v4258_v42 = vadd.f32 %v9368_v13, %v9346_v2 }
 0x3af   : > { %v7259_v24 = vpop.eup %7258  ;;  %5286 = vst.msk [vmem:[%s8731_s24 + $0x340] sm:$0xff] %vm5181_vm1, %v5157_v47  ;;  %v5160_v28 = vmin.f32 %v5032_v56, 1.0  ;;  %v5030_v45 = vmax.f32 %v7257_v62, 0.0  ;;  %7276 = vpow2.f32 %v4651_v5  ;;  %v4408_v36 = vsub.f32 0.0, %v4266_v30 }
 0x3b0   : > { %v7261_v39 = vpop.eup %7260  ;;  %7278 = vrcp.f32 %v4783_v58  ;;  %v4781_v60 = vadd.f32 1.0, %v7259_v24  ;;  %v3734_v31 = vadd.f32 %v9382_v3, %v9781_v23  ;;  %v4271_v21 = vadd.f32 %v9386_v6, %v3726_v14 }
 0x3b1   : > { %v7263_v35 = vpop.eup %7262  ;;  %5289 = vst.msk [vmem:[%s8731_s24 + $0x358] sm:$0xff] %vm5181_vm1, %v5160_v28  ;;  %v5158_v0 = vmin.f32 %v5030_v45, 1.0  ;;  %v4784_v40 = vadd.f32 1.0, %v7261_v39  ;;  %7280 = vpow2.f32 %v4647_v8  ;;  %v4659_v46 = vmul.f32 1.442695, %v4408_v36 }
 0x3b2   : > { %v7265_v11 = vpop.eup %7264  ;;  %7282 = vrcp.f32 %v4781_v60  ;;  %v4782_v63 = vadd.f32 1.0, %v7263_v35  ;;  %v4406_v10 = vsub.f32 0.0, %v4258_v42  ;;  %v4279_v2 = vadd.f32 %v9384_v41, %v3734_v31 }
 0x3b3   : > { %v7267_v43 = vpop.eup %7266  ;;  %5287 = vst.msk [vmem:[%s8731_s24 + $0x348] sm:$0xff] %vm5181_vm1, %v5158_v0  ;;  %v5035_v54 = vmax.f32 %v7265_v11, 0.0  ;;  %7284 = vrcp.f32 %v4784_v40  ;;  %v4409_v3 = vsub.f32 0.0, %v4271_v21  ;;  %v3737_v59 = vadd.f32 %v9392_v44, %v9782_v26 }
 0x3b4   : > { %v7269_v37 = vpop.eup %7268  ;;  %7286 = vrcp.f32 %v4782_v63  ;;  %v4787_v49 = vadd.f32 1.0, %v7267_v43  ;;  %v4655_v53 = vmul.f32 1.442695, %v4406_v10  ;;  %v4411_v57 = vsub.f32 0.0, %v4279_v2 }
 0x3b5   : > { %v7271_v55 = vpop.eup %7270  ;;  %v5163_v9 = vmin.f32 %v5035_v54, 1.0  ;;  %v5033_v7 = vmax.f32 %v7269_v37, 0.0  ;;  %7288 = vpow2.f32 %v4657_v17  ;;  %v4661_v19 = vmul.f32 1.442695, %v4409_v3 }
 0x3b6   : > { %v7273_v13 = vpop.eup %7272  ;;  %7290 = vrcp.f32 %v4787_v49  ;;  %v4785_v16 = vadd.f32 1.0, %v7271_v55  ;;  %v4274_v41 = vadd.f32 %v9400_v22, %v3729_v20  ;;  %v4665_v61 = vmul.f32 1.442695, %v4411_v57 }
 0x3b7   : > { %5292 = vst.msk [vmem:[%s8731_s24 + $0x370] sm:$0xff] %vm5181_vm1, %v5163_v9  ;;  %v5161_v6 = vmin.f32 %v5033_v7, 1.0  ;;  %v5036_v52 = vmax.f32 %v7273_v13, 0.0  ;;  %7292 = vpow2.f32 %v4653_v34  ;;  %v4282_v27 = vadd.f32 %v9394_v12, %v3737_v59 }
 0x3b8   : > { %v7275_v51 = vpop.eup %7274  ;;  %7294 = vrcp.f32 %v4785_v16  ;;  %v4410_v38 = vsub.f32 0.0, %v4274_v41 }
 0x3b9   : > { %v7277_v50 = vpop.eup %7276  ;;  %5290 = vst.msk [vmem:[%s8731_s24 + $0x360] sm:$0xff] %vm5181_vm1, %v5161_v6  ;;  %v5164_v14 = vmin.f32 %v5036_v52, 1.0  ;;  %v5034_v48 = vmax.f32 %v7275_v51, 0.0  ;;  %7296 = vpow2.f32 %v4659_v46  ;;  %v4412_v47 = vsub.f32 0.0, %v4282_v27 }
 0x3ba   : > { %v7279_v32 = vpop.eup %7278  ;;  %v4788_v4 = vadd.f32 1.0, %v7277_v50  ;;  %7298 = vpow2.f32 %v4655_v53  ;;  %v4663_v56 = vmul.f32 1.442695, %v4410_v38 }
 0x3bb   : > { %v7281_v5 = vpop.eup %7280  ;;  %5293 = vst.msk [vmem:[%s8731_s24 + $0x378] sm:$0xff] %vm5181_vm1, %v5164_v14  ;;  %v5162_v44 = vmin.f32 %v5034_v48, 1.0  ;;  %v5039_v29 = vmax.f32 %v7279_v32, 0.0  ;;  %7300 = vpow2.f32 %v4665_v61  ;;  %v4667_v1 = vmul.f32 1.442695, %v4412_v47 }
 0x3bc   : > { %v7283_v22 = vpop.eup %7282  ;;  %7302 = vrcp.f32 %v4788_v4  ;;  %v4786_v18 = vadd.f32 1.0, %v7281_v5 }
 0x3bd   : > { %v7285_v8 = vpop.eup %7284  ;;  %5291 = vst.msk [vmem:[%s8731_s24 + $0x368] sm:$0xff] %vm5181_vm1, %v5162_v44  ;;  %v5167_v33 = vmin.f32 %v5039_v29, 1.0  ;;  %v5037_v62 = vmax.f32 %v7283_v22, 0.0  ;;  %7304 = vpow2.f32 %v4661_v19 }
 0x3be   : > { %v7287_v12 = vpop.eup %7286  ;;  %v5040_v58 = vmax.f32 %v7285_v8, 0.0  ;;  %7306 = vrcp.f32 %v4786_v18 }
 0x3bf   : > { %v7289_v15 = vpop.eup %7288  ;;  %5296 = vst.msk [vmem:[%s8731_s24 + $0x390] sm:$0xff] %vm5181_vm1, %v5167_v33  ;;  %v5165_v20 = vmin.f32 %v5037_v62, 1.0  ;;  %v5038_v24 = vmax.f32 %v7287_v12, 0.0  ;;  %7308 = vpow2.f32 %v4663_v56 }
 0x3c0   : > { %v7291_v28 = vpop.eup %7290  ;;  %v5168_v45 = vmin.f32 %v5040_v58, 1.0  ;;  %v4791_v25 = vadd.f32 1.0, %v7289_v15  ;;  %7310 = vpow2.f32 %v4667_v1 }
 0x3c1   : > { %v7293_v39 = vpop.eup %7292  ;;  %5294 = vst.msk [vmem:[%s8731_s24 + $0x380] sm:$0xff] %vm5181_vm1, %v5165_v20  ;;  %v5166_v60 = vmin.f32 %v5038_v24, 1.0  ;;  %v5043_v17 = vmax.f32 %v7291_v28, 0.0 }
 0x3c2   : > { %v7295_v30 = vpop.eup %7294  ;;  %5297 = vst.msk [vmem:[%s8731_s24 + $0x398] sm:$0xff] %vm5181_vm1, %v5168_v45  ;;  %7312 = vrcp.f32 %v4791_v25  ;;  %v4789_v35 = vadd.f32 1.0, %v7293_v39 }
 0x3c3   : > { %v7297_v0 = vpop.eup %7296  ;;  %5295 = vst.msk [vmem:[%s8731_s24 + $0x388] sm:$0xff] %vm5181_vm1, %v5166_v60  ;;  %v5171_v40 = vmin.f32 %v5043_v17, 1.0  ;;  %v5041_v34 = vmax.f32 %v7295_v30, 0.0 }
 0x3c4   : > { %v7299_v11 = vpop.eup %7298  ;;  %7314 = vrcp.f32 %v4789_v35  ;;  %v4792_v63 = vadd.f32 1.0, %v7297_v0 }
 0x3c5   : > { %v7301_v36 = vpop.eup %7300  ;;  %5300 = vst.msk [vmem:[%s8731_s24 + $0x3b0] sm:$0xff] %vm5181_vm1, %v5171_v40  ;;  %v5169_v42 = vmin.f32 %v5041_v34, 1.0  ;;  %v4790_v43 = vadd.f32 1.0, %v7299_v11 }
 0x3c6   : > { %v7303_v54 = vpop.eup %7302  ;;  %7316 = vrcp.f32 %v4792_v63  ;;  %v4795_v23 = vadd.f32 1.0, %v7301_v36 }
 0x3c7   : > { %v7305_v31 = vpop.eup %7304  ;;  %5298 = vst.msk [vmem:[%s8731_s24 + $0x3a0] sm:$0xff] %vm5181_vm1, %v5169_v42  ;;  %v5044_v21 = vmax.f32 %v7303_v54, 0.0  ;;  %7318 = vrcp.f32 %v4790_v43 }
 0x3c8   : > { %v7307_v37 = vpop.eup %7306  ;;  %7320 = vrcp.f32 %v4795_v23  ;;  %v4793_v49 = vadd.f32 1.0, %v7305_v31 }
 0x3c9   : > { %v7309_v46 = vpop.eup %7308  ;;  %v5172_v10 = vmin.f32 %v5044_v21, 1.0  ;;  %v5042_v55 = vmax.f32 %v7307_v37, 0.0 }
 0x3ca   : > { %v7311_v9 = vpop.eup %7310  ;;  %7322 = vrcp.f32 %v4793_v49  ;;  %v4794_v7 = vadd.f32 1.0, %v7309_v46 }
 0x3cb   : > { %5301 = vst.msk [vmem:[%s8731_s24 + $0x3b8] sm:$0xff] %vm5181_vm1, %v5172_v10  ;;  %v5170_v2 = vmin.f32 %v5042_v55, 1.0  ;;  %v4796_v13 = vadd.f32 1.0, %v7311_v9 }
 0x3cc   : > { %v7313_v16 = vpop.eup %7312  ;;  %7324 = vrcp.f32 %v4794_v7 }
 0x3cd   : > { %5299 = vst.msk [vmem:[%s8731_s24 + $0x3a8] sm:$0xff] %vm5181_vm1, %v5170_v2  ;;  %v5047_v53 = vmax.f32 %v7313_v16, 0.0  ;;  %7326 = vrcp.f32 %v4796_v13 }
 0x3ce   : > { %v7315_v3 = vpop.eup %7314 }
 0x3cf   : > { %v5175_v6 = vmin.f32 %v5047_v53, 1.0  ;;  %v5045_v52 = vmax.f32 %v7315_v3, 0.0 }
 0x3d0   : > { %v7317_v57 = vpop.eup %7316 }
 0x3d1   : > { %v7319_v51 = vpop.eup %7318  ;;  %5304 = vst.msk [vmem:[%s8731_s24 + $0x3d0] sm:$0xff] %vm5181_vm1, %v5175_v6  ;;  %v5173_v19 = vmin.f32 %v5045_v52, 1.0  ;;  %v5048_v26 = vmax.f32 %v7317_v57, 0.0 }
 0x3d2   : > { %v7321_v59 = vpop.eup %7320  ;;  %v5046_v41 = vmax.f32 %v7319_v51, 0.0 }
 0x3d3   : > { %5302 = vst.msk [vmem:[%s8731_s24 + $0x3c0] sm:$0xff] %vm5181_vm1, %v5173_v19  ;;  %v5176_v50 = vmin.f32 %v5048_v26, 1.0  ;;  %v5051_v14 = vmax.f32 %v7321_v59, 0.0 }
 0x3d4   : > { %v7323_v48 = vpop.eup %7322  ;;  %v5174_v61 = vmin.f32 %v5046_v41, 1.0 }
 0x3d5   : > { %5305 = vst.msk [vmem:[%s8731_s24 + $0x3d8] sm:$0xff] %vm5181_vm1, %v5176_v50  ;;  %v5179_v32 = vmin.f32 %v5051_v14, 1.0  ;;  %v5049_v4 = vmax.f32 %v7323_v48, 0.0 }
 0x3d6   : > { %v7325_v27 = vpop.eup %7324  ;;  %5303 = vst.msk [vmem:[%s8731_s24 + $0x3c8] sm:$0xff] %vm5181_vm1, %v5174_v61 }
 0x3d7   : > { %v7327_v38 = vpop.eup %7326  ;;  %5308 = vst.msk [vmem:[%s8731_s24 + $0x3f0] sm:$0xff] %vm5181_vm1, %v5179_v32  ;;  %v5177_v5 = vmin.f32 %v5049_v4, 1.0  ;;  %v5050_v44 = vmax.f32 %v7325_v27, 0.0 }
 0x3d8   : > { %v5052_v29 = vmax.f32 %v7327_v38, 0.0 }
 0x3d9   : > { %5306 = vst.msk [vmem:[%s8731_s24 + $0x3e0] sm:$0xff] %vm5181_vm1, %v5177_v5  ;;  %v5178_v22 = vmin.f32 %v5050_v44, 1.0 }
 0x3da   : > { %v5180_v18 = vmin.f32 %v5052_v29, 1.0 }
 0x3db   : > { %5307 = vst.msk [vmem:[%s8731_s24 + $0x3e8] sm:$0xff] %vm5181_vm1, %v5178_v22 }
 0x3dc   : > { %5309 = vst.msk [vmem:[%s8731_s24 + $0x3f8] sm:$0xff] %vm5181_vm1, %v5180_v18 }
 0x3dd PF: > { %s13_s12 = sadd.s32 1, %s7335_s12  }
 0x3de   : > { %p10_p4 = scmp.ge.s32.totalorder %s13_s12, 4  }
 0x3e0   :  { %12 = sbr.rel (!%p10_p4) target bundleno = 1 (0x1), region = 62 }

</bundles_post_ra>
